<compile_context>
chip_gen: v7x
topology: tpu7x:2x2x1
jax: 0.10.0
libtpu: 0.0.40
codegen_flags: <defaults>
</compile_context>

<pallas_src>
import functools

import jax
import jax.numpy as jnp
from jax.experimental import pallas as pl
from jax.experimental.pallas import tpu as pltpu


C_PAD = 64          # num_filters (mid-layer channel count)
N_LAYERS = 6
K_MID = 9 * C_PAD   # im2col depth for layers 1..5 (576)
K0_PAD = 32         # padded im2col depth for layer 0 (real K = 9 * 2 = 18)
COUT5_PAD = 8       # padded output channels of the last layer (real Cout = 2)
LANE_MARGIN = 128   # lane margin around the activation row (needs >= W + 1)


# ----------------------------------------------------------------------------
# Fused ResNet5Block + residual + CG kernel (one program per batch element)
# ----------------------------------------------------------------------------
def _modl_kernel(x_ref, inp_ref, mask_ref, w0_ref, wm_ref, w5_ref, sh_ref,
                 lam_ref, o_ref, act_ref, col_ref, col0_ref, *, H, W,
                 cg_max_iter):
    HW = H * W
    LM = LANE_MARGIN
    C = C_PAD

    # Column-boundary masks for ReflectionPad2d(1); row boundaries are handled
    # by mirroring rows 1 / H-2 into the lane margins (no row masks needed).
    lane = jax.lax.broadcasted_iota(jnp.int32, (1, HW), 1)
    colx = lane % W
    xm_lo = colx == 0
    xm_hi = colx == (W - 1)

    # Zero the (W+1)-lane outer margin strips once per grid step so the two
    # extreme lanes read by corner taps are deterministic (always masked out).
    act_ref[:, LM - W - 1:LM] = jnp.zeros((C, W + 1), act_ref.dtype)
    act_ref[:, LM + HW:LM + HW + W + 1] = jnp.zeros((C, W + 1), act_ref.dtype)

    # Stage this batch element's image into center channels 0..1 (bf16).
    # Channels 2..63 are never read at layer 0 -> no full-scratch zeroing.
    x0 = x_ref[0]                                     # (2, HW) f32
    act_ref[0:2, LM:LM + HW] = x0.astype(act_ref.dtype)

    taps = [(dy, dx) for dy in (-1, 0, 1) for dx in (-1, 0, 1)]

    def write_row_margins(cin):
        # reflected rows: row -1 -> row 1, row H -> row H-2
        act_ref[0:cin, LM - W:LM] = act_ref[0:cin, LM + W:LM + 2 * W]
        act_ref[0:cin, LM + HW:LM + HW + W] = \
            act_ref[0:cin, LM + (H - 2) * W:LM + (H - 1) * W]

    def tap_view(dy, dx, cin):
        """(cin, HW) activation shifted to neighbour (y+dy, x+dx) with reflect
        padding.  Loaded just-in-time; only dx != 0 taps need one select."""
        off = dy * W + dx
        main = act_ref[0:cin, LM + off:LM + off + HW]
        if dx != 0:
            alt = act_ref[0:cin, LM + dy * W - dx:LM + dy * W - dx + HW]
            main = jnp.where(xm_lo if dx < 0 else xm_hi, alt, main)
        return main

    # ---------------- layer 0: Cin = 2 (K = 18 padded to K0_PAD, f32) --------
    write_row_margins(2)
    col0_ref[K0_PAD // 2:K0_PAD, :] = jnp.zeros((K0_PAD // 2, HW),
                                                col0_ref.dtype)
    for t, (dy, dx) in enumerate(taps):
        col0_ref[2 * t:2 * t + 2, :] = tap_view(dy, dx, 2).astype(col0_ref.dtype)
    a = jnp.dot(w0_ref[...], col0_ref[...], preferred_element_type=jnp.float32)
    a = jnp.maximum(a + sh_ref[0], 0.0)
    act_ref[:, LM:LM + HW] = a.astype(act_ref.dtype)

    # ---------------- layers 1..4: one K=576 im2col matmul each --------------
    def build_col():
        for t, (dy, dx) in enumerate(taps):
            col_ref[C * t:C * (t + 1), :] = tap_view(dy, dx, C)

    for layer in range(1, N_LAYERS - 1):
        write_row_margins(C)
        build_col()
        a = jnp.dot(wm_ref[layer - 1], col_ref[...],
                    preferred_element_type=jnp.float32)        # (64, HW) f32
        a = jnp.maximum(a + sh_ref[layer], 0.0)
        act_ref[:, LM:LM + HW] = a.astype(act_ref.dtype)

    # ---------------- layer 5: Cout = 2 (8 padded output rows) ---------------
    write_row_margins(C)
    build_col()
    a5 = jnp.dot(w5_ref[...], col_ref[...], preferred_element_type=jnp.float32)
    cnn = a5[0:2, :] + sh_ref[N_LAYERS - 1, 0:2]               # (2, HW) f32

    # ---------------- residual + CG solve -------------------------------------
    # (AHA + lam*I) z = inp + lam*(x + cnn),  z0 = x,  AHA(v) = mask * v
    lam = lam_ref[0]
    rhs = inp_ref[0] + lam * (x0 + cnn)
    mlam = mask_ref[0] + lam          # hoisted out of the CG loop

    z = x0
    res = rhs - mlam * z
    p = res
    rs = jnp.sum(res * res)
    # TODO(synk): deepinpy ConjGrad also early-terminates on ||res|| < eps; here
    # we run a fixed cg_max_iter iterations (data-dependent break not lowered).
    for _ in range(cg_max_iter):
        Ap = mlam * p
        pAp = jnp.sum(p * Ap)
        alpha = rs / jnp.where(pAp != 0.0, pAp, 1.0)   # guard exact convergence
        z = z + alpha * p
        res = res - alpha * Ap
        rs_new = jnp.sum(res * res)
        beta = rs_new / jnp.where(rs != 0.0, rs, 1.0)
        p = res + beta * p
        rs = rs_new

    o_ref[0] = z


def modl_block_forward(x, inp, mask, params, l2lam, cg_max_iter):
    """x, inp: complex64 (B, H, W); mask: f32 (H, W); AHA(v) = mask * v."""
    w0, wmid, w5, shifts = params
    B, H, W = x.shape
    HW = H * W
    assert H >= 2 and W >= 2 and LANE_MARGIN >= W + 1

    xf = jnp.stack([x.real, x.imag], axis=1).reshape(B, 2, HW).astype(jnp.float32)
    inpf = jnp.stack([inp.real, inp.imag], axis=1).reshape(B, 2, HW).astype(jnp.float32)
    maskf = mask.reshape(1, 1, HW).astype(jnp.float32)
    lam = jnp.asarray(l2lam, jnp.float32).reshape(1)

    kernel = functools.partial(_modl_kernel, H=H, W=W, cg_max_iter=cg_max_iter)
    scratch_cols = 2 * LANE_MARGIN + HW

    z = pl.pallas_call(
        kernel,
        out_shape=jax.ShapeDtypeStruct((B, 2, HW), jnp.float32),
        grid_spec=pltpu.PrefetchScalarGridSpec(
            num_scalar_prefetch=0,
            grid=(B,),
            in_specs=[
                pl.BlockSpec((1, 2, HW), lambda b: (b, 0, 0)),              # x
                pl.BlockSpec((1, 2, HW), lambda b: (b, 0, 0)),              # inp
                pl.BlockSpec((1, 1, HW), lambda b: (0, 0, 0)),              # mask
                pl.BlockSpec((C_PAD, K0_PAD), lambda b: (0, 0)),            # w0
                pl.BlockSpec((N_LAYERS - 2, C_PAD, K_MID),
                             lambda b: (0, 0, 0)),                          # w1..4
                pl.BlockSpec((COUT5_PAD, K_MID), lambda b: (0, 0)),         # w5
                pl.BlockSpec((N_LAYERS, C_PAD, 1), lambda b: (0, 0, 0)),    # shifts
                pl.BlockSpec(memory_space=pltpu.MemorySpace.SMEM),          # l2lam
            ],
            out_specs=pl.BlockSpec((1, 2, HW), lambda b: (b, 0, 0)),
            scratch_shapes=[
                pltpu.VMEM((C_PAD, scratch_cols), jnp.bfloat16),   # act + margins
                pltpu.VMEM((K_MID, HW), jnp.bfloat16),             # im2col (L1..5)
                pltpu.VMEM((K0_PAD, HW), jnp.float32),             # im2col (L0)
            ],
        ),
        compiler_params=pltpu.CompilerParams(dimension_semantics=("parallel",)),
    )(xf, inpf, maskf, w0, wmid, w5, shifts, lam)

    z = z.reshape(B, 2, H, W)
    return jax.lax.complex(z[:, 0], z[:, 1])


# ----------------------------------------------------------------------------
# Parameter init (torch layout) and folding to the kernel's im2col layouts
# ----------------------------------------------------------------------------
def init_params(key, channels=2, num_filters=64, k=3):
    specs = [(channels, num_filters)] + [(num_filters, num_filters)] * 4 \
            + [(num_filters, channels)]
    layers = []
    for i, (cin, cout) in enumerate(specs):
        key, kw, kb, kg, kbt, km, kv = jax.random.split(key, 7)
        bound = 1.0 / (cin * k * k) ** 0.5
        w = jax.random.uniform(kw, (cout, cin, k, k), jnp.float32, -bound, bound)
        b = jax.random.uniform(kb, (cout,), jnp.float32, -bound, bound)
        has_bn = i < 5
        if has_bn:   # eval-mode BatchNorm2d running stats / affine params
            gamma = jax.random.uniform(kg, (cout,), jnp.float32, 0.5, 1.5)
            beta = 0.1 * jax.random.normal(kbt, (cout,), jnp.float32)
            rmean = 0.1 * jax.random.normal(km, (cout,), jnp.float32)
            rvar = jax.random.uniform(kv, (cout,), jnp.float32, 0.5, 1.5)
        else:
            gamma = beta = rmean = rvar = None
        layers.append(dict(w=w, b=b, gamma=gamma, beta=beta, rmean=rmean,
                           rvar=rvar, relu=has_bn))
    return layers


def fold_params(layers, eps=1e-5):
    """Fold BN scale into the conv weights and conv bias into the BN shift,
    then reshape to the kernel's im2col layouts:
      w0   (C_PAD, K0_PAD)          f32  (layer 0, K = tap*2 + c, bf16-rounded)
      wmid (4, C_PAD, 9*C_PAD)      bf16 (layers 1..4, lane-dense)
      w5   (COUT5_PAD, 9*C_PAD)     bf16 (layer 5, Cout padded to 8)
      sh   (6, C_PAD, 1)            f32  (folded bias / BN shift)
    Also returns per-layer reference params (tap-major (9, cout, cin) bf16)."""
    wk_list, sh_list, ref_layers = [], [], []
    for lp in layers:
        w, b = lp["w"], lp["b"]
        cout, cin = w.shape[0], w.shape[1]
        if lp["gamma"] is not None:
            scale = lp["gamma"] / jnp.sqrt(lp["rvar"] + eps)
            shift = lp["beta"] - lp["rmean"] * scale + b * scale
        else:
            scale = jnp.ones((cout,), jnp.float32)
            shift = b
        wf = w * scale[:, None, None, None]                        # (co,ci,3,3)
        # kernel im2col K ordering: K = tap*cin + c, tap = ky*3 + kx
        wk = jnp.transpose(wf, (0, 2, 3, 1)).reshape(cout, 9 * cin)
        w9 = jnp.transpose(wf, (2, 3, 0, 1)).reshape(9, cout, cin)  # reference
        wk_list.append(wk)
        sh_list.append(shift)
        ref_layers.append((w9.astype(jnp.bfloat16), shift, lp["relu"]))

    # Layer 0 runs in f32 with bf16-rounded weight values (matches reference).
    w0 = jnp.zeros((C_PAD, K0_PAD), jnp.float32)
    w0 = w0.at[:, :wk_list[0].shape[1]].set(
        wk_list[0].astype(jnp.bfloat16).astype(jnp.float32))
    wmid = jnp.stack(wk_list[1:N_LAYERS - 1]).astype(jnp.bfloat16)
    w5 = jnp.zeros((COUT5_PAD, K_MID), jnp.float32).at[:2].set(wk_list[-1])
    w5 = w5.astype(jnp.bfloat16)
    sh = jnp.zeros((N_LAYERS, C_PAD), jnp.float32)
    for i, s in enumerate(sh_list):
        sh = sh.at[i, :s.shape[0]].set(s)
    sh = sh.reshape(N_LAYERS, C_PAD, 1)
    return (w0, wmid, w5, sh), ref_layers


# ----------------------------------------------------------------------------
# Pure-JAX reference (mirrors the kernel's bf16 matmul operands / f32 epilogue)
# ----------------------------------------------------------------------------
def reference_forward(x, inp, mask, ref_layers, l2lam, cg_max_iter):
    B, H, W = x.shape
    x0 = jnp.stack([x.real, x.imag], axis=1).astype(jnp.float32)     # (B,2,H,W)
    inp0 = jnp.stack([inp.real, inp.imag], axis=1).astype(jnp.float32)

    a = x0
    for w9, shift, relu in ref_layers:
        cout = w9.shape[1]
        ap = jnp.pad(a, ((0, 0), (0, 0), (1, 1), (1, 1)),
                     mode="reflect").astype(jnp.bfloat16)
        out = jnp.zeros((B, cout, H, W), jnp.float32)
        for t in range(9):
            ky, kx = t // 3, t % 3
            win = ap[:, :, ky:ky + H, kx:kx + W]
            out = out + jnp.einsum("oc,bchw->bohw", w9[t], win,
                                   preferred_element_type=jnp.float32)
        out = out + shift.reshape(1, cout, 1, 1)
        if relu:
            out = jnp.maximum(out, 0.0)
        a = out
    r = x0 + a

    lam = jnp.float32(l2lam)
    rhs = inp0 + lam * r
    mlam = mask.reshape(1, 1, H, W).astype(jnp.float32) + lam

    def ip(u, v):
        return jnp.sum(u * v, axis=(1, 2, 3), keepdims=True)

    z = x0
    res = rhs - mlam * z
    p = res
    rs = ip(res, res)
    for _ in range(cg_max_iter):
        Ap = mlam * p
        alpha = rs / ip(p, Ap)
        z = z + alpha * p
        res = res - alpha * Ap
        rs_new = ip(res, res)
        beta = rs_new / rs
        p = res + beta * p
        rs = rs_new
    return jax.lax.complex(z[:, 0], z[:, 1])


if __name__ == "__main__":
    key = jax.random.PRNGKey(0)
    B, H, W = 2, 16, 16
    channels = 2                 # complex path -> real/imag channels
    mu_init = 0.5
    cg_max_iter = 5

    kx, ki, km, kp = jax.random.split(key, 4)
    xr = jax.random.normal(kx, (B, H, W, 2), jnp.float32)
    x = jax.lax.complex(xr[..., 0], xr[..., 1])
    ir = jax.random.normal(ki, (B, H, W, 2), jnp.float32)
    inp = jax.lax.complex(ir[..., 0], ir[..., 1])
    mask = (jax.random.uniform(km, (H, W)) > 0.5).astype(jnp.float32)

    raw_params = init_params(kp, channels=channels)
    params, ref_layers = fold_params(raw_params)
    l2lam = jnp.float32(mu_init)   # torch.nn.Parameter(torch.ones(1) * mu_init)

    fwd = jax.jit(functools.partial(modl_block_forward, cg_max_iter=cg_max_iter))
    out = fwd(x, inp, mask, params, l2lam)
    jax.block_until_ready(out)
    assert out.shape == (B, H, W) and out.dtype == jnp.complex64

    ref = reference_forward(x, inp, mask, ref_layers, l2lam, cg_max_iter)
    err = float(jnp.max(jnp.abs(out - ref)))
    assert err < 3e-3, f"max |kernel - reference| = {err}"
    print("KERNEL_OK")
</pallas_src>

<mosaic_0001>
module attributes {stable_mosaic.version = 11 : i64} {
  func.func @_modl_kernel(%arg0: i32, %arg1: memref<1x2x256xf32, #tpu.memory_space<vmem>>, %arg2: memref<1x2x256xf32, #tpu.memory_space<vmem>>, %arg3: memref<1x1x256xf32, #tpu.memory_space<vmem>>, %arg4: memref<64x32xf32, #tpu.memory_space<vmem>>, %arg5: memref<4x64x576xbf16, #tpu.memory_space<vmem>>, %arg6: memref<8x576xbf16, #tpu.memory_space<vmem>>, %arg7: memref<6x64x1xf32, #tpu.memory_space<vmem>>, %arg8: memref<1xf32, #tpu.memory_space<smem>>, %arg9: memref<1x2x256xf32, #tpu.memory_space<vmem>>, %arg10: memref<64x512xbf16, #tpu.memory_space<vmem>>, %arg11: memref<576x256xbf16, #tpu.memory_space<vmem>>, %arg12: memref<32x256xf32, #tpu.memory_space<vmem>>) attributes {dimension_semantics = [#tpu.dimension_semantics<parallel>], iteration_bounds = array<i64: 2>, scalar_prefetch = 0 : i64, scratch_operands = 3 : i64, tpu.core_type = #tpu.core_type<tc>, window_params = [{transform_indices = @transform_0, window_bounds = array<i64: 1, 2, 256>}, {transform_indices = @transform_1, window_bounds = array<i64: 1, 2, 256>}, {pipeline_mode = #tpu.pipeline_mode<synchronous>, transform_indices = @transform_2, window_bounds = array<i64: 1, 1, 256>}, {pipeline_mode = #tpu.pipeline_mode<synchronous>, transform_indices = @transform_3, window_bounds = array<i64: 64, 32>}, {pipeline_mode = #tpu.pipeline_mode<synchronous>, transform_indices = @transform_4, window_bounds = array<i64: 4, 64, 576>}, {pipeline_mode = #tpu.pipeline_mode<synchronous>, transform_indices = @transform_5, window_bounds = array<i64: 8, 576>}, {pipeline_mode = #tpu.pipeline_mode<synchronous>, transform_indices = @transform_6, window_bounds = array<i64: 6, 64, 1>}, {transform_indices = @transform_7, window_bounds = array<i64: 1>}, {transform_indices = @transform_8, window_bounds = array<i64: 1, 2, 256>}]} {
    %0 = tpu.iota {dimensions = array<i32: 1>} : vector<1x256xi32>
    %c16_i32 = arith.constant 16 : i32
    %c0_i32 = arith.constant 0 : i32
    %1 = arith.cmpi eq, %c16_i32, %c0_i32 : i32
    %c1_i32 = arith.constant 1 : i32
    %2 = arith.select %1, %c1_i32, %c16_i32 : i32
    %3 = vector.broadcast %2 : i32 to vector<1x256xi32>
    %4 = arith.remsi %0, %3 : vector<1x256xi32>
    %c0_i32_0 = arith.constant 0 : i32
    %5 = vector.broadcast %c0_i32_0 : i32 to vector<1x256xi32>
    %6 = arith.cmpi ne, %4, %5 : vector<1x256xi32>
    %c0_i32_1 = arith.constant 0 : i32
    %7 = vector.broadcast %c0_i32_1 : i32 to vector<1x256xi32>
    %8 = arith.cmpi slt, %4, %7 : vector<1x256xi32>
    %c0_i32_2 = arith.constant 0 : i32
    %9 = arith.cmpi slt, %2, %c0_i32_2 : i32
    %10 = vector.broadcast %9 : i1 to vector<1x256xi1>
    %11 = vector.broadcast %10 : vector<1x256xi1> to vector<1x256xi1>
    %12 = arith.xori %8, %11 : vector<1x256xi1>
    %13 = arith.andi %12, %6 : vector<1x256xi1>
    %14 = vector.broadcast %2 : i32 to vector<1x256xi32>
    %15 = arith.addi %4, %14 : vector<1x256xi32>
    %16 = arith.select %13, %15, %4 : vector<1x256xi1>, vector<1x256xi32>
    %c0_i32_3 = arith.constant 0 : i32
    %17 = vector.broadcast %c0_i32_3 : i32 to vector<1x256xi32>
    %18 = arith.cmpi eq, %16, %17 : vector<1x256xi32>
    %c15_i32 = arith.constant 15 : i32
    %19 = vector.broadcast %c15_i32 : i32 to vector<1x256xi32>
    %20 = arith.cmpi eq, %16, %19 : vector<1x256xi32>
    %cst = arith.constant 0.000000e+00 : bf16
    %21 = vector.broadcast %cst : bf16 to vector<64x17xbf16>
    %c0 = arith.constant 0 : index
    %c111 = arith.constant 111 : index
    %22 = vector.load %arg10[%c0, %c111] : memref<64x512xbf16, #tpu.memory_space<vmem>>, vector<64x17xbf16>
    tpu.vector_store %arg10[%c0, %c111], %21 {strides = array<i32>} : memref<64x512xbf16, #tpu.memory_space<vmem>>, vector<64x17xbf16>,
    %cst_4 = arith.constant 0.000000e+00 : bf16
    %23 = vector.broadcast %cst_4 : bf16 to vector<64x17xbf16>
    %c0_5 = arith.constant 0 : index
    %c384 = arith.constant 384 : index
    %24 = vector.load %arg10[%c0_5, %c384] : memref<64x512xbf16, #tpu.memory_space<vmem>>, vector<64x17xbf16>
    tpu.vector_store %arg10[%c0_5, %c384], %23 {strides = array<i32>} : memref<64x512xbf16, #tpu.memory_space<vmem>>, vector<64x17xbf16>,
    %c0_6 = arith.constant 0 : index
    %c0_7 = arith.constant 0 : index
    %c0_8 = arith.constant 0 : index
    %25 = vector.load %arg1[%c0_6, %c0_7, %c0_8] : memref<1x2x256xf32, #tpu.memory_space<vmem>>, vector<1x2x256xf32>
    %26 = vector.shape_cast %25 : vector<1x2x256xf32> to vector<2x256xf32>
    %27 = arith.truncf %26 : vector<2x256xf32> to vector<2x256xbf16>
    %c0_9 = arith.constant 0 : index
    %c128 = arith.constant 128 : index
    %28 = vector.load %arg10[%c0_9, %c128] : memref<64x512xbf16, #tpu.memory_space<vmem>>, vector<2x256xbf16>
    tpu.vector_store %arg10[%c0_9, %c128], %27 {strides = array<i32>} : memref<64x512xbf16, #tpu.memory_space<vmem>>, vector<2x256xbf16>,
    %c0_10 = arith.constant 0 : index
    %c144 = arith.constant 144 : index
    %29 = vector.load %arg10[%c0_10, %c144] : memref<64x512xbf16, #tpu.memory_space<vmem>>, vector<2x16xbf16>
    %c0_11 = arith.constant 0 : index
    %c112 = arith.constant 112 : index
    %30 = vector.load %arg10[%c0_11, %c112] : memref<64x512xbf16, #tpu.memory_space<vmem>>, vector<2x16xbf16>
    tpu.vector_store %arg10[%c0_11, %c112], %29 {strides = array<i32>} : memref<64x512xbf16, #tpu.memory_space<vmem>>, vector<2x16xbf16>,
    %c0_12 = arith.constant 0 : index
    %c352 = arith.constant 352 : index
    %31 = vector.load %arg10[%c0_12, %c352] : memref<64x512xbf16, #tpu.memory_space<vmem>>, vector<2x16xbf16>
    %c0_13 = arith.constant 0 : index
    %c384_14 = arith.constant 384 : index
    %32 = vector.load %arg10[%c0_13, %c384_14] : memref<64x512xbf16, #tpu.memory_space<vmem>>, vector<2x16xbf16>
    tpu.vector_store %arg10[%c0_13, %c384_14], %31 {strides = array<i32>} : memref<64x512xbf16, #tpu.memory_space<vmem>>, vector<2x16xbf16>,
    %cst_15 = arith.constant 0.000000e+00 : f32
    %33 = vector.broadcast %cst_15 : f32 to vector<16x256xf32>
    %c16 = arith.constant 16 : index
    %c0_16 = arith.constant 0 : index
    %34 = vector.load %arg12[%c16, %c0_16] : memref<32x256xf32, #tpu.memory_space<vmem>>, vector<16x256xf32>
    tpu.vector_store %arg12[%c16, %c0_16], %33 {strides = array<i32>} : memref<32x256xf32, #tpu.memory_space<vmem>>, vector<16x256xf32>,
    %c0_17 = arith.constant 0 : index
    %c111_18 = arith.constant 111 : index
    %35 = vector.load %arg10[%c0_17, %c111_18] : memref<64x512xbf16, #tpu.memory_space<vmem>>, vector<2x256xbf16>
    %c0_19 = arith.constant 0 : index
    %c113 = arith.constant 113 : index
    %36 = vector.load %arg10[%c0_19, %c113] : memref<64x512xbf16, #tpu.memory_space<vmem>>, vector<2x256xbf16>
    %37 = vector.shape_cast %18 : vector<1x256xi1> to vector<1x256xi1>
    %38 = vector.broadcast %37 : vector<1x256xi1> to vector<2x256xi1>
    %39 = arith.select %38, %36, %35 : vector<2x256xi1>, vector<2x256xbf16>
    %40 = arith.extf %39 : vector<2x256xbf16> to vector<2x256xf32>
    %c0_20 = arith.constant 0 : index
    %c0_21 = arith.constant 0 : index
    %41 = vector.load %arg12[%c0_20, %c0_21] : memref<32x256xf32, #tpu.memory_space<vmem>>, vector<2x256xf32>
    tpu.vector_store %arg12[%c0_20, %c0_21], %40 {strides = array<i32>} : memref<32x256xf32, #tpu.memory_space<vmem>>, vector<2x256xf32>,
    %c0_22 = arith.constant 0 : index
    %c112_23 = arith.constant 112 : index
    %42 = vector.load %arg10[%c0_22, %c112_23] : memref<64x512xbf16, #tpu.memory_space<vmem>>, vector<2x256xbf16>
    %43 = arith.extf %42 : vector<2x256xbf16> to vector<2x256xf32>
    %c2 = arith.constant 2 : index
    %c0_24 = arith.constant 0 : index
    %44 = vector.load %arg12[%c2, %c0_24] : memref<32x256xf32, #tpu.memory_space<vmem>>, vector<2x256xf32>
    tpu.vector_store %arg12[%c2, %c0_24], %43 {strides = array<i32>} : memref<32x256xf32, #tpu.memory_space<vmem>>, vector<2x256xf32>,
    %c0_25 = arith.constant 0 : index
    %c113_26 = arith.constant 113 : index
    %45 = vector.load %arg10[%c0_25, %c113_26] : memref<64x512xbf16, #tpu.memory_space<vmem>>, vector<2x256xbf16>
    %c0_27 = arith.constant 0 : index
    %c111_28 = arith.constant 111 : index
    %46 = vector.load %arg10[%c0_27, %c111_28] : memref<64x512xbf16, #tpu.memory_space<vmem>>, vector<2x256xbf16>
    %47 = vector.shape_cast %20 : vector<1x256xi1> to vector<1x256xi1>
    %48 = vector.broadcast %47 : vector<1x256xi1> to vector<2x256xi1>
    %49 = arith.select %48, %46, %45 : vector<2x256xi1>, vector<2x256xbf16>
    %50 = arith.extf %49 : vector<2x256xbf16> to vector<2x256xf32>
    %c4 = arith.constant 4 : index
    %c0_29 = arith.constant 0 : index
    %51 = vector.load %arg12[%c4, %c0_29] : memref<32x256xf32, #tpu.memory_space<vmem>>, vector<2x256xf32>
    tpu.vector_store %arg12[%c4, %c0_29], %50 {strides = array<i32>} : memref<32x256xf32, #tpu.memory_space<vmem>>, vector<2x256xf32>,
    %c0_30 = arith.constant 0 : index
    %c127 = arith.constant 127 : index
    %52 = vector.load %arg10[%c0_30, %c127] : memref<64x512xbf16, #tpu.memory_space<vmem>>, vector<2x256xbf16>
    %c0_31 = arith.constant 0 : index
    %c129 = arith.constant 129 : index
    %53 = vector.load %arg10[%c0_31, %c129] : memref<64x512xbf16, #tpu.memory_space<vmem>>, vector<2x256xbf16>
    %54 = vector.shape_cast %18 : vector<1x256xi1> to vector<1x256xi1>
    %55 = vector.broadcast %54 : vector<1x256xi1> to vector<2x256xi1>
    %56 = arith.select %55, %53, %52 : vector<2x256xi1>, vector<2x256xbf16>
    %57 = arith.extf %56 : vector<2x256xbf16> to vector<2x256xf32>
    %c6 = arith.constant 6 : index
    %c0_32 = arith.constant 0 : index
    %58 = vector.load %arg12[%c6, %c0_32] : memref<32x256xf32, #tpu.memory_space<vmem>>, vector<2x256xf32>
    tpu.vector_store %arg12[%c6, %c0_32], %57 {strides = array<i32>} : memref<32x256xf32, #tpu.memory_space<vmem>>, vector<2x256xf32>,
    %c0_33 = arith.constant 0 : index
    %c128_34 = arith.constant 128 : index
    %59 = vector.load %arg10[%c0_33, %c128_34] : memref<64x512xbf16, #tpu.memory_space<vmem>>, vector<2x256xbf16>
    %60 = arith.extf %59 : vector<2x256xbf16> to vector<2x256xf32>
    %c8 = arith.constant 8 : index
    %c0_35 = arith.constant 0 : index
    %61 = vector.load %arg12[%c8, %c0_35] : memref<32x256xf32, #tpu.memory_space<vmem>>, vector<2x256xf32>
    tpu.vector_store %arg12[%c8, %c0_35], %60 {strides = array<i32>} : memref<32x256xf32, #tpu.memory_space<vmem>>, vector<2x256xf32>,
    %c0_36 = arith.constant 0 : index
    %c129_37 = arith.constant 129 : index
    %62 = vector.load %arg10[%c0_36, %c129_37] : memref<64x512xbf16, #tpu.memory_space<vmem>>, vector<2x256xbf16>
    %c0_38 = arith.constant 0 : index
    %c127_39 = arith.constant 127 : index
    %63 = vector.load %arg10[%c0_38, %c127_39] : memref<64x512xbf16, #tpu.memory_space<vmem>>, vector<2x256xbf16>
    %64 = vector.shape_cast %20 : vector<1x256xi1> to vector<1x256xi1>
    %65 = vector.broadcast %64 : vector<1x256xi1> to vector<2x256xi1>
    %66 = arith.select %65, %63, %62 : vector<2x256xi1>, vector<2x256xbf16>
    %67 = arith.extf %66 : vector<2x256xbf16> to vector<2x256xf32>
    %c10 = arith.constant 10 : index
    %c0_40 = arith.constant 0 : index
    %68 = vector.load %arg12[%c10, %c0_40] : memref<32x256xf32, #tpu.memory_space<vmem>>, vector<2x256xf32>
    tpu.vector_store %arg12[%c10, %c0_40], %67 {strides = array<i32>} : memref<32x256xf32, #tpu.memory_space<vmem>>, vector<2x256xf32>,
    %c0_41 = arith.constant 0 : index
    %c143 = arith.constant 143 : index
    %69 = vector.load %arg10[%c0_41, %c143] : memref<64x512xbf16, #tpu.memory_space<vmem>>, vector<2x256xbf16>
    %c0_42 = arith.constant 0 : index
    %c145 = arith.constant 145 : index
    %70 = vector.load %arg10[%c0_42, %c145] : memref<64x512xbf16, #tpu.memory_space<vmem>>, vector<2x256xbf16>
    %71 = vector.shape_cast %18 : vector<1x256xi1> to vector<1x256xi1>
    %72 = vector.broadcast %71 : vector<1x256xi1> to vector<2x256xi1>
    %73 = arith.select %72, %70, %69 : vector<2x256xi1>, vector<2x256xbf16>
    %74 = arith.extf %73 : vector<2x256xbf16> to vector<2x256xf32>
    %c12 = arith.constant 12 : index
    %c0_43 = arith.constant 0 : index
    %75 = vector.load %arg12[%c12, %c0_43] : memref<32x256xf32, #tpu.memory_space<vmem>>, vector<2x256xf32>
    tpu.vector_store %arg12[%c12, %c0_43], %74 {strides = array<i32>} : memref<32x256xf32, #tpu.memory_space<vmem>>, vector<2x256xf32>,
    %c0_44 = arith.constant 0 : index
    %c144_45 = arith.constant 144 : index
    %76 = vector.load %arg10[%c0_44, %c144_45] : memref<64x512xbf16, #tpu.memory_space<vmem>>, vector<2x256xbf16>
    %77 = arith.extf %76 : vector<2x256xbf16> to vector<2x256xf32>
    %c14 = arith.constant 14 : index
    %c0_46 = arith.constant 0 : index
    %78 = vector.load %arg12[%c14, %c0_46] : memref<32x256xf32, #tpu.memory_space<vmem>>, vector<2x256xf32>
    tpu.vector_store %arg12[%c14, %c0_46], %77 {strides = array<i32>} : memref<32x256xf32, #tpu.memory_space<vmem>>, vector<2x256xf32>,
    %c0_47 = arith.constant 0 : index
    %c145_48 = arith.constant 145 : index
    %79 = vector.load %arg10[%c0_47, %c145_48] : memref<64x512xbf16, #tpu.memory_space<vmem>>, vector<2x256xbf16>
    %c0_49 = arith.constant 0 : index
    %c143_50 = arith.constant 143 : index
    %80 = vector.load %arg10[%c0_49, %c143_50] : memref<64x512xbf16, #tpu.memory_space<vmem>>, vector<2x256xbf16>
    %81 = vector.shape_cast %20 : vector<1x256xi1> to vector<1x256xi1>
    %82 = vector.broadcast %81 : vector<1x256xi1> to vector<2x256xi1>
    %83 = arith.select %82, %80, %79 : vector<2x256xi1>, vector<2x256xbf16>
    %84 = arith.extf %83 : vector<2x256xbf16> to vector<2x256xf32>
    %c16_51 = arith.constant 16 : index
    %c0_52 = arith.constant 0 : index
    %85 = vector.load %arg12[%c16_51, %c0_52] : memref<32x256xf32, #tpu.memory_space<vmem>>, vector<2x256xf32>
    tpu.vector_store %arg12[%c16_51, %c0_52], %84 {strides = array<i32>} : memref<32x256xf32, #tpu.memory_space<vmem>>, vector<2x256xf32>,
    %c0_53 = arith.constant 0 : index
    %c0_54 = arith.constant 0 : index
    %86 = vector.load %arg4[%c0_53, %c0_54] : memref<64x32xf32, #tpu.memory_space<vmem>>, vector<64x32xf32>
    %c0_55 = arith.constant 0 : index
    %c0_56 = arith.constant 0 : index
    %87 = vector.load %arg12[%c0_55, %c0_56] : memref<32x256xf32, #tpu.memory_space<vmem>>, vector<32x256xf32>
    %cst_57 = arith.constant dense<0.000000e+00> : vector<64x256xf32>
    %88 = tpu.matmul %86, %87, %cst_57 {dimension_numbers = #tpu.dot_dimension_numbers<[1], [0], [0], [1], [0, 0, 1, 1], [], []>} : vector<64x32xf32>, vector<32x256xf32>, vector<64x256xf32> -> vector<64x256xf32>
    %c0_58 = arith.constant 0 : index
    %c0_59 = arith.constant 0 : index
    %c0_60 = arith.constant 0 : index
    %89 = vector.load %arg7[%c0_58, %c0_59, %c0_60] : memref<6x64x1xf32, #tpu.memory_space<vmem>>, vector<1x64x1xf32>
    %90 = vector.shape_cast %89 : vector<1x64x1xf32> to vector<64x1xf32>
    %91 = vector.broadcast %90 : vector<64x1xf32> to vector<64x256xf32>
    %92 = arith.addf %88, %91 : vector<64x256xf32>
    %cst_61 = arith.constant 0.000000e+00 : f32
    %93 = vector.broadcast %cst_61 : f32 to vector<64x256xf32>
    %94 = arith.maximumf %92, %93 : vector<64x256xf32>
    %95 = arith.truncf %94 : vector<64x256xf32> to vector<64x256xbf16>
    %c0_62 = arith.constant 0 : index
    %c128_63 = arith.constant 128 : index
    %96 = vector.load %arg10[%c0_62, %c128_63] : memref<64x512xbf16, #tpu.memory_space<vmem>>, vector<64x256xbf16>
    tpu.vector_store %arg10[%c0_62, %c128_63], %95 {strides = array<i32>} : memref<64x512xbf16, #tpu.memory_space<vmem>>, vector<64x256xbf16>,
    %c0_64 = arith.constant 0 : index
    %c144_65 = arith.constant 144 : index
    %97 = vector.load %arg10[%c0_64, %c144_65] : memref<64x512xbf16, #tpu.memory_space<vmem>>, vector<64x16xbf16>
    %c0_66 = arith.constant 0 : index
    %c112_67 = arith.constant 112 : index
    %98 = vector.load %arg10[%c0_66, %c112_67] : memref<64x512xbf16, #tpu.memory_space<vmem>>, vector<64x16xbf16>
    tpu.vector_store %arg10[%c0_66, %c112_67], %97 {strides = array<i32>} : memref<64x512xbf16, #tpu.memory_space<vmem>>, vector<64x16xbf16>,
    %c0_68 = arith.constant 0 : index
    %c352_69 = arith.constant 352 : index
    %99 = vector.load %arg10[%c0_68, %c352_69] : memref<64x512xbf16, #tpu.memory_space<vmem>>, vector<64x16xbf16>
    %c0_70 = arith.constant 0 : index
    %c384_71 = arith.constant 384 : index
    %100 = vector.load %arg10[%c0_70, %c384_71] : memref<64x512xbf16, #tpu.memory_space<vmem>>, vector<64x16xbf16>
    tpu.vector_store %arg10[%c0_70, %c384_71], %99 {strides = array<i32>} : memref<64x512xbf16, #tpu.memory_space<vmem>>, vector<64x16xbf16>,
    %c0_72 = arith.constant 0 : index
    %c111_73 = arith.constant 111 : index
    %101 = vector.load %arg10[%c0_72, %c111_73] : memref<64x512xbf16, #tpu.memory_space<vmem>>, vector<64x256xbf16>
    %c0_74 = arith.constant 0 : index
    %c113_75 = arith.constant 113 : index
    %102 = vector.load %arg10[%c0_74, %c113_75] : memref<64x512xbf16, #tpu.memory_space<vmem>>, vector<64x256xbf16>
    %103 = vector.shape_cast %18 : vector<1x256xi1> to vector<1x256xi1>
    %104 = vector.broadcast %103 : vector<1x256xi1> to vector<64x256xi1>
    %105 = arith.select %104, %102, %101 : vector<64x256xi1>, vector<64x256xbf16>
    %c0_76 = arith.constant 0 : index
    %c0_77 = arith.constant 0 : index
    %106 = vector.load %arg11[%c0_76, %c0_77] : memref<576x256xbf16, #tpu.memory_space<vmem>>, vector<64x256xbf16>
    tpu.vector_store %arg11[%c0_76, %c0_77], %105 {strides = array<i32>} : memref<576x256xbf16, #tpu.memory_space<vmem>>, vector<64x256xbf16>,
    %c0_78 = arith.constant 0 : index
    %c112_79 = arith.constant 112 : index
    %107 = vector.load %arg10[%c0_78, %c112_79] : memref<64x512xbf16, #tpu.memory_space<vmem>>, vector<64x256xbf16>
    %c64 = arith.constant 64 : index
    %c0_80 = arith.constant 0 : index
    %108 = vector.load %arg11[%c64, %c0_80] : memref<576x256xbf16, #tpu.memory_space<vmem>>, vector<64x256xbf16>
    tpu.vector_store %arg11[%c64, %c0_80], %107 {strides = array<i32>} : memref<576x256xbf16, #tpu.memory_space<vmem>>, vector<64x256xbf16>,
    %c0_81 = arith.constant 0 : index
    %c113_82 = arith.constant 113 : index
    %109 = vector.load %arg10[%c0_81, %c113_82] : memref<64x512xbf16, #tpu.memory_space<vmem>>, vector<64x256xbf16>
    %c0_83 = arith.constant 0 : index
    %c111_84 = arith.constant 111 : index
    %110 = vector.load %arg10[%c0_83, %c111_84] : memref<64x512xbf16, #tpu.memory_space<vmem>>, vector<64x256xbf16>
    %111 = vector.shape_cast %20 : vector<1x256xi1> to vector<1x256xi1>
    %112 = vector.broadcast %111 : vector<1x256xi1> to vector<64x256xi1>
    %113 = arith.select %112, %110, %109 : vector<64x256xi1>, vector<64x256xbf16>
    %c128_85 = arith.constant 128 : index
    %c0_86 = arith.constant 0 : index
    %114 = vector.load %arg11[%c128_85, %c0_86] : memref<576x256xbf16, #tpu.memory_space<vmem>>, vector<64x256xbf16>
    tpu.vector_store %arg11[%c128_85, %c0_86], %113 {strides = array<i32>} : memref<576x256xbf16, #tpu.memory_space<vmem>>, vector<64x256xbf16>,
    %c0_87 = arith.constant 0 : index
    %c127_88 = arith.constant 127 : index
    %115 = vector.load %arg10[%c0_87, %c127_88] : memref<64x512xbf16, #tpu.memory_space<vmem>>, vector<64x256xbf16>
    %c0_89 = arith.constant 0 : index
    %c129_90 = arith.constant 129 : index
    %116 = vector.load %arg10[%c0_89, %c129_90] : memref<64x512xbf16, #tpu.memory_space<vmem>>, vector<64x256xbf16>
    %117 = vector.shape_cast %18 : vector<1x256xi1> to vector<1x256xi1>
    %118 = vector.broadcast %117 : vector<1x256xi1> to vector<64x256xi1>
    %119 = arith.select %118, %116, %115 : vector<64x256xi1>, vector<64x256xbf16>
    %c192 = arith.constant 192 : index
    %c0_91 = arith.constant 0 : index
    %120 = vector.load %arg11[%c192, %c0_91] : memref<576x256xbf16, #tpu.memory_space<vmem>>, vector<64x256xbf16>
    tpu.vector_store %arg11[%c192, %c0_91], %119 {strides = array<i32>} : memref<576x256xbf16, #tpu.memory_space<vmem>>, vector<64x256xbf16>,
    %c0_92 = arith.constant 0 : index
    %c128_93 = arith.constant 128 : index
    %121 = vector.load %arg10[%c0_92, %c128_93] : memref<64x512xbf16, #tpu.memory_space<vmem>>, vector<64x256xbf16>
    %c256 = arith.constant 256 : index
    %c0_94 = arith.constant 0 : index
    %122 = vector.load %arg11[%c256, %c0_94] : memref<576x256xbf16, #tpu.memory_space<vmem>>, vector<64x256xbf16>
    tpu.vector_store %arg11[%c256, %c0_94], %121 {strides = array<i32>} : memref<576x256xbf16, #tpu.memory_space<vmem>>, vector<64x256xbf16>,
    %c0_95 = arith.constant 0 : index
    %c129_96 = arith.constant 129 : index
    %123 = vector.load %arg10[%c0_95, %c129_96] : memref<64x512xbf16, #tpu.memory_space<vmem>>, vector<64x256xbf16>
    %c0_97 = arith.constant 0 : index
    %c127_98 = arith.constant 127 : index
    %124 = vector.load %arg10[%c0_97, %c127_98] : memref<64x512xbf16, #tpu.memory_space<vmem>>, vector<64x256xbf16>
    %125 = vector.shape_cast %20 : vector<1x256xi1> to vector<1x256xi1>
    %126 = vector.broadcast %125 : vector<1x256xi1> to vector<64x256xi1>
    %127 = arith.select %126, %124, %123 : vector<64x256xi1>, vector<64x256xbf16>
    %c320 = arith.constant 320 : index
    %c0_99 = arith.constant 0 : index
    %128 = vector.load %arg11[%c320, %c0_99] : memref<576x256xbf16, #tpu.memory_space<vmem>>, vector<64x256xbf16>
    tpu.vector_store %arg11[%c320, %c0_99], %127 {strides = array<i32>} : memref<576x256xbf16, #tpu.memory_space<vmem>>, vector<64x256xbf16>,
    %c0_100 = arith.constant 0 : index
    %c143_101 = arith.constant 143 : index
    %129 = vector.load %arg10[%c0_100, %c143_101] : memref<64x512xbf16, #tpu.memory_space<vmem>>, vector<64x256xbf16>
    %c0_102 = arith.constant 0 : index
    %c145_103 = arith.constant 145 : index
    %130 = vector.load %arg10[%c0_102, %c145_103] : memref<64x512xbf16, #tpu.memory_space<vmem>>, vector<64x256xbf16>
    %131 = vector.shape_cast %18 : vector<1x256xi1> to vector<1x256xi1>
    %132 = vector.broadcast %131 : vector<1x256xi1> to vector<64x256xi1>
    %133 = arith.select %132, %130, %129 : vector<64x256xi1>, vector<64x256xbf16>
    %c384_104 = arith.constant 384 : index
    %c0_105 = arith.constant 0 : index
    %134 = vector.load %arg11[%c384_104, %c0_105] : memref<576x256xbf16, #tpu.memory_space<vmem>>, vector<64x256xbf16>
    tpu.vector_store %arg11[%c384_104, %c0_105], %133 {strides = array<i32>} : memref<576x256xbf16, #tpu.memory_space<vmem>>, vector<64x256xbf16>,
    %c0_106 = arith.constant 0 : index
    %c144_107 = arith.constant 144 : index
    %135 = vector.load %arg10[%c0_106, %c144_107] : memref<64x512xbf16, #tpu.memory_space<vmem>>, vector<64x256xbf16>
    %c448 = arith.constant 448 : index
    %c0_108 = arith.constant 0 : index
    %136 = vector.load %arg11[%c448, %c0_108] : memref<576x256xbf16, #tpu.memory_space<vmem>>, vector<64x256xbf16>
    tpu.vector_store %arg11[%c448, %c0_108], %135 {strides = array<i32>} : memref<576x256xbf16, #tpu.memory_space<vmem>>, vector<64x256xbf16>,
    %c0_109 = arith.constant 0 : index
    %c145_110 = arith.constant 145 : index
    %137 = vector.load %arg10[%c0_109, %c145_110] : memref<64x512xbf16, #tpu.memory_space<vmem>>, vector<64x256xbf16>
    %c0_111 = arith.constant 0 : index
    %c143_112 = arith.constant 143 : index
    %138 = vector.load %arg10[%c0_111, %c143_112] : memref<64x512xbf16, #tpu.memory_space<vmem>>, vector<64x256xbf16>
    %139 = vector.shape_cast %20 : vector<1x256xi1> to vector<1x256xi1>
    %140 = vector.broadcast %139 : vector<1x256xi1> to vector<64x256xi1>
    %141 = arith.select %140, %138, %137 : vector<64x256xi1>, vector<64x256xbf16>
    %c512 = arith.constant 512 : index
    %c0_113 = arith.constant 0 : index
    %142 = vector.load %arg11[%c512, %c0_113] : memref<576x256xbf16, #tpu.memory_space<vmem>>, vector<64x256xbf16>
    tpu.vector_store %arg11[%c512, %c0_113], %141 {strides = array<i32>} : memref<576x256xbf16, #tpu.memory_space<vmem>>, vector<64x256xbf16>,
    %c0_114 = arith.constant 0 : index
    %c0_115 = arith.constant 0 : index
    %c0_116 = arith.constant 0 : index
    %143 = vector.load %arg5[%c0_114, %c0_115, %c0_116] : memref<4x64x576xbf16, #tpu.memory_space<vmem>>, vector<1x64x576xbf16>
    %144 = vector.shape_cast %143 : vector<1x64x576xbf16> to vector<64x576xbf16>
    %c0_117 = arith.constant 0 : index
    %c0_118 = arith.constant 0 : index
    %145 = vector.load %arg11[%c0_117, %c0_118] : memref<576x256xbf16, #tpu.memory_space<vmem>>, vector<576x256xbf16>
    %cst_119 = arith.constant dense<0.000000e+00> : vector<64x256xf32>
    %146 = tpu.matmul %144, %145, %cst_119 {dimension_numbers = #tpu.dot_dimension_numbers<[1], [0], [0], [1], [0, 0, 1, 1], [], []>} : vector<64x576xbf16>, vector<576x256xbf16>, vector<64x256xf32> -> vector<64x256xf32>
    %c1 = arith.constant 1 : index
    %c0_120 = arith.constant 0 : index
    %c0_121 = arith.constant 0 : index
    %147 = vector.load %arg7[%c1, %c0_120, %c0_121] : memref<6x64x1xf32, #tpu.memory_space<vmem>>, vector<1x64x1xf32>
    %148 = vector.shape_cast %147 : vector<1x64x1xf32> to vector<64x1xf32>
    %149 = vector.broadcast %148 : vector<64x1xf32> to vector<64x256xf32>
    %150 = arith.addf %146, %149 : vector<64x256xf32>
    %cst_122 = arith.constant 0.000000e+00 : f32
    %151 = vector.broadcast %cst_122 : f32 to vector<64x256xf32>
    %152 = arith.maximumf %150, %151 : vector<64x256xf32>
    %153 = arith.truncf %152 : vector<64x256xf32> to vector<64x256xbf16>
    %c0_123 = arith.constant 0 : index
    %c128_124 = arith.constant 128 : index
    %154 = vector.load %arg10[%c0_123, %c128_124] : memref<64x512xbf16, #tpu.memory_space<vmem>>, vector<64x256xbf16>
    tpu.vector_store %arg10[%c0_123, %c128_124], %153 {strides = array<i32>} : memref<64x512xbf16, #tpu.memory_space<vmem>>, vector<64x256xbf16>,
    %c0_125 = arith.constant 0 : index
    %c144_126 = arith.constant 144 : index
    %155 = vector.load %arg10[%c0_125, %c144_126] : memref<64x512xbf16, #tpu.memory_space<vmem>>, vector<64x16xbf16>
    %c0_127 = arith.constant 0 : index
    %c112_128 = arith.constant 112 : index
    %156 = vector.load %arg10[%c0_127, %c112_128] : memref<64x512xbf16, #tpu.memory_space<vmem>>, vector<64x16xbf16>
    tpu.vector_store %arg10[%c0_127, %c112_128], %155 {strides = array<i32>} : memref<64x512xbf16, #tpu.memory_space<vmem>>, vector<64x16xbf16>,
    %c0_129 = arith.constant 0 : index
    %c352_130 = arith.constant 352 : index
    %157 = vector.load %arg10[%c0_129, %c352_130] : memref<64x512xbf16, #tpu.memory_space<vmem>>, vector<64x16xbf16>
    %c0_131 = arith.constant 0 : index
    %c384_132 = arith.constant 384 : index
    %158 = vector.load %arg10[%c0_131, %c384_132] : memref<64x512xbf16, #tpu.memory_space<vmem>>, vector<64x16xbf16>
    tpu.vector_store %arg10[%c0_131, %c384_132], %157 {strides = array<i32>} : memref<64x512xbf16, #tpu.memory_space<vmem>>, vector<64x16xbf16>,
    %c0_133 = arith.constant 0 : index
    %c111_134 = arith.constant 111 : index
    %159 = vector.load %arg10[%c0_133, %c111_134] : memref<64x512xbf16, #tpu.memory_space<vmem>>, vector<64x256xbf16>
    %c0_135 = arith.constant 0 : index
    %c113_136 = arith.constant 113 : index
    %160 = vector.load %arg10[%c0_135, %c113_136] : memref<64x512xbf16, #tpu.memory_space<vmem>>, vector<64x256xbf16>
    %161 = vector.shape_cast %18 : vector<1x256xi1> to vector<1x256xi1>
    %162 = vector.broadcast %161 : vector<1x256xi1> to vector<64x256xi1>
    %163 = arith.select %162, %160, %159 : vector<64x256xi1>, vector<64x256xbf16>
    %c0_137 = arith.constant 0 : index
    %c0_138 = arith.constant 0 : index
    %164 = vector.load %arg11[%c0_137, %c0_138] : memref<576x256xbf16, #tpu.memory_space<vmem>>, vector<64x256xbf16>
    tpu.vector_store %arg11[%c0_137, %c0_138], %163 {strides = array<i32>} : memref<576x256xbf16, #tpu.memory_space<vmem>>, vector<64x256xbf16>,
    %c0_139 = arith.constant 0 : index
    %c112_140 = arith.constant 112 : index
    %165 = vector.load %arg10[%c0_139, %c112_140] : memref<64x512xbf16, #tpu.memory_space<vmem>>, vector<64x256xbf16>
    %c64_141 = arith.constant 64 : index
    %c0_142 = arith.constant 0 : index
    %166 = vector.load %arg11[%c64_141, %c0_142] : memref<576x256xbf16, #tpu.memory_space<vmem>>, vector<64x256xbf16>
    tpu.vector_store %arg11[%c64_141, %c0_142], %165 {strides = array<i32>} : memref<576x256xbf16, #tpu.memory_space<vmem>>, vector<64x256xbf16>,
    %c0_143 = arith.constant 0 : index
    %c113_144 = arith.constant 113 : index
    %167 = vector.load %arg10[%c0_143, %c113_144] : memref<64x512xbf16, #tpu.memory_space<vmem>>, vector<64x256xbf16>
    %c0_145 = arith.constant 0 : index
    %c111_146 = arith.constant 111 : index
    %168 = vector.load %arg10[%c0_145, %c111_146] : memref<64x512xbf16, #tpu.memory_space<vmem>>, vector<64x256xbf16>
    %169 = vector.shape_cast %20 : vector<1x256xi1> to vector<1x256xi1>
    %170 = vector.broadcast %169 : vector<1x256xi1> to vector<64x256xi1>
    %171 = arith.select %170, %168, %167 : vector<64x256xi1>, vector<64x256xbf16>
    %c128_147 = arith.constant 128 : index
    %c0_148 = arith.constant 0 : index
    %172 = vector.load %arg11[%c128_147, %c0_148] : memref<576x256xbf16, #tpu.memory_space<vmem>>, vector<64x256xbf16>
    tpu.vector_store %arg11[%c128_147, %c0_148], %171 {strides = array<i32>} : memref<576x256xbf16, #tpu.memory_space<vmem>>, vector<64x256xbf16>,
    %c0_149 = arith.constant 0 : index
    %c127_150 = arith.constant 127 : index
    %173 = vector.load %arg10[%c0_149, %c127_150] : memref<64x512xbf16, #tpu.memory_space<vmem>>, vector<64x256xbf16>
    %c0_151 = arith.constant 0 : index
    %c129_152 = arith.constant 129 : index
    %174 = vector.load %arg10[%c0_151, %c129_152] : memref<64x512xbf16, #tpu.memory_space<vmem>>, vector<64x256xbf16>
    %175 = vector.shape_cast %18 : vector<1x256xi1> to vector<1x256xi1>
    %176 = vector.broadcast %175 : vector<1x256xi1> to vector<64x256xi1>
    %177 = arith.select %176, %174, %173 : vector<64x256xi1>, vector<64x256xbf16>
    %c192_153 = arith.constant 192 : index
    %c0_154 = arith.constant 0 : index
    %178 = vector.load %arg11[%c192_153, %c0_154] : memref<576x256xbf16, #tpu.memory_space<vmem>>, vector<64x256xbf16>
    tpu.vector_store %arg11[%c192_153, %c0_154], %177 {strides = array<i32>} : memref<576x256xbf16, #tpu.memory_space<vmem>>, vector<64x256xbf16>,
    %c0_155 = arith.constant 0 : index
    %c128_156 = arith.constant 128 : index
    %179 = vector.load %arg10[%c0_155, %c128_156] : memref<64x512xbf16, #tpu.memory_space<vmem>>, vector<64x256xbf16>
    %c256_157 = arith.constant 256 : index
    %c0_158 = arith.constant 0 : index
    %180 = vector.load %arg11[%c256_157, %c0_158] : memref<576x256xbf16, #tpu.memory_space<vmem>>, vector<64x256xbf16>
    tpu.vector_store %arg11[%c256_157, %c0_158], %179 {strides = array<i32>} : memref<576x256xbf16, #tpu.memory_space<vmem>>, vector<64x256xbf16>,
    %c0_159 = arith.constant 0 : index
    %c129_160 = arith.constant 129 : index
    %181 = vector.load %arg10[%c0_159, %c129_160] : memref<64x512xbf16, #tpu.memory_space<vmem>>, vector<64x256xbf16>
    %c0_161 = arith.constant 0 : index
    %c127_162 = arith.constant 127 : index
    %182 = vector.load %arg10[%c0_161, %c127_162] : memref<64x512xbf16, #tpu.memory_space<vmem>>, vector<64x256xbf16>
    %183 = vector.shape_cast %20 : vector<1x256xi1> to vector<1x256xi1>
    %184 = vector.broadcast %183 : vector<1x256xi1> to vector<64x256xi1>
    %185 = arith.select %184, %182, %181 : vector<64x256xi1>, vector<64x256xbf16>
    %c320_163 = arith.constant 320 : index
    %c0_164 = arith.constant 0 : index
    %186 = vector.load %arg11[%c320_163, %c0_164] : memref<576x256xbf16, #tpu.memory_space<vmem>>, vector<64x256xbf16>
    tpu.vector_store %arg11[%c320_163, %c0_164], %185 {strides = array<i32>} : memref<576x256xbf16, #tpu.memory_space<vmem>>, vector<64x256xbf16>,
    %c0_165 = arith.constant 0 : index
    %c143_166 = arith.constant 143 : index
    %187 = vector.load %arg10[%c0_165, %c143_166] : memref<64x512xbf16, #tpu.memory_space<vmem>>, vector<64x256xbf16>
    %c0_167 = arith.constant 0 : index
    %c145_168 = arith.constant 145 : index
    %188 = vector.load %arg10[%c0_167, %c145_168] : memref<64x512xbf16, #tpu.memory_space<vmem>>, vector<64x256xbf16>
    %189 = vector.shape_cast %18 : vector<1x256xi1> to vector<1x256xi1>
    %190 = vector.broadcast %189 : vector<1x256xi1> to vector<64x256xi1>
    %191 = arith.select %190, %188, %187 : vector<64x256xi1>, vector<64x256xbf16>
    %c384_169 = arith.constant 384 : index
    %c0_170 = arith.constant 0 : index
    %192 = vector.load %arg11[%c384_169, %c0_170] : memref<576x256xbf16, #tpu.memory_space<vmem>>, vector<64x256xbf16>
    tpu.vector_store %arg11[%c384_169, %c0_170], %191 {strides = array<i32>} : memref<576x256xbf16, #tpu.memory_space<vmem>>, vector<64x256xbf16>,
    %c0_171 = arith.constant 0 : index
    %c144_172 = arith.constant 144 : index
    %193 = vector.load %arg10[%c0_171, %c144_172] : memref<64x512xbf16, #tpu.memory_space<vmem>>, vector<64x256xbf16>
    %c448_173 = arith.constant 448 : index
    %c0_174 = arith.constant 0 : index
    %194 = vector.load %arg11[%c448_173, %c0_174] : memref<576x256xbf16, #tpu.memory_space<vmem>>, vector<64x256xbf16>
    tpu.vector_store %arg11[%c448_173, %c0_174], %193 {strides = array<i32>} : memref<576x256xbf16, #tpu.memory_space<vmem>>, vector<64x256xbf16>,
    %c0_175 = arith.constant 0 : index
    %c145_176 = arith.constant 145 : index
    %195 = vector.load %arg10[%c0_175, %c145_176] : memref<64x512xbf16, #tpu.memory_space<vmem>>, vector<64x256xbf16>
    %c0_177 = arith.constant 0 : index
    %c143_178 = arith.constant 143 : index
    %196 = vector.load %arg10[%c0_177, %c143_178] : memref<64x512xbf16, #tpu.memory_space<vmem>>, vector<64x256xbf16>
    %197 = vector.shape_cast %20 : vector<1x256xi1> to vector<1x256xi1>
    %198 = vector.broadcast %197 : vector<1x256xi1> to vector<64x256xi1>
    %199 = arith.select %198, %196, %195 : vector<64x256xi1>, vector<64x256xbf16>
    %c512_179 = arith.constant 512 : index
    %c0_180 = arith.constant 0 : index
    %200 = vector.load %arg11[%c512_179, %c0_180] : memref<576x256xbf16, #tpu.memory_space<vmem>>, vector<64x256xbf16>
    tpu.vector_store %arg11[%c512_179, %c0_180], %199 {strides = array<i32>} : memref<576x256xbf16, #tpu.memory_space<vmem>>, vector<64x256xbf16>,
    %c1_181 = arith.constant 1 : index
    %c0_182 = arith.constant 0 : index
    %c0_183 = arith.constant 0 : index
    %201 = vector.load %arg5[%c1_181, %c0_182, %c0_183] : memref<4x64x576xbf16, #tpu.memory_space<vmem>>, vector<1x64x576xbf16>
    %202 = vector.shape_cast %201 : vector<1x64x576xbf16> to vector<64x576xbf16>
    %c0_184 = arith.constant 0 : index
    %c0_185 = arith.constant 0 : index
    %203 = vector.load %arg11[%c0_184, %c0_185] : memref<576x256xbf16, #tpu.memory_space<vmem>>, vector<576x256xbf16>
    %cst_186 = arith.constant dense<0.000000e+00> : vector<64x256xf32>
    %204 = tpu.matmul %202, %203, %cst_186 {dimension_numbers = #tpu.dot_dimension_numbers<[1], [0], [0], [1], [0, 0, 1, 1], [], []>} : vector<64x576xbf16>, vector<576x256xbf16>, vector<64x256xf32> -> vector<64x256xf32>
    %c2_187 = arith.constant 2 : index
    %c0_188 = arith.constant 0 : index
    %c0_189 = arith.constant 0 : index
    %205 = vector.load %arg7[%c2_187, %c0_188, %c0_189] : memref<6x64x1xf32, #tpu.memory_space<vmem>>, vector<1x64x1xf32>
    %206 = vector.shape_cast %205 : vector<1x64x1xf32> to vector<64x1xf32>
    %207 = vector.broadcast %206 : vector<64x1xf32> to vector<64x256xf32>
    %208 = arith.addf %204, %207 : vector<64x256xf32>
    %cst_190 = arith.constant 0.000000e+00 : f32
    %209 = vector.broadcast %cst_190 : f32 to vector<64x256xf32>
    %210 = arith.maximumf %208, %209 : vector<64x256xf32>
    %211 = arith.truncf %210 : vector<64x256xf32> to vector<64x256xbf16>
    %c0_191 = arith.constant 0 : index
    %c128_192 = arith.constant 128 : index
    %212 = vector.load %arg10[%c0_191, %c128_192] : memref<64x512xbf16, #tpu.memory_space<vmem>>, vector<64x256xbf16>
    tpu.vector_store %arg10[%c0_191, %c128_192], %211 {strides = array<i32>} : memref<64x512xbf16, #tpu.memory_space<vmem>>, vector<64x256xbf16>,
    %c0_193 = arith.constant 0 : index
    %c144_194 = arith.constant 144 : index
    %213 = vector.load %arg10[%c0_193, %c144_194] : memref<64x512xbf16, #tpu.memory_space<vmem>>, vector<64x16xbf16>
    %c0_195 = arith.constant 0 : index
    %c112_196 = arith.constant 112 : index
    %214 = vector.load %arg10[%c0_195, %c112_196] : memref<64x512xbf16, #tpu.memory_space<vmem>>, vector<64x16xbf16>
    tpu.vector_store %arg10[%c0_195, %c112_196], %213 {strides = array<i32>} : memref<64x512xbf16, #tpu.memory_space<vmem>>, vector<64x16xbf16>,
    %c0_197 = arith.constant 0 : index
    %c352_198 = arith.constant 352 : index
    %215 = vector.load %arg10[%c0_197, %c352_198] : memref<64x512xbf16, #tpu.memory_space<vmem>>, vector<64x16xbf16>
    %c0_199 = arith.constant 0 : index
    %c384_200 = arith.constant 384 : index
    %216 = vector.load %arg10[%c0_199, %c384_200] : memref<64x512xbf16, #tpu.memory_space<vmem>>, vector<64x16xbf16>
    tpu.vector_store %arg10[%c0_199, %c384_200], %215 {strides = array<i32>} : memref<64x512xbf16, #tpu.memory_space<vmem>>, vector<64x16xbf16>,
    %c0_201 = arith.constant 0 : index
    %c111_202 = arith.constant 111 : index
    %217 = vector.load %arg10[%c0_201, %c111_202] : memref<64x512xbf16, #tpu.memory_space<vmem>>, vector<64x256xbf16>
    %c0_203 = arith.constant 0 : index
    %c113_204 = arith.constant 113 : index
    %218 = vector.load %arg10[%c0_203, %c113_204] : memref<64x512xbf16, #tpu.memory_space<vmem>>, vector<64x256xbf16>
    %219 = vector.shape_cast %18 : vector<1x256xi1> to vector<1x256xi1>
    %220 = vector.broadcast %219 : vector<1x256xi1> to vector<64x256xi1>
    %221 = arith.select %220, %218, %217 : vector<64x256xi1>, vector<64x256xbf16>
    %c0_205 = arith.constant 0 : index
    %c0_206 = arith.constant 0 : index
    %222 = vector.load %arg11[%c0_205, %c0_206] : memref<576x256xbf16, #tpu.memory_space<vmem>>, vector<64x256xbf16>
    tpu.vector_store %arg11[%c0_205, %c0_206], %221 {strides = array<i32>} : memref<576x256xbf16, #tpu.memory_space<vmem>>, vector<64x256xbf16>,
    %c0_207 = arith.constant 0 : index
    %c112_208 = arith.constant 112 : index
    %223 = vector.load %arg10[%c0_207, %c112_208] : memref<64x512xbf16, #tpu.memory_space<vmem>>, vector<64x256xbf16>
    %c64_209 = arith.constant 64 : index
    %c0_210 = arith.constant 0 : index
    %224 = vector.load %arg11[%c64_209, %c0_210] : memref<576x256xbf16, #tpu.memory_space<vmem>>, vector<64x256xbf16>
    tpu.vector_store %arg11[%c64_209, %c0_210], %223 {strides = array<i32>} : memref<576x256xbf16, #tpu.memory_space<vmem>>, vector<64x256xbf16>,
    %c0_211 = arith.constant 0 : index
    %c113_212 = arith.constant 113 : index
    %225 = vector.load %arg10[%c0_211, %c113_212] : memref<64x512xbf16, #tpu.memory_space<vmem>>, vector<64x256xbf16>
    %c0_213 = arith.constant 0 : index
    %c111_214 = arith.constant 111 : index
    %226 = vector.load %arg10[%c0_213, %c111_214] : memref<64x512xbf16, #tpu.memory_space<vmem>>, vector<64x256xbf16>
    %227 = vector.shape_cast %20 : vector<1x256xi1> to vector<1x256xi1>
    %228 = vector.broadcast %227 : vector<1x256xi1> to vector<64x256xi1>
    %229 = arith.select %228, %226, %225 : vector<64x256xi1>, vector<64x256xbf16>
    %c128_215 = arith.constant 128 : index
    %c0_216 = arith.constant 0 : index
    %230 = vector.load %arg11[%c128_215, %c0_216] : memref<576x256xbf16, #tpu.memory_space<vmem>>, vector<64x256xbf16>
    tpu.vector_store %arg11[%c128_215, %c0_216], %229 {strides = array<i32>} : memref<576x256xbf16, #tpu.memory_space<vmem>>, vector<64x256xbf16>,
    %c0_217 = arith.constant 0 : index
    %c127_218 = arith.constant 127 : index
    %231 = vector.load %arg10[%c0_217, %c127_218] : memref<64x512xbf16, #tpu.memory_space<vmem>>, vector<64x256xbf16>
    %c0_219 = arith.constant 0 : index
    %c129_220 = arith.constant 129 : index
    %232 = vector.load %arg10[%c0_219, %c129_220] : memref<64x512xbf16, #tpu.memory_space<vmem>>, vector<64x256xbf16>
    %233 = vector.shape_cast %18 : vector<1x256xi1> to vector<1x256xi1>
    %234 = vector.broadcast %233 : vector<1x256xi1> to vector<64x256xi1>
    %235 = arith.select %234, %232, %231 : vector<64x256xi1>, vector<64x256xbf16>
    %c192_221 = arith.constant 192 : index
    %c0_222 = arith.constant 0 : index
    %236 = vector.load %arg11[%c192_221, %c0_222] : memref<576x256xbf16, #tpu.memory_space<vmem>>, vector<64x256xbf16>
    tpu.vector_store %arg11[%c192_221, %c0_222], %235 {strides = array<i32>} : memref<576x256xbf16, #tpu.memory_space<vmem>>, vector<64x256xbf16>,
    %c0_223 = arith.constant 0 : index
    %c128_224 = arith.constant 128 : index
    %237 = vector.load %arg10[%c0_223, %c128_224] : memref<64x512xbf16, #tpu.memory_space<vmem>>, vector<64x256xbf16>
    %c256_225 = arith.constant 256 : index
    %c0_226 = arith.constant 0 : index
    %238 = vector.load %arg11[%c256_225, %c0_226] : memref<576x256xbf16, #tpu.memory_space<vmem>>, vector<64x256xbf16>
    tpu.vector_store %arg11[%c256_225, %c0_226], %237 {strides = array<i32>} : memref<576x256xbf16, #tpu.memory_space<vmem>>, vector<64x256xbf16>,
    %c0_227 = arith.constant 0 : index
    %c129_228 = arith.constant 129 : index
    %239 = vector.load %arg10[%c0_227, %c129_228] : memref<64x512xbf16, #tpu.memory_space<vmem>>, vector<64x256xbf16>
    %c0_229 = arith.constant 0 : index
    %c127_230 = arith.constant 127 : index
    %240 = vector.load %arg10[%c0_229, %c127_230] : memref<64x512xbf16, #tpu.memory_space<vmem>>, vector<64x256xbf16>
    %241 = vector.shape_cast %20 : vector<1x256xi1> to vector<1x256xi1>
    %242 = vector.broadcast %241 : vector<1x256xi1> to vector<64x256xi1>
    %243 = arith.select %242, %240, %239 : vector<64x256xi1>, vector<64x256xbf16>
    %c320_231 = arith.constant 320 : index
    %c0_232 = arith.constant 0 : index
    %244 = vector.load %arg11[%c320_231, %c0_232] : memref<576x256xbf16, #tpu.memory_space<vmem>>, vector<64x256xbf16>
    tpu.vector_store %arg11[%c320_231, %c0_232], %243 {strides = array<i32>} : memref<576x256xbf16, #tpu.memory_space<vmem>>, vector<64x256xbf16>,
    %c0_233 = arith.constant 0 : index
    %c143_234 = arith.constant 143 : index
    %245 = vector.load %arg10[%c0_233, %c143_234] : memref<64x512xbf16, #tpu.memory_space<vmem>>, vector<64x256xbf16>
    %c0_235 = arith.constant 0 : index
    %c145_236 = arith.constant 145 : index
    %246 = vector.load %arg10[%c0_235, %c145_236] : memref<64x512xbf16, #tpu.memory_space<vmem>>, vector<64x256xbf16>
    %247 = vector.shape_cast %18 : vector<1x256xi1> to vector<1x256xi1>
    %248 = vector.broadcast %247 : vector<1x256xi1> to vector<64x256xi1>
    %249 = arith.select %248, %246, %245 : vector<64x256xi1>, vector<64x256xbf16>
    %c384_237 = arith.constant 384 : index
    %c0_238 = arith.constant 0 : index
    %250 = vector.load %arg11[%c384_237, %c0_238] : memref<576x256xbf16, #tpu.memory_space<vmem>>, vector<64x256xbf16>
    tpu.vector_store %arg11[%c384_237, %c0_238], %249 {strides = array<i32>} : memref<576x256xbf16, #tpu.memory_space<vmem>>, vector<64x256xbf16>,
    %c0_239 = arith.constant 0 : index
    %c144_240 = arith.constant 144 : index
    %251 = vector.load %arg10[%c0_239, %c144_240] : memref<64x512xbf16, #tpu.memory_space<vmem>>, vector<64x256xbf16>
    %c448_241 = arith.constant 448 : index
    %c0_242 = arith.constant 0 : index
    %252 = vector.load %arg11[%c448_241, %c0_242] : memref<576x256xbf16, #tpu.memory_space<vmem>>, vector<64x256xbf16>
    tpu.vector_store %arg11[%c448_241, %c0_242], %251 {strides = array<i32>} : memref<576x256xbf16, #tpu.memory_space<vmem>>, vector<64x256xbf16>,
    %c0_243 = arith.constant 0 : index
    %c145_244 = arith.constant 145 : index
    %253 = vector.load %arg10[%c0_243, %c145_244] : memref<64x512xbf16, #tpu.memory_space<vmem>>, vector<64x256xbf16>
    %c0_245 = arith.constant 0 : index
    %c143_246 = arith.constant 143 : index
    %254 = vector.load %arg10[%c0_245, %c143_246] : memref<64x512xbf16, #tpu.memory_space<vmem>>, vector<64x256xbf16>
    %255 = vector.shape_cast %20 : vector<1x256xi1> to vector<1x256xi1>
    %256 = vector.broadcast %255 : vector<1x256xi1> to vector<64x256xi1>
    %257 = arith.select %256, %254, %253 : vector<64x256xi1>, vector<64x256xbf16>
    %c512_247 = arith.constant 512 : index
    %c0_248 = arith.constant 0 : index
    %258 = vector.load %arg11[%c512_247, %c0_248] : memref<576x256xbf16, #tpu.memory_space<vmem>>, vector<64x256xbf16>
    tpu.vector_store %arg11[%c512_247, %c0_248], %257 {strides = array<i32>} : memref<576x256xbf16, #tpu.memory_space<vmem>>, vector<64x256xbf16>,
    %c2_249 = arith.constant 2 : index
    %c0_250 = arith.constant 0 : index
    %c0_251 = arith.constant 0 : index
    %259 = vector.load %arg5[%c2_249, %c0_250, %c0_251] : memref<4x64x576xbf16, #tpu.memory_space<vmem>>, vector<1x64x576xbf16>
    %260 = vector.shape_cast %259 : vector<1x64x576xbf16> to vector<64x576xbf16>
    %c0_252 = arith.constant 0 : index
    %c0_253 = arith.constant 0 : index
    %261 = vector.load %arg11[%c0_252, %c0_253] : memref<576x256xbf16, #tpu.memory_space<vmem>>, vector<576x256xbf16>
    %cst_254 = arith.constant dense<0.000000e+00> : vector<64x256xf32>
    %262 = tpu.matmul %260, %261, %cst_254 {dimension_numbers = #tpu.dot_dimension_numbers<[1], [0], [0], [1], [0, 0, 1, 1], [], []>} : vector<64x576xbf16>, vector<576x256xbf16>, vector<64x256xf32> -> vector<64x256xf32>
    %c3 = arith.constant 3 : index
    %c0_255 = arith.constant 0 : index
    %c0_256 = arith.constant 0 : index
    %263 = vector.load %arg7[%c3, %c0_255, %c0_256] : memref<6x64x1xf32, #tpu.memory_space<vmem>>, vector<1x64x1xf32>
    %264 = vector.shape_cast %263 : vector<1x64x1xf32> to vector<64x1xf32>
    %265 = vector.broadcast %264 : vector<64x1xf32> to vector<64x256xf32>
    %266 = arith.addf %262, %265 : vector<64x256xf32>
    %cst_257 = arith.constant 0.000000e+00 : f32
    %267 = vector.broadcast %cst_257 : f32 to vector<64x256xf32>
    %268 = arith.maximumf %266, %267 : vector<64x256xf32>
    %269 = arith.truncf %268 : vector<64x256xf32> to vector<64x256xbf16>
    %c0_258 = arith.constant 0 : index
    %c128_259 = arith.constant 128 : index
    %270 = vector.load %arg10[%c0_258, %c128_259] : memref<64x512xbf16, #tpu.memory_space<vmem>>, vector<64x256xbf16>
    tpu.vector_store %arg10[%c0_258, %c128_259], %269 {strides = array<i32>} : memref<64x512xbf16, #tpu.memory_space<vmem>>, vector<64x256xbf16>,
    %c0_260 = arith.constant 0 : index
    %c144_261 = arith.constant 144 : index
    %271 = vector.load %arg10[%c0_260, %c144_261] : memref<64x512xbf16, #tpu.memory_space<vmem>>, vector<64x16xbf16>
    %c0_262 = arith.constant 0 : index
    %c112_263 = arith.constant 112 : index
    %272 = vector.load %arg10[%c0_262, %c112_263] : memref<64x512xbf16, #tpu.memory_space<vmem>>, vector<64x16xbf16>
    tpu.vector_store %arg10[%c0_262, %c112_263], %271 {strides = array<i32>} : memref<64x512xbf16, #tpu.memory_space<vmem>>, vector<64x16xbf16>,
    %c0_264 = arith.constant 0 : index
    %c352_265 = arith.constant 352 : index
    %273 = vector.load %arg10[%c0_264, %c352_265] : memref<64x512xbf16, #tpu.memory_space<vmem>>, vector<64x16xbf16>
    %c0_266 = arith.constant 0 : index
    %c384_267 = arith.constant 384 : index
    %274 = vector.load %arg10[%c0_266, %c384_267] : memref<64x512xbf16, #tpu.memory_space<vmem>>, vector<64x16xbf16>
    tpu.vector_store %arg10[%c0_266, %c384_267], %273 {strides = array<i32>} : memref<64x512xbf16, #tpu.memory_space<vmem>>, vector<64x16xbf16>,
    %c0_268 = arith.constant 0 : index
    %c111_269 = arith.constant 111 : index
    %275 = vector.load %arg10[%c0_268, %c111_269] : memref<64x512xbf16, #tpu.memory_space<vmem>>, vector<64x256xbf16>
    %c0_270 = arith.constant 0 : index
    %c113_271 = arith.constant 113 : index
    %276 = vector.load %arg10[%c0_270, %c113_271] : memref<64x512xbf16, #tpu.memory_space<vmem>>, vector<64x256xbf16>
    %277 = vector.shape_cast %18 : vector<1x256xi1> to vector<1x256xi1>
    %278 = vector.broadcast %277 : vector<1x256xi1> to vector<64x256xi1>
    %279 = arith.select %278, %276, %275 : vector<64x256xi1>, vector<64x256xbf16>
    %c0_272 = arith.constant 0 : index
    %c0_273 = arith.constant 0 : index
    %280 = vector.load %arg11[%c0_272, %c0_273] : memref<576x256xbf16, #tpu.memory_space<vmem>>, vector<64x256xbf16>
    tpu.vector_store %arg11[%c0_272, %c0_273], %279 {strides = array<i32>} : memref<576x256xbf16, #tpu.memory_space<vmem>>, vector<64x256xbf16>,
    %c0_274 = arith.constant 0 : index
    %c112_275 = arith.constant 112 : index
    %281 = vector.load %arg10[%c0_274, %c112_275] : memref<64x512xbf16, #tpu.memory_space<vmem>>, vector<64x256xbf16>
    %c64_276 = arith.constant 64 : index
    %c0_277 = arith.constant 0 : index
    %282 = vector.load %arg11[%c64_276, %c0_277] : memref<576x256xbf16, #tpu.memory_space<vmem>>, vector<64x256xbf16>
    tpu.vector_store %arg11[%c64_276, %c0_277], %281 {strides = array<i32>} : memref<576x256xbf16, #tpu.memory_space<vmem>>, vector<64x256xbf16>,
    %c0_278 = arith.constant 0 : index
    %c113_279 = arith.constant 113 : index
    %283 = vector.load %arg10[%c0_278, %c113_279] : memref<64x512xbf16, #tpu.memory_space<vmem>>, vector<64x256xbf16>
    %c0_280 = arith.constant 0 : index
    %c111_281 = arith.constant 111 : index
    %284 = vector.load %arg10[%c0_280, %c111_281] : memref<64x512xbf16, #tpu.memory_space<vmem>>, vector<64x256xbf16>
    %285 = vector.shape_cast %20 : vector<1x256xi1> to vector<1x256xi1>
    %286 = vector.broadcast %285 : vector<1x256xi1> to vector<64x256xi1>
    %287 = arith.select %286, %284, %283 : vector<64x256xi1>, vector<64x256xbf16>
    %c128_282 = arith.constant 128 : index
    %c0_283 = arith.constant 0 : index
    %288 = vector.load %arg11[%c128_282, %c0_283] : memref<576x256xbf16, #tpu.memory_space<vmem>>, vector<64x256xbf16>
    tpu.vector_store %arg11[%c128_282, %c0_283], %287 {strides = array<i32>} : memref<576x256xbf16, #tpu.memory_space<vmem>>, vector<64x256xbf16>,
    %c0_284 = arith.constant 0 : index
    %c127_285 = arith.constant 127 : index
    %289 = vector.load %arg10[%c0_284, %c127_285] : memref<64x512xbf16, #tpu.memory_space<vmem>>, vector<64x256xbf16>
    %c0_286 = arith.constant 0 : index
    %c129_287 = arith.constant 129 : index
    %290 = vector.load %arg10[%c0_286, %c129_287] : memref<64x512xbf16, #tpu.memory_space<vmem>>, vector<64x256xbf16>
    %291 = vector.shape_cast %18 : vector<1x256xi1> to vector<1x256xi1>
    %292 = vector.broadcast %291 : vector<1x256xi1> to vector<64x256xi1>
    %293 = arith.select %292, %290, %289 : vector<64x256xi1>, vector<64x256xbf16>
    %c192_288 = arith.constant 192 : index
    %c0_289 = arith.constant 0 : index
    %294 = vector.load %arg11[%c192_288, %c0_289] : memref<576x256xbf16, #tpu.memory_space<vmem>>, vector<64x256xbf16>
    tpu.vector_store %arg11[%c192_288, %c0_289], %293 {strides = array<i32>} : memref<576x256xbf16, #tpu.memory_space<vmem>>, vector<64x256xbf16>,
    %c0_290 = arith.constant 0 : index
    %c128_291 = arith.constant 128 : index
    %295 = vector.load %arg10[%c0_290, %c128_291] : memref<64x512xbf16, #tpu.memory_space<vmem>>, vector<64x256xbf16>
    %c256_292 = arith.constant 256 : index
    %c0_293 = arith.constant 0 : index
    %296 = vector.load %arg11[%c256_292, %c0_293] : memref<576x256xbf16, #tpu.memory_space<vmem>>, vector<64x256xbf16>
    tpu.vector_store %arg11[%c256_292, %c0_293], %295 {strides = array<i32>} : memref<576x256xbf16, #tpu.memory_space<vmem>>, vector<64x256xbf16>,
    %c0_294 = arith.constant 0 : index
    %c129_295 = arith.constant 129 : index
    %297 = vector.load %arg10[%c0_294, %c129_295] : memref<64x512xbf16, #tpu.memory_space<vmem>>, vector<64x256xbf16>
    %c0_296 = arith.constant 0 : index
    %c127_297 = arith.constant 127 : index
    %298 = vector.load %arg10[%c0_296, %c127_297] : memref<64x512xbf16, #tpu.memory_space<vmem>>, vector<64x256xbf16>
    %299 = vector.shape_cast %20 : vector<1x256xi1> to vector<1x256xi1>
    %300 = vector.broadcast %299 : vector<1x256xi1> to vector<64x256xi1>
    %301 = arith.select %300, %298, %297 : vector<64x256xi1>, vector<64x256xbf16>
    %c320_298 = arith.constant 320 : index
    %c0_299 = arith.constant 0 : index
    %302 = vector.load %arg11[%c320_298, %c0_299] : memref<576x256xbf16, #tpu.memory_space<vmem>>, vector<64x256xbf16>
    tpu.vector_store %arg11[%c320_298, %c0_299], %301 {strides = array<i32>} : memref<576x256xbf16, #tpu.memory_space<vmem>>, vector<64x256xbf16>,
    %c0_300 = arith.constant 0 : index
    %c143_301 = arith.constant 143 : index
    %303 = vector.load %arg10[%c0_300, %c143_301] : memref<64x512xbf16, #tpu.memory_space<vmem>>, vector<64x256xbf16>
    %c0_302 = arith.constant 0 : index
    %c145_303 = arith.constant 145 : index
    %304 = vector.load %arg10[%c0_302, %c145_303] : memref<64x512xbf16, #tpu.memory_space<vmem>>, vector<64x256xbf16>
    %305 = vector.shape_cast %18 : vector<1x256xi1> to vector<1x256xi1>
    %306 = vector.broadcast %305 : vector<1x256xi1> to vector<64x256xi1>
    %307 = arith.select %306, %304, %303 : vector<64x256xi1>, vector<64x256xbf16>
    %c384_304 = arith.constant 384 : index
    %c0_305 = arith.constant 0 : index
    %308 = vector.load %arg11[%c384_304, %c0_305] : memref<576x256xbf16, #tpu.memory_space<vmem>>, vector<64x256xbf16>
    tpu.vector_store %arg11[%c384_304, %c0_305], %307 {strides = array<i32>} : memref<576x256xbf16, #tpu.memory_space<vmem>>, vector<64x256xbf16>,
    %c0_306 = arith.constant 0 : index
    %c144_307 = arith.constant 144 : index
    %309 = vector.load %arg10[%c0_306, %c144_307] : memref<64x512xbf16, #tpu.memory_space<vmem>>, vector<64x256xbf16>
    %c448_308 = arith.constant 448 : index
    %c0_309 = arith.constant 0 : index
    %310 = vector.load %arg11[%c448_308, %c0_309] : memref<576x256xbf16, #tpu.memory_space<vmem>>, vector<64x256xbf16>
    tpu.vector_store %arg11[%c448_308, %c0_309], %309 {strides = array<i32>} : memref<576x256xbf16, #tpu.memory_space<vmem>>, vector<64x256xbf16>,
    %c0_310 = arith.constant 0 : index
    %c145_311 = arith.constant 145 : index
    %311 = vector.load %arg10[%c0_310, %c145_311] : memref<64x512xbf16, #tpu.memory_space<vmem>>, vector<64x256xbf16>
    %c0_312 = arith.constant 0 : index
    %c143_313 = arith.constant 143 : index
    %312 = vector.load %arg10[%c0_312, %c143_313] : memref<64x512xbf16, #tpu.memory_space<vmem>>, vector<64x256xbf16>
    %313 = vector.shape_cast %20 : vector<1x256xi1> to vector<1x256xi1>
    %314 = vector.broadcast %313 : vector<1x256xi1> to vector<64x256xi1>
    %315 = arith.select %314, %312, %311 : vector<64x256xi1>, vector<64x256xbf16>
    %c512_314 = arith.constant 512 : index
    %c0_315 = arith.constant 0 : index
    %316 = vector.load %arg11[%c512_314, %c0_315] : memref<576x256xbf16, #tpu.memory_space<vmem>>, vector<64x256xbf16>
    tpu.vector_store %arg11[%c512_314, %c0_315], %315 {strides = array<i32>} : memref<576x256xbf16, #tpu.memory_space<vmem>>, vector<64x256xbf16>,
    %c3_316 = arith.constant 3 : index
    %c0_317 = arith.constant 0 : index
    %c0_318 = arith.constant 0 : index
    %317 = vector.load %arg5[%c3_316, %c0_317, %c0_318] : memref<4x64x576xbf16, #tpu.memory_space<vmem>>, vector<1x64x576xbf16>
    %318 = vector.shape_cast %317 : vector<1x64x576xbf16> to vector<64x576xbf16>
    %c0_319 = arith.constant 0 : index
    %c0_320 = arith.constant 0 : index
    %319 = vector.load %arg11[%c0_319, %c0_320] : memref<576x256xbf16, #tpu.memory_space<vmem>>, vector<576x256xbf16>
    %cst_321 = arith.constant dense<0.000000e+00> : vector<64x256xf32>
    %320 = tpu.matmul %318, %319, %cst_321 {dimension_numbers = #tpu.dot_dimension_numbers<[1], [0], [0], [1], [0, 0, 1, 1], [], []>} : vector<64x576xbf16>, vector<576x256xbf16>, vector<64x256xf32> -> vector<64x256xf32>
    %c4_322 = arith.constant 4 : index
    %c0_323 = arith.constant 0 : index
    %c0_324 = arith.constant 0 : index
    %321 = vector.load %arg7[%c4_322, %c0_323, %c0_324] : memref<6x64x1xf32, #tpu.memory_space<vmem>>, vector<1x64x1xf32>
    %322 = vector.shape_cast %321 : vector<1x64x1xf32> to vector<64x1xf32>
    %323 = vector.broadcast %322 : vector<64x1xf32> to vector<64x256xf32>
    %324 = arith.addf %320, %323 : vector<64x256xf32>
    %cst_325 = arith.constant 0.000000e+00 : f32
    %325 = vector.broadcast %cst_325 : f32 to vector<64x256xf32>
    %326 = arith.maximumf %324, %325 : vector<64x256xf32>
    %327 = arith.truncf %326 : vector<64x256xf32> to vector<64x256xbf16>
    %c0_326 = arith.constant 0 : index
    %c128_327 = arith.constant 128 : index
    %328 = vector.load %arg10[%c0_326, %c128_327] : memref<64x512xbf16, #tpu.memory_space<vmem>>, vector<64x256xbf16>
    tpu.vector_store %arg10[%c0_326, %c128_327], %327 {strides = array<i32>} : memref<64x512xbf16, #tpu.memory_space<vmem>>, vector<64x256xbf16>,
    %c0_328 = arith.constant 0 : index
    %c144_329 = arith.constant 144 : index
    %329 = vector.load %arg10[%c0_328, %c144_329] : memref<64x512xbf16, #tpu.memory_space<vmem>>, vector<64x16xbf16>
    %c0_330 = arith.constant 0 : index
    %c112_331 = arith.constant 112 : index
    %330 = vector.load %arg10[%c0_330, %c112_331] : memref<64x512xbf16, #tpu.memory_space<vmem>>, vector<64x16xbf16>
    tpu.vector_store %arg10[%c0_330, %c112_331], %329 {strides = array<i32>} : memref<64x512xbf16, #tpu.memory_space<vmem>>, vector<64x16xbf16>,
    %c0_332 = arith.constant 0 : index
    %c352_333 = arith.constant 352 : index
    %331 = vector.load %arg10[%c0_332, %c352_333] : memref<64x512xbf16, #tpu.memory_space<vmem>>, vector<64x16xbf16>
    %c0_334 = arith.constant 0 : index
    %c384_335 = arith.constant 384 : index
    %332 = vector.load %arg10[%c0_334, %c384_335] : memref<64x512xbf16, #tpu.memory_space<vmem>>, vector<64x16xbf16>
    tpu.vector_store %arg10[%c0_334, %c384_335], %331 {strides = array<i32>} : memref<64x512xbf16, #tpu.memory_space<vmem>>, vector<64x16xbf16>,
    %c0_336 = arith.constant 0 : index
    %c111_337 = arith.constant 111 : index
    %333 = vector.load %arg10[%c0_336, %c111_337] : memref<64x512xbf16, #tpu.memory_space<vmem>>, vector<64x256xbf16>
    %c0_338 = arith.constant 0 : index
    %c113_339 = arith.constant 113 : index
    %334 = vector.load %arg10[%c0_338, %c113_339] : memref<64x512xbf16, #tpu.memory_space<vmem>>, vector<64x256xbf16>
    %335 = vector.shape_cast %18 : vector<1x256xi1> to vector<1x256xi1>
    %336 = vector.broadcast %335 : vector<1x256xi1> to vector<64x256xi1>
    %337 = arith.select %336, %334, %333 : vector<64x256xi1>, vector<64x256xbf16>
    %c0_340 = arith.constant 0 : index
    %c0_341 = arith.constant 0 : index
    %338 = vector.load %arg11[%c0_340, %c0_341] : memref<576x256xbf16, #tpu.memory_space<vmem>>, vector<64x256xbf16>
    tpu.vector_store %arg11[%c0_340, %c0_341], %337 {strides = array<i32>} : memref<576x256xbf16, #tpu.memory_space<vmem>>, vector<64x256xbf16>,
    %c0_342 = arith.constant 0 : index
    %c112_343 = arith.constant 112 : index
    %339 = vector.load %arg10[%c0_342, %c112_343] : memref<64x512xbf16, #tpu.memory_space<vmem>>, vector<64x256xbf16>
    %c64_344 = arith.constant 64 : index
    %c0_345 = arith.constant 0 : index
    %340 = vector.load %arg11[%c64_344, %c0_345] : memref<576x256xbf16, #tpu.memory_space<vmem>>, vector<64x256xbf16>
    tpu.vector_store %arg11[%c64_344, %c0_345], %339 {strides = array<i32>} : memref<576x256xbf16, #tpu.memory_space<vmem>>, vector<64x256xbf16>,
    %c0_346 = arith.constant 0 : index
    %c113_347 = arith.constant 113 : index
    %341 = vector.load %arg10[%c0_346, %c113_347] : memref<64x512xbf16, #tpu.memory_space<vmem>>, vector<64x256xbf16>
    %c0_348 = arith.constant 0 : index
    %c111_349 = arith.constant 111 : index
    %342 = vector.load %arg10[%c0_348, %c111_349] : memref<64x512xbf16, #tpu.memory_space<vmem>>, vector<64x256xbf16>
    %343 = vector.shape_cast %20 : vector<1x256xi1> to vector<1x256xi1>
    %344 = vector.broadcast %343 : vector<1x256xi1> to vector<64x256xi1>
    %345 = arith.select %344, %342, %341 : vector<64x256xi1>, vector<64x256xbf16>
    %c128_350 = arith.constant 128 : index
    %c0_351 = arith.constant 0 : index
    %346 = vector.load %arg11[%c128_350, %c0_351] : memref<576x256xbf16, #tpu.memory_space<vmem>>, vector<64x256xbf16>
    tpu.vector_store %arg11[%c128_350, %c0_351], %345 {strides = array<i32>} : memref<576x256xbf16, #tpu.memory_space<vmem>>, vector<64x256xbf16>,
    %c0_352 = arith.constant 0 : index
    %c127_353 = arith.constant 127 : index
    %347 = vector.load %arg10[%c0_352, %c127_353] : memref<64x512xbf16, #tpu.memory_space<vmem>>, vector<64x256xbf16>
    %c0_354 = arith.constant 0 : index
    %c129_355 = arith.constant 129 : index
    %348 = vector.load %arg10[%c0_354, %c129_355] : memref<64x512xbf16, #tpu.memory_space<vmem>>, vector<64x256xbf16>
    %349 = vector.shape_cast %18 : vector<1x256xi1> to vector<1x256xi1>
    %350 = vector.broadcast %349 : vector<1x256xi1> to vector<64x256xi1>
    %351 = arith.select %350, %348, %347 : vector<64x256xi1>, vector<64x256xbf16>
    %c192_356 = arith.constant 192 : index
    %c0_357 = arith.constant 0 : index
    %352 = vector.load %arg11[%c192_356, %c0_357] : memref<576x256xbf16, #tpu.memory_space<vmem>>, vector<64x256xbf16>
    tpu.vector_store %arg11[%c192_356, %c0_357], %351 {strides = array<i32>} : memref<576x256xbf16, #tpu.memory_space<vmem>>, vector<64x256xbf16>,
    %c0_358 = arith.constant 0 : index
    %c128_359 = arith.constant 128 : index
    %353 = vector.load %arg10[%c0_358, %c128_359] : memref<64x512xbf16, #tpu.memory_space<vmem>>, vector<64x256xbf16>
    %c256_360 = arith.constant 256 : index
    %c0_361 = arith.constant 0 : index
    %354 = vector.load %arg11[%c256_360, %c0_361] : memref<576x256xbf16, #tpu.memory_space<vmem>>, vector<64x256xbf16>
    tpu.vector_store %arg11[%c256_360, %c0_361], %353 {strides = array<i32>} : memref<576x256xbf16, #tpu.memory_space<vmem>>, vector<64x256xbf16>,
    %c0_362 = arith.constant 0 : index
    %c129_363 = arith.constant 129 : index
    %355 = vector.load %arg10[%c0_362, %c129_363] : memref<64x512xbf16, #tpu.memory_space<vmem>>, vector<64x256xbf16>
    %c0_364 = arith.constant 0 : index
    %c127_365 = arith.constant 127 : index
    %356 = vector.load %arg10[%c0_364, %c127_365] : memref<64x512xbf16, #tpu.memory_space<vmem>>, vector<64x256xbf16>
    %357 = vector.shape_cast %20 : vector<1x256xi1> to vector<1x256xi1>
    %358 = vector.broadcast %357 : vector<1x256xi1> to vector<64x256xi1>
    %359 = arith.select %358, %356, %355 : vector<64x256xi1>, vector<64x256xbf16>
    %c320_366 = arith.constant 320 : index
    %c0_367 = arith.constant 0 : index
    %360 = vector.load %arg11[%c320_366, %c0_367] : memref<576x256xbf16, #tpu.memory_space<vmem>>, vector<64x256xbf16>
    tpu.vector_store %arg11[%c320_366, %c0_367], %359 {strides = array<i32>} : memref<576x256xbf16, #tpu.memory_space<vmem>>, vector<64x256xbf16>,
    %c0_368 = arith.constant 0 : index
    %c143_369 = arith.constant 143 : index
    %361 = vector.load %arg10[%c0_368, %c143_369] : memref<64x512xbf16, #tpu.memory_space<vmem>>, vector<64x256xbf16>
    %c0_370 = arith.constant 0 : index
    %c145_371 = arith.constant 145 : index
    %362 = vector.load %arg10[%c0_370, %c145_371] : memref<64x512xbf16, #tpu.memory_space<vmem>>, vector<64x256xbf16>
    %363 = vector.shape_cast %18 : vector<1x256xi1> to vector<1x256xi1>
    %364 = vector.broadcast %363 : vector<1x256xi1> to vector<64x256xi1>
    %365 = arith.select %364, %362, %361 : vector<64x256xi1>, vector<64x256xbf16>
    %c384_372 = arith.constant 384 : index
    %c0_373 = arith.constant 0 : index
    %366 = vector.load %arg11[%c384_372, %c0_373] : memref<576x256xbf16, #tpu.memory_space<vmem>>, vector<64x256xbf16>
    tpu.vector_store %arg11[%c384_372, %c0_373], %365 {strides = array<i32>} : memref<576x256xbf16, #tpu.memory_space<vmem>>, vector<64x256xbf16>,
    %c0_374 = arith.constant 0 : index
    %c144_375 = arith.constant 144 : index
    %367 = vector.load %arg10[%c0_374, %c144_375] : memref<64x512xbf16, #tpu.memory_space<vmem>>, vector<64x256xbf16>
    %c448_376 = arith.constant 448 : index
    %c0_377 = arith.constant 0 : index
    %368 = vector.load %arg11[%c448_376, %c0_377] : memref<576x256xbf16, #tpu.memory_space<vmem>>, vector<64x256xbf16>
    tpu.vector_store %arg11[%c448_376, %c0_377], %367 {strides = array<i32>} : memref<576x256xbf16, #tpu.memory_space<vmem>>, vector<64x256xbf16>,
    %c0_378 = arith.constant 0 : index
    %c145_379 = arith.constant 145 : index
    %369 = vector.load %arg10[%c0_378, %c145_379] : memref<64x512xbf16, #tpu.memory_space<vmem>>, vector<64x256xbf16>
    %c0_380 = arith.constant 0 : index
    %c143_381 = arith.constant 143 : index
    %370 = vector.load %arg10[%c0_380, %c143_381] : memref<64x512xbf16, #tpu.memory_space<vmem>>, vector<64x256xbf16>
    %371 = vector.shape_cast %20 : vector<1x256xi1> to vector<1x256xi1>
    %372 = vector.broadcast %371 : vector<1x256xi1> to vector<64x256xi1>
    %373 = arith.select %372, %370, %369 : vector<64x256xi1>, vector<64x256xbf16>
    %c512_382 = arith.constant 512 : index
    %c0_383 = arith.constant 0 : index
    %374 = vector.load %arg11[%c512_382, %c0_383] : memref<576x256xbf16, #tpu.memory_space<vmem>>, vector<64x256xbf16>
    tpu.vector_store %arg11[%c512_382, %c0_383], %373 {strides = array<i32>} : memref<576x256xbf16, #tpu.memory_space<vmem>>, vector<64x256xbf16>,
    %c0_384 = arith.constant 0 : index
    %c0_385 = arith.constant 0 : index
    %375 = vector.load %arg6[%c0_384, %c0_385] : memref<8x576xbf16, #tpu.memory_space<vmem>>, vector<8x576xbf16>
    %c0_386 = arith.constant 0 : index
    %c0_387 = arith.constant 0 : index
    %376 = vector.load %arg11[%c0_386, %c0_387] : memref<576x256xbf16, #tpu.memory_space<vmem>>, vector<576x256xbf16>
    %cst_388 = arith.constant dense<0.000000e+00> : vector<8x256xf32>
    %377 = tpu.matmul %375, %376, %cst_388 {dimension_numbers = #tpu.dot_dimension_numbers<[1], [0], [0], [1], [0, 0, 1, 1], [], []>} : vector<8x576xbf16>, vector<576x256xbf16>, vector<8x256xf32> -> vector<8x256xf32>
    %378 = vector.extract_strided_slice %377 {offsets = [0, 0], sizes = [2, 256], strides = [1, 1]} : vector<8x256xf32> to vector<2x256xf32>
    %c5 = arith.constant 5 : index
    %c0_389 = arith.constant 0 : index
    %c0_390 = arith.constant 0 : index
    %379 = vector.load %arg7[%c5, %c0_389, %c0_390] : memref<6x64x1xf32, #tpu.memory_space<vmem>>, vector<1x2x1xf32>
    %380 = vector.shape_cast %379 : vector<1x2x1xf32> to vector<2x1xf32>
    %381 = vector.broadcast %380 : vector<2x1xf32> to vector<2x256xf32>
    %382 = arith.addf %378, %381 : vector<2x256xf32>
    %c0_391 = arith.constant 0 : index
    %383 = memref.load %arg8[%c0_391] : memref<1xf32, #tpu.memory_space<smem>>
    %c0_392 = arith.constant 0 : index
    %c0_393 = arith.constant 0 : index
    %c0_394 = arith.constant 0 : index
    %384 = vector.load %arg2[%c0_392, %c0_393, %c0_394] : memref<1x2x256xf32, #tpu.memory_space<vmem>>, vector<1x2x256xf32>
    %385 = vector.shape_cast %384 : vector<1x2x256xf32> to vector<2x256xf32>
    %386 = arith.addf %26, %382 : vector<2x256xf32>
    %387 = vector.broadcast %383 : f32 to vector<2x256xf32>
    %388 = arith.mulf %387, %386 : vector<2x256xf32>
    %389 = arith.addf %385, %388 : vector<2x256xf32>
    %c0_395 = arith.constant 0 : index
    %c0_396 = arith.constant 0 : index
    %c0_397 = arith.constant 0 : index
    %390 = vector.load %arg3[%c0_395, %c0_396, %c0_397] : memref<1x1x256xf32, #tpu.memory_space<vmem>>, vector<1x1x256xf32>
    %391 = vector.shape_cast %390 : vector<1x1x256xf32> to vector<1x256xf32>
    %392 = vector.broadcast %383 : f32 to vector<1x256xf32>
    %393 = arith.addf %391, %392 : vector<1x256xf32>
    %394 = vector.broadcast %393 : vector<1x256xf32> to vector<2x256xf32>
    %395 = arith.mulf %394, %26 : vector<2x256xf32>
    %396 = arith.subf %389, %395 : vector<2x256xf32>
    %397 = arith.mulf %396, %396 : vector<2x256xf32>
    %398 = vector.shape_cast %397 : vector<2x256xf32> to vector<1x2x256xf32>
    %cst_398 = arith.constant dense<0.000000e+00> : vector<1xf32>
    %399 = vector.multi_reduction <add>, %398, %cst_398 [1, 2] : vector<1x2x256xf32> to vector<1xf32>
    %400 = vector.shape_cast %399 : vector<1xf32> to vector<1x1x1xf32>
    %401 = vector.extract %400[0, 0, 0] : f32 from vector<1x1x1xf32>
    %402 = vector.broadcast %393 : vector<1x256xf32> to vector<2x256xf32>
    %403 = arith.mulf %402, %396 : vector<2x256xf32>
    %404 = arith.mulf %396, %403 : vector<2x256xf32>
    %405 = vector.shape_cast %404 : vector<2x256xf32> to vector<1x2x256xf32>
    %cst_399 = arith.constant dense<0.000000e+00> : vector<1xf32>
    %406 = vector.multi_reduction <add>, %405, %cst_399 [1, 2] : vector<1x2x256xf32> to vector<1xf32>
    %407 = vector.shape_cast %406 : vector<1xf32> to vector<1x1x1xf32>
    %408 = vector.extract %407[0, 0, 0] : f32 from vector<1x1x1xf32>
    %cst_400 = arith.constant 0.000000e+00 : f32
    %409 = arith.cmpf one, %408, %cst_400 : f32
    %cst_401 = arith.constant 1.000000e+00 : f32
    %410 = arith.select %409, %408, %cst_401 : f32
    %411 = arith.divf %401, %410 : f32
    %412 = vector.broadcast %411 : f32 to vector<2x256xf32>
    %413 = arith.mulf %412, %396 : vector<2x256xf32>
    %414 = arith.addf %26, %413 : vector<2x256xf32>
    %415 = vector.broadcast %411 : f32 to vector<2x256xf32>
    %416 = arith.mulf %415, %403 : vector<2x256xf32>
    %417 = arith.subf %396, %416 : vector<2x256xf32>
    %418 = arith.mulf %417, %417 : vector<2x256xf32>
    %419 = vector.shape_cast %418 : vector<2x256xf32> to vector<1x2x256xf32>
    %cst_402 = arith.constant dense<0.000000e+00> : vector<1xf32>
    %420 = vector.multi_reduction <add>, %419, %cst_402 [1, 2] : vector<1x2x256xf32> to vector<1xf32>
    %421 = vector.shape_cast %420 : vector<1xf32> to vector<1x1x1xf32>
    %422 = vector.extract %421[0, 0, 0] : f32 from vector<1x1x1xf32>
    %cst_403 = arith.constant 0.000000e+00 : f32
    %423 = arith.cmpf one, %401, %cst_403 : f32
    %cst_404 = arith.constant 1.000000e+00 : f32
    %424 = arith.select %423, %401, %cst_404 : f32
    %425 = arith.divf %422, %424 : f32
    %426 = vector.broadcast %425 : f32 to vector<2x256xf32>
    %427 = arith.mulf %426, %396 : vector<2x256xf32>
    %428 = arith.addf %417, %427 : vector<2x256xf32>
    %429 = vector.broadcast %393 : vector<1x256xf32> to vector<2x256xf32>
    %430 = arith.mulf %429, %428 : vector<2x256xf32>
    %431 = arith.mulf %428, %430 : vector<2x256xf32>
    %432 = vector.shape_cast %431 : vector<2x256xf32> to vector<1x2x256xf32>
    %cst_405 = arith.constant dense<0.000000e+00> : vector<1xf32>
    %433 = vector.multi_reduction <add>, %432, %cst_405 [1, 2] : vector<1x2x256xf32> to vector<1xf32>
    %434 = vector.shape_cast %433 : vector<1xf32> to vector<1x1x1xf32>
    %435 = vector.extract %434[0, 0, 0] : f32 from vector<1x1x1xf32>
    %cst_406 = arith.constant 0.000000e+00 : f32
    %436 = arith.cmpf one, %435, %cst_406 : f32
    %cst_407 = arith.constant 1.000000e+00 : f32
    %437 = arith.select %436, %435, %cst_407 : f32
    %438 = arith.divf %422, %437 : f32
    %439 = vector.broadcast %438 : f32 to vector<2x256xf32>
    %440 = arith.mulf %439, %428 : vector<2x256xf32>
    %441 = arith.addf %414, %440 : vector<2x256xf32>
    %442 = vector.broadcast %438 : f32 to vector<2x256xf32>
    %443 = arith.mulf %442, %430 : vector<2x256xf32>
    %444 = arith.subf %417, %443 : vector<2x256xf32>
    %445 = arith.mulf %444, %444 : vector<2x256xf32>
    %446 = vector.shape_cast %445 : vector<2x256xf32> to vector<1x2x256xf32>
    %cst_408 = arith.constant dense<0.000000e+00> : vector<1xf32>
    %447 = vector.multi_reduction <add>, %446, %cst_408 [1, 2] : vector<1x2x256xf32> to vector<1xf32>
    %448 = vector.shape_cast %447 : vector<1xf32> to vector<1x1x1xf32>
    %449 = vector.extract %448[0, 0, 0] : f32 from vector<1x1x1xf32>
    %cst_409 = arith.constant 0.000000e+00 : f32
    %450 = arith.cmpf one, %422, %cst_409 : f32
    %cst_410 = arith.constant 1.000000e+00 : f32
    %451 = arith.select %450, %422, %cst_410 : f32
    %452 = arith.divf %449, %451 : f32
    %453 = vector.broadcast %452 : f32 to vector<2x256xf32>
    %454 = arith.mulf %453, %428 : vector<2x256xf32>
    %455 = arith.addf %444, %454 : vector<2x256xf32>
    %456 = vector.broadcast %393 : vector<1x256xf32> to vector<2x256xf32>
    %457 = arith.mulf %456, %455 : vector<2x256xf32>
    %458 = arith.mulf %455, %457 : vector<2x256xf32>
    %459 = vector.shape_cast %458 : vector<2x256xf32> to vector<1x2x256xf32>
    %cst_411 = arith.constant dense<0.000000e+00> : vector<1xf32>
    %460 = vector.multi_reduction <add>, %459, %cst_411 [1, 2] : vector<1x2x256xf32> to vector<1xf32>
    %461 = vector.shape_cast %460 : vector<1xf32> to vector<1x1x1xf32>
    %462 = vector.extract %461[0, 0, 0] : f32 from vector<1x1x1xf32>
    %cst_412 = arith.constant 0.000000e+00 : f32
    %463 = arith.cmpf one, %462, %cst_412 : f32
    %cst_413 = arith.constant 1.000000e+00 : f32
    %464 = arith.select %463, %462, %cst_413 : f32
    %465 = arith.divf %449, %464 : f32
    %466 = vector.broadcast %465 : f32 to vector<2x256xf32>
    %467 = arith.mulf %466, %455 : vector<2x256xf32>
    %468 = arith.addf %441, %467 : vector<2x256xf32>
    %469 = vector.broadcast %465 : f32 to vector<2x256xf32>
    %470 = arith.mulf %469, %457 : vector<2x256xf32>
    %471 = arith.subf %444, %470 : vector<2x256xf32>
    %472 = arith.mulf %471, %471 : vector<2x256xf32>
    %473 = vector.shape_cast %472 : vector<2x256xf32> to vector<1x2x256xf32>
    %cst_414 = arith.constant dense<0.000000e+00> : vector<1xf32>
    %474 = vector.multi_reduction <add>, %473, %cst_414 [1, 2] : vector<1x2x256xf32> to vector<1xf32>
    %475 = vector.shape_cast %474 : vector<1xf32> to vector<1x1x1xf32>
    %476 = vector.extract %475[0, 0, 0] : f32 from vector<1x1x1xf32>
    %cst_415 = arith.constant 0.000000e+00 : f32
    %477 = arith.cmpf one, %449, %cst_415 : f32
    %cst_416 = arith.constant 1.000000e+00 : f32
    %478 = arith.select %477, %449, %cst_416 : f32
    %479 = arith.divf %476, %478 : f32
    %480 = vector.broadcast %479 : f32 to vector<2x256xf32>
    %481 = arith.mulf %480, %455 : vector<2x256xf32>
    %482 = arith.addf %471, %481 : vector<2x256xf32>
    %483 = vector.broadcast %393 : vector<1x256xf32> to vector<2x256xf32>
    %484 = arith.mulf %483, %482 : vector<2x256xf32>
    %485 = arith.mulf %482, %484 : vector<2x256xf32>
    %486 = vector.shape_cast %485 : vector<2x256xf32> to vector<1x2x256xf32>
    %cst_417 = arith.constant dense<0.000000e+00> : vector<1xf32>
    %487 = vector.multi_reduction <add>, %486, %cst_417 [1, 2] : vector<1x2x256xf32> to vector<1xf32>
    %488 = vector.shape_cast %487 : vector<1xf32> to vector<1x1x1xf32>
    %489 = vector.extract %488[0, 0, 0] : f32 from vector<1x1x1xf32>
    %cst_418 = arith.constant 0.000000e+00 : f32
    %490 = arith.cmpf one, %489, %cst_418 : f32
    %cst_419 = arith.constant 1.000000e+00 : f32
    %491 = arith.select %490, %489, %cst_419 : f32
    %492 = arith.divf %476, %491 : f32
    %493 = vector.broadcast %492 : f32 to vector<2x256xf32>
    %494 = arith.mulf %493, %482 : vector<2x256xf32>
    %495 = arith.addf %468, %494 : vector<2x256xf32>
    %496 = vector.broadcast %492 : f32 to vector<2x256xf32>
    %497 = arith.mulf %496, %484 : vector<2x256xf32>
    %498 = arith.subf %471, %497 : vector<2x256xf32>
    %499 = arith.mulf %498, %498 : vector<2x256xf32>
    %500 = vector.shape_cast %499 : vector<2x256xf32> to vector<1x2x256xf32>
    %cst_420 = arith.constant dense<0.000000e+00> : vector<1xf32>
    %501 = vector.multi_reduction <add>, %500, %cst_420 [1, 2] : vector<1x2x256xf32> to vector<1xf32>
    %502 = vector.shape_cast %501 : vector<1xf32> to vector<1x1x1xf32>
    %503 = vector.extract %502[0, 0, 0] : f32 from vector<1x1x1xf32>
    %cst_421 = arith.constant 0.000000e+00 : f32
    %504 = arith.cmpf one, %476, %cst_421 : f32
    %cst_422 = arith.constant 1.000000e+00 : f32
    %505 = arith.select %504, %476, %cst_422 : f32
    %506 = arith.divf %503, %505 : f32
    %507 = vector.broadcast %506 : f32 to vector<2x256xf32>
    %508 = arith.mulf %507, %482 : vector<2x256xf32>
    %509 = arith.addf %498, %508 : vector<2x256xf32>
    %510 = vector.broadcast %393 : vector<1x256xf32> to vector<2x256xf32>
    %511 = arith.mulf %510, %509 : vector<2x256xf32>
    %512 = arith.mulf %509, %511 : vector<2x256xf32>
    %513 = vector.shape_cast %512 : vector<2x256xf32> to vector<1x2x256xf32>
    %cst_423 = arith.constant dense<0.000000e+00> : vector<1xf32>
    %514 = vector.multi_reduction <add>, %513, %cst_423 [1, 2] : vector<1x2x256xf32> to vector<1xf32>
    %515 = vector.shape_cast %514 : vector<1xf32> to vector<1x1x1xf32>
    %516 = vector.extract %515[0, 0, 0] : f32 from vector<1x1x1xf32>
    %cst_424 = arith.constant 0.000000e+00 : f32
    %517 = arith.cmpf one, %516, %cst_424 : f32
    %cst_425 = arith.constant 1.000000e+00 : f32
    %518 = arith.select %517, %516, %cst_425 : f32
    %519 = arith.divf %503, %518 : f32
    %520 = vector.broadcast %519 : f32 to vector<2x256xf32>
    %521 = arith.mulf %520, %509 : vector<2x256xf32>
    %522 = arith.addf %495, %521 : vector<2x256xf32>
    %c0_426 = arith.constant 0 : index
    %c0_427 = arith.constant 0 : index
    %c0_428 = arith.constant 0 : index
    %523 = vector.load %arg9[%c0_426, %c0_427, %c0_428] : memref<1x2x256xf32, #tpu.memory_space<vmem>>, vector<1x2x256xf32>
    %524 = vector.shape_cast %523 : vector<1x2x256xf32> to vector<2x256xf32>
    %525 = vector.shape_cast %522 : vector<2x256xf32> to vector<1x2x256xf32>
    tpu.vector_store %arg9[%c0_426, %c0_427, %c0_428], %525 {strides = array<i32>} : memref<1x2x256xf32, #tpu.memory_space<vmem>>, vector<1x2x256xf32>,
    return
  }
  func.func @transform_0(%arg0: i32) -> (i32, i32, i32) {
    %c0_i32 = arith.constant 0 : i32
    %c0_i32_0 = arith.constant 0 : i32
    %c0_i32_1 = arith.constant 0 : i32
    return %arg0, %c0_i32, %c0_i32_0 : i32, i32, i32
  }
  func.func @transform_1(%arg0: i32) -> (i32, i32, i32) {
    %c0_i32 = arith.constant 0 : i32
    %c0_i32_0 = arith.constant 0 : i32
    %c0_i32_1 = arith.constant 0 : i32
    return %arg0, %c0_i32, %c0_i32_0 : i32, i32, i32
  }
  func.func @transform_2(%arg0: i32) -> (i32, i32, i32) {
    %c0_i32 = arith.constant 0 : i32
    %c0_i32_0 = arith.constant 0 : i32
    %c0_i32_1 = arith.constant 0 : i32
    %c0_i32_2 = arith.constant 0 : i32
    return %c0_i32, %c0_i32_0, %c0_i32_1 : i32, i32, i32
  }
  func.func @transform_3(%arg0: i32) -> (i32, i32) {
    %c0_i32 = arith.constant 0 : i32
    %c0_i32_0 = arith.constant 0 : i32
    %c0_i32_1 = arith.constant 0 : i32
    return %c0_i32, %c0_i32_0 : i32, i32
  }
  func.func @transform_4(%arg0: i32) -> (i32, i32, i32) {
    %c0_i32 = arith.constant 0 : i32
    %c0_i32_0 = arith.constant 0 : i32
    %c0_i32_1 = arith.constant 0 : i32
    %c0_i32_2 = arith.constant 0 : i32
    return %c0_i32, %c0_i32_0, %c0_i32_1 : i32, i32, i32
  }
  func.func @transform_5(%arg0: i32) -> (i32, i32) {
    %c0_i32 = arith.constant 0 : i32
    %c0_i32_0 = arith.constant 0 : i32
    %c0_i32_1 = arith.constant 0 : i32
    return %c0_i32, %c0_i32_0 : i32, i32
  }
  func.func @transform_6(%arg0: i32) -> (i32, i32, i32) {
    %c0_i32 = arith.constant 0 : i32
    %c0_i32_0 = arith.constant 0 : i32
    %c0_i32_1 = arith.constant 0 : i32
    %c0_i32_2 = arith.constant 0 : i32
    return %c0_i32, %c0_i32_0, %c0_i32_1 : i32, i32, i32
  }
  func.func @transform_7(%arg0: i32) -> i32 {
    %c0_i32 = arith.constant 0 : i32
    %c0_i32_0 = arith.constant 0 : i32
    return %c0_i32 : i32
  }
  func.func @transform_8(%arg0: i32) -> (i32, i32, i32) {
    %c0_i32 = arith.constant 0 : i32
    %c0_i32_0 = arith.constant 0 : i32
    %c0_i32_1 = arith.constant 0 : i32
    return %arg0, %c0_i32, %c0_i32_0 : i32, i32, i32
  }
}

</mosaic_0001>

<bundles_post_ra>
// kernel: custom-call
= control target key start
LH: loop header
LB: loop body
LE: loop exit
PB: predicated region body
PF: predicated region fallthrough
CT: control target
= control target key end

     0   :  { %2 = vsyncpa [#allocation0], 0  ;;  %s61_s0 = inlined_call_operand.hbm [shape: c64[2,16,16], index: 0, kind: input, shape index: {}]   ;;  %s62_s1 = inlined_call_operand.vmem [shape: f32[2,16,16], index: 1, kind: output, shape index: {}]  }
   0x1   :  { %s3_s8 = sshll.u32 %s62_s1, 4  ;;  %s9_s11 = scalar_lea.hbm %s61_s0, 512  ;;  %s4_s8 = int_to_ptr.vmem [resolvable:$true] %s3_s8 }
   0x2   :  { %p10_p0 = scmp.ne.s32.totalorder %s61_s0, %s9_s11  ;;  %s11_s16 = scalar_lea.hbm %s61_s0, 1024 }
   0x3   :  { %p12_p1 = scmp.lt.u32.totalorder %s11_s16, %s9_s11  ;;  %p13_p2 = scmp.lt.u32.totalorder %s9_s11, %s61_s0 }
   0x5   :  { %p14_p3 = por %p13_p2, %p12_p1 }
   0x7   :  { %p15_p4 = pnand %p14_p3, %p10_p0 }
   0x9   :  { %18 = shalt.err (!%p15_p4)  }
   0xa   :  { %s19_s1 = scalar_lea.vmem %s4_s8, 512  ;;  %p24_p6 = scmp.lt.s32.totalorder %s4_s8, %s4_s8 }
   0xb   :  { %p20_p5 = scmp.ne.s32.totalorder %s4_s8, %s19_s1  ;;  %p25_p7 = scmp.lt.s32.totalorder %s19_s1, %s19_s1 }
   0xd   :  { %p26_p8 = por %p25_p7, %p24_p6 }
   0xf   :  { %p27_p9 = pnand %p26_p8, %p20_p5 }
  0x11   :  { %30 = shalt.err (!%p27_p9)  }
  0x12   :  { %6 = dma.hbm_to_vmem [thread:$0]  %s61_s0, 512, %s4_s8, [#allocation0] }
  0x13   :  { %31 = dma.done.wait [#allocation0], 512  }
  0x14   :  { %32 = vsyncadd [#allocation0], 4294966784 }
  0x15   :  { %8 = vsyncpa [#allocation0], 1 }

// kernel: custom-call.1
= control target key start
LH: loop header
LB: loop body
LE: loop exit
PB: predicated region body
PF: predicated region fallthrough
CT: control target
= control target key end

     0   :  { %s59_s0 = inlined_call_operand.hbm [shape: c64[2,16,16], index: 0, kind: input, shape index: {}]   ;;  %s60_s1 = inlined_call_operand.vmem [shape: f32[2,16,16], index: 1, kind: output, shape index: {}]  }
   0x1   :  { %s2_s8 = scalar_lea.hbm %s59_s0, 512 }
   0x2   :  { %3 = vsyncpa [#allocation0], 0  ;;  %s4_s11 = sshll.u32 %s60_s1, 4  ;;  %s34_s14 = scalar_lea.hbm %s59_s0, 1024  ;;  %s5_s11 = int_to_ptr.vmem [resolvable:$true] %s4_s11 }
   0x3   :  { %p11_p0 = scmp.ne.s32.totalorder %s2_s8, %s34_s14  ;;  %p13_p1 = scmp.lt.u32.totalorder %s2_s8, %s59_s0 }
   0x4   :  { %p14_p2 = scmp.lt.u32.totalorder %s34_s14, %s34_s14  ;;  %p16_p4 = scmp.lt.u32.totalorder %s34_s14, %s2_s8 }
   0x6   :  { %p15_p3 = por %p14_p2, %p13_p1 }
   0x8   :  { %p17_p5 = por %p16_p4, %p15_p3 }
   0xa   :  { %p18_p6 = pnand %p17_p5, %p11_p0 }
   0xc   :  { %21 = shalt.err (!%p18_p6)  }
   0xd   :  { %s22_s17 = scalar_lea.vmem %s5_s11, 512  ;;  %p27_p8 = scmp.lt.s32.totalorder %s5_s11, %s5_s11 }
   0xe   :  { %p23_p7 = scmp.ne.s32.totalorder %s5_s11, %s22_s17  ;;  %p28_p9 = scmp.lt.s32.totalorder %s22_s17, %s22_s17 }
  0x10   :  { %p29_p10 = por %p28_p9, %p27_p8 }
  0x12   :  { %p30_p11 = pnand %p29_p10, %p23_p7 }
  0x14   :  { %33 = shalt.err (!%p30_p11)  }
  0x15   :  { %7 = dma.hbm_to_vmem [thread:$0]  %s2_s8, 512, %s5_s11, [#allocation0] }
  0x16   :  { %35 = dma.done.wait [#allocation0], 512  }
  0x17   :  { %36 = vsyncadd [#allocation0], 4294966784 }
  0x18   :  { %9 = vsyncpa [#allocation0], 1 }

// kernel: custom-call.4
= control target key start
LH: loop header
LB: loop body
LE: loop exit
PB: predicated region body
PF: predicated region fallthrough
CT: control target
= control target key end

     0   :  { %s126_s0 = inlined_call_operand.vmem [shape: f32[2,16,16], index: 0, kind: input, shape index: {}]   ;;  %s127_s1 = inlined_call_operand.vmem [shape: f32[2,16,16], index: 1, kind: input, shape index: {}]   ;;  %s128_s2 = inlined_call_operand.hbm [shape: c64[2,16,16], index: 2, kind: output, shape index: {}]  }
   0x1   :  { %s87_s11 = scalar_lea.hbm %s128_s2, 512 }
   0x2   :  { %4 = vsyncpa [#allocation0], 0  ;;  %s5_s14 = sshll.u32 %s126_s0, 4  ;;  %s6_s14 = int_to_ptr.vmem [resolvable:$true] %s5_s14 }
   0x3   :  { %s18_s15 = scalar_lea.vmem %s6_s14, 512  ;;  %p23_p1 = scmp.lt.s32.totalorder %s6_s14, %s6_s14 }
   0x4   :  { %p19_p0 = scmp.ne.s32.totalorder %s6_s14, %s18_s15  ;;  %p24_p2 = scmp.lt.s32.totalorder %s18_s15, %s18_s15 }
   0x6   :  { %p25_p3 = por %p24_p2, %p23_p1 }
   0x8   :  { %p26_p4 = pnand %p25_p3, %p19_p0 }
   0xa   :  { %29 = shalt.err (!%p26_p4)  }
   0xb   :  { %p31_p5 = scmp.ne.s32.totalorder %s128_s2, %s87_s11  ;;  %s32_s0 = scalar_lea.hbm %s128_s2, 1024 }
   0xc   :  { %p33_p6 = scmp.lt.u32.totalorder %s32_s0, %s87_s11  ;;  %p34_p7 = scmp.lt.u32.totalorder %s87_s11, %s128_s2 }
   0xe   :  { %p35_p8 = por %p34_p7, %p33_p6 }
  0x10   :  { %p36_p9 = pnand %p35_p8, %p31_p5 }
  0x12   :  { %39 = shalt.err (!%p36_p9)  }
  0x13   :  { %8 = dma.vmem_to_hbm [thread:$0]  %s6_s14, 512, %s128_s2, [#allocation0] }
  0x14   :  { %65 = dma.done.wait [#allocation0], 512  }
  0x15   :  { %66 = vsyncadd [#allocation0], 4294966784 }
  0x16   :  { %10 = vsyncpa [#allocation0], 1 }
  0x17   :  { %11 = vsyncpa [#allocation1], 0  ;;  %s12_s28 = sshll.u32 %s127_s1, 4  ;;  %s13_s28 = int_to_ptr.vmem [resolvable:$true] %s12_s28 }
  0x18   :  { %s40_s29 = scalar_lea.vmem %s13_s28, 512  ;;  %p45_p11 = scmp.lt.s32.totalorder %s13_s28, %s13_s28 }
  0x19   :  { %p41_p10 = scmp.ne.s32.totalorder %s13_s28, %s40_s29  ;;  %p46_p12 = scmp.lt.s32.totalorder %s40_s29, %s40_s29 }
  0x1b   :  { %p47_p13 = por %p46_p12, %p45_p11 }
  0x1d   :  { %p48_p0 = pnand %p47_p13, %p41_p10 }
  0x1f   :  { %51 = shalt.err (!%p48_p0)  }
  0x20   :  { %p53_p1 = scmp.ne.s32.totalorder %s87_s11, %s32_s0  ;;  %p56_p2 = scmp.lt.u32.totalorder %s32_s0, %s32_s0 }
  0x22   :  { %p57_p3 = por %p56_p2, %p34_p7 }
  0x24   :  { %p59_p4 = por %p57_p3, %p33_p6 }
  0x26   :  { %p60_p5 = pnand %p59_p4, %p53_p1 }
  0x28   :  { %63 = shalt.err (!%p60_p5)  }
  0x29   :  { %15 = dma.vmem_to_hbm [thread:$0]  %s13_s28, 512, %s87_s11, [#allocation1] }
  0x2a   :  { %67 = dma.done.wait [#allocation1], 512  }
  0x2b   :  { %68 = vsyncadd [#allocation1], 4294966784 }
  0x2c   :  { %17 = vsyncpa [#allocation1], 1 }

// kernel: modl_block_forward.1
= control target key start
LH: loop header
LB: loop body
LE: loop exit
PB: predicated region body
PF: predicated region fallthrough
CT: control target
= control target key end

     0   :  { %s10028_s29 = smov 0   ;;  %s15934_s0 = inlined_call_operand.vmem [shape: f32[2,2,256], index: 0, kind: input, shape index: {}]   ;;  %s15935_s1 = inlined_call_operand.vmem [shape: f32[2,2,256], index: 1, kind: input, shape index: {}]   ;;  %s15936_s2 = inlined_call_operand.vmem [shape: f32[1,1,256], index: 2, kind: input, shape index: {}]   ;;  %s15937_s3 = inlined_call_operand.vmem [shape: f32[64,32], index: 3, kind: input, shape index: {}]   ;;  %s15938_s4 = inlined_call_operand.vmem [shape: bf16[4,64,576], index: 4, kind: input, shape index: {}]   ;;  %s15939_s5 = inlined_call_operand.vmem [shape: bf16[8,576], index: 5, kind: input, shape index: {}]   ;;  %s15940_s6 = inlined_call_operand.vmem [shape: f32[6,64,1], index: 6, kind: input, shape index: {}]   ;;  %s15941_s7 = inlined_call_operand.<no memory space> [shape: f32[1], index: 7, kind: input, shape index: {}]   ;;  %s15942_s8 = inlined_call_operand.vmem [shape: f32[2,2,256], index: 8, kind: output, shape index: {}]  }
   0x1   :  { %13 = sst [smem:[#allocation5]] %s15941_s7 }
   0x2 LB: > { %s9262_s30 = sadd.s32 4294967295, %s9963_s29   ;;  %p9266_p0 = scmp.ge.s32.totalorder %s9963_s29, 1  ;;  %s9963_s29 = sphi %s10028_s29, %s19_s29  }
   0x3   : > { %p273_p1 = scmp.lt.s32.totalorder %s9963_s29, 3 }
   0x5   : > { %p274_p2 = pnand %p9266_p0, %p273_p1 }
   0x7   : > { %277 = sbr.rel (%p274_p2) target bundleno = 7199 (0x1c1f), region = 52 }
   0xe   : > { %v330_v0 = vlaneseq  ;;  %v9965_v1 = vmov 1983009808   ;;  %p312_p3 = scmp.lt.s32.totalorder %s9262_s30, 1  ;;  %v15961_v3 = vmov 0   ;;  %vm366_vm1 = vcmask 138240   ;;  %s15991_s12 = smov 111  }
   0xf   : > { %v374_v2 = vunpack.c.l.s4 %v9965_v1  ;;  %9795 = vset.pattern.permute.xlu1 %v15961_v3  ;;  %9794 = vset.pattern.permute.xlu0 %v15961_v3  ;;  %367 = vst.msk [vmem:[#allocation2 + $0x18] sm:$0xff] %vm366_vm1, %v15961_v3  ;;  %368 = vst.msk [vmem:[#allocation2 + $0x38] sm:$0xff] %vm366_vm1, %v15961_v3  ;;  %vm361_vm7 = vcmask 1048440   ;;  %s15993_s13 = smov 1   ;;  %s16028_s14 = smov 32   ;;  %vm399_vm8 = vcmask 122880  }
  0x10   : > { %v331_v4 = vand.u32 127, %v330_v0  ;;  %v10038_v5 = vshrl.u32 %v330_v0, 7  ;;  %s16717_s30 = smov (!%p312_p3, %s9262_s30), 1  ;;  %369 = vst.msk [vmem:[#allocation2 + $0x58] sm:$0xff] %vm366_vm1, %v15961_v3  ;;  %370 = vst.msk [vmem:[#allocation2 + $0x78] sm:$0xff] %vm366_vm1, %v15961_v3  ;;  %s16009_s15 = smov 127  }
  0x11   : > { %v375_v6 = vunpack.c.0.s8 %v374_v2  ;;  %s10043_s7 = sshll.u32 %s16717_s30, 2  ;;  %362 = vst.msk [vmem:[#allocation2] sm:$0xff] %vm361_vm7, %v15961_v3  ;;  %363 = vst.msk [vmem:[#allocation2 + $0x20] sm:$0xff] %vm361_vm7, %v15961_v3  ;;  %s9971_s16 = smov 96   ;;  %vm392_vm9 = vcmask 1041280   ;;  %vm15990_vm10 = vcmask 908288  }
  0x12   : > { %16062 = vst [vmem:[#allocation6_spill] sm:$0xff] %v10038_v5  ;;  %v332_v7 = vadd.s32 128, %v331_v4  ;;  %v337_v8 = vand.u32 15, %v331_v4  ;;  %s10049_s11 = scalar_lea.vmem %s15934_s0, %s10043_s7  ;;  %v10052_v11 = vsub.s32 0, %v10038_v5  ;;  %v420_v15 = vsub.s32 4, %v10038_v5  ;;  %364 = vst.msk [vmem:[#allocation2 + $0x40] sm:$0xff] %vm361_vm7, %v15961_v3 }
  0x13   : > { %v10041_v9 = vsub.s32 %v375_v6, %v10038_v5  ;;  %v10055_v12 = vld.sshfl [vmem:[%s10049_s11] sm:$0x33 pattern:$0x76325410]  ;;  %365 = vst.msk [vmem:[#allocation2 + $0x60] sm:$0xff] %vm361_vm7, %v15961_v3  ;;  %s16026_s17 = smov 17  }
  0x14   : > { %v344_v10 = vand.u32 15, %v332_v7  ;;  %vm359_vm0 = vcmp.eq.s32.totalorder %v337_v8, 15  ;;  %16064 = vst [vmem:[#allocation8_spill] sm:$0xff] %v10052_v11  ;;  %16065 = vst [vmem:[#allocation9_spill] sm:$0xff] %v10055_v12  ;;  %vm10057_vm3 = vcmp.eq.s32.totalorder %v337_v8, 0  ;;  %v10077_v17 = vcombine.high %v10055_v12, %v10055_v12  ;;  %s16045_s18 = smov 126  }
  0x15   : > { %16063 = vst [vmem:[#allocation7_spill] sm:$0xff] %v10041_v9  ;;  %v383_v18 = vpack.c.bf16 %v10055_v12, %v10055_v12  ;;  %s9974_s19 = smov 2   ;;  %s15955_s20 = smov 113   ;;  %vm15988_vm12 = vcmask 7168   ;;  %vm528_vm13 = vcmask 1031168   ;;  %vm440_vm15 = vcmask 15360  }
  0x16   : > { %vm360_vm2 = vcmp.eq.s32.totalorder %v344_v10, 15  ;;  %vm10061_vm4 = vcmp.eq.s32.totalorder %v344_v10, 0  ;;  %16070 = vst [vmem:[#allocation10_spill] sm:$0xff] %v10077_v17  ;;  %v384_v20 = vpack.c.bf16 %v10077_v17, %v10077_v17  ;;  %s16011_s21 = smov 15   ;;  %s16043_s22 = smov 16  }
  0x17   : > { %vm500_vm5 = vmpackc.low %vm360_vm2, %vm359_vm0  ;;  %385 = vst [vmem:[#allocation2 + $0x8] sm:$0x1] %v383_v18  ;;  %s15957_s23 = smov 112   ;;  %s16125_s28 = smov 112  }
  0x18   : > { %v501_v16 = vsel %vm500_vm5, 65537, %v15961_v3  ;;  %vm412_vm6 = vmpackc.low %vm10061_vm4, %vm10057_vm3  ;;  %386 = vst [vmem:[#allocation2 + $0x10] sm:$0x1] %v384_v20  ;;  %vm15989_vm5 = vcmask 1039360   ;;  %s16143_s30 = smov 113   ;;  %s16209_s9 = smov 1  }
  0x19   : > { %v505_v19 = vrot.slane %v501_v16, %v10052_v11  ;;  %v10093_v21 = vrot.slane %v501_v16, %v420_v15  ;;  %v413_v22 = vsel %vm412_vm6, 65537, %v15961_v3  ;;  %vm15959_vm6 = vcmask 924672   ;;  %s16300_s26 = smov 15   ;;  %s16314_s27 = smov 127  }
  0x1a   : > { %v421_v23 = vrot.slane %v413_v22, %v420_v15  ;;  %v417_v26 = vrot.slane %v413_v22, %v10052_v11  ;;  %s16430_s10 = smov 32  }
  0x1b   : > { %510 = vrot.lane.b32.xlu1 %v505_v19, %s15991_s12 }
  0x1e   : > { %v387_v25 = vld [vmem:[#allocation2 + $0x8] sm:$0x1] }
  0x1f   : > { %512 = vrot.lane.b32.xlu1 %v10093_v21, %s15991_s12  ;;  %v394_v24 = vld [vmem:[#allocation2 + $0x10] sm:$0x1]  ;;  %v10117_v30 = vld [vmem:[#allocation2 + $0x8] sm:$0x1] }
  0x20   : > { %396 = vrot.lane.b32.xlu0 %v394_v24, %s16028_s14  ;;  %v10104_v27 = vld [vmem:[#allocation2 + $0x10] sm:$0x1]  ;;  %v10124_v31 = vld [vmem:[#allocation2 + $0x8] sm:$0x1] }
  0x21   : > { %v10110_v28 = vld [vmem:[#allocation2 + $0x10] sm:$0x1]  ;;  %v10126_v32 = vld [vmem:[#allocation2 + $0x8] sm:$0x1] }
  0x22   : > { %v10113_v29 = vld [vmem:[#allocation2 + $0x10] sm:$0x1]  ;;  %v10132_v33 = vld [vmem:[#allocation2 + $0x8] sm:$0x1] }
  0x23   : > { %564 = vrot.lane.b32.xlu1 %v421_v23, %s15993_s13  ;;  %v10137_v34 = vld [vmem:[#allocation2 + $0x8] sm:$0x1]  ;;  %v10139_v35 = vld [vmem:[#allocation2 + $0x10] sm:$0x1] }
  0x24   : > { %389 = vrot.lane.b32.xlu0 %v387_v25, %s9971_s16  ;;  %v10147_v36 = vld [vmem:[#allocation2 + $0x10] sm:$0x1]  ;;  %v469_v49 = vld [vmem:[#allocation2 + $0x8] sm:$0x1] }
  0x25   : > { %v470_v50 = vld [vmem:[#allocation2 + $0x10] sm:$0x1]  ;;  %v472_v56 = vunpack.c.l.bf16 %v469_v49  ;;  %v10209_v7 = vld [vmem:[#allocation2 + $0x8] sm:$0x1] }
  0x26   : > { %v473_v57 = vunpack.c.l.bf16 %v470_v50  ;;  %v10189_v59 = vld [vmem:[#allocation2 + $0x10] sm:$0x1] }
  0x27   : > { %622 = vrot.lane.b32.xlu1 %v10093_v21, %s16009_s15  ;;  %v478_v2 = vrot.slane %v472_v56, 6 }
  0x28   : > { %562 = vrot.lane.b32.xlu0 %v417_v26, %s15993_s13  ;;  %v479_v4 = vrot.slane %v473_v57, 6 }
  0x2a   : > { %v9754_v16 = vpack.i.bf16 %v479_v4, %v478_v2 }
  0x2b   : > { %673 = vrot.lane.b32.xlu1 %v421_v23, %s16026_s17 }
  0x2c   : > { %620 = vrot.lane.b32.xlu0 %v505_v19, %s16009_s15 }
  0x2f   : > { %526 = vrot.lane.b32.xlu1 %v10104_v27, %s16045_s18 }
  0x30   : > { %671 = vrot.lane.b32.xlu0 %v417_v26, %s16026_s17 }
  0x33   : > { %578 = vrot.lane.b32.xlu1 %v10110_v28, %s9974_s19 }
  0x34   : > { %524 = vrot.lane.b32.xlu0 %v10117_v30, %s16045_s18 }
  0x37   : > { %634 = vrot.lane.b32.xlu1 %v10113_v29, %s16045_s18 }
  0x38   : > { %576 = vrot.lane.b32.xlu0 %v10126_v32, %s9974_s19 }
  0x3b   : > { %683 = vrot.lane.b32.xlu1 %v10124_v31, %s9974_s19 }
  0x3c   : > { %632 = vrot.lane.b32.xlu0 %v10132_v33, %s16045_s18 }
  0x3f   : > { %424 = vrot.lane.b32.xlu1 %v421_v23, %s15955_s20 }
  0x40   : > { %685 = vrot.lane.b32.xlu0 %v10139_v35, %s9974_s19 }
  0x43   : > { %436 = vrot.lane.b32.xlu1 %v10137_v34, %s9974_s19 }
  0x44   : > { %422 = vrot.lane.b32.xlu0 %v417_v26, %s15955_s20 }
  0x47   : > { %747 = vrot.lane.b32.xlu1 %v505_v19, %s16011_s21 }
  0x48   : > { %438 = vrot.lane.b32.xlu0 %v10147_v36, %s9974_s19 }
  0x8d   : > { %v10151_v37 = vpop.permute.xlu1 %510 }
  0x8e   : > { %vm15953_vm7 = vcmp.ne.s16.totalorder %v10151_v37, 0 }
  0x91   : > { %v10153_v38 = vpop.permute.xlu1 %512 }
  0x92   : > { %16071 = vst [vmem:[#allocation11_spill] sm:$0xff] %v10153_v38  ;;  %v397_v40 = vpop.permute.xlu0 %396  ;;  %vm518_vm11 = vcmp.ne.s16.totalorder %v10153_v38, 0  ;;  %v10174_v52 = vsel %vm15990_vm10, %v10151_v37, %v10153_v38 }
  0x93   : > { %400 = vst.msk [vmem:[#allocation2 + $0x18] sm:$0x1] %vm399_vm8, %v397_v40  ;;  %16072 = vst [vmem:[#allocation12_spill] sm:$0xff] %v10174_v52  ;;  %vm15947_vm14 = vcmp.ne.s16.totalorder %v10174_v52, 0 }
  0x95   : > { %v10155_v39 = vpop.permute.xlu1 %564 }
  0x96   : > { %v390_v42 = vpop.permute.xlu0 %389  ;;  %vm15945_vm3 = vcmp.ne.s16.totalorder %v10155_v39, 0 }
  0x97   : > { %393 = vst.msk [vmem:[#allocation2] sm:$0x1] %vm392_vm9, %v390_v42  ;;  %v720_v42 = vld [vmem:[#allocation2 + $0x10] sm:$0x1] }
  0x99   : > { %v10157_v41 = vpop.permute.xlu1 %622 }
  0x9a   : > { %v10161_v44 = vpop.permute.xlu0 %562  ;;  %v10178_v54 = vld [vmem:[#allocation2 + $0x18] sm:$0x1] }
  0x9b   : > { %v10197_v61 = vsel %vm15988_vm12, %v10161_v44, %v10155_v39  ;;  %v618_v63 = vld [vmem:[#allocation2 + $0x18] sm:$0x1] }
  0x9c   : > { %vm15946_vm0 = vcmp.ne.s16.totalorder %v10197_v61, 0  ;;  %v561_v19 = vld [vmem:[#allocation2 + $0x18] sm:$0x1] }
  0x9d   : > { %v10159_v43 = vpop.permute.xlu1 %673  ;;  %v10234_v26 = vld [vmem:[#allocation2 + $0x18] sm:$0x1] }
  0x9e   : > { %v10163_v46 = vpop.permute.xlu0 %620  ;;  %v558_v47 = vld [vmem:[#allocation2] sm:$0x1]  ;;  %v721_v50 = vld [vmem:[#allocation2 + $0x18] sm:$0x1] }
  0x9f   : > { %v10165_v48 = vld [vmem:[#allocation2] sm:$0x1]  ;;  %574 = vrot.lane.b32.xlu1 %v558_v47, %s9974_s19  ;;  %vm15944_vm4 = vcmp.ne.s16.totalorder %v10163_v46, 0 }
  0xa0   : > { %522 = vrot.lane.b32.xlu0 %v10165_v48, %s16045_s18  ;;  %v10180_v55 = vld [vmem:[#allocation2] sm:$0x1] }
  0xa1   : > { %v527_v45 = vpop.permute.xlu1 %526  ;;  %v619_v25 = vld [vmem:[#allocation2] sm:$0x1] }
  0xa2   : > { %v10176_v53 = vpop.permute.xlu0 %671  ;;  %v536_v58 = vsel %vm518_vm11, %v10104_v27, %v527_v45  ;;  %v468_v49 = vld [vmem:[#allocation2] sm:$0x1] }
  0xa3   : > { %687 = vrot.lane.b32.xlu1 %v10178_v54, %s9974_s19  ;;  %v539_v0 = vunpack.c.l.bf16 %v536_v58  ;;  %vm15943_vm2 = vcmp.ne.s16.totalorder %v10176_v53, 0  ;;  %v471_v57 = vunpack.c.l.bf16 %v468_v49  ;;  %v723_v58 = vunpack.c.l.bf16 %v720_v42 }
  0xa4   : > { %434 = vrot.lane.b32.xlu0 %v10180_v55, %s9974_s19 }
  0xa5   : > { %v579_v51 = vpop.permute.xlu1 %578  ;;  %v545_v14 = vrot.slane %v539_v0, 4  ;;  %v729_v2 = vrot.slane %v723_v58, 2 }
  0xa6   : > { %v10199_v62 = vpop.permute.xlu0 %524  ;;  %v587_v23 = vsel %vm15945_vm3, %v561_v19, %v579_v51  ;;  %v10256_v19 = vsel %vm15989_vm5, %v10163_v46, %v10157_v41  ;;  %vm15952_vm3 = vcmp.ne.s16.totalorder %v10161_v44, 0 }
  0xa7   : > { %v530_v1 = vsel %vm528_vm13, %v10199_v62, %v527_v45  ;;  %761 = vrot.lane.b32.xlu1 %v10189_v59, %s16045_s18  ;;  %vm15949_vm8 = vcmp.ne.s16.totalorder %v10256_v19, 0 }
  0xa8   : > { %636 = vrot.lane.b32.xlu0 %v618_v63, %s16045_s18  ;;  %v535_v6 = vsel %vm15947_vm14, %v10117_v30, %v530_v1  ;;  %v724_v63 = vunpack.c.l.bf16 %v721_v50  ;;  %v477_v1 = vrot.slane %v471_v57, 6 }
  0xa9   : > { %v10192_v60 = vpop.permute.xlu1 %634  ;;  %v538_v8 = vunpack.c.l.bf16 %v535_v6 }
  0xaa   : > { %v10216_v13 = vpop.permute.xlu0 %576  ;;  %v730_v4 = vrot.slane %v724_v63, 2 }
  0xab   : > { %v581_v15 = vsel %vm440_vm15, %v10216_v13, %v579_v51  ;;  %759 = vrot.lane.b32.xlu1 %v10209_v7, %s16045_s18  ;;  %v544_v18 = vrot.slane %v538_v8, 4 }
  0xac   : > { %749 = vrot.lane.b32.xlu0 %v10093_v21, %s16011_s21  ;;  %v586_v20 = vsel %vm15946_vm0, %v10110_v28, %v581_v15  ;;  %v9764_v6 = vpack.i.bf16 %v730_v4, %v729_v2  ;;  %v719_v2 = vld [vmem:[#allocation2 + $0x8] sm:$0x1]  ;;  %v611_v4 = vld [vmem:[#allocation2 + $0x10] sm:$0x1] }
  0xad   : > { %v10213_v10 = vpop.permute.xlu1 %683  ;;  %v589_v24 = vunpack.c.l.bf16 %v586_v20  ;;  %v9759_v30 = vpack.i.bf16 %v545_v14, %v544_v18 }
  0xae   : > { %v694_v22 = vsel %vm15943_vm2, %v10124_v31, %v10213_v10  ;;  %v633_v21 = vpop.permute.xlu0 %632  ;;  %v590_v31 = vunpack.c.l.bf16 %v587_v23 }
  0xaf   : > { %v643_v27 = vsel %vm15944_vm4, %v619_v25, %v633_v21  ;;  %9755 = vrot.lane.b32.xlu1 %v9754_v16, %s16043_s22  ;;  %v697_v28 = vunpack.c.l.bf16 %v694_v22  ;;  %v595_v47 = vrot.slane %v589_v24, 2  ;;  %v10261_v22 = vsel %vm366_vm1, %v10176_v53, %v10159_v43 }
  0xb0   : > { %763 = vrot.lane.b32.xlu0 %v10234_v26, %s16045_s18  ;;  %v646_v40 = vunpack.c.l.bf16 %v643_v27  ;;  %v596_v56 = vrot.slane %v590_v31, 2  ;;  %vm15948_vm9 = vcmp.ne.s16.totalorder %v10261_v22, 0  ;;  %v638_v23 = vsel %vm528_vm13, %v633_v21, %v10192_v60 }
  0xb1   : > { %v703_v51 = vrot.slane %v697_v28, 4  ;;  %v10247_v8 = vpop.permute.xlu1 %424  ;;  %vm15950_vm4 = vcmp.ne.s16.totalorder %v10159_v43, 0 }
  0xb2   : > { %v652_v45 = vrot.slane %v646_v40, 6  ;;  %v9769_v0 = vpack.i.bf16 %v596_v56, %v595_v47  ;;  %16073 = vst [vmem:[#allocation13_spill] sm:$0xff] %v10247_v8  ;;  %v686_v14 = vpop.permute.xlu0 %685  ;;  %vm15978_vm2 = vcmp.ne.s16.totalorder %v10247_v8, 0  ;;  %v644_v40 = vsel %vm15949_vm8, %v10132_v33, %v638_v23 }
  0xb3   : > { %v689_v24 = vsel %vm440_vm15, %v10213_v10, %v686_v14  ;;  %vm461_vm8 = vcmask 121856   ;;  %v647_v58 = vunpack.c.l.bf16 %v644_v40  ;;  %v9979_v23 = vmov 0.0  }
  0xb4   : > { %9760 = vrot.lane.b32.xlu0 %v9759_v30, %s16026_s17  ;;  %655 = vrot.lane.b32.xlu1 %v652_v45, %s15993_s13  ;;  %v695_v42 = vsel %vm15948_vm9, %v10139_v35, %v689_v24  ;;  %vm15951_vm9 = vcmp.ne.s16.totalorder %v10157_v41, 0  ;;  %402 = vst [vmem:[#allocation4 + $0x28] sm:$0xff] %v9979_v23  ;;  %401 = vst [vmem:[#allocation4 + $0x20] sm:$0xff] %v9979_v23  ;;  %v613_v24 = vunpack.c.l.bf16 %v611_v4 }
  0xb5   : > { %v437_v15 = vpop.permute.xlu1 %436  ;;  %v698_v63 = vunpack.c.l.bf16 %v695_v42  ;;  %945 = vmatprep.mubr.f32.mxu0 %v9979_v23 }
  0xb6   : > { %v10249_v16 = vpop.permute.xlu0 %422  ;;  %615 = vst [vmem:[#allocation4 + $0x18] sm:$0x3] %v613_v24 }
  0xb7   : > { %v10274_v28 = vsel %vm15959_vm6, %v10249_v16, %v10247_v8  ;;  %vm428_vm0 = vcmp.ne.s16.totalorder %v10249_v16, 0 }
  0xb8   : > { %706 = vrot.lane.b32.xlu0 %v703_v51, %s15991_s12  ;;  %9770 = vrot.lane.b32.xlu1 %v9769_v0, %s16009_s15  ;;  %vm15987_vm14 = vcmp.ne.s16.totalorder %v10274_v28, 0 }
  0xb9   : > { %v10251_v18 = vpop.permute.xlu1 %747 }
  0xba   : > { %16074 = vst [vmem:[#allocation14_spill] sm:$0xff] %v10251_v18  ;;  %v439_v20 = vpop.permute.xlu0 %438 }
  0xbb   : > { %v442_v30 = vsel %vm440_vm15, %v437_v15, %v439_v20 }
  0xbc   : > { %480 = vrot.lane.b32.xlu0 %v477_v1, %s16043_s22 }
  0xc0   : > { %9765 = vrot.lane.b32.xlu0 %v9764_v6, %s15957_s23  ;;  %v610_v6 = vld [vmem:[#allocation2 + $0x8] sm:$0x1] }
 0x111   : > { %v575_v25 = vpop.permute.xlu1 %574 }
 0x112   : > { %v523_v27 = vpop.permute.xlu0 %522  ;;  %v580_v31 = vsel %vm440_vm15, %v575_v25, %v10216_v13  ;;  %v612_v25 = vunpack.c.l.bf16 %v610_v6 }
 0x113   : > { %v529_v21 = vsel %vm528_vm13, %v523_v27, %v10199_v62  ;;  %v585_v62 = vsel %vm15952_vm3, %v10126_v32, %v580_v31  ;;  %vm15954_vm3 = vcmp.ne.s16.totalorder %v10251_v18, 0 }
 0x114   : > { %v534_v10 = vsel %vm15953_vm7, %v10165_v48, %v529_v21  ;;  %v448_v48 = vsel %vm15978_vm2, %v10147_v36, %v442_v30  ;;  %v588_v0 = vunpack.c.l.bf16 %v585_v62  ;;  %v704_v21 = vrot.slane %v698_v63, 4  ;;  %614 = vst [vmem:[#allocation4 + $0x10] sm:$0x3] %v612_v25 }
 0x115   : > { %v688_v13 = vpop.permute.xlu1 %687  ;;  %v537_v47 = vunpack.c.l.bf16 %v534_v10  ;;  %v451_v51 = vunpack.c.l.bf16 %v448_v48  ;;  %v653_v48 = vrot.slane %v647_v58, 6  ;;  %vm486_vm7 = vcmask 130048  }
 0x116   : > { %v435_v45 = vpop.permute.xlu0 %434  ;;  %v690_v33 = vsel %vm440_vm15, %v686_v14, %v688_v13  ;;  %v594_v40 = vrot.slane %v588_v0, 2 }
 0x117   : > { %v441_v49 = vsel %vm440_vm15, %v435_v45, %v437_v15  ;;  %v446_v35 = vsel %vm428_vm0, %v10180_v55, %v435_v45  ;;  %v696_v36 = vsel %vm15950_vm4, %v10178_v54, %v690_v33 }
 0x118   : > { %v447_v32 = vsel %vm15987_vm14, %v10137_v34, %v441_v49  ;;  %v449_v50 = vunpack.c.l.bf16 %v446_v35  ;;  %v699_v56 = vunpack.c.l.bf16 %v696_v36  ;;  %v543_v34 = vrot.slane %v537_v47, 4 }
 0x119   : > { %v450_v57 = vunpack.c.l.bf16 %v447_v32  ;;  %v762_v1 = vpop.permute.xlu1 %761 }
 0x11a   : > { %455 = vrot.lane.b32.xlu1 %v449_v50, %s16011_s21  ;;  %v637_v55 = vpop.permute.xlu0 %636  ;;  %v705_v15 = vrot.slane %v699_v56, 4 }
 0x11b   : > { %v639_v54 = vsel %vm528_vm13, %v10192_v60, %v637_v55  ;;  %v9774_v14 = vpack.i.bf16 %v451_v51, %v450_v57  ;;  %v722_v60 = vunpack.c.l.bf16 %v719_v2 }
 0x11c   : > { %v645_v20 = vsel %vm15951_vm9, %v10113_v29, %v639_v54  ;;  %v9784_v42 = vpack.i.bf16 %v705_v15, %v704_v21  ;;  %v810_v21 = vld [vmem:[%s15940_s6 + $0x10] sm:$0xff] }
 0x11d   : > { %v648_v27 = vunpack.c.l.bf16 %v645_v20  ;;  %9775 = vrot.lane.b32.xlu0 %v9774_v14, %s16011_s21  ;;  %v760_v30 = vpop.permute.xlu1 %759  ;;  %v728_v62 = vrot.slane %v722_v60, 2  ;;  %v809_v60 = vld [vmem:[%s15940_s6 + $0x8] sm:$0xff] }
 0x11e   : > { %546 = vrot.lane.b32.xlu1 %v543_v34, %s16026_s17  ;;  %v10323_v31 = vpop.permute.xlu0 %749  ;;  %v765_v13 = vsel %vm528_vm13, %v760_v30, %v762_v1  ;;  %v808_v30 = vld [vmem:[%s15940_s6] sm:$0xff] }
 0x11f   : > { %16075 = vst [vmem:[#allocation15_spill] sm:$0xff] %v10323_v31  ;;  %v654_v29 = vrot.slane %v648_v27, 6  ;;  %v10328_v10 = vsel %vm461_vm8, %v10251_v18, %v10323_v31  ;;  %vm755_vm9 = vcmp.ne.s16.totalorder %v10323_v31, 0  ;;  %v770_v56 = vsel %vm15954_vm3, %v10209_v7, %v765_v13 }
 0x120   : > { %16076 = vst [vmem:[#allocation16_spill] sm:$0xff] %v10328_v10  ;;  %vm16008_vm4 = vcmp.ne.s16.totalorder %v10328_v10, 0  ;;  %v773_v55 = vunpack.c.l.bf16 %v770_v56  ;;  %vm15960_vm3 = vcmask 916480  }
 0x121   : > { %597 = vrot.lane.b32.xlu0 %v594_v40, %s16009_s15  ;;  %v9756_v47 = vpop.permute.xlu1 %9755  ;;  %v9779_v33 = vpack.i.bf16 %v654_v29, %v653_v48  ;;  %v811_v29 = vld [vmem:[%s15940_s6 + $0x18] sm:$0xff]  ;;  %v812_v40 = vld [vmem:[%s15940_s6 + $0x20] sm:$0xff]  ;;  %v814_v48 = vld [vmem:[%s15940_s6 + $0x30] sm:$0xff] }
 0x122   : > { %9785 = vrot.lane.b32.xlu1 %v9784_v42, %s15991_s12  ;;  %v764_v45 = vpop.permute.xlu0 %763  ;;  %v9758_v36 = vunpack.i.h.bf16 %v9756_v47  ;;  %v9757_v32 = vunpack.i.l.bf16 %v9756_v47  ;;  %v813_v42 = vld [vmem:[%s15940_s6 + $0x28] sm:$0xff] }
 0x123   : > { %v766_v49 = vsel %vm528_vm13, %v762_v1, %v764_v45  ;;  %v772_v35 = vsel %vm755_vm9, %v10234_v26, %v764_v45 }
 0x124   : > { %v771_v50 = vsel %vm16008_vm4, %v10189_v59, %v766_v49  ;;  %v775_v51 = vunpack.c.l.bf16 %v772_v35  ;;  %v488_v57 = vsel %vm486_vm7, %v9757_v32, %v9758_v36 }
 0x125   : > { %9780 = vrot.lane.b32.xlu0 %v9779_v33, %s15993_s13  ;;  %v774_v58 = vunpack.c.l.bf16 %v771_v50  ;;  %492 = vst [vmem:[#allocation4 + $0x8] sm:$0xc] %v488_v57 }
 0x126   : > { %731 = vrot.lane.b32.xlu1 %v728_v62, %s15957_s23  ;;  %v9761_v26 = vpop.permute.xlu0 %9760  ;;  %v10349_v1 = vpop.permute.xlu1 %655  ;;  %v815_v62 = vld [vmem:[%s15940_s6 + $0x38] sm:$0xff]  ;;  %s321_s23 = scalar_lea.vmem %s15935_s1, %s10043_s7 }
 0x127   : > { %v9763_v63 = vunpack.i.h.bf16 %v9761_v26  ;;  %v9762_v0 = vunpack.i.l.bf16 %v9761_v26  ;;  %v9789_v59 = vpack.i.bf16 %v775_v51, %v774_v58 }
 0x129   : > { %v553_v2 = vsel %vm366_vm1, %v9762_v0, %v9763_v63  ;;  %9790 = vrot.lane.b32.xlu0 %v9789_v59, %s15955_s20 }
 0x12a   : > { %557 = vst [vmem:[#allocation4 + $0x8] sm:$0x30] %v553_v2  ;;  %779 = vrot.lane.b32.xlu1 %v773_v55, %s15955_s20  ;;  %v707_v7 = vpop.permute.xlu0 %706  ;;  %v9771_v4 = vpop.permute.xlu1 %9770 }
 0x12b   : > { %v9773_v6 = vunpack.i.h.bf16 %v9771_v4  ;;  %v9772_v54 = vunpack.i.l.bf16 %v9771_v4 }
 0x12d   : > { %v605_v14 = vsel %vm15989_vm5, %v9772_v54, %v9773_v6  ;;  %818 = vperm.xlu0 %9794, %v808_v30  }
 0x12e   : > { %v481_v34 = vpop.permute.xlu0 %480  ;;  %609 = vst [vmem:[#allocation4 + $0x8] sm:$0xc0] %v605_v14  ;;  %823 = vperm.xlu1 %9795, %v809_v60  }
 0x12f   : > { %v487_v15 = vsel %vm486_vm7, %v481_v34, %v9757_v32 }
 0x130   : > { %491 = vst [vmem:[#allocation4] sm:$0xc] %v487_v15 }
 0x131   : > { %833 = vperm.xlu0 %9794, %v811_v29  }
 0x132   : > { %v9766_v20 = vpop.permute.xlu0 %9765  ;;  %828 = vperm.xlu1 %9795, %v810_v21  }
 0x133   : > { %v9768_v24 = vunpack.i.h.bf16 %v9766_v20  ;;  %v9767_v25 = vunpack.i.l.bf16 %v9766_v20 }
 0x135   : > { %v739_v27 = vsel %vm15960_vm3, %v9767_v25, %v9768_v24  ;;  %843 = vperm.xlu0 %9794, %v813_v42  }
 0x136   : > { %743 = vst [vmem:[#allocation4 + $0x18] sm:$0xc0] %v739_v27  ;;  %838 = vperm.xlu1 %9795, %v812_v40  }
 0x139   : > { %853 = vperm.xlu0 %9794, %v815_v62   ;;  %v792_v62 = vld [vmem:[%s15937_s3] sm:$0xff] }
 0x13a   : > { %848 = vperm.xlu1 %9795, %v814_v48  }
 0x18c   : > { %v456_v13 = vpop.permute.xlu1 %455 }
 0x18f   : > { %v9776_v45 = vpop.permute.xlu0 %9775 }
 0x190   : > { %v9778_v47 = vunpack.i.h.bf16 %v9776_v45  ;;  %v9777_v33 = vunpack.i.l.bf16 %v9776_v45  ;;  %v547_v49 = vpop.permute.xlu1 %546  ;;  %v794_v45 = vld [vmem:[%s15937_s3 + $0x10] sm:$0xff] }
 0x191   : > { %v552_v35 = vsel %vm366_vm1, %v547_v49, %v9762_v0  ;;  %v797_v49 = vld [vmem:[%s15937_s3 + $0x28] sm:$0xff] }
 0x192   : > { %v462_v36 = vsel %vm461_vm8, %v456_v13, %v9777_v33  ;;  %v463_v32 = vsel %vm461_vm8, %v9777_v33, %v9778_v47  ;;  %556 = vst [vmem:[#allocation4] sm:$0x30] %v552_v35  ;;  %v793_v13 = vld [vmem:[%s15937_s3 + $0x8] sm:$0xff]  ;;  %v795_v47 = vld [vmem:[%s15937_s3 + $0x18] sm:$0xff]  ;;  %v796_v33 = vld [vmem:[%s15937_s3 + $0x20] sm:$0xff] }
 0x193   : > { %466 = vst [vmem:[#allocation4] sm:$0x3] %v462_v36  ;;  %467 = vst [vmem:[#allocation4 + $0x8] sm:$0x3] %v463_v32  ;;  %v598_v50 = vpop.permute.xlu0 %597  ;;  %v798_v35 = vld [vmem:[%s15937_s3 + $0x30] sm:$0xff]  ;;  %v799_v36 = vld [vmem:[%s15937_s3 + $0x38] sm:$0xff] }
 0x194   : > { %v604_v51 = vsel %vm15989_vm5, %v598_v50, %v9772_v54  ;;  %v9786_v56 = vpop.permute.xlu1 %9785 }
 0x195   : > { %608 = vst [vmem:[#allocation4] sm:$0xc0] %v604_v51  ;;  %v9788_v57 = vunpack.i.h.bf16 %v9786_v56  ;;  %v9787_v58 = vunpack.i.l.bf16 %v9786_v56 }
 0x197   : > { %v713_v26 = vsel %vm15990_vm10, %v707_v7, %v9787_v58  ;;  %v714_v63 = vsel %vm15990_vm10, %v9787_v58, %v9788_v57  ;;  %v9781_v59 = vpop.permute.xlu0 %9780 }
 0x198   : > { %717 = vst [vmem:[#allocation4 + $0x10] sm:$0x30] %v713_v26  ;;  %718 = vst [vmem:[#allocation4 + $0x18] sm:$0x30] %v714_v63  ;;  %v9783_v0 = vunpack.i.h.bf16 %v9781_v59  ;;  %v9782_v55 = vunpack.i.l.bf16 %v9781_v59  ;;  %v732_v2 = vpop.permute.xlu1 %731 }
 0x199   : > { %v738_v4 = vsel %vm15960_vm3, %v732_v2, %v9767_v25  ;;  %vm16078_vm3 = vcmp.ne.s16.totalorder %v10174_v52, 0 }
 0x19a   : > { %v662_v6 = vsel %vm15988_vm12, %v10349_v1, %v9782_v55  ;;  %v663_v54 = vsel %vm15988_vm12, %v9782_v55, %v9783_v0  ;;  %742 = vst [vmem:[#allocation4 + $0x10] sm:$0xc0] %v738_v4  ;;  %v801_v27 = vld [vmem:[#allocation4 + $0x8] sm:$0xff] }
 0x19b   : > { %666 = vst [vmem:[#allocation4 + $0x10] sm:$0xc] %v662_v6  ;;  %667 = vst [vmem:[#allocation4 + $0x18] sm:$0xc] %v663_v54  ;;  %v9791_v14 = vpop.permute.xlu0 %9790 }
 0x19c   : > { %v9793_v7 = vunpack.i.h.bf16 %v9791_v14  ;;  %v9792_v34 = vunpack.i.l.bf16 %v9791_v14  ;;  %v780_v15 = vpop.permute.xlu1 %779  ;;  %v800_v60 = vld [vmem:[#allocation4] sm:$0xff] }
 0x19e   : > { %v787_v20 = vsel %vm15959_vm6, %v9792_v34, %v9793_v7  ;;  %v786_v24 = vsel %vm15959_vm6, %v780_v15, %v9792_v34  ;;  %vm856_vm6 = vcmask 261120  }
 0x19f   : > { %791 = vst [vmem:[#allocation4 + $0x28] sm:$0x3] %v787_v20  ;;  %790 = vst [vmem:[#allocation4 + $0x20] sm:$0x3] %v786_v24 }
 0x1a2   : > { %v803_v25 = vld [vmem:[#allocation4 + $0x18] sm:$0xff]  ;;  %v802_v30 = vld [vmem:[#allocation4 + $0x10] sm:$0xff] }
 0x1a3   : > { %v9493_v1 = vpack.c.bf16 %v803_v25, %v801_v27  ;;  %v9495_v21 = vpack.c.bf16 %v802_v30, %v800_v60 }
 0x1a5   : > { %9494 = vmatprep.subr.bf16.mxu0 %v9493_v1 }
 0x1a6   : > { %9496 = vmatpush1.bf16.msra.mxu0 %v9495_v21  ;;  %v805_v29 = vld [vmem:[#allocation4 + $0x28] sm:$0xff]  ;;  %v804_v40 = vld [vmem:[#allocation4 + $0x20] sm:$0xff] }
 0x1a7   : > { %v9497_v42 = vpack.c.bf16 %v9979_v23, %v805_v29  ;;  %v9499_v48 = vpack.c.bf16 %v9979_v23, %v804_v40 }
 0x1a9   : > { %9498 = vmatprep.subr.bf16.mxu0 %v9497_v42 }
 0x1aa   : > { %9500 = vmatpush1.bf16.msra.mxu0 %v9499_v48 }
 0x1ac   : > { %v819_v51 = vpop.permute.xlu0 %818 }
 0x1ad   : > { %9273 = vmatmul.mubr.msk.f32.vlgmr.msra.gmra.mrb[0].mxu0 %vm856_vm6, %v792_v62  ;;  %v824_v57 = vpop.permute.xlu1 %823 }
 0x1ae   : > { %951 = vmatprep.mubr.f32.mxu0 %v9979_v23 }
 0x1b0   : > { %v834_v20 = vpop.permute.xlu0 %833 }
 0x1b1   : > { %9274 = vmatmul.mubr.msk.f32.gmra.mrb[2].mxu0 %vm856_vm6, %v793_v13  ;;  %v829_v7 = vpop.permute.xlu1 %828 }
 0x1b2   : > { %957 = vmatprep.mubr.f32.mxu0 %v9979_v23 }
 0x1b5   : > { %9275 = vmatmul.mubr.msk.f32.gmra.mrb[4].mxu0 %vm856_vm6, %v794_v45  ;;  %v839_v13 = vpop.permute.xlu1 %838 }
 0x1b6   : > { %963 = vmatprep.mubr.f32.mxu0 %v9979_v23 }
 0x1b9   : > { %9276 = vmatmul.mubr.msk.f32.gmra.mrb[6].mxu0 %vm856_vm6, %v795_v47 }
 0x1ba   : > { %969 = vmatprep.mubr.f32.mxu0 %v9979_v23 }
 0x1bd   : > { %9277 = vmatmul.mubr.msk.f32.gmra.mrb[8].mxu0 %vm856_vm6, %v796_v33  ;;  %v844_v33 = vpop.permute.xlu0 %843 }
 0x1be   : > { %975 = vmatprep.mubr.f32.mxu0 %v9979_v23 }
 0x1c1   : > { %9278 = vmatmul.mubr.msk.f32.gmra.mrb[10].mxu0 %vm856_vm6, %v797_v49 }
 0x1c2   : > { %981 = vmatprep.mubr.f32.mxu0 %v9979_v23 }
 0x1c5   : > { %9279 = vmatmul.mubr.msk.f32.gmra.mrb[12].mxu0 %vm856_vm6, %v798_v35 }
 0x1c6   : > { %987 = vmatprep.mubr.f32.mxu0 %v9979_v23 }
 0x1c9   : > { %9280 = vmatmul.mubr.msk.f32.gmra.mrb[14].mxu0 %vm856_vm6, %v799_v36  ;;  %vm1046_vm6 = vcmask 1048448  }
 0x280   : > { %v947_v32 = vpop.f32.mrb[0].mxu0 }
 0x281   : > { %v949_v50 = vpop.f32.mrb[1].mxu0  ;;  %v948_v56 = vadd.f32 %v947_v32, %v819_v51 }
 0x282   : > { %v950_v58 = vadd.f32 %v949_v50, %v819_v51 }
 0x283   : > { %v994_v55 = vmax.f32 %v948_v56, 0.0 }
 0x284   : > { %v953_v26 = vpop.f32.mrb[2].mxu0  ;;  %v995_v4 = vmax.f32 %v950_v58, 0.0 }
 0x285   : > { %v954_v63 = vadd.f32 %v953_v26, %v824_v57  ;;  %v955_v59 = vpop.f32.mrb[3].mxu0 }
 0x286   : > { %v956_v0 = vadd.f32 %v955_v59, %v824_v57 }
 0x287   : > { %v996_v2 = vmax.f32 %v954_v63, 0.0 }
 0x288   : > { %v997_v23 = vmax.f32 %v956_v0, 0.0  ;;  %v959_v6 = vpop.f32.mrb[4].mxu0  ;;  %v849_v0 = vpop.permute.xlu1 %848 }
 0x289   : > { %v10434_v54 = vpack.c.bf16 %v996_v2, %v994_v55  ;;  %v961_v14 = vpop.f32.mrb[5].mxu0  ;;  %v960_v15 = vadd.f32 %v959_v6, %v829_v7 }
 0x28a   : > { %v10436_v34 = vpack.c.bf16 %v997_v23, %v995_v4  ;;  %v962_v24 = vadd.f32 %v961_v14, %v829_v7  ;;  %v854_v4 = vpop.permute.xlu0 %853 }
 0x28b   : > { %1018 = vst [vmem:[#allocation2 + $0x8] sm:$0xff] %v10434_v54  ;;  %1101 = vrot.lane.b32.xlu0 %v10434_v54, %s9974_s19  ;;  %1034 = vrot.lane.b32.xlu1 %v10434_v54, %s9971_s16  ;;  %v998_v1 = vmax.f32 %v960_v15, 0.0 }
 0x28c   : > { %1019 = vst [vmem:[#allocation2 + $0x10] sm:$0xff] %v10436_v34  ;;  %v965_v27 = vpop.f32.mrb[6].mxu0  ;;  %v999_v29 = vmax.f32 %v962_v24, 0.0 }
 0x28d   : > { %v966_v25 = vadd.f32 %v965_v27, %v834_v20  ;;  %v967_v60 = vpop.f32.mrb[7].mxu0 }
 0x28e   : > { %v968_v30 = vadd.f32 %v967_v60, %v834_v20 }
 0x28f   : > { %v1000_v21 = vmax.f32 %v966_v25, 0.0  ;;  %1632 = vrot.lane.b32.xlu0 %v10434_v54, %s16045_s18  ;;  %1314 = vrot.lane.b32.xlu1 %v10434_v54, %s16045_s18 }
 0x290   : > { %v1001_v40 = vmax.f32 %v968_v30, 0.0  ;;  %v971_v42 = vpop.f32.mrb[8].mxu0 }
 0x291   : > { %v10448_v48 = vpack.c.bf16 %v1000_v21, %v998_v1  ;;  %v973_v62 = vpop.f32.mrb[9].mxu0  ;;  %v972_v47 = vadd.f32 %v971_v42, %v839_v13 }
 0x292   : > { %v10450_v45 = vpack.c.bf16 %v1001_v40, %v999_v29  ;;  %v974_v49 = vadd.f32 %v973_v62, %v839_v13 }
 0x293   : > { %1020 = vst [vmem:[#allocation2 + $0x28] sm:$0xff] %v10448_v48  ;;  %1772 = vrot.lane.b32.xlu0 %v10434_v54, %s9974_s19  ;;  %1466 = vrot.lane.b32.xlu1 %v10434_v54, %s9974_s19  ;;  %v1002_v51 = vmax.f32 %v972_v47, 0.0 }
 0x294   : > { %1021 = vst [vmem:[#allocation2 + $0x30] sm:$0xff] %v10450_v45  ;;  %v977_v35 = vpop.f32.mrb[10].mxu0  ;;  %v1003_v57 = vmax.f32 %v974_v49, 0.0 }
 0x295   : > { %v978_v36 = vadd.f32 %v977_v35, %v844_v33  ;;  %v979_v32 = vpop.f32.mrb[11].mxu0 }
 0x296   : > { %v980_v50 = vadd.f32 %v979_v32, %v844_v33 }
 0x297   : > { %v1004_v56 = vmax.f32 %v978_v36, 0.0  ;;  %1316 = vrot.lane.b32.xlu0 %v10436_v34, %s16045_s18  ;;  %1241 = vrot.lane.b32.xlu1 %v10434_v54, %s16043_s22 }
 0x298   : > { %v1005_v58 = vmax.f32 %v980_v50, 0.0  ;;  %v983_v26 = vpop.f32.mrb[12].mxu0 }
 0x299   : > { %v10462_v63 = vpack.c.bf16 %v1004_v56, %v1002_v51  ;;  %v985_v59 = vpop.f32.mrb[13].mxu0  ;;  %v984_v2 = vadd.f32 %v983_v26, %v849_v0 }
 0x29a   : > { %v10464_v55 = vpack.c.bf16 %v1005_v58, %v1003_v57  ;;  %v986_v23 = vadd.f32 %v985_v59, %v849_v0 }
 0x29b   : > { %1022 = vst [vmem:[#allocation2 + $0x48] sm:$0xff] %v10462_v63  ;;  %1468 = vrot.lane.b32.xlu0 %v10436_v34, %s9974_s19  ;;  %1103 = vrot.lane.b32.xlu1 %v10436_v34, %s9974_s19  ;;  %v1006_v20 = vmax.f32 %v984_v2, 0.0 }
 0x29c   : > { %1023 = vst [vmem:[#allocation2 + $0x50] sm:$0xff] %v10464_v55  ;;  %v989_v6 = vpop.f32.mrb[14].mxu0  ;;  %v1007_v27 = vmax.f32 %v986_v23, 0.0 }
 0x29d   : > { %v990_v14 = vadd.f32 %v989_v6, %v854_v4  ;;  %v991_v7 = vpop.f32.mrb[15].mxu0 }
 0x29e   : > { %v992_v15 = vadd.f32 %v991_v7, %v854_v4 }
 0x29f   : > { %v1008_v24 = vmax.f32 %v990_v14, 0.0  ;;  %1243 = vrot.lane.b32.xlu0 %v10436_v34, %s16043_s22  ;;  %1059 = vrot.lane.b32.xlu1 %v10436_v34, %s16028_s14 }
 0x2a0   : > { %v1009_v25 = vmax.f32 %v992_v15, 0.0 }
 0x2a1   : > { %v10476_v60 = vpack.c.bf16 %v1008_v24, %v1006_v20 }
 0x2a2   : > { %v10478_v30 = vpack.c.bf16 %v1009_v25, %v1007_v27 }
 0x2a3   : > { %1024 = vst [vmem:[#allocation2 + $0x68] sm:$0xff] %v10476_v60  ;;  %1036 = vrot.lane.b32.xlu0 %v10448_v48, %s9971_s16  ;;  %1634 = vrot.lane.b32.xlu1 %v10436_v34, %s16045_s18 }
 0x2a4   : > { %1025 = vst [vmem:[#allocation2 + $0x70] sm:$0xff] %v10478_v30 }
 0x2a7   : > { %1320 = vrot.lane.b32.xlu0 %v10448_v48, %s16045_s18  ;;  %1774 = vrot.lane.b32.xlu1 %v10436_v34, %s9974_s19 }
 0x2ab   : > { %1472 = vrot.lane.b32.xlu0 %v10448_v48, %s9974_s19  ;;  %1107 = vrot.lane.b32.xlu1 %v10448_v48, %s9974_s19 }
 0x2af   : > { %1247 = vrot.lane.b32.xlu0 %v10448_v48, %s16043_s22  ;;  %1322 = vrot.lane.b32.xlu1 %v10450_v45, %s16045_s18 }
 0x2b3   : > { %1638 = vrot.lane.b32.xlu0 %v10448_v48, %s16045_s18  ;;  %1474 = vrot.lane.b32.xlu1 %v10450_v45, %s9974_s19 }
 0x2b7   : > { %1778 = vrot.lane.b32.xlu0 %v10448_v48, %s9974_s19  ;;  %1249 = vrot.lane.b32.xlu1 %v10450_v45, %s16043_s22 }
 0x2bb   : > { %1109 = vrot.lane.b32.xlu0 %v10450_v45, %s9974_s19  ;;  %1640 = vrot.lane.b32.xlu1 %v10450_v45, %s16045_s18 }
 0x2bf   : > { %1061 = vrot.lane.b32.xlu0 %v10450_v45, %s16028_s14  ;;  %1780 = vrot.lane.b32.xlu1 %v10450_v45, %s9974_s19 }
 0x2c3   : > { %1113 = vrot.lane.b32.xlu0 %v10462_v63, %s9974_s19  ;;  %1038 = vrot.lane.b32.xlu1 %v10462_v63, %s9971_s16 }
 0x2c7   : > { %1253 = vrot.lane.b32.xlu0 %v10462_v63, %s16043_s22  ;;  %1326 = vrot.lane.b32.xlu1 %v10462_v63, %s16045_s18 }
 0x2cb   : > { %1644 = vrot.lane.b32.xlu0 %v10462_v63, %s16045_s18  ;;  %1478 = vrot.lane.b32.xlu1 %v10462_v63, %s9974_s19 }
 0x2cf   : > { %1328 = vrot.lane.b32.xlu0 %v10464_v55, %s16045_s18  ;;  %1115 = vrot.lane.b32.xlu1 %v10464_v55, %s9974_s19 }
 0x2d3   : > { %1480 = vrot.lane.b32.xlu0 %v10464_v55, %s9974_s19  ;;  %1063 = vrot.lane.b32.xlu1 %v10464_v55, %s16028_s14 }
 0x2d7   : > { %1040 = vrot.lane.b32.xlu0 %v10476_v60, %s9971_s16  ;;  %1255 = vrot.lane.b32.xlu1 %v10464_v55, %s16043_s22 }
 0x2db   : > { %1332 = vrot.lane.b32.xlu0 %v10476_v60, %s16045_s18  ;;  %1646 = vrot.lane.b32.xlu1 %v10464_v55, %s16045_s18 }
 0x2df   : > { %1484 = vrot.lane.b32.xlu0 %v10476_v60, %s9974_s19  ;;  %1119 = vrot.lane.b32.xlu1 %v10476_v60, %s9974_s19 }
 0x2e3   : > { %1259 = vrot.lane.b32.xlu0 %v10476_v60, %s16043_s22  ;;  %1334 = vrot.lane.b32.xlu1 %v10478_v30, %s16045_s18 }
 0x2e7   : > { %1650 = vrot.lane.b32.xlu0 %v10476_v60, %s16045_s18  ;;  %1486 = vrot.lane.b32.xlu1 %v10478_v30, %s9974_s19 }
 0x2eb   : > { %1121 = vrot.lane.b32.xlu0 %v10478_v30, %s9974_s19  ;;  %1261 = vrot.lane.b32.xlu1 %v10478_v30, %s16043_s22 }
 0x2ef   : > { %1065 = vrot.lane.b32.xlu0 %v10478_v30, %s16028_s14  ;;  %1652 = vrot.lane.b32.xlu1 %v10478_v30, %s16045_s18 }
 0x2fd   : > { %v10562_v1 = vpop.permute.xlu0 %1101  ;;  %v1035_v21 = vpop.permute.xlu1 %1034 }
 0x2fe   : > { %1047 = vst.msk [vmem:[#allocation2] sm:$0xff] %vm1046_vm6, %v1035_v21 }
 0x301   : > { %v10565_v29 = vpop.permute.xlu0 %1632  ;;  %v10567_v40 = vpop.permute.xlu1 %1314 }
 0x305   : > { %v10569_v42 = vpop.permute.xlu0 %1772  ;;  %v10571_v62 = vpop.permute.xlu1 %1466  ;;  %v10596_v58 = vld [vmem:[#allocation2] sm:$0xff] }
 0x309   : > { %v1317_v13 = vpop.permute.xlu0 %1316  ;;  %v10573_v47 = vpop.permute.xlu1 %1241 }
 0x30a   : > { %16077 = vst [vmem:[#allocation17_spill] sm:$0xff] %v10573_v47  ;;  %v1337_v33 = vsel %vm528_vm13, %v10567_v40, %v1317_v13  ;;  %v1358_v49 = vsel %vm518_vm11, %v10436_v34, %v1317_v13 }
 0x30b   : > { %1384 = vrot.lane.b32.xlu1 %v1358_v49, %s16026_s17  ;;  %v1357_v35 = vsel %vm16078_vm3, %v10434_v54, %v1337_v33 }
 0x30c   : > { %1382 = vrot.lane.b32.xlu0 %v1357_v35, %s16026_s17 }
 0x30d   : > { %v10585_v36 = vpop.permute.xlu0 %1468  ;;  %v1104_v32 = vpop.permute.xlu1 %1103 }
 0x30e   : > { %v1124_v50 = vsel %vm440_vm15, %v10562_v1, %v1104_v32 }
 0x30f   : > { %v1145_v51 = vsel %vm15978_vm2, %v10436_v34, %v1124_v50 }
 0x310   : > { %1171 = vrot.lane.b32.xlu1 %v1145_v51, %s16011_s21 }
 0x311   : > { %v10593_v56 = vpop.permute.xlu0 %1243  ;;  %v1060_v57 = vpop.permute.xlu1 %1059 }
 0x312   : > { %16079 = vst [vmem:[#allocation18_spill] sm:$0xff] %v10593_v56  ;;  %1071 = vst.msk [vmem:[#allocation2 + $0x18] sm:$0xff] %vm486_vm7, %v1060_v57 }
 0x314   : > { %1099 = vrot.lane.b32.xlu1 %v10596_v58, %s9974_s19 }
 0x315   : > { %v1037_v26 = vpop.permute.xlu0 %1036  ;;  %v10600_v59 = vpop.permute.xlu1 %1634 }
 0x316   : > { %1048 = vst.msk [vmem:[#allocation2 + $0x20] sm:$0xff] %vm1046_vm6, %v1037_v26 }
 0x318   : > { %1312 = vrot.lane.b32.xlu1 %v10596_v58, %s16045_s18 }
 0x319   : > { %v10605_v0 = vpop.permute.xlu0 %1320  ;;  %v10607_v2 = vpop.permute.xlu1 %1774  ;;  %v10609_v4 = vld [vmem:[#allocation2 + $0x18] sm:$0xff] }
 0x31a   : > { %1636 = vrot.lane.b32.xlu0 %v10609_v4, %s16045_s18 }
 0x31c   : > { %1464 = vrot.lane.b32.xlu1 %v10596_v58, %s9974_s19 }
 0x31d   : > { %v10615_v23 = vpop.permute.xlu0 %1472  ;;  %v10617_v6 = vpop.permute.xlu1 %1107  ;;  %v10639_v21 = vld [vmem:[#allocation2 + $0x20] sm:$0xff] }
 0x31e   : > { %1776 = vrot.lane.b32.xlu0 %v10609_v4, %s9974_s19 }
 0x320   : > { %1239 = vrot.lane.b32.xlu1 %v10596_v58, %s16043_s22 }
 0x321   : > { %v10623_v14 = vpop.permute.xlu0 %1247  ;;  %v1323_v7 = vpop.permute.xlu1 %1322 }
 0x322   : > { %16080 = vst [vmem:[#allocation19_spill] sm:$0xff] %v10623_v14  ;;  %v1339_v15 = vsel %vm528_vm13, %v10605_v0, %v1323_v7  ;;  %v1361_v20 = vsel %vm518_vm11, %v10450_v45, %v1323_v7 }
 0x323   : > { %v1360_v24 = vsel %vm16078_vm3, %v10448_v48, %v1339_v15 }
 0x324   : > { %1390 = vrot.lane.b32.xlu1 %v1361_v20, %s16026_s17  ;;  %1388 = vrot.lane.b32.xlu0 %v1360_v24, %s16026_s17 }
 0x325   : > { %v10635_v27 = vpop.permute.xlu0 %1638  ;;  %v10637_v25 = vpop.permute.xlu1 %1474 }
 0x328   : > { %1105 = vrot.lane.b32.xlu0 %v10639_v21, %s9974_s19 }
 0x329   : > { %v10643_v13 = vpop.permute.xlu0 %1778  ;;  %v10645_v33 = vpop.permute.xlu1 %1249 }
 0x32a   : > { %16081 = vst [vmem:[#allocation20_spill] sm:$0xff] %v10645_v33 }
 0x32c   : > { %1318 = vrot.lane.b32.xlu0 %v10639_v21, %s16045_s18 }
 0x32d   : > { %v1110_v49 = vpop.permute.xlu0 %1109  ;;  %v10649_v35 = vpop.permute.xlu1 %1640 }
 0x32e   : > { %v1126_v32 = vsel %vm440_vm15, %v10617_v6, %v1110_v49 }
 0x32f   : > { %v1148_v50 = vsel %vm15978_vm2, %v10450_v45, %v1126_v32 }
 0x330   : > { %1177 = vrot.lane.b32.xlu1 %v1148_v50, %s16011_s21  ;;  %1470 = vrot.lane.b32.xlu0 %v10639_v21, %s9974_s19 }
 0x331   : > { %v1062_v51 = vpop.permute.xlu0 %1061  ;;  %v10659_v57 = vpop.permute.xlu1 %1780 }
 0x332   : > { %1072 = vst.msk [vmem:[#allocation2 + $0x38] sm:$0xff] %vm486_vm7, %v1062_v51 }
 0x334   : > { %1245 = vrot.lane.b32.xlu1 %v10639_v21, %s16043_s22 }
 0x335   : > { %v10664_v26 = vpop.permute.xlu0 %1113  ;;  %v1039_v7 = vpop.permute.xlu1 %1038 }
 0x336   : > { %1049 = vst.msk [vmem:[#allocation2 + $0x40] sm:$0xff] %vm1046_vm6, %v1039_v7 }
 0x339   : > { %v10667_v15 = vpop.permute.xlu0 %1253  ;;  %v10669_v20 = vpop.permute.xlu1 %1326  ;;  %v10671_v24 = vld [vmem:[#allocation2 + $0x38] sm:$0xff] }
 0x33a   : > { %16082 = vst [vmem:[#allocation21_spill] sm:$0xff] %v10667_v15  ;;  %1642 = vrot.lane.b32.xlu0 %v10671_v24, %s16045_s18 }
 0x33d   : > { %v10675_v49 = vpop.permute.xlu0 %1644  ;;  %v10677_v32 = vpop.permute.xlu1 %1478 }
 0x341   : > { %v1329_v50 = vpop.permute.xlu0 %1328  ;;  %v1116_v51 = vpop.permute.xlu1 %1115 }
 0x342   : > { %v1128_v3 = vsel %vm440_vm15, %v10664_v26, %v1116_v51  ;;  %v1364_v7 = vsel %vm518_vm11, %v10464_v55, %v1329_v50  ;;  %v1341_v17 = vsel %vm528_vm13, %v10669_v20, %v1329_v50  ;;  %v10694_v51 = vld [vmem:[#allocation2 + $0x40] sm:$0xff] }
 0x343   : > { %1396 = vrot.lane.b32.xlu1 %v1364_v7, %s16026_s17  ;;  %v1151_v9 = vsel %vm15978_vm2, %v10464_v55, %v1128_v3  ;;  %v1363_v7 = vsel %vm16078_vm3, %v10462_v63, %v1341_v17 }
 0x344   : > { %1183 = vrot.lane.b32.xlu0 %v1151_v9, %s16011_s21 }
 0x345   : > { %v10691_v12 = vpop.permute.xlu0 %1480  ;;  %v1064_v11 = vpop.permute.xlu1 %1063 }
 0x346   : > { %1073 = vst.msk [vmem:[#allocation2 + $0x58] sm:$0xff] %vm486_vm7, %v1064_v11 }
 0x347   : > { %1111 = vrot.lane.b32.xlu1 %v10694_v51, %s9974_s19 }
 0x348   : > { %1394 = vrot.lane.b32.xlu0 %v1363_v7, %s16026_s17 }
 0x349   : > { %v1041_v3 = vpop.permute.xlu0 %1040  ;;  %v10702_v50 = vpop.permute.xlu1 %1255 }
 0x34a   : > { %16083 = vst [vmem:[#allocation22_spill] sm:$0xff] %v10702_v50  ;;  %1050 = vst.msk [vmem:[#allocation2 + $0x60] sm:$0xff] %vm1046_vm6, %v1041_v3 }
 0x34b   : > { %1324 = vrot.lane.b32.xlu1 %v10694_v51, %s16045_s18 }
 0x34d   : > { %v10707_v9 = vpop.permute.xlu0 %1332  ;;  %v10709_v11 = vpop.permute.xlu1 %1646  ;;  %v10711_v5 = vld [vmem:[#allocation2 + $0x58] sm:$0xff] }
 0x34e   : > { %1648 = vrot.lane.b32.xlu0 %v10711_v5, %s16045_s18 }
 0x34f   : > { %1476 = vrot.lane.b32.xlu1 %v10694_v51, %s9974_s19 }
 0x351   : > { %v10717_v17 = vpop.permute.xlu0 %1484  ;;  %v10719_v7 = vpop.permute.xlu1 %1119  ;;  %v10721_v3 = vld [vmem:[#allocation2 + $0x60] sm:$0xff] }
 0x352   : > { %1117 = vrot.lane.b32.xlu0 %v10721_v3, %s9974_s19 }
 0x353   : > { %1251 = vrot.lane.b32.xlu1 %v10694_v51, %s16043_s22 }
 0x355   : > { %v10727_v18 = vpop.permute.xlu0 %1259  ;;  %v1335_v10 = vpop.permute.xlu1 %1334 }
 0x356   : > { %16084 = vst [vmem:[#allocation23_spill] sm:$0xff] %v10727_v18  ;;  %v1343_v31 = vsel %vm528_vm13, %v10707_v9, %v1335_v10  ;;  %1782 = vrot.lane.b32.xlu0 %v10671_v24, %s9974_s19 }
 0x357   : > { %v1366_v50 = vsel %vm16078_vm3, %v10476_v60, %v1343_v31  ;;  %v1489_v31 = vsel %vm440_vm15, %v10571_v62, %v10585_v36  ;;  %vm16085_vm3 = vcmp.ne.s16.totalorder %v10197_v61, 0 }
 0x359   : > { %v10733_v15 = vpop.permute.xlu0 %1650 }
 0x35a   : > { %1400 = vrot.lane.b32.xlu0 %v1366_v50, %s16026_s17 }
 0x35d   : > { %v1122_v14 = vpop.permute.xlu0 %1121 }
 0x35e   : > { %v1130_v33 = vsel %vm440_vm15, %v10719_v7, %v1122_v14  ;;  %1784 = vrot.lane.b32.xlu0 %v10462_v63, %s9974_s19  ;;  %v1367_v14 = vsel %vm518_vm11, %v10478_v30, %v1335_v10  ;;  %v10770_v10 = vpop.permute.xlu1 %1486 }
 0x35f   : > { %v1154_v18 = vsel %vm15978_vm2, %v10478_v30, %v1130_v33  ;;  %vm16086_vm2 = vcmp.ne.s16.totalorder %v10155_v39, 0 }
 0x360   : > { %1189 = vrot.lane.b32.xlu1 %v1154_v18, %s16011_s21  ;;  %v1509_v18 = vsel %vm16085_vm3, %v10436_v34, %v1489_v31  ;;  %vm16091_vm3 = vcmp.ne.s16.totalorder %v10161_v44, 0 }
 0x361   : > { %v1066_v47 = vpop.permute.xlu0 %1065 }
 0x362   : > { %1074 = vst.msk [vmem:[#allocation2 + $0x78] sm:$0xff] %vm486_vm7, %v1066_v47  ;;  %1788 = vrot.lane.b32.xlu0 %v10711_v5, %s9974_s19  ;;  %v1510_v47 = vsel %vm16086_vm2, %v10609_v4, %v10585_v36  ;;  %v10780_v50 = vpop.permute.xlu1 %1261  ;;  %vm16090_vm2 = vcmp.ne.s16.totalorder %v10151_v37, 0 }
 0x363   : > { %16087 = vst [vmem:[#allocation24_spill] sm:$0xff] %v10780_v50 }
 0x364   : > { %1402 = vrot.lane.b32.xlu1 %v1367_v14, %s16026_s17 }
 0x366   : > { %1534 = vrot.lane.b32.xlu0 %v1509_v18, %s16009_s15  ;;  %v10788_v36 = vpop.permute.xlu1 %1652 }
 0x368   : > { %1786 = vrot.lane.b32.xlu1 %v10464_v55, %s9974_s19 }
 0x369   : > { %v10776_v33 = vld [vmem:[#allocation2 + $0x78] sm:$0xff] }
 0x36a   : > { %1790 = vrot.lane.b32.xlu0 %v10476_v60, %s9974_s19 }
 0x36c   : > { %1536 = vrot.lane.b32.xlu1 %v1510_v47, %s16009_s15 }
 0x36e   : > { %1330 = vrot.lane.b32.xlu0 %v10721_v3, %s16045_s18 }
 0x370   : > { %1792 = vrot.lane.b32.xlu1 %v10478_v30, %s9974_s19 }
 0x372   : > { %1654 = vrot.lane.b32.xlu0 %v10776_v33, %s16045_s18 }
 0x374   : > { %1482 = vrot.lane.b32.xlu1 %v10721_v3, %s9974_s19 }
 0x376   : > { %1794 = vrot.lane.b32.xlu0 %v10776_v33, %s9974_s19 }
 0x378   : > { %1257 = vrot.lane.b32.xlu1 %v10721_v3, %s16043_s22 }
 0x37d   : > { %v10790_v31 = vpop.permute.xlu1 %1384 }
 0x37e   : > { %16088 = vst [vmem:[#allocation25_spill] sm:$0xff] %v10790_v31  ;;  %v10797_v8 = vpop.permute.xlu0 %1382 }
 0x37f   : > { %16089 = vst [vmem:[#allocation26_spill] sm:$0xff] %v10797_v8 }
 0x382   : > { %v10792_v14 = vpop.permute.xlu1 %1171 }
 0x386   : > { %v1100_v18 = vpop.permute.xlu1 %1099 }
 0x387   : > { %v1143_v47 = vsel %vm428_vm0, %v10596_v58, %v1100_v18  ;;  %v1123_v52 = vsel %vm440_vm15, %v1100_v18, %v10562_v1 }
 0x388   : > { %1167 = vrot.lane.b32.xlu0 %v1143_v47, %s16011_s21  ;;  %v1144_v31 = vsel %vm15987_vm14, %v10434_v54, %v1123_v52 }
 0x38a   : > { %v1313_v38 = vpop.permute.xlu1 %1312 }
 0x38b   : > { %v1336_v50 = vsel %vm528_vm13, %v1313_v38, %v10567_v40 }
 0x38c   : > { %v10807_v56 = vpop.permute.xlu0 %1636  ;;  %1169 = vrot.lane.b32.xlu0 %v1144_v31, %s16011_s21  ;;  %v1356_v8 = vsel %vm16090_vm2, %v10596_v58, %v1336_v50 }
 0x38d   : > { %1380 = vrot.lane.b32.xlu1 %v1356_v8, %s16026_s17 }
 0x38e   : > { %v1465_v1 = vpop.permute.xlu1 %1464 }
 0x38f   : > { %v1488_v18 = vsel %vm440_vm15, %v1465_v1, %v10571_v62 }
 0x390   : > { %v1508_v38 = vsel %vm16091_vm3, %v10434_v54, %v1488_v18  ;;  %v10820_v52 = vpop.permute.xlu0 %1776  ;;  %vm16098_vm3 = vmmov %vm16090_vm2 }
 0x391   : > { %1532 = vrot.lane.b32.xlu1 %v1508_v38, %s16009_s15 }
 0x392   : > { %v10839_v38 = vpop.permute.xlu1 %1239 }
 0x393   : > { %16093 = vst [vmem:[#allocation28_spill] sm:$0xff] %v10839_v38 }
 0x396   : > { %v10822_v40 = vpop.permute.xlu0 %1388 }
 0x397   : > { %16092 = vst [vmem:[#allocation27_spill] sm:$0xff] %v10822_v40 }
 0x39a   : > { %v1106_v31 = vpop.permute.xlu0 %1105 }
 0x39b   : > { %v1146_v50 = vsel %vm428_vm0, %v10639_v21, %v1106_v31  ;;  %v1125_v8 = vsel %vm440_vm15, %v1106_v31, %v10617_v6  ;;  %v10842_v6 = vpop.permute.xlu1 %1390 }
 0x39c   : > { %1173 = vrot.lane.b32.xlu0 %v1146_v50, %s16011_s21  ;;  %v1147_v1 = vsel %vm15987_vm14, %v10448_v48, %v1125_v8  ;;  %16094 = vst [vmem:[#allocation29_spill] sm:$0xff] %v10842_v6 }
 0x39e   : > { %v1319_v62 = vpop.permute.xlu0 %1318 }
 0x39f   : > { %v1338_v47 = vsel %vm528_vm13, %v1319_v62, %v10605_v0 }
 0x3a0   : > { %1175 = vrot.lane.b32.xlu0 %v1147_v1, %s16011_s21  ;;  %v1359_v18 = vsel %vm16090_vm2, %v10639_v21, %v1338_v47  ;;  %vm16099_vm2 = vcmp.ne.s16.totalorder %v10155_v39, 0 }
 0x3a1   : > { %1386 = vrot.lane.b32.xlu1 %v1359_v18, %s16026_s17 }
 0x3a2   : > { %v10844_v31 = vpop.permute.xlu1 %1177  ;;  %v1471_v50 = vpop.permute.xlu0 %1470 }
 0x3a6   : > { %v10846_v0 = vpop.permute.xlu1 %1245 }
 0x3a7   : > { %16095 = vst [vmem:[#allocation30_spill] sm:$0xff] %v10846_v0 }
 0x3ac   : > { %v1643_v62 = vpop.permute.xlu0 %1642 }
 0x3b5   : > { %v10848_v40 = vpop.permute.xlu1 %1396 }
 0x3b6   : > { %16096 = vst [vmem:[#allocation31_spill] sm:$0xff] %v10848_v40  ;;  %v10850_v8 = vpop.permute.xlu0 %1183 }
 0x3b7   : > { %16097 = vst [vmem:[#allocation32_spill] sm:$0xff] %v10850_v8 }
 0x3b9   : > { %v1112_v1 = vpop.permute.xlu1 %1111 }
 0x3ba   : > { %v1149_v47 = vsel %vm428_vm0, %v10694_v51, %v1112_v1  ;;  %v1127_v18 = vsel %vm440_vm15, %v1112_v1, %v10664_v26  ;;  %v10858_v6 = vpop.permute.xlu0 %1394 }
 0x3bb   : > { %1179 = vrot.lane.b32.xlu1 %v1149_v47, %s16011_s21  ;;  %v1150_v0 = vsel %vm15987_vm14, %v10462_v63, %v1127_v18 }
 0x3bd   : > { %v1325_v38 = vpop.permute.xlu1 %1324 }
 0x3be   : > { %v1340_v40 = vsel %vm528_vm13, %v1325_v38, %v10669_v20  ;;  %v1513_v20 = vsel %vm16099_vm2, %v10671_v24, %v10637_v25 }
 0x3bf   : > { %1181 = vrot.lane.b32.xlu1 %v1150_v0, %s16011_s21  ;;  %v1362_v26 = vsel %vm16098_vm3, %v10694_v51, %v1340_v40  ;;  %v1493_v40 = vsel %vm440_vm15, %v10677_v32, %v10691_v12  ;;  %vm16100_vm3 = vcmp.ne.s16.totalorder %v10197_v61, 0 }
 0x3c0   : > { %v10866_v8 = vpop.permute.xlu0 %1648  ;;  %vm16101_vm2 = vmmov %vm16100_vm3 }
 0x3c1   : > { %v1477_v38 = vpop.permute.xlu1 %1476 }
 0x3c3   : > { %1392 = vrot.lane.b32.xlu1 %v1362_v26, %s16026_s17  ;;  %v1491_v26 = vsel %vm440_vm15, %v10615_v23, %v10637_v25  ;;  %v1490_v25 = vsel %vm440_vm15, %v1471_v50, %v10615_v23  ;;  %v1656_v50 = vsel %vm528_vm13, %v10565_v29, %v10600_v59 }
 0x3c4   : > { %v1118_v1 = vpop.permute.xlu0 %1117 }
 0x3c5   : > { %v1152_v47 = vsel %vm428_vm0, %v10721_v3, %v1118_v1  ;;  %v1129_v18 = vsel %vm440_vm15, %v1118_v1, %v10719_v7  ;;  %v1515_v1 = vsel %vm16100_vm3, %v10464_v55, %v1493_v40 }
 0x3c6   : > { %1185 = vrot.lane.b32.xlu0 %v1152_v47, %s16011_s21  ;;  %v1153_v7 = vsel %vm15987_vm14, %v10476_v60, %v1129_v18  ;;  %v1492_v47 = vsel %vm440_vm15, %v1477_v38, %v10677_v32  ;;  %v1512_v18 = vsel %vm16101_vm2, %v10450_v45, %v1491_v26  ;;  %vm16102_vm14 = vcmp.ne.s16.totalorder %v10161_v44, 0  ;;  %v10929_v26 = vpop.permute.xlu1 %1251 }
 0x3c7   : > { %1542 = vrot.lane.b32.xlu1 %v1513_v20, %s16009_s15  ;;  %v1514_v40 = vsel %vm16102_vm14, %v10462_v63, %v1492_v47  ;;  %vm16103_vm3 = vmmov %vm16102_vm14  ;;  %vm16104_vm2 = vcmp.ne.s16.totalorder %v10155_v39, 0  ;;  %v1495_v47 = vsel %vm440_vm15, %v10717_v17, %v10770_v10 }
 0x3c8   : > { %v10886_v0 = vpop.permute.xlu0 %1782  ;;  %v1511_v38 = vsel %vm16103_vm3, %v10448_v48, %v1490_v25  ;;  %v1519_v23 = vsel %vm16104_vm2, %v10776_v33, %v10770_v10  ;;  %vm16105_vm14 = vmmov %vm16104_vm2  ;;  %vm16106_vm3 = vcmp.ne.s16.totalorder %v10256_v19, 0  ;;  %vm16107_vm2 = vcmp.ne.s16.totalorder %v10197_v61, 0 }
 0x3c9   : > { %v1657_v10 = vsel %vm528_vm13, %v10600_v59, %v10807_v56  ;;  %v1658_v56 = vsel %vm528_vm13, %v10635_v27, %v10649_v35 }
 0x3ca   : > { %1187 = vrot.lane.b32.xlu0 %v1153_v7, %s16011_s21 }
 0x3cb   : > { %1546 = vrot.lane.b32.xlu1 %v1515_v1, %s16009_s15  ;;  %v1516_v1 = vsel %vm16105_vm14, %v10711_v5, %v10691_v12  ;;  %v1518_v12 = vsel %vm16107_vm2, %v10478_v30, %v1495_v47  ;;  %vm16108_vm14 = vcmp.ne.s16.totalorder %v10163_v46, 0 }
 0x3cc   : > { %v10901_v20 = vpop.permute.xlu0 %1400 }
 0x3ce   : > { %1540 = vrot.lane.b32.xlu0 %v1512_v18, %s16009_s15  ;;  %v1677_v18 = vsel %vm16106_vm3, %v10434_v54, %v1656_v50  ;;  %vm16109_vm3 = vcmp.ne.s16.totalorder %v10157_v41, 0 }
 0x3cf   : > { %1544 = vrot.lane.b32.xlu1 %v1514_v40, %s16009_s15  ;;  %vm16110_vm2 = vmmov %vm16109_vm3 }
 0x3d0   : > { %v10913_v32 = vpop.permute.xlu0 %1784 }
 0x3d2   : > { %1538 = vrot.lane.b32.xlu0 %v1511_v38, %s16009_s15  ;;  %v10945_v40 = vpop.permute.xlu1 %1189  ;;  %v1676_v38 = vsel %vm16108_vm14, %v10596_v58, %v10565_v29  ;;  %vm16111_vm14 = vcmp.ne.s16.totalorder %v10256_v19, 0 }
 0x3d3   : > { %1554 = vrot.lane.b32.xlu1 %v1519_v23, %s16009_s15  ;;  %v1659_v23 = vsel %vm528_vm13, %v10649_v35, %v1643_v62  ;;  %v1680_v62 = vsel %vm16111_vm14, %v10448_v48, %v1658_v56  ;;  %v1662_v56 = vsel %vm528_vm13, %v10733_v15, %v10788_v36 }
 0x3d4   : > { %v10927_v7 = vpop.permute.xlu0 %1788  ;;  %v1681_v29 = vsel %vm16110_vm2, %v10450_v45, %v1659_v23  ;;  %vm16113_vm2 = vcmp.ne.s16.totalorder %v10163_v46, 0 }
 0x3d6   : > { %1548 = vrot.lane.b32.xlu0 %v1516_v1, %s16009_s15  ;;  %v1678_v1 = vsel %vm16109_vm3, %v10436_v34, %v1657_v10  ;;  %v10973_v58 = vpop.permute.xlu1 %1402  ;;  %vm16112_vm3 = vcmp.ne.s16.totalorder %v10151_v37, 0  ;;  %v1661_v10 = vsel %vm528_vm13, %v10709_v11, %v10866_v8  ;;  %v9798_v8 = vld [vmem:[%s15938_s4 + $0x4] ss:$20 sps:$4 sm:$0xff]  }
 0x3d7   : > { %1702 = vrot.lane.b32.xlu1 %v1677_v18, %s15993_s13  ;;  %2391 = vmatprep.mubr.bf16.mxu1 %v9798_v8 }
 0x3d8   : > { %v10943_v25 = vpop.permute.xlu0 %1534 }
 0x3da   : > { %1552 = vrot.lane.b32.xlu0 %v1518_v12, %s16009_s15  ;;  %v10984_v47 = vpop.permute.xlu1 %1786  ;;  %v1679_v12 = vsel %vm16113_vm2, %v10639_v21, %v10635_v27 }
 0x3db   : > { %1700 = vrot.lane.b32.xlu1 %v1676_v38, %s15993_s13 }
 0x3dc   : > { %v10961_v50 = vpop.permute.xlu0 %1790 }
 0x3de   : > { %1704 = vrot.lane.b32.xlu0 %v1678_v1, %s15993_s13  ;;  %v11003_v38 = vpop.permute.xlu1 %1536 }
 0x3df   : > { %1710 = vrot.lane.b32.xlu1 %v1681_v29, %s15993_s13 }
 0x3e0   : > { %v1331_v59 = vpop.permute.xlu0 %1330 }
 0x3e1   : > { %v1342_v35 = vsel %vm528_vm13, %v1331_v59, %v10707_v9  ;;  %v1660_v9 = vsel %vm528_vm13, %v10675_v49, %v10709_v11  ;;  %v1682_v11 = vsel %vm16113_vm2, %v10694_v51, %v10675_v49  ;;  %v1686_v49 = vsel %vm16111_vm14, %v10476_v60, %v1662_v56 }
 0x3e2   : > { %1708 = vrot.lane.b32.xlu0 %v1680_v62, %s15993_s13  ;;  %v1365_v18 = vsel %vm16112_vm3, %v10721_v3, %v1342_v35  ;;  %v1683_v23 = vsel %vm16111_vm14, %v10462_v63, %v1660_v9  ;;  %vm16114_vm3 = vcmp.ne.s16.totalorder %v10157_v41, 0  ;;  %v11015_v1 = vpop.permute.xlu1 %1792  ;;  %vm16116_vm2 = vcmp.ne.s16.totalorder %v10159_v43, 0 }
 0x3e3   : > { %1989 = vrot.lane.b32.xlu1 %v10609_v4, %s16045_s18  ;;  %v1684_v27 = vsel %vm16114_vm3, %v10464_v55, %v1661_v10  ;;  %vm16115_vm3 = vcmp.ne.s16.totalorder %v10161_v44, 0  ;;  %vm16117_vm14 = vcmp.ne.s16.totalorder %v10163_v46, 0 }
 0x3e4   : > { %v1655_v21 = vpop.permute.xlu0 %1654 }
 0x3e6   : > { %1987 = vrot.lane.b32.xlu0 %v10436_v34, %s16045_s18  ;;  %v1483_v59 = vpop.permute.xlu1 %1482 }
 0x3e7   : > { %1398 = vrot.lane.b32.xlu1 %v1365_v18, %s16026_s17  ;;  %v1494_v51 = vsel %vm440_vm15, %v1483_v59, %v10717_v17  ;;  %v1663_v59 = vsel %vm528_vm13, %v10788_v36, %v1655_v21 }
 0x3e8   : > { %v11031_v29 = vpop.permute.xlu0 %1794  ;;  %v1517_v35 = vsel %vm16115_vm3, %v10476_v60, %v1494_v51  ;;  %vm16118_vm3 = vcmp.ne.s16.totalorder %v10261_v22, 0 }
 0x3ea   : > { %1706 = vrot.lane.b32.xlu0 %v1679_v12, %s15993_s13  ;;  %v1797_v12 = vsel %vm440_vm15, %v10607_v2, %v10820_v52  ;;  %v1685_v52 = vsel %vm16117_vm14, %v10721_v3, %v10733_v15  ;;  %v1800_v3 = vsel %vm440_vm15, %v10913_v32, %v10984_v47  ;;  %vm16119_vm14 = vcmp.ne.s16.totalorder %v10176_v53, 0  ;;  %v11127_v51 = vpop.permute.xlu1 %1257 }
 0x3eb   : > { %1985 = vrot.lane.b32.xlu1 %v10434_v54, %s16045_s18  ;;  %v1818_v10 = vsel %vm16116_vm2, %v10609_v4, %v1797_v12  ;;  %v1823_v56 = vsel %vm16118_vm3, %v10464_v55, %v1800_v3  ;;  %v11198_v3 = vld [vmem:[#allocation2 + $0x68] sm:$0xff] }
 0x3ee   : > { %1714 = vrot.lane.b32.xlu0 %v1683_v23, %s15993_s13 }
 0x3ef   : > { %1716 = vrot.lane.b32.xlu1 %v1684_v27, %s15993_s13  ;;  %v1799_v27 = vsel %vm440_vm15, %v10659_v57, %v10886_v0  ;;  %v1816_v0 = vsel %vm16119_vm14, %v10434_v54, %v10569_v42  ;;  %vm16121_vm14 = vcmp.ne.s16.totalorder %v10157_v41, 0 }
 0x3f2   : > { %1993 = vrot.lane.b32.xlu0 %v10450_v45, %s16045_s18 }
 0x3f3   : > { %1995 = vrot.lane.b32.xlu1 %v10671_v24, %s16045_s18 }
 0x3f6   : > { %1712 = vrot.lane.b32.xlu0 %v1682_v11, %s15993_s13  ;;  %v1798_v11 = vsel %vm440_vm15, %v10643_v13, %v10659_v57  ;;  %v1687_v57 = vsel %vm16121_vm14, %v10478_v30, %v1663_v59  ;;  %vm16124_vm14 = vcmp.ne.s16.totalorder %v10159_v43, 0 }
 0x3f7   : > { %1991 = vrot.lane.b32.xlu1 %v10448_v48, %s16045_s18 }
 0x3fa   : > { %v1168_v62 = vpop.permute.xlu0 %1167  ;;  %1720 = vrot.lane.b32.xlu0 %v1686_v49, %s15993_s13 }
 0x3fb   : > { %2001 = vrot.lane.b32.xlu1 %v10711_v5, %s16045_s18 }
 0x3fe   : > { %v1170_v18 = vpop.permute.xlu0 %1169  ;;  %1550 = vrot.lane.b32.xlu0 %v1517_v35, %s16009_s15 }
 0x3ff   : > { %1997 = vrot.lane.b32.xlu1 %v10462_v63, %s16045_s18  ;;  %v1192_v17 = vsel %vm461_vm8, %v1170_v18, %v10792_v14  ;;  %v1191_v9 = vsel %vm461_vm8, %v1168_v62, %v1170_v18  ;;  %v1796_v14 = vsel %vm440_vm15, %v10569_v42, %v10607_v2  ;;  %v1821_v2 = vsel %vm16116_vm2, %v10671_v24, %v1799_v27  ;;  %vm16120_vm2 = vmmov %vm16118_vm3 }
 0x400   : > { %2359 = vmatprep.subr.bf16.mxu1 %v1192_v17  ;;  %v1817_v23 = vsel %vm16118_vm3, %v10436_v34, %v1796_v14  ;;  %v1820_v42 = vsel %vm16120_vm2, %v10450_v45, %v1798_v11  ;;  %vm16122_vm3 = vcmp.ne.s16.totalorder %v10176_v53, 0 }
 0x401   : > { %2360 = vmatpush1.bf16.msra.mxu1 %v1191_v9  ;;  %v1819_v36 = vsel %vm16122_vm3, %v10448_v48, %v10643_v13  ;;  %vm16123_vm2 = vmmov %vm16122_vm3  ;;  %v1802_v48 = vsel %vm440_vm15, %v10961_v50, %v11015_v1  ;;  %v11137_v13 = vld [vmem:[#allocation2 + $0x10] sm:$0xff]  ;;  %vm16126_vm3 = vcmp.ne.s16.totalorder %v10261_v22, 0  ;;  %v11181_v9 = vld [vmem:[#allocation2 + $0x48] sm:$0xff] }
 0x402   : > { %1999 = vrot.lane.b32.xlu0 %v10464_v55, %s16045_s18  ;;  %v1822_v21 = vsel %vm16123_vm2, %v10462_v63, %v10913_v32  ;;  %v1826_v63 = vsel %vm16126_vm3, %v10478_v30, %v1802_v48  ;;  %v11147_v32 = vld [vmem:[#allocation2 + $0x8] sm:$0xff]  ;;  %v1825_v18 = vsel %vm16123_vm2, %v10476_v60, %v10961_v50 }
 0x403   : > { %1844 = vrot.lane.b32.xlu1 %v1818_v10, %s15991_s12  ;;  %v11177_v50 = vld [vmem:[#allocation2 + $0x28] sm:$0xff]  ;;  %v16127_v10 = vld [vmem:[#allocation32_spill] sm:$0xff] }
 0x406   : > { %1718 = vrot.lane.b32.xlu0 %v1685_v52, %s15993_s13 }
 0x407   : > { %2007 = vrot.lane.b32.xlu1 %v10776_v33, %s16045_s18 }
 0x40a   : > { %1842 = vrot.lane.b32.xlu0 %v1817_v23, %s15991_s12 }
 0x40b   : > { %2003 = vrot.lane.b32.xlu1 %v10476_v60, %s16045_s18 }
 0x40e   : > { %v1174_v15 = vpop.permute.xlu0 %1173  ;;  %2005 = vrot.lane.b32.xlu0 %v10478_v30, %s16045_s18 }
 0x40f   : > { %1850 = vrot.lane.b32.xlu1 %v1821_v2, %s15991_s12 }
 0x412   : > { %v1176_v8 = vpop.permute.xlu0 %1175  ;;  %1840 = vrot.lane.b32.xlu0 %v1816_v0, %s15991_s12 }
 0x413   : > { %1854 = vrot.lane.b32.xlu1 %v1823_v56, %s15991_s12  ;;  %v1194_v49 = vsel %vm461_vm8, %v1176_v8, %v10844_v31  ;;  %v1193_v54 = vsel %vm461_vm8, %v1174_v15, %v1176_v8  ;;  %v1801_v31 = vsel %vm440_vm15, %v10984_v47, %v10927_v7  ;;  %v11139_v7 = vpop.permute.xlu1 %1380  ;;  %v1803_v47 = vsel %vm440_vm15, %v11015_v1, %v11031_v29  ;;  %v11171_v29 = vld [vmem:[#allocation2 + $0x30] sm:$0xff]  ;;  %v16128_v8 = vld [vmem:[#allocation18_spill] sm:$0xff]  ;;  %v16129_v56 = vld [vmem:[#allocation17_spill] sm:$0xff] }
 0x414   : > { %2361 = vmatprep.subr.bf16.mxu1 %v1194_v49  ;;  %v1824_v62 = vsel %vm16124_vm14, %v10711_v5, %v1801_v31  ;;  %v1827_v12 = vsel %vm16124_vm14, %v10776_v33, %v1803_v47  ;;  %v1265_v59 = vsel %vm486_vm7, %v16129_v56, %v16128_v8  ;;  %v16135_v47 = vld [vmem:[#allocation21_spill] sm:$0xff]  ;;  %v16139_v8 = vld [vmem:[#allocation26_spill] sm:$0xff] }
 0x415   : > { %2362 = vmatpush1.bf16.msra.mxu1 %v1193_v54  ;;  %v16130_v54 = vld [vmem:[#allocation28_spill] sm:$0xff] }
 0x416   : > { %1848 = vrot.lane.b32.xlu0 %v1820_v42, %s15991_s12  ;;  %v16131_v42 = vld [vmem:[#allocation20_spill] sm:$0xff] }
 0x417   : > { %1722 = vrot.lane.b32.xlu1 %v1687_v57, %s15993_s13  ;;  %v11154_v35 = vpop.permute.xlu1 %1532  ;;  %v16132_v57 = vld [vmem:[#allocation19_spill] sm:$0xff]  ;;  %s16220_s13 = smov 111  }
 0x41a   : > { %1846 = vrot.lane.b32.xlu0 %v1819_v36, %s15991_s12  ;;  %v1267_v36 = vsel %vm486_vm7, %v16132_v57, %v16131_v42  ;;  %v16141_v42 = vld [vmem:[#allocation27_spill] sm:$0xff] }
 0x41b   : > { %1852 = vrot.lane.b32.xlu1 %v1822_v21, %s15991_s12  ;;  %v11165_v17 = vpop.permute.xlu1 %1386 }
 0x41e   : > { %1856 = vrot.lane.b32.xlu0 %v1824_v62, %s15991_s12  ;;  %v16133_v62 = vld [vmem:[#allocation30_spill] sm:$0xff] }
 0x41f   : > { %1914 = vrot.lane.b32.xlu1 %v11137_v13, %s16125_s28  ;;  %v1266_v48 = vsel %vm486_vm7, %v16133_v62, %v16132_v57  ;;  %v1406_v62 = vsel %vm366_vm1, %v11165_v17, %v16141_v42 }
 0x422   : > { %1860 = vrot.lane.b32.xlu0 %v1826_v63, %s15991_s12  ;;  %v16134_v63 = vld [vmem:[#allocation22_spill] sm:$0xff] }
 0x423   : > { %1912 = vrot.lane.b32.xlu1 %v11147_v32, %s16125_s28 }
 0x426   : > { %1858 = vrot.lane.b32.xlu0 %v1825_v18, %s15991_s12  ;;  %v1269_v18 = vsel %vm486_vm7, %v16135_v47, %v16134_v63 }
 0x427   : > { %1862 = vrot.lane.b32.xlu1 %v1827_v12, %s15991_s12  ;;  %s16433_s12 = smov 17  }
 0x42a   : > { %1916 = vrot.lane.b32.xlu0 %v10609_v4, %s16125_s28 }
 0x42b   : > { %1922 = vrot.lane.b32.xlu1 %v10671_v24, %s16125_s28 }
 0x42d   : > { %v1180_v1 = vpop.permute.xlu1 %1179 }
 0x42e   : > { %1920 = vrot.lane.b32.xlu0 %v11171_v29, %s16125_s28 }
 0x42f   : > { %1926 = vrot.lane.b32.xlu1 %v10464_v55, %s16125_s28 }
 0x431   : > { %v1182_v60 = vpop.permute.xlu1 %1181 }
 0x432   : > { %1918 = vrot.lane.b32.xlu0 %v11177_v50, %s16125_s28  ;;  %v1196_v52 = vsel %vm461_vm8, %v1182_v60, %v16127_v10  ;;  %v1195_v14 = vsel %vm461_vm8, %v1180_v1, %v1182_v60  ;;  %v1268_v60 = vsel %vm486_vm7, %v10929_v26, %v16135_v47  ;;  %v16136_v10 = vld [vmem:[#allocation24_spill] sm:$0xff] }
 0x433   : > { %1924 = vrot.lane.b32.xlu1 %v11181_v9, %s16125_s28  ;;  %2363 = vmatprep.subr.bf16.mxu1 %v1196_v52  ;;  %v16137_v52 = vld [vmem:[#allocation23_spill] sm:$0xff] }
 0x434   : > { %2364 = vmatpush1.bf16.msra.mxu1 %v1195_v14  ;;  %v1271_v14 = vsel %vm486_vm7, %v16137_v52, %v16136_v10 }
 0x435   : > { %v1393_v23 = vpop.permute.xlu1 %1392 }
 0x436   : > { %1928 = vrot.lane.b32.xlu0 %v10711_v5, %s16125_s28 }
 0x437   : > { %1934 = vrot.lane.b32.xlu1 %v10776_v33, %s16125_s28 }
 0x438   : > { %v1186_v55 = vpop.permute.xlu0 %1185 }
 0x439   : > { %v11192_v27 = vpop.permute.xlu1 %1542 }
 0x43a   : > { %1932 = vrot.lane.b32.xlu0 %v10478_v30, %s16125_s28 }
 0x43c   : > { %v1188_v15 = vpop.permute.xlu0 %1187 }
 0x43d   : > { %v11196_v2 = vpop.permute.xlu1 %1546  ;;  %v1198_v0 = vsel %vm461_vm8, %v1188_v15, %v10945_v40  ;;  %v1197_v11 = vsel %vm461_vm8, %v1186_v55, %v1188_v15  ;;  %v1264_v40 = vsel %vm486_vm7, %v16130_v54, %v16129_v56  ;;  %v1404_v54 = vsel %vm366_vm1, %v11139_v7, %v16139_v8  ;;  %v16144_v7 = vld [vmem:[#allocation31_spill] sm:$0xff] }
 0x43e   : > { %1930 = vrot.lane.b32.xlu0 %v11198_v3, %s16125_s28  ;;  %2365 = vmatprep.subr.bf16.mxu1 %v1198_v0  ;;  %v1270_v0 = vsel %vm486_vm7, %v11127_v51, %v16137_v52  ;;  %v1409_v47 = vsel %vm366_vm1, %v10858_v6, %v16144_v7  ;;  %v1408_v52 = vsel %vm366_vm1, %v1393_v23, %v10858_v6  ;;  %v9931_v23 = vld [vmem:[#allocation2 + $0x8] sm:$0xff] }
 0x43f   : > { %2366 = vmatpush1.bf16.msra.mxu1 %v1197_v11  ;;  %v16138_v11 = vld [vmem:[#allocation25_spill] sm:$0xff]  ;;  %v9932_v7 = vld [vmem:[#allocation2 + $0x28] sm:$0xff] }
 0x440   : > { %v11208_v30 = vpop.permute.xlu0 %1540  ;;  %2367 = vmatprep.subr.bf16.mxu1 %v1265_v59  ;;  %v1405_v56 = vsel %vm366_vm1, %v16139_v8, %v16138_v11 }
 0x441   : > { %v11210_v49 = vpop.permute.xlu1 %1544 }
 0x443   : > { %2368 = vmatpush1.bf16.msra.mxu1 %v1264_v40  ;;  %v16140_v40 = vld [vmem:[#allocation29_spill] sm:$0xff] }
 0x444   : > { %v1539_v31 = vpop.permute.xlu0 %1538  ;;  %2369 = vmatprep.subr.bf16.mxu1 %v1267_v36  ;;  %v1407_v57 = vsel %vm366_vm1, %v16141_v42, %v16140_v40 }
 0x445   : > { %v11218_v21 = vpop.permute.xlu1 %1554 }
 0x447   : > { %2370 = vmatpush1.bf16.msra.mxu1 %v1266_v48 }
 0x448   : > { %v1549_v12 = vpop.permute.xlu0 %1548  ;;  %2371 = vmatprep.subr.bf16.mxu1 %v1269_v18 }
 0x449   : > { %v11226_v1 = vpop.permute.xlu1 %1702 }
 0x44b   : > { %2372 = vmatpush1.bf16.msra.mxu1 %v1268_v60 }
 0x44c   : > { %v11234_v55 = vpop.permute.xlu0 %1552  ;;  %2373 = vmatprep.subr.bf16.mxu1 %v1271_v14 }
 0x44d   : > { %v11236_v15 = vpop.permute.xlu1 %1700 }
 0x44f   : > { %2374 = vmatpush1.bf16.msra.mxu1 %v1270_v0 }
 0x450   : > { %v11244_v26 = vpop.permute.xlu0 %1704  ;;  %2375 = vmatprep.subr.bf16.mxu1 %v1405_v56  ;;  %v16146_v56 = vld [vmem:[#allocation14_spill] sm:$0xff] }
 0x451   : > { %v11246_v59 = vpop.permute.xlu1 %1710  ;;  %vm16147_vm3 = vcmp.ne.s16.totalorder %v16146_v56, 0 }
 0x452   : > { %vm16148_vm2 = vmmov %vm16147_vm3 }
 0x453   : > { %2376 = vmatpush1.bf16.msra.mxu1 %v1404_v54  ;;  %vm16149_vm14 = vmmov %vm16148_vm2 }
 0x454   : > { %v11254_v51 = vpop.permute.xlu0 %1708  ;;  %2377 = vmatprep.subr.bf16.mxu1 %v1407_v57 }
 0x455   : > { %v1990_v36 = vpop.permute.xlu1 %1989 }
 0x456   : > { %v2031_v63 = vsel %vm755_vm9, %v10609_v4, %v1990_v36  ;;  %v1411_v4 = vsel %vm366_vm1, %v10901_v20, %v10973_v58 }
 0x457   : > { %2378 = vmatpush1.bf16.msra.mxu1 %v1406_v62  ;;  %2057 = vrot.lane.b32.xlu0 %v2031_v63, %s16143_s30  ;;  %v1558_v62 = vsel %vm15989_vm5, %v1539_v31, %v11208_v30 }
 0x458   : > { %v1988_v18 = vpop.permute.xlu0 %1987  ;;  %2379 = vmatprep.subr.bf16.mxu1 %v1409_v47 }
 0x459   : > { %v2010_v60 = vsel %vm528_vm13, %v1988_v18, %v1990_v36  ;;  %v1399_v10 = vpop.permute.xlu1 %1398 }
 0x45a   : > { %v2030_v14 = vsel %vm16008_vm4, %v10436_v34, %v2010_v60  ;;  %v1410_v6 = vsel %vm366_vm1, %v1399_v10, %v10901_v20  ;;  %v1557_v34 = vsel %vm15989_vm5, %v10943_v25, %v11003_v38  ;;  %v1556_v20 = vsel %vm15989_vm5, %v11154_v35, %v10943_v25  ;;  %v9796_v10 = vld [vmem:[%s15938_s4] ss:$20 sps:$4 sm:$0xff]  }
 0x45b   : > { %2380 = vmatpush1.bf16.msra.mxu1 %v1408_v52  ;;  %2055 = vrot.lane.b32.xlu1 %v2030_v14, %s16143_s30  ;;  %v1559_v38 = vsel %vm15989_vm5, %v11208_v30, %v11192_v27  ;;  %v1561_v25 = vsel %vm15989_vm5, %v11196_v2, %v1549_v12  ;;  %v1563_v12 = vsel %vm15989_vm5, %v11234_v55, %v11218_v21  ;;  %v9799_v52 = vld [vmem:[%s15938_s4 + $0x2c] ss:$20 sps:$4 sm:$0xff]  }
 0x45c   : > { %v11276_v0 = vpop.permute.xlu0 %1706  ;;  %2381 = vmatprep.subr.bf16.mxu1 %v1411_v4 }
 0x45d   : > { %v1986_v11 = vpop.permute.xlu1 %1985 }
 0x45e   : > { %v2009_v8 = vsel %vm528_vm13, %v1986_v11, %v1988_v18 }
 0x45f   : > { %2382 = vmatpush1.bf16.msra.mxu1 %v1410_v6  ;;  %v2029_v54 = vsel %vm16147_vm3, %v9931_v23, %v2009_v8  ;;  %v9934_v23 = vld [vmem:[#allocation2 + $0x48] sm:$0xff]  ;;  %vm16150_vm3 = vmmov %vm16148_vm2 }
 0x460   : > { %v11286_v40 = vpop.permute.xlu0 %1714  ;;  %2383 = vmatprep.subr.bf16.mxu1 %v1557_v34  ;;  %2053 = vrot.lane.b32.xlu1 %v2029_v54, %s16143_s30  ;;  %v9801_v34 = vld [vmem:[%s15938_s4 + $0x28] ss:$20 sps:$4 sm:$0xff]  }
 0x461   : > { %v11289_v58 = vpop.permute.xlu1 %1716 }
 0x463   : > { %2384 = vmatpush1.bf16.msra.mxu1 %v1556_v20 }
 0x464   : > { %v1994_v42 = vpop.permute.xlu0 %1993  ;;  %2385 = vmatprep.subr.bf16.mxu1 %v1559_v38 }
 0x465   : > { %v1996_v57 = vpop.permute.xlu1 %1995 }
 0x466   : > { %v2012_v36 = vsel %vm528_vm13, %v1994_v42, %v1996_v57  ;;  %v2034_v63 = vsel %vm755_vm9, %v10671_v24, %v1996_v57  ;;  %v1560_v24 = vsel %vm15989_vm5, %v11210_v49, %v11196_v2 }
 0x467   : > { %2386 = vmatpush1.bf16.msra.mxu1 %v1558_v62  ;;  %2063 = vrot.lane.b32.xlu1 %v2034_v63, %s16143_s30  ;;  %v2033_v35 = vsel %vm16008_vm4, %v10450_v45, %v2012_v36  ;;  %v9281_v36 = vld [vmem:[%s15940_s6 + $0x40] sm:$0xff] }
 0x468   : > { %v11309_v27 = vpop.permute.xlu0 %1712  ;;  %2387 = vmatprep.subr.bf16.mxu1 %v1561_v25  ;;  %2061 = vrot.lane.b32.xlu0 %v2033_v35, %s16143_s30  ;;  %v9935_v25 = vld [vmem:[#allocation2 + $0x70] sm:$0xff] }
 0x469   : > { %v1992_v30 = vpop.permute.xlu1 %1991 }
 0x46a   : > { %v2011_v31 = vsel %vm528_vm13, %v1992_v30, %v1994_v42  ;;  %v1587_v42 = vld [vmem:[#allocation2 + $0x70] sm:$0xff] }
 0x46b   : > { %2388 = vmatpush1.bf16.msra.mxu1 %v1560_v24  ;;  %v2032_v45 = vsel %vm16148_vm2, %v9932_v7, %v2011_v31  ;;  %v9805_v30 = vld [vmem:[%s15938_s4 + $0x7c] ss:$20 sps:$4 sm:$0xff]   ;;  %v1727_v7 = vsel %vm15988_vm12, %v11254_v51, %v11246_v59  ;;  %v9282_v59 = vld [vmem:[%s15940_s6 + $0x48] sm:$0xff]  ;;  %vm16151_vm2 = vcmask 916480  }
 0x46c   : > { %v11321_v47 = vpop.permute.xlu0 %1720  ;;  %2389 = vmatprep.subr.bf16.mxu1 %v1563_v12  ;;  %2059 = vrot.lane.b32.xlu0 %v2032_v45, %s16143_s30  ;;  %v9936_v45 = vld [vmem:[#allocation2 + $0x68] sm:$0xff] }
 0x46d   : > { %v2002_v18 = vpop.permute.xlu1 %2001 }
 0x46e   : > { %v2037_v60 = vsel %vm755_vm9, %v10711_v5, %v2002_v18 }
 0x470   : > { %v1551_v2 = vpop.permute.xlu0 %1550  ;;  %2069 = vrot.lane.b32.xlu0 %v2037_v60, %s16143_s30 }
 0x471   : > { %v1998_v49 = vpop.permute.xlu1 %1997  ;;  %v1562_v21 = vsel %vm15989_vm5, %v1551_v2, %v11234_v55  ;;  %v9933_v55 = vld [vmem:[#allocation2 + $0x50] sm:$0xff]  ;;  %vm16155_vm5 = vmmov %vm16151_vm2 }
 0x472   : > { %2390 = vmatpush1.bf16.msra.mxu1 %v1562_v21  ;;  %v1729_v21 = vsel %vm15988_vm12, %v11286_v40, %v11289_v58  ;;  %v9284_v58 = vld [vmem:[%s15940_s6 + $0x58] sm:$0xff] }
 0x473   : > { %2432 = vmatprep.subr.bf16.mxu1 %v11137_v13 }
 0x474   : > { %v2000_v14 = vpop.permute.xlu0 %1999 }
 0x475   : > { %v2014_v5 = vsel %vm528_vm13, %v2000_v14, %v2002_v18  ;;  %v11338_v4 = vpop.permute.xlu1 %1844  ;;  %2392 = vmatmul.mubr.bf16.vlgmr.msra.gmra.mrb[0].mxu1 %v9796_v10  ;;  %v2013_v8 = vsel %vm528_vm13, %v1998_v49, %v2000_v14  ;;  %v9807_v49 = vld [vmem:[%s15938_s4 + $0x78] ss:$20 sps:$4 sm:$0xff]  }
 0x476   : > { %2433 = vmatpush1.bf16.msra.mxu1 %v11147_v32  ;;  %v2036_v11 = vsel %vm16008_vm4, %v9933_v55, %v2014_v5  ;;  %2401 = vmatprep.mubr.bf16.mxu1 %v9799_v52  ;;  %v1585_v32 = vld [vmem:[#allocation2 + $0x50] sm:$0xff]  ;;  %v2035_v54 = vsel %vm16149_vm14, %v9934_v23, %v2013_v8  ;;  %v9810_v10 = vld [vmem:[%s15938_s4 + $0xc] ss:$20 sps:$4 sm:$0xff]   ;;  %v1728_v52 = vsel %vm15988_vm12, %v11309_v27, %v11286_v40  ;;  %vm16152_vm14 = vmmov %vm16151_vm2 }
 0x477   : > { %2434 = vmatprep.subr.bf16.mxu1 %v11171_v29  ;;  %2067 = vrot.lane.b32.xlu1 %v2036_v11, %s16143_s30  ;;  %v9802_v29 = vld [vmem:[%s15938_s4 + $0x54] ss:$20 sps:$4 sm:$0xff]  }
 0x478   : > { %v11346_v13 = vpop.permute.xlu0 %1718  ;;  %v9286_v27 = vld [vmem:[%s15940_s6 + $0x68] sm:$0xff] }
 0x479   : > { %v2008_v6 = vpop.permute.xlu1 %2007  ;;  %v1730_v11 = vsel %vm15988_vm12, %v11346_v13, %v11321_v47 }
 0x47a   : > { %2435 = vmatpush1.bf16.msra.mxu1 %v11177_v50  ;;  %v2040_v50 = vsel %vm755_vm9, %v10776_v33, %v2008_v6  ;;  %v1725_v33 = vsel %vm15988_vm12, %v11226_v1, %v11244_v26  ;;  %v1724_v26 = vsel %vm15988_vm12, %v11236_v15, %v11226_v1  ;;  %v9285_v1 = vld [vmem:[%s15940_s6 + $0x60] sm:$0xff]  ;;  %v1726_v15 = vsel %vm15988_vm12, %v11276_v0, %v11254_v51  ;;  %v9287_v0 = vld [vmem:[%s15940_s6 + $0x70] sm:$0xff] }
 0x47b   : > { %2436 = vmatprep.subr.bf16.mxu1 %v1585_v32  ;;  %2065 = vrot.lane.b32.xlu1 %v2035_v54, %s16143_s30 }
 0x47c   : > { %v11358_v20 = vpop.permute.xlu0 %1842 }
 0x47d   : > { %v2004_v38 = vpop.permute.xlu1 %2003  ;;  %2402 = vmatmul.mubr.bf16.gmra.mrb[4].mxu1 %v9801_v34  ;;  %v1865_v8 = vsel %vm15990_vm10, %v11358_v20, %v11338_v4 }
 0x47e   : > { %2437 = vmatpush1.bf16.msra.mxu1 %v11181_v9  ;;  %2411 = vmatprep.mubr.bf16.mxu1 %v9802_v29  ;;  %v9804_v9 = vld [vmem:[%s15938_s4 + $0x50] ss:$20 sps:$4 sm:$0xff]  }
 0x47f   : > { %2438 = vmatprep.subr.bf16.mxu1 %v1587_v42  ;;  %2075 = vrot.lane.b32.xlu1 %v2040_v50, %s16143_s30 }
 0x480   : > { %v2006_v57 = vpop.permute.xlu0 %2005 }
 0x481   : > { %v2016_v62 = vsel %vm528_vm13, %v2006_v57, %v2008_v6  ;;  %v1851_v63 = vpop.permute.xlu1 %1850  ;;  %v2015_v31 = vsel %vm528_vm13, %v2004_v38, %v2006_v57 }
 0x482   : > { %2439 = vmatpush1.bf16.msra.mxu1 %v11198_v3  ;;  %v2039_v35 = vsel %vm16008_vm4, %v9935_v25, %v2016_v62  ;;  %v9283_v3 = vld [vmem:[%s15940_s6 + $0x50] sm:$0xff]  ;;  %v2038_v18 = vsel %vm16150_vm3, %v9936_v45, %v2015_v31  ;;  %vm16153_vm3 = vmmov %vm16151_vm2 }
 0x483   : > { %2440 = vmatprep.subr.bf16.mxu1 %v1725_v33  ;;  %2208 = vperm.xlu1 %9795, %v9281_v36  }
 0x484   : > { %2073 = vrot.lane.b32.xlu0 %v2039_v35, %s16143_s30  ;;  %v1841_v24 = vpop.permute.xlu0 %1840 }
 0x485   : > { %v1855_v12 = vpop.permute.xlu1 %1854  ;;  %2412 = vmatmul.mubr.bf16.gmra.mrb[8].mxu1 %v9804_v9  ;;  %v1864_v34 = vsel %vm15990_vm10, %v1841_v24, %v11358_v20 }
 0x486   : > { %2441 = vmatpush1.bf16.msra.mxu1 %v1724_v26  ;;  %2421 = vmatprep.mubr.bf16.mxu1 %v9805_v30 }
 0x487   : > { %2442 = vmatprep.subr.bf16.mxu1 %v1727_v7  ;;  %2218 = vperm.xlu1 %9795, %v9283_v3  }
 0x488   : > { %2071 = vrot.lane.b32.xlu0 %v2038_v18, %s16143_s30  ;;  %v1849_v60 = vpop.permute.xlu0 %1848 }
 0x489   : > { %v1723_v2 = vpop.permute.xlu1 %1722  ;;  %v1867_v13 = vsel %vm15990_vm10, %v1849_v60, %v1851_v63 }
 0x48a   : > { %2443 = vmatpush1.bf16.msra.mxu1 %v1726_v15  ;;  %v1731_v5 = vsel %vm15988_vm12, %v11321_v47, %v1723_v2  ;;  %v9288_v47 = vld [vmem:[%s15940_s6 + $0x78] sm:$0xff]  ;;  %vm16154_vm12 = vmmov %vm16151_vm2  ;;  %v9813_v15 = vld [vmem:[%s15938_s4 + $0x30] ss:$20 sps:$4 sm:$0xff]  }
 0x48b   : > { %2444 = vmatprep.subr.bf16.mxu1 %v1729_v21  ;;  %2228 = vperm.xlu1 %9795, %v9285_v1   ;;  %v9811_v1 = vld [vmem:[%s15938_s4 + $0x34] ss:$20 sps:$4 sm:$0xff]   ;;  %v9814_v2 = vld [vmem:[%s15938_s4 + $0x5c] ss:$20 sps:$4 sm:$0xff]  }
 0x48c   : > { %2213 = vperm.xlu0 %9794, %v9282_v59   ;;  %v1847_v51 = vpop.permute.xlu0 %1846  ;;  %v9816_v59 = vld [vmem:[%s15938_s4 + $0x58] ss:$20 sps:$4 sm:$0xff]   ;;  %v9819_v21 = vld [vmem:[%s15938_s4 + $0x80] ss:$20 sps:$4 sm:$0xff]  }
 0x48d   : > { %v1853_v14 = vpop.permute.xlu1 %1852  ;;  %2422 = vmatmul.mubr.bf16.gmra.mrb[12].mxu1 %v9807_v49  ;;  %v1866_v54 = vsel %vm15990_vm10, %v1847_v51, %v1849_v60  ;;  %v9808_v60 = vld [vmem:[%s15938_s4 + $0x8] ss:$20 sps:$4 sm:$0xff]   ;;  %v9817_v49 = vld [vmem:[%s15938_s4 + $0x84] ss:$20 sps:$4 sm:$0xff]  }
 0x48e   : > { %2445 = vmatpush1.bf16.msra.mxu1 %v1728_v52  ;;  %2464 = vmatprep.mubr.bf16.mxu1 %v9810_v10  ;;  %v1868_v20 = vsel %vm15990_vm10, %v1853_v14, %v1855_v12  ;;  %v16159_v52 = vmov 0  }
 0x48f   : > { %2238 = vperm.xlu1 %9795, %v9287_v0   ;;  %2446 = vmatprep.subr.bf16.mxu1 %v1731_v5 }
 0x490   : > { %2223 = vperm.xlu0 %9794, %v9284_v58   ;;  %v1857_v55 = vpop.permute.xlu0 %1856 }
 0x491   : > { %v1915_v40 = vpop.permute.xlu1 %1914  ;;  %v1869_v29 = vsel %vm15990_vm10, %v1855_v12, %v1857_v55 }
 0x492   : > { %2447 = vmatpush1.bf16.msra.mxu1 %v1730_v11 }
 0x493   : > { %2448 = vmatprep.subr.bf16.mxu1 %v1865_v8 }
 0x494   : > { %2233 = vperm.xlu0 %9794, %v9286_v27   ;;  %v1861_v6 = vpop.permute.xlu0 %1860 }
 0x495   : > { %v1913_v32 = vpop.permute.xlu1 %1912 }
 0x496   : > { %2449 = vmatpush1.bf16.msra.mxu1 %v1864_v34  ;;  %v1937_v33 = vsel %vm16152_vm14, %v1913_v32, %v1915_v40  ;;  %vm16157_vm14 = vmmov %vm16151_vm2 }
 0x497   : > { %2450 = vmatprep.subr.bf16.mxu1 %v1867_v13 }
 0x498   : > { %2243 = vperm.xlu0 %9794, %v9288_v47   ;;  %v1859_v23 = vpop.permute.xlu0 %1858 }
 0x499   : > { %v1863_v4 = vpop.permute.xlu1 %1862  ;;  %v1870_v36 = vsel %vm15990_vm10, %v1859_v23, %v1861_v6 }
 0x49a   : > { %2451 = vmatpush1.bf16.msra.mxu1 %v1866_v54  ;;  %v1871_v50 = vsel %vm15990_vm10, %v1861_v6, %v1863_v4  ;;  %vm16156_vm10 = vmmov %vm16151_vm2 }
 0x49b   : > { %2452 = vmatprep.subr.bf16.mxu1 %v1869_v29 }
 0x49c   : > { %v1917_v38 = vpop.permute.xlu0 %1916 }
 0x49d   : > { %v1923_v42 = vpop.permute.xlu1 %1922  ;;  %v1938_v63 = vsel %vm16151_vm2, %v1915_v40, %v1917_v38  ;;  %v9820_v38 = vld [vmem:[%s15938_s4 + $0x10] ss:$20 sps:$4 sm:$0xff]  }
 0x49e   : > { %2453 = vmatpush1.bf16.msra.mxu1 %v1868_v20  ;;  %v9821_v20 = vld [vmem:[%s15938_s4 + $0x38] ss:$20 sps:$4 sm:$0xff]  }
 0x49f   : > { %2454 = vmatprep.subr.bf16.mxu1 %v1871_v50  ;;  %v9823_v50 = vld [vmem:[%s15938_s4 + $0x88] ss:$20 sps:$4 sm:$0xff]  }
 0x4a0   : > { %v1921_v57 = vpop.permute.xlu0 %1920 }
 0x4a1   : > { %v1927_v62 = vpop.permute.xlu1 %1926  ;;  %v1940_v35 = vsel %vm16153_vm3, %v1921_v57, %v1923_v42  ;;  %v9822_v42 = vld [vmem:[%s15938_s4 + $0x60] ss:$20 sps:$4 sm:$0xff]  }
 0x4a2   : > { %2455 = vmatpush1.bf16.msra.mxu1 %v1870_v36 }
 0x4a3   : > { %2456 = vmatprep.subr.bf16.mxu1 %v1938_v63 }
 0x4a4   : > { %v1919_v9 = vpop.permute.xlu0 %1918 }
 0x4a5   : > { %v1925_v25 = vpop.permute.xlu1 %1924  ;;  %v1939_v31 = vsel %vm16154_vm12, %v1919_v9, %v1921_v57 }
 0x4a6   : > { %2457 = vmatpush1.bf16.msra.mxu1 %v1937_v33  ;;  %v1941_v12 = vsel %vm16156_vm10, %v1925_v25, %v1927_v62  ;;  %vm16158_vm10 = vcmask 924672  }
 0x4a7   : > { %2458 = vmatprep.subr.bf16.mxu1 %v1940_v35  ;;  %vm16160_vm12 = vmmov %vm16158_vm10 }
 0x4a8   : > { %v1929_v30 = vpop.permute.xlu0 %1928 }
 0x4a9   : > { %v1942_v24 = vsel %vm16155_vm5, %v1927_v62, %v1929_v30  ;;  %v1935_v3 = vpop.permute.xlu1 %1934  ;;  %vm16161_vm5 = vmmov %vm16158_vm10 }
 0x4aa   : > { %2459 = vmatpush1.bf16.msra.mxu1 %v1939_v31  ;;  %vm16162_vm3 = vmmov %vm16161_vm5 }
 0x4ab   : > { %2460 = vmatprep.subr.bf16.mxu1 %v1942_v24 }
 0x4ac   : > { %v1933_v26 = vpop.permute.xlu0 %1932 }
 0x4ad   : > { %v1944_v7 = vsel %vm16151_vm2, %v1933_v26, %v1935_v3  ;;  %vm16163_vm2 = vmmov %vm16162_vm3 }
 0x4ae   : > { %2461 = vmatpush1.bf16.msra.mxu1 %v1941_v12 }
 0x4af   : > { %2462 = vmatprep.subr.bf16.mxu1 %v1944_v7 }
 0x4b0   : > { %v1931_v45 = vpop.permute.xlu0 %1930 }
 0x4b1   : > { %v1943_v18 = vsel %vm16157_vm14, %v1931_v45, %v1933_v26  ;;  %vm16164_vm14 = vmmov %vm16163_vm2 }
 0x4b2   : > { %2463 = vmatpush1.bf16.msra.mxu1 %v1943_v18 }
 0x4b5   : > { %2465 = vmatmul.mubr.bf16.vlgmr.msra.gmra.mrb[0].mxu1 %v9808_v60 }
 0x4b6   : > { %2474 = vmatprep.mubr.bf16.mxu1 %v9811_v1 }
 0x4bd   : > { %2475 = vmatmul.mubr.bf16.gmra.mrb[4].mxu1 %v9813_v15 }
 0x4be   : > { %2484 = vmatprep.mubr.bf16.mxu1 %v9814_v2 }
 0x4c5   : > { %2485 = vmatmul.mubr.bf16.gmra.mrb[8].mxu1 %v9816_v59 }
 0x4c6   : > { %2494 = vmatprep.mubr.bf16.mxu1 %v9817_v49 }
 0x4c9   : > { %v2058_v10 = vpop.permute.xlu0 %2057 }
 0x4cd   : > { %v2056_v51 = vpop.permute.xlu1 %2055  ;;  %2495 = vmatmul.mubr.bf16.gmra.mrb[12].mxu1 %v9819_v21 }
 0x4ce   : > { %v2078_v0 = vsel %vm16158_vm10, %v2056_v51, %v2058_v10  ;;  %2537 = vmatprep.mubr.bf16.mxu1 %v16159_v52  ;;  %vm16165_vm10 = vmmov %vm16163_vm2 }
 0x4cf   : > { %2505 = vmatprep.subr.bf16.mxu1 %v2078_v0 }
 0x4d2   : > { %v2054_v14 = vpop.permute.xlu1 %2053 }
 0x4d3   : > { %v2077_v58 = vsel %vm16160_vm12, %v2054_v14, %v2056_v51  ;;  %vm16166_vm12 = vmmov %vm16163_vm2 }
 0x4d4   : > { %2506 = vmatpush1.bf16.msra.mxu1 %v2077_v58 }
 0x4d9   : > { %v2064_v5 = vpop.permute.xlu1 %2063 }
 0x4da   : > { %v2062_v55 = vpop.permute.xlu0 %2061 }
 0x4db   : > { %v2080_v11 = vsel %vm16161_vm5, %v2062_v55, %v2064_v5  ;;  %vm2346_vm5 = vcmask 523264  }
 0x4dc   : > { %2507 = vmatprep.subr.bf16.mxu1 %v2080_v11 }
 0x4de   : > { %v2060_v40 = vpop.permute.xlu0 %2059 }
 0x4df   : > { %v2079_v27 = vsel %vm16162_vm3, %v2060_v40, %v2062_v55 }
 0x4e0   : > { %2508 = vmatpush1.bf16.msra.mxu1 %v2079_v27 }
 0x4e2   : > { %v2070_v8 = vpop.permute.xlu0 %2069 }
 0x4e9   : > { %v2068_v6 = vpop.permute.xlu1 %2067 }
 0x4ea   : > { %v2082_v34 = vsel %vm16163_vm2, %v2068_v6, %v2070_v8 }
 0x4eb   : > { %2509 = vmatprep.subr.bf16.mxu1 %v2082_v34 }
 0x4ed   : > { %v2066_v32 = vpop.permute.xlu1 %2065 }
 0x4ee   : > { %v2081_v47 = vsel %vm16164_vm14, %v2066_v32, %v2068_v6 }
 0x4ef   : > { %2510 = vmatpush1.bf16.msra.mxu1 %v2081_v47 }
 0x4f1   : > { %v2076_v13 = vpop.permute.xlu1 %2075 }
 0x4f6   : > { %v2074_v23 = vpop.permute.xlu0 %2073 }
 0x4f7   : > { %v2084_v54 = vsel %vm16165_vm10, %v2074_v23, %v2076_v13 }
 0x4f8   : > { %2511 = vmatprep.subr.bf16.mxu1 %v2084_v54 }
 0x4fa   : > { %v2072_v4 = vpop.permute.xlu0 %2071 }
 0x4fb   : > { %v2083_v29 = vsel %vm16166_vm12, %v2072_v4, %v2074_v23 }
 0x4fc   : > { %2512 = vmatpush1.bf16.msra.mxu1 %v2083_v29 }
 0x4ff   : > { %9309 = vmatmul.mubr.msk.bf16.vlgmr.msra.gmra.mrb[0].mxu1 %vm2346_vm5, %v9820_v38 }
 0x500   : > { %2547 = vmatprep.mubr.bf16.mxu1 %v16159_v52 }
 0x502   : > { %v2209_v57 = vpop.permute.xlu1 %2208 }
 0x506   : > { %v2219_v45 = vpop.permute.xlu1 %2218 }
 0x507   : > { %9310 = vmatmul.mubr.msk.bf16.gmra.mrb[4].mxu1 %vm2346_vm5, %v9821_v20 }
 0x508   : > { %2557 = vmatprep.mubr.bf16.mxu1 %v16159_v52 }
 0x50a   : > { %v2229_v11 = vpop.permute.xlu1 %2228 }
 0x50b   : > { %v2214_v9 = vpop.permute.xlu0 %2213 }
 0x50f   : > { %9311 = vmatmul.mubr.msk.bf16.gmra.mrb[8].mxu1 %vm2346_vm5, %v9822_v42  ;;  %v2224_v2 = vpop.permute.xlu0 %2223 }
 0x510   : > { %2567 = vmatprep.mubr.bf16.mxu1 %v16159_v52 }
 0x513   : > { %v2234_v34 = vpop.permute.xlu0 %2233 }
 0x517   : > { %9312 = vmatmul.mubr.msk.bf16.gmra.mrb[12].mxu1 %vm2346_vm5, %v9823_v50  ;;  %v2239_v50 = vpop.permute.xlu1 %2238 }
 0x5d2   : > { %v2539_v36 = vpop.f32.mrb[0].mxu1 }
 0x5d3   : > { %v9501_v62 = vadd.f32 %v2539_v36, %v2209_v57  ;;  %v2541_v63 = vpop.f32.mrb[1].mxu1 }
 0x5d4   : > { %v9502_v33 = vadd.f32 %v2541_v63, %v2209_v57  ;;  %v2543_v25 = vpop.f32.mrb[2].mxu1 }
 0x5d5   : > { %v9503_v35 = vadd.f32 %v2543_v25, %v2214_v9  ;;  %v2545_v30 = vpop.f32.mrb[3].mxu1  ;;  %v2578_v24 = vmax.f32 %v9501_v62, 0.0 }
 0x5d6   : > { %v9504_v31 = vadd.f32 %v2545_v30, %v2214_v9  ;;  %v2579_v26 = vmax.f32 %v9502_v33, 0.0  ;;  %v2244_v9 = vpop.permute.xlu0 %2243 }
 0x5d7   : > { %v2580_v3 = vmax.f32 %v9503_v35, 0.0 }
 0x5d8   : > { %v2581_v12 = vmax.f32 %v9504_v31, 0.0 }
 0x5d9   : > { %v11501_v7 = vpack.c.bf16 %v2580_v3, %v2578_v24 }
 0x5da   : > { %v11503_v18 = vpack.c.bf16 %v2581_v12, %v2579_v26  ;;  %v2549_v60 = vpop.f32.mrb[4].mxu1 }
 0x5db   : > { %2602 = vst [vmem:[#allocation2 + $0x8] sm:$0xff] %v11501_v7  ;;  %v9505_v1 = vadd.f32 %v2549_v60, %v2219_v45  ;;  %v2551_v15 = vpop.f32.mrb[5].mxu1  ;;  %2684 = vrot.lane.b32.xlu0 %v11501_v7, %s9974_s19  ;;  %2618 = vrot.lane.b32.xlu1 %v11501_v7, %s9971_s16 }
 0x5dc   : > { %2603 = vst [vmem:[#allocation2 + $0x10] sm:$0xff] %v11503_v18  ;;  %v9506_v59 = vadd.f32 %v2551_v15, %v2219_v45  ;;  %v2553_v49 = vpop.f32.mrb[6].mxu1 }
 0x5dd   : > { %v9507_v21 = vadd.f32 %v2553_v49, %v2224_v2  ;;  %v2555_v10 = vpop.f32.mrb[7].mxu1  ;;  %v2582_v0 = vmax.f32 %v9505_v1, 0.0 }
 0x5de   : > { %v9508_v51 = vadd.f32 %v2555_v10, %v2224_v2  ;;  %v2583_v58 = vmax.f32 %v9506_v59, 0.0 }
 0x5df   : > { %v2584_v14 = vmax.f32 %v9507_v21, 0.0  ;;  %3214 = vrot.lane.b32.xlu0 %v11501_v7, %s16045_s18  ;;  %2896 = vrot.lane.b32.xlu1 %v11501_v7, %s16045_s18 }
 0x5e0   : > { %v2585_v5 = vmax.f32 %v9508_v51, 0.0 }
 0x5e1   : > { %v11515_v55 = vpack.c.bf16 %v2584_v14, %v2582_v0 }
 0x5e2   : > { %v11517_v40 = vpack.c.bf16 %v2585_v5, %v2583_v58  ;;  %v2559_v27 = vpop.f32.mrb[8].mxu1  ;;  %v16169_v5 = vld [vmem:[#allocation12_spill] sm:$0xff] }
 0x5e3   : > { %2604 = vst [vmem:[#allocation2 + $0x28] sm:$0xff] %v11515_v55  ;;  %v9509_v8 = vadd.f32 %v2559_v27, %v2229_v11  ;;  %v2561_v6 = vpop.f32.mrb[9].mxu1  ;;  %3354 = vrot.lane.b32.xlu0 %v11501_v7, %s9974_s19  ;;  %3048 = vrot.lane.b32.xlu1 %v11501_v7, %s9974_s19  ;;  %vm16170_vm3 = vcmp.ne.s16.totalorder %v16169_v5, 0 }
 0x5e4   : > { %2605 = vst [vmem:[#allocation2 + $0x30] sm:$0xff] %v11517_v40  ;;  %v9510_v32 = vadd.f32 %v2561_v6, %v2229_v11  ;;  %v2563_v47 = vpop.f32.mrb[10].mxu1  ;;  %vm16175_vm14 = vmmov %vm16170_vm3 }
 0x5e5   : > { %v9511_v13 = vadd.f32 %v2563_v47, %v2234_v34  ;;  %v2565_v23 = vpop.f32.mrb[11].mxu1  ;;  %v2586_v4 = vmax.f32 %v9509_v8, 0.0 }
 0x5e6   : > { %v9512_v54 = vadd.f32 %v2565_v23, %v2234_v34  ;;  %v2587_v38 = vmax.f32 %v9510_v32, 0.0  ;;  %v16171_v34 = vld [vmem:[#allocation13_spill] sm:$0xff] }
 0x5e7   : > { %v2588_v29 = vmax.f32 %v9511_v13, 0.0  ;;  %2898 = vrot.lane.b32.xlu0 %v11503_v18, %s16045_s18  ;;  %2824 = vrot.lane.b32.xlu1 %v11501_v7, %s16043_s22  ;;  %vm16172_vm2 = vcmp.ne.s16.totalorder %v16171_v34, 0 }
 0x5e8   : > { %v2589_v20 = vmax.f32 %v9512_v54, 0.0  ;;  %vm16177_vm10 = vmmov %vm16172_vm2 }
 0x5e9   : > { %v11529_v42 = vpack.c.bf16 %v2588_v29, %v2586_v4  ;;  %vm16179_vm12 = vmmov %vm16172_vm2 }
 0x5ea   : > { %v11531_v57 = vpack.c.bf16 %v2589_v20, %v2587_v38  ;;  %v2569_v36 = vpop.f32.mrb[12].mxu1 }
 0x5eb   : > { %2606 = vst [vmem:[#allocation2 + $0x48] sm:$0xff] %v11529_v42  ;;  %v9513_v62 = vadd.f32 %v2569_v36, %v2239_v50  ;;  %v2571_v63 = vpop.f32.mrb[13].mxu1  ;;  %3050 = vrot.lane.b32.xlu0 %v11503_v18, %s9974_s19  ;;  %2686 = vrot.lane.b32.xlu1 %v11503_v18, %s9974_s19 }
 0x5ec   : > { %2607 = vst [vmem:[#allocation2 + $0x50] sm:$0xff] %v11531_v57  ;;  %v9514_v33 = vadd.f32 %v2571_v63, %v2239_v50  ;;  %v2573_v25 = vpop.f32.mrb[14].mxu1 }
 0x5ed   : > { %v9515_v35 = vadd.f32 %v2573_v25, %v2244_v9  ;;  %v2575_v30 = vpop.f32.mrb[15].mxu1  ;;  %v2590_v24 = vmax.f32 %v9513_v62, 0.0 }
 0x5ee   : > { %v9516_v31 = vadd.f32 %v2575_v30, %v2244_v9  ;;  %v2591_v26 = vmax.f32 %v9514_v33, 0.0 }
 0x5ef   : > { %v2592_v3 = vmax.f32 %v9515_v35, 0.0  ;;  %2826 = vrot.lane.b32.xlu0 %v11503_v18, %s16043_s22  ;;  %2642 = vrot.lane.b32.xlu1 %v11503_v18, %s16028_s14 }
 0x5f0   : > { %v2593_v12 = vmax.f32 %v9516_v31, 0.0 }
 0x5f1   : > { %v11543_v45 = vpack.c.bf16 %v2592_v3, %v2590_v24 }
 0x5f2   : > { %v11545_v60 = vpack.c.bf16 %v2593_v12, %v2591_v26 }
 0x5f3   : > { %2608 = vst [vmem:[#allocation2 + $0x68] sm:$0xff] %v11543_v45  ;;  %3216 = vrot.lane.b32.xlu1 %v11503_v18, %s16045_s18  ;;  %2620 = vrot.lane.b32.xlu0 %v11515_v55, %s9971_s16 }
 0x5f4   : > { %2609 = vst [vmem:[#allocation2 + $0x70] sm:$0xff] %v11545_v60 }
 0x5f7   : > { %3356 = vrot.lane.b32.xlu1 %v11503_v18, %s9974_s19  ;;  %2902 = vrot.lane.b32.xlu0 %v11515_v55, %s16045_s18 }
 0x5fb   : > { %2690 = vrot.lane.b32.xlu1 %v11515_v55, %s9974_s19  ;;  %3054 = vrot.lane.b32.xlu0 %v11515_v55, %s9974_s19 }
 0x5ff   : > { %2904 = vrot.lane.b32.xlu1 %v11517_v40, %s16045_s18  ;;  %2830 = vrot.lane.b32.xlu0 %v11515_v55, %s16043_s22 }
 0x603   : > { %3056 = vrot.lane.b32.xlu1 %v11517_v40, %s9974_s19  ;;  %3220 = vrot.lane.b32.xlu0 %v11515_v55, %s16045_s18 }
 0x607   : > { %2832 = vrot.lane.b32.xlu1 %v11517_v40, %s16043_s22  ;;  %3360 = vrot.lane.b32.xlu0 %v11515_v55, %s9974_s19 }
 0x60b   : > { %3222 = vrot.lane.b32.xlu1 %v11517_v40, %s16045_s18  ;;  %2692 = vrot.lane.b32.xlu0 %v11517_v40, %s9974_s19 }
 0x60f   : > { %3362 = vrot.lane.b32.xlu1 %v11517_v40, %s9974_s19  ;;  %2644 = vrot.lane.b32.xlu0 %v11517_v40, %s16028_s14 }
 0x613   : > { %2696 = vrot.lane.b32.xlu0 %v11529_v42, %s9974_s19  ;;  %2622 = vrot.lane.b32.xlu1 %v11529_v42, %s9971_s16 }
 0x617   : > { %2836 = vrot.lane.b32.xlu0 %v11529_v42, %s16043_s22  ;;  %2908 = vrot.lane.b32.xlu1 %v11529_v42, %s16045_s18 }
 0x61b   : > { %3226 = vrot.lane.b32.xlu0 %v11529_v42, %s16045_s18  ;;  %3060 = vrot.lane.b32.xlu1 %v11529_v42, %s9974_s19 }
 0x61f   : > { %2910 = vrot.lane.b32.xlu0 %v11531_v57, %s16045_s18  ;;  %2698 = vrot.lane.b32.xlu1 %v11531_v57, %s9974_s19 }
 0x623   : > { %3062 = vrot.lane.b32.xlu0 %v11531_v57, %s9974_s19  ;;  %2646 = vrot.lane.b32.xlu1 %v11531_v57, %s16028_s14 }
 0x627   : > { %2838 = vrot.lane.b32.xlu1 %v11531_v57, %s16043_s22  ;;  %2624 = vrot.lane.b32.xlu0 %v11543_v45, %s9971_s16 }
 0x62b   : > { %3228 = vrot.lane.b32.xlu1 %v11531_v57, %s16045_s18  ;;  %2914 = vrot.lane.b32.xlu0 %v11543_v45, %s16045_s18 }
 0x62f   : > { %2702 = vrot.lane.b32.xlu1 %v11543_v45, %s9974_s19  ;;  %3066 = vrot.lane.b32.xlu0 %v11543_v45, %s9974_s19 }
 0x633   : > { %2916 = vrot.lane.b32.xlu1 %v11545_v60, %s16045_s18  ;;  %2842 = vrot.lane.b32.xlu0 %v11543_v45, %s16043_s22 }
 0x637   : > { %3068 = vrot.lane.b32.xlu1 %v11545_v60, %s9974_s19  ;;  %3232 = vrot.lane.b32.xlu0 %v11543_v45, %s16045_s18 }
 0x63b   : > { %2844 = vrot.lane.b32.xlu1 %v11545_v60, %s16043_s22  ;;  %2704 = vrot.lane.b32.xlu0 %v11545_v60, %s9974_s19 }
 0x63f   : > { %3234 = vrot.lane.b32.xlu1 %v11545_v60, %s16045_s18  ;;  %2648 = vrot.lane.b32.xlu0 %v11545_v60, %s16028_s14 }
 0x64d   : > { %v11629_v1 = vpop.permute.xlu0 %2684  ;;  %v2619_v15 = vpop.permute.xlu1 %2618 }
 0x64e   : > { %2630 = vst.msk [vmem:[#allocation2] sm:$0xff] %vm1046_vm6, %v2619_v15 }
 0x651   : > { %v11632_v2 = vpop.permute.xlu0 %3214  ;;  %v11634_v59 = vpop.permute.xlu1 %2896 }
 0x655   : > { %v11636_v49 = vpop.permute.xlu0 %3354  ;;  %v11638_v21 = vpop.permute.xlu1 %3048  ;;  %v11663_v23 = vld [vmem:[#allocation2] sm:$0xff] }
 0x659   : > { %v2899_v10 = vpop.permute.xlu0 %2898  ;;  %v11640_v51 = vpop.permute.xlu1 %2824 }
 0x65a   : > { %16167 = vst [vmem:[#allocation32_spill] sm:$0xff] %v11640_v51  ;;  %v2919_v0 = vsel %vm528_vm13, %v11634_v59, %v2899_v10  ;;  %v2940_v58 = vsel %vm518_vm11, %v11503_v18, %v2899_v10 }
 0x65b   : > { %2966 = vrot.lane.b32.xlu1 %v2940_v58, %s16026_s17  ;;  %v2939_v11 = vsel %vm16170_vm3, %v11501_v7, %v2919_v0 }
 0x65c   : > { %2964 = vrot.lane.b32.xlu0 %v2939_v11, %s16026_s17 }
 0x65d   : > { %v11652_v27 = vpop.permute.xlu0 %3050  ;;  %v2687_v8 = vpop.permute.xlu1 %2686 }
 0x65e   : > { %v2707_v6 = vsel %vm440_vm15, %v11629_v1, %v2687_v8 }
 0x65f   : > { %v2728_v32 = vsel %vm16172_vm2, %v11503_v18, %v2707_v6  ;;  %vm16182_vm2 = vmmov %vm16170_vm3 }
 0x660   : > { %2754 = vrot.lane.b32.xlu1 %v2728_v32, %s16011_s21 }
 0x661   : > { %v11660_v47 = vpop.permute.xlu0 %2826  ;;  %v2643_v13 = vpop.permute.xlu1 %2642 }
 0x662   : > { %16173 = vst [vmem:[#allocation18_spill] sm:$0xff] %v11660_v47  ;;  %2654 = vst.msk [vmem:[#allocation2 + $0x18] sm:$0xff] %vm486_vm7, %v2643_v13 }
 0x664   : > { %2682 = vrot.lane.b32.xlu1 %v11663_v23, %s9974_s19 }
 0x665   : > { %v2621_v54 = vpop.permute.xlu0 %2620  ;;  %v11667_v4 = vpop.permute.xlu1 %3216 }
 0x666   : > { %2631 = vst.msk [vmem:[#allocation2 + $0x20] sm:$0xff] %vm1046_vm6, %v2621_v54 }
 0x668   : > { %2894 = vrot.lane.b32.xlu1 %v11663_v23, %s16045_s18 }
 0x669   : > { %v11672_v29 = vpop.permute.xlu0 %2902  ;;  %v11674_v38 = vpop.permute.xlu1 %3356  ;;  %v11676_v20 = vld [vmem:[#allocation2 + $0x18] sm:$0xff] }
 0x66a   : > { %3218 = vrot.lane.b32.xlu0 %v11676_v20, %s16045_s18 }
 0x66c   : > { %3046 = vrot.lane.b32.xlu1 %v11663_v23, %s9974_s19 }
 0x66d   : > { %v11682_v50 = vpop.permute.xlu0 %3054  ;;  %v11684_v36 = vpop.permute.xlu1 %2690  ;;  %v11706_v31 = vld [vmem:[#allocation2 + $0x20] sm:$0xff] }
 0x66e   : > { %3358 = vrot.lane.b32.xlu0 %v11676_v20, %s9974_s19 }
 0x670   : > { %2822 = vrot.lane.b32.xlu1 %v11663_v23, %s16043_s22 }
 0x671   : > { %v11690_v62 = vpop.permute.xlu0 %2830  ;;  %v2905_v63 = vpop.permute.xlu1 %2904 }
 0x672   : > { %16174 = vst [vmem:[#allocation17_spill] sm:$0xff] %v11690_v62  ;;  %v2921_v9 = vsel %vm528_vm13, %v11672_v29, %v2905_v63  ;;  %v2943_v33 = vsel %vm518_vm11, %v11517_v40, %v2905_v63 }
 0x673   : > { %v2942_v25 = vsel %vm16175_vm14, %v11515_v55, %v2921_v9  ;;  %vm16183_vm14 = vmmov %vm16177_vm10 }
 0x674   : > { %2972 = vrot.lane.b32.xlu1 %v2943_v33, %s16026_s17  ;;  %2970 = vrot.lane.b32.xlu0 %v2942_v25, %s16026_s17 }
 0x675   : > { %v11702_v35 = vpop.permute.xlu0 %3220  ;;  %v11704_v30 = vpop.permute.xlu1 %3056 }
 0x678   : > { %2688 = vrot.lane.b32.xlu0 %v11706_v31, %s9974_s19 }
 0x679   : > { %v11710_v24 = vpop.permute.xlu0 %3360  ;;  %v11712_v3 = vpop.permute.xlu1 %2832 }
 0x67a   : > { %16176 = vst [vmem:[#allocation28_spill] sm:$0xff] %v11712_v3 }
 0x67c   : > { %2900 = vrot.lane.b32.xlu0 %v11706_v31, %s16045_s18 }
 0x67d   : > { %v2693_v26 = vpop.permute.xlu0 %2692  ;;  %v11716_v12 = vpop.permute.xlu1 %3222 }
 0x67e   : > { %v2709_v15 = vsel %vm440_vm15, %v11684_v36, %v2693_v26 }
 0x67f   : > { %v2731_v10 = vsel %vm16177_vm10, %v11517_v40, %v2709_v15  ;;  %vm16184_vm10 = vcmp.ne.s16.totalorder %v10197_v61, 0 }
 0x680   : > { %2760 = vrot.lane.b32.xlu1 %v2731_v10, %s16011_s21  ;;  %3052 = vrot.lane.b32.xlu0 %v11706_v31, %s9974_s19 }
 0x681   : > { %v2645_v0 = vpop.permute.xlu0 %2644  ;;  %v11726_v58 = vpop.permute.xlu1 %3362 }
 0x682   : > { %2655 = vst.msk [vmem:[#allocation2 + $0x38] sm:$0xff] %vm486_vm7, %v2645_v0 }
 0x684   : > { %2828 = vrot.lane.b32.xlu1 %v11706_v31, %s16043_s22 }
 0x685   : > { %v11731_v11 = vpop.permute.xlu0 %2696  ;;  %v2623_v8 = vpop.permute.xlu1 %2622 }
 0x686   : > { %2632 = vst.msk [vmem:[#allocation2 + $0x40] sm:$0xff] %vm1046_vm6, %v2623_v8 }
 0x689   : > { %v11734_v6 = vpop.permute.xlu0 %2836  ;;  %v11736_v32 = vpop.permute.xlu1 %2908  ;;  %v11738_v13 = vld [vmem:[#allocation2 + $0x38] sm:$0xff] }
 0x68a   : > { %16178 = vst [vmem:[#allocation20_spill] sm:$0xff] %v11734_v6  ;;  %3224 = vrot.lane.b32.xlu0 %v11738_v13, %s16045_s18 }
 0x68d   : > { %v11742_v54 = vpop.permute.xlu0 %3226  ;;  %v11744_v63 = vpop.permute.xlu1 %3060 }
 0x691   : > { %v2911_v9 = vpop.permute.xlu0 %2910  ;;  %v2699_v33 = vpop.permute.xlu1 %2698 }
 0x692   : > { %v2711_v25 = vsel %vm440_vm15, %v11731_v11, %v2699_v33  ;;  %v2946_v26 = vsel %vm518_vm11, %v11531_v57, %v2911_v9  ;;  %v2923_v10 = vsel %vm528_vm13, %v11736_v32, %v2911_v9  ;;  %v11761_v33 = vld [vmem:[#allocation2 + $0x40] sm:$0xff] }
 0x693   : > { %2978 = vrot.lane.b32.xlu1 %v2946_v26, %s16026_s17  ;;  %v2734_v15 = vsel %vm16179_vm12, %v11531_v57, %v2711_v25  ;;  %v2945_v26 = vsel %vm16170_vm3, %v11529_v42, %v2923_v10  ;;  %vm16185_vm12 = vcmp.ne.s16.totalorder %v10155_v39, 0  ;;  %vm16189_vm3 = vcmp.ne.s16.totalorder %v10274_v28, 0 }
 0x694   : > { %2766 = vrot.lane.b32.xlu0 %v2734_v15, %s16011_s21 }
 0x695   : > { %v11758_v0 = vpop.permute.xlu0 %3062  ;;  %v2647_v8 = vpop.permute.xlu1 %2646 }
 0x696   : > { %2656 = vst.msk [vmem:[#allocation2 + $0x58] sm:$0xff] %vm486_vm7, %v2647_v8 }
 0x697   : > { %2694 = vrot.lane.b32.xlu1 %v11761_v33, %s9974_s19 }
 0x698   : > { %2976 = vrot.lane.b32.xlu0 %v2945_v26, %s16026_s17 }
 0x699   : > { %v2625_v25 = vpop.permute.xlu0 %2624  ;;  %v11769_v9 = vpop.permute.xlu1 %2838 }
 0x69a   : > { %16180 = vst [vmem:[#allocation19_spill] sm:$0xff] %v11769_v9  ;;  %2633 = vst.msk [vmem:[#allocation2 + $0x60] sm:$0xff] %vm1046_vm6, %v2625_v25 }
 0x69b   : > { %2906 = vrot.lane.b32.xlu1 %v11761_v33, %s16045_s18 }
 0x69d   : > { %v11774_v15 = vpop.permute.xlu0 %2914  ;;  %v11776_v8 = vpop.permute.xlu1 %3228  ;;  %v11778_v52 = vld [vmem:[#allocation2 + $0x58] sm:$0xff] }
 0x69e   : > { %3230 = vrot.lane.b32.xlu0 %v11778_v52, %s16045_s18 }
 0x69f   : > { %3058 = vrot.lane.b32.xlu1 %v11761_v33, %s9974_s19 }
 0x6a1   : > { %v11784_v10 = vpop.permute.xlu0 %3066  ;;  %v11786_v26 = vpop.permute.xlu1 %2702  ;;  %v11788_v25 = vld [vmem:[#allocation2 + $0x60] sm:$0xff] }
 0x6a2   : > { %2700 = vrot.lane.b32.xlu0 %v11788_v25, %s9974_s19 }
 0x6a3   : > { %2834 = vrot.lane.b32.xlu1 %v11761_v33, %s16043_s22 }
 0x6a5   : > { %v11794_v56 = vpop.permute.xlu0 %2842  ;;  %v2917_v17 = vpop.permute.xlu1 %2916 }
 0x6a6   : > { %16181 = vst [vmem:[#allocation30_spill] sm:$0xff] %v11794_v56  ;;  %v2925_v48 = vsel %vm528_vm13, %v11774_v15, %v2917_v17  ;;  %3364 = vrot.lane.b32.xlu0 %v11738_v13, %s9974_s19 }
 0x6a7   : > { %v2948_v9 = vsel %vm16182_vm2, %v11543_v45, %v2925_v48  ;;  %v3071_v48 = vsel %vm440_vm15, %v11638_v21, %v11652_v27  ;;  %vm16190_vm2 = vcmp.ne.s16.totalorder %v10151_v37, 0 }
 0x6a9   : > { %v11800_v6 = vpop.permute.xlu0 %3232 }
 0x6aa   : > { %2982 = vrot.lane.b32.xlu0 %v2948_v9, %s16026_s17 }
 0x6ad   : > { %v2705_v62 = vpop.permute.xlu0 %2704 }
 0x6ae   : > { %v2713_v3 = vsel %vm440_vm15, %v11786_v26, %v2705_v62  ;;  %3366 = vrot.lane.b32.xlu0 %v11529_v42, %s9974_s19  ;;  %v2949_v62 = vsel %vm518_vm11, %v11545_v60, %v2917_v17  ;;  %v11837_v17 = vpop.permute.xlu1 %3068 }
 0x6af   : > { %v2737_v56 = vsel %vm16183_vm14, %v11545_v60, %v2713_v3  ;;  %vm16191_vm14 = vcmp.ne.s16.totalorder %v10161_v44, 0 }
 0x6b0   : > { %2772 = vrot.lane.b32.xlu1 %v2737_v56, %s16011_s21  ;;  %v3091_v56 = vsel %vm16184_vm10, %v11503_v18, %v3071_v48  ;;  %vm16193_vm10 = vmmov %vm16189_vm3 }
 0x6b1   : > { %v2649_v51 = vpop.permute.xlu0 %2648 }
 0x6b2   : > { %2657 = vst.msk [vmem:[#allocation2 + $0x78] sm:$0xff] %vm486_vm7, %v2649_v51  ;;  %3370 = vrot.lane.b32.xlu0 %v11778_v52, %s9974_s19  ;;  %v3092_v51 = vsel %vm16185_vm12, %v11676_v20, %v11652_v27  ;;  %v11847_v9 = vpop.permute.xlu1 %2844  ;;  %vm16194_vm12 = vmmov %vm16190_vm2 }
 0x6b3   : > { %16186 = vst [vmem:[#allocation22_spill] sm:$0xff] %v11847_v9 }
 0x6b4   : > { %2984 = vrot.lane.b32.xlu1 %v2949_v62, %s16026_s17 }
 0x6b6   : > { %3116 = vrot.lane.b32.xlu0 %v3091_v56, %s16009_s15  ;;  %v11855_v27 = vpop.permute.xlu1 %3234 }
 0x6b8   : > { %3368 = vrot.lane.b32.xlu1 %v11531_v57, %s9974_s19 }
 0x6b9   : > { %v11843_v3 = vld [vmem:[#allocation2 + $0x78] sm:$0xff] }
 0x6ba   : > { %3372 = vrot.lane.b32.xlu0 %v11543_v45, %s9974_s19 }
 0x6bc   : > { %3118 = vrot.lane.b32.xlu1 %v3092_v51, %s16009_s15 }
 0x6be   : > { %2912 = vrot.lane.b32.xlu0 %v11788_v25, %s16045_s18 }
 0x6c0   : > { %3374 = vrot.lane.b32.xlu1 %v11545_v60, %s9974_s19 }
 0x6c2   : > { %3236 = vrot.lane.b32.xlu0 %v11843_v3, %s16045_s18 }
 0x6c4   : > { %3064 = vrot.lane.b32.xlu1 %v11788_v25, %s9974_s19 }
 0x6c6   : > { %3376 = vrot.lane.b32.xlu0 %v11843_v3, %s9974_s19 }
 0x6c8   : > { %2840 = vrot.lane.b32.xlu1 %v11788_v25, %s16043_s22 }
 0x6cd   : > { %v11857_v48 = vpop.permute.xlu1 %2966 }
 0x6ce   : > { %16187 = vst [vmem:[#allocation21_spill] sm:$0xff] %v11857_v48  ;;  %v11864_v34 = vpop.permute.xlu0 %2964 }
 0x6cf   : > { %16188 = vst [vmem:[#allocation24_spill] sm:$0xff] %v11864_v34 }
 0x6d2   : > { %v11859_v62 = vpop.permute.xlu1 %2754 }
 0x6d6   : > { %v2683_v56 = vpop.permute.xlu1 %2682 }
 0x6d7   : > { %v2726_v51 = vsel %vm428_vm0, %v11663_v23, %v2683_v56  ;;  %v2706_v5 = vsel %vm440_vm15, %v2683_v56, %v11629_v1 }
 0x6d8   : > { %2750 = vrot.lane.b32.xlu0 %v2726_v51, %s16011_s21  ;;  %v2727_v48 = vsel %vm16189_vm3, %v11501_v7, %v2706_v5 }
 0x6da   : > { %v2895_v14 = vpop.permute.xlu1 %2894 }
 0x6db   : > { %v2918_v9 = vsel %vm528_vm13, %v2895_v14, %v11634_v59 }
 0x6dc   : > { %v11874_v47 = vpop.permute.xlu0 %3218  ;;  %2752 = vrot.lane.b32.xlu0 %v2727_v48, %s16011_s21  ;;  %v2938_v34 = vsel %vm16190_vm2, %v11663_v23, %v2918_v9 }
 0x6dd   : > { %2962 = vrot.lane.b32.xlu1 %v2938_v34, %s16026_s17 }
 0x6de   : > { %v3047_v1 = vpop.permute.xlu1 %3046 }
 0x6df   : > { %v3070_v56 = vsel %vm440_vm15, %v3047_v1, %v11638_v21 }
 0x6e0   : > { %v3090_v59 = vsel %vm16191_vm14, %v11501_v7, %v3070_v56  ;;  %v11887_v14 = vpop.permute.xlu0 %3358  ;;  %vm16200_vm14 = vcmp.ne.s16.totalorder %v10155_v39, 0 }
 0x6e1   : > { %3114 = vrot.lane.b32.xlu1 %v3090_v59, %s16009_s15 }
 0x6e2   : > { %v11906_v59 = vpop.permute.xlu1 %2822 }
 0x6e3   : > { %16195 = vst [vmem:[#allocation25_spill] sm:$0xff] %v11906_v59 }
 0x6e6   : > { %v11889_v5 = vpop.permute.xlu0 %2970 }
 0x6e7   : > { %16192 = vst [vmem:[#allocation23_spill] sm:$0xff] %v11889_v5 }
 0x6ea   : > { %v2689_v48 = vpop.permute.xlu0 %2688 }
 0x6eb   : > { %v2729_v9 = vsel %vm428_vm0, %v11706_v31, %v2689_v48  ;;  %v2708_v34 = vsel %vm440_vm15, %v2689_v48, %v11684_v36  ;;  %v11909_v36 = vpop.permute.xlu1 %2972 }
 0x6ec   : > { %2756 = vrot.lane.b32.xlu0 %v2729_v9, %s16011_s21  ;;  %v2730_v1 = vsel %vm16193_vm10, %v11515_v55, %v2708_v34  ;;  %16196 = vst [vmem:[#allocation26_spill] sm:$0xff] %v11909_v36  ;;  %vm16201_vm10 = vmmov %vm16189_vm3 }
 0x6ee   : > { %v2901_v21 = vpop.permute.xlu0 %2900 }
 0x6ef   : > { %v2920_v51 = vsel %vm528_vm13, %v2901_v21, %v11672_v29 }
 0x6f0   : > { %2758 = vrot.lane.b32.xlu0 %v2730_v1, %s16011_s21  ;;  %v2941_v56 = vsel %vm16194_vm12, %v11706_v31, %v2920_v51  ;;  %vm16202_vm12 = vcmp.ne.s16.totalorder %v10197_v61, 0 }
 0x6f1   : > { %2968 = vrot.lane.b32.xlu1 %v2941_v56, %s16026_s17 }
 0x6f2   : > { %v11911_v48 = vpop.permute.xlu1 %2760  ;;  %v3053_v9 = vpop.permute.xlu0 %3052 }
 0x6f6   : > { %v11913_v29 = vpop.permute.xlu1 %2828 }
 0x6f7   : > { %16197 = vst [vmem:[#allocation29_spill] sm:$0xff] %v11913_v29 }
 0x6fc   : > { %v3225_v21 = vpop.permute.xlu0 %3224 }
 0x705   : > { %v11915_v5 = vpop.permute.xlu1 %2978 }
 0x706   : > { %16198 = vst [vmem:[#allocation27_spill] sm:$0xff] %v11915_v5  ;;  %v11917_v34 = vpop.permute.xlu0 %2766 }
 0x707   : > { %16199 = vst [vmem:[#allocation31_spill] sm:$0xff] %v11917_v34 }
 0x709   : > { %v2695_v1 = vpop.permute.xlu1 %2694 }
 0x70a   : > { %v2732_v51 = vsel %vm428_vm0, %v11761_v33, %v2695_v1  ;;  %v2710_v56 = vsel %vm440_vm15, %v2695_v1, %v11731_v11  ;;  %v11925_v36 = vpop.permute.xlu0 %2976 }
 0x70b   : > { %2762 = vrot.lane.b32.xlu1 %v2732_v51, %s16011_s21  ;;  %v2733_v29 = vsel %vm16189_vm3, %v11529_v42, %v2710_v56  ;;  %vm16203_vm3 = vmmov %vm16202_vm12 }
 0x70d   : > { %v2907_v59 = vpop.permute.xlu1 %2906 }
 0x70e   : > { %v2922_v5 = vsel %vm528_vm13, %v2907_v59, %v11736_v32  ;;  %v3095_v32 = vsel %vm16200_vm14, %v11738_v13, %v11704_v30 }
 0x70f   : > { %2764 = vrot.lane.b32.xlu1 %v2733_v29, %s16011_s21  ;;  %v2944_v11 = vsel %vm16190_vm2, %v11761_v33, %v2922_v5  ;;  %v3075_v5 = vsel %vm440_vm15, %v11744_v63, %v11758_v0  ;;  %vm16204_vm2 = vcmp.ne.s16.totalorder %v10161_v44, 0 }
 0x710   : > { %v11933_v34 = vpop.permute.xlu0 %3230  ;;  %vm16205_vm14 = vmmov %vm16204_vm2 }
 0x711   : > { %v3059_v59 = vpop.permute.xlu1 %3058 }
 0x713   : > { %2974 = vrot.lane.b32.xlu1 %v2944_v11, %s16026_s17  ;;  %v3073_v11 = vsel %vm440_vm15, %v11682_v50, %v11704_v30  ;;  %v3072_v30 = vsel %vm440_vm15, %v3053_v9, %v11682_v50  ;;  %v3238_v9 = vsel %vm528_vm13, %v11632_v2, %v11667_v4 }
 0x714   : > { %v2701_v1 = vpop.permute.xlu0 %2700 }
 0x715   : > { %v2735_v51 = vsel %vm428_vm0, %v11788_v25, %v2701_v1  ;;  %v2712_v56 = vsel %vm440_vm15, %v2701_v1, %v11786_v26  ;;  %v3097_v1 = vsel %vm16202_vm12, %v11531_v57, %v3075_v5 }
 0x716   : > { %2768 = vrot.lane.b32.xlu0 %v2735_v51, %s16011_s21  ;;  %v2736_v26 = vsel %vm16201_vm10, %v11543_v45, %v2712_v56  ;;  %v3074_v51 = vsel %vm440_vm15, %v3059_v59, %v11744_v63  ;;  %v3094_v56 = vsel %vm16203_vm3, %v11517_v40, %v3073_v11  ;;  %v3093_v59 = vsel %vm16205_vm14, %v11515_v55, %v3072_v30  ;;  %v11996_v11 = vpop.permute.xlu1 %2834 }
 0x717   : > { %3124 = vrot.lane.b32.xlu1 %v3095_v32, %s16009_s15  ;;  %v3096_v5 = vsel %vm16204_vm2, %v11529_v42, %v3074_v51  ;;  %vm16206_vm10 = vcmp.ne.s16.totalorder %v10155_v39, 0  ;;  %v3077_v51 = vsel %vm440_vm15, %v11784_v10, %v11837_v17  ;;  %vm16208_vm3 = vcmp.ne.s16.totalorder %v10256_v19, 0 }
 0x718   : > { %v11953_v29 = vpop.permute.xlu0 %3364  ;;  %v3101_v50 = vsel %vm16206_vm10, %v11843_v3, %v11837_v17  ;;  %vm16207_vm12 = vmmov %vm16206_vm10  ;;  %vm16210_vm2 = vcmp.ne.s16.totalorder %v10197_v61, 0  ;;  %v3239_v17 = vsel %vm528_vm13, %v11667_v4, %v11874_v47  ;;  %vm16211_vm14 = vcmp.ne.s16.totalorder %v10163_v46, 0 }
 0x719   : > { %vm16212_vm10 = vcmp.ne.s16.totalorder %v10157_v41, 0  ;;  %v3240_v47 = vsel %vm528_vm13, %v11702_v35, %v11716_v12 }
 0x71a   : > { %2770 = vrot.lane.b32.xlu0 %v2736_v26, %s16011_s21  ;;  %s16566_s21 = smov 16  }
 0x71b   : > { %3128 = vrot.lane.b32.xlu1 %v3097_v1, %s16009_s15  ;;  %v3098_v1 = vsel %vm16207_vm12, %v11778_v52, %v11758_v0  ;;  %v3100_v0 = vsel %vm16210_vm2, %v11545_v60, %v3077_v51  ;;  %vm16213_vm12 = vmmov %vm16212_vm10  ;;  %vm16214_vm2 = vcmp.ne.s16.totalorder %v10151_v37, 0 }
 0x71c   : > { %v11968_v32 = vpop.permute.xlu0 %2982 }
 0x71e   : > { %3122 = vrot.lane.b32.xlu0 %v3094_v56, %s16009_s15  ;;  %v3259_v56 = vsel %vm16208_vm3, %v11501_v7, %v3238_v9 }
 0x71f   : > { %3126 = vrot.lane.b32.xlu1 %v3096_v5, %s16009_s15 }
 0x720   : > { %v11980_v63 = vpop.permute.xlu0 %3366 }
 0x722   : > { %3120 = vrot.lane.b32.xlu0 %v3093_v59, %s16009_s15  ;;  %v12012_v5 = vpop.permute.xlu1 %2772  ;;  %v3258_v59 = vsel %vm16211_vm14, %v11663_v23, %v11632_v2 }
 0x723   : > { %3136 = vrot.lane.b32.xlu1 %v3101_v50, %s16009_s15  ;;  %v3241_v50 = vsel %vm528_vm13, %v11716_v12, %v3225_v21  ;;  %v3262_v21 = vsel %vm16208_vm3, %v11515_v55, %v3240_v47  ;;  %v3244_v47 = vsel %vm528_vm13, %v11800_v6, %v11855_v27 }
 0x724   : > { %v11994_v26 = vpop.permute.xlu0 %3370  ;;  %v3263_v2 = vsel %vm16213_vm12, %v11517_v40, %v3241_v50 }
 0x726   : > { %3130 = vrot.lane.b32.xlu0 %v3098_v1, %s16009_s15  ;;  %v3260_v1 = vsel %vm16212_vm10, %v11503_v18, %v3239_v17  ;;  %v12040_v23 = vpop.permute.xlu1 %2984  ;;  %v3243_v17 = vsel %vm528_vm13, %v11776_v8, %v11933_v34  ;;  %vm16215_vm10 = vmmov %vm16208_vm3 }
 0x727   : > { %3284 = vrot.lane.b32.xlu1 %v3259_v56, %s16209_s9  ;;  %vm16216_vm3 = vmmov %vm16211_vm14 }
 0x728   : > { %v12010_v30 = vpop.permute.xlu0 %3116  ;;  %v3264_v34 = vsel %vm16216_vm3, %v11761_v33, %v11742_v54 }
 0x72a   : > { %3134 = vrot.lane.b32.xlu0 %v3100_v0, %s16009_s15  ;;  %v12051_v51 = vpop.permute.xlu1 %3368  ;;  %v3261_v0 = vsel %vm16211_vm14, %v11706_v31, %v11702_v35  ;;  %v3266_v35 = vsel %vm16213_vm12, %v11531_v57, %v3243_v17  ;;  %vm16218_vm14 = vcmp.ne.s16.totalorder %v10161_v44, 0  ;;  %vm16221_vm12 = vmmov %vm16216_vm3  ;;  %vm16222_vm3 = vcmp.ne.s16.totalorder %v10261_v22, 0 }
 0x72b   : > { %3282 = vrot.lane.b32.xlu1 %v3258_v59, %s16209_s9 }
 0x72c   : > { %v12028_v9 = vpop.permute.xlu0 %3372 }
 0x72e   : > { %3286 = vrot.lane.b32.xlu0 %v3260_v1, %s16209_s9  ;;  %v12070_v59 = vpop.permute.xlu1 %3118 }
 0x72f   : > { %3292 = vrot.lane.b32.xlu1 %v3263_v2, %s16209_s9 }
 0x730   : > { %v2913_v4 = vpop.permute.xlu0 %2912 }
 0x731   : > { %v2924_v12 = vsel %vm528_vm13, %v2913_v4, %v11774_v15  ;;  %v3242_v15 = vsel %vm528_vm13, %v11742_v54, %v11776_v8  ;;  %v9826_v8 = vld [vmem:[%s15938_s4 + $0xa4] ss:$20 sps:$4 sm:$0xff]  }
 0x732   : > { %3290 = vrot.lane.b32.xlu0 %v3262_v21, %s16209_s9  ;;  %v2947_v56 = vsel %vm16214_vm2, %v11788_v25, %v2924_v12  ;;  %v3265_v50 = vsel %vm16215_vm10, %v11529_v42, %v3242_v15  ;;  %v12082_v1 = vpop.permute.xlu1 %3374  ;;  %3972 = vmatprep.mubr.bf16.mxu0 %v9826_v8  ;;  %vm16217_vm2 = vmmov %vm16215_vm10  ;;  %vm16219_vm10 = vcmp.ne.s16.totalorder %v10159_v43, 0  ;;  %v3380_v8 = vsel %vm440_vm15, %v11710_v24, %v11726_v58 }
 0x733   : > { %3570 = vrot.lane.b32.xlu1 %v11676_v20, %s16045_s18  ;;  %v3268_v21 = vsel %vm16217_vm2, %v11543_v45, %v3244_v47  ;;  %vm16223_vm2 = vmmov %vm16219_vm10 }
 0x734   : > { %v3237_v31 = vpop.permute.xlu0 %3236 }
 0x736   : > { %3568 = vrot.lane.b32.xlu0 %v11503_v18, %s16045_s18  ;;  %v3065_v4 = vpop.permute.xlu1 %3064 }
 0x737   : > { %2980 = vrot.lane.b32.xlu1 %v2947_v56, %s16026_s17  ;;  %v3076_v54 = vsel %vm440_vm15, %v3065_v4, %v11784_v10  ;;  %v3245_v4 = vsel %vm528_vm13, %v11855_v27, %v3237_v31  ;;  %v3383_v27 = vsel %vm440_vm15, %v12051_v51, %v11994_v26 }
 0x738   : > { %v12098_v2 = vpop.permute.xlu0 %3376  ;;  %v3099_v12 = vsel %vm16218_vm14, %v11543_v45, %v3076_v54  ;;  %vm16224_vm14 = vcmp.ne.s16.totalorder %v10176_v53, 0 }
 0x73a   : > { %3288 = vrot.lane.b32.xlu0 %v3261_v0, %s16209_s9  ;;  %v3379_v0 = vsel %vm440_vm15, %v11674_v38, %v11887_v14  ;;  %v3267_v14 = vsel %vm16221_vm12, %v11788_v25, %v11800_v6  ;;  %v3382_v25 = vsel %vm440_vm15, %v11980_v63, %v12051_v51  ;;  %vm16226_vm12 = vmmov %vm16222_vm3  ;;  %v12194_v31 = vpop.permute.xlu1 %2840  ;;  %v3385_v51 = vsel %vm440_vm15, %v12082_v1, %v12098_v2  ;;  %v12238_v2 = vld [vmem:[#allocation2 + $0x30] sm:$0xff] }
 0x73b   : > { %3566 = vrot.lane.b32.xlu1 %v11501_v7, %s16045_s18  ;;  %v3400_v17 = vsel %vm16219_vm10, %v11676_v20, %v3379_v0  ;;  %vm16225_vm10 = vmmov %vm16222_vm3 }
 0x73c   : > { %v3405_v47 = vsel %vm16225_vm10, %v11531_v57, %v3382_v25  ;;  %vm16230_vm10 = vcmp.ne.s16.totalorder %v10159_v43, 0 }
 0x73d   : > { %v3406_v54 = vsel %vm16230_vm10, %v11778_v52, %v3383_v27 }
 0x73e   : > { %3296 = vrot.lane.b32.xlu0 %v3265_v50, %s16209_s9 }
 0x73f   : > { %3298 = vrot.lane.b32.xlu1 %v3266_v35, %s16209_s9  ;;  %v3381_v35 = vsel %vm440_vm15, %v11726_v58, %v11953_v29  ;;  %v3398_v29 = vsel %vm16224_vm14, %v11501_v7, %v11636_v49 }
 0x742   : > { %3574 = vrot.lane.b32.xlu0 %v11517_v40, %s16045_s18 }
 0x743   : > { %3576 = vrot.lane.b32.xlu1 %v11738_v13, %s16045_s18 }
 0x746   : > { %3294 = vrot.lane.b32.xlu0 %v3264_v34, %s16209_s9 }
 0x747   : > { %3572 = vrot.lane.b32.xlu1 %v11515_v55, %s16045_s18 }
 0x74a   : > { %v2751_v33 = vpop.permute.xlu0 %2750  ;;  %3302 = vrot.lane.b32.xlu0 %v3268_v21, %s16209_s9 }
 0x74b   : > { %3582 = vrot.lane.b32.xlu1 %v11778_v52, %s16045_s18 }
 0x74e   : > { %v2753_v56 = vpop.permute.xlu0 %2752  ;;  %3132 = vrot.lane.b32.xlu0 %v3099_v12, %s16009_s15  ;;  %s16565_s15 = smov 126  }
 0x74f   : > { %3578 = vrot.lane.b32.xlu1 %v11529_v42, %s16045_s18  ;;  %v2775_v10 = vsel %vm461_vm8, %v2753_v56, %v11859_v62  ;;  %v2774_v15 = vsel %vm461_vm8, %v2751_v33, %v2753_v56  ;;  %v3378_v62 = vsel %vm440_vm15, %v11636_v49, %v11674_v38  ;;  %v3403_v38 = vsel %vm16223_vm2, %v11738_v13, %v3381_v35  ;;  %vm16228_vm2 = vmmov %vm16224_vm14  ;;  %v12206_v26 = vpop.permute.xlu1 %2962 }
 0x750   : > { %3940 = vmatprep.subr.bf16.mxu0 %v2775_v10  ;;  %v3399_v50 = vsel %vm16222_vm3, %v11503_v18, %v3378_v62  ;;  %v3402_v49 = vsel %vm16226_vm12, %v11517_v40, %v3380_v8  ;;  %vm16227_vm3 = vcmp.ne.s16.totalorder %v10157_v41, 0  ;;  %v3401_v58 = vsel %vm16228_vm2, %v11515_v55, %v11710_v24  ;;  %vm16229_vm14 = vmmov %vm16228_vm2  ;;  %v12204_v24 = vld [vmem:[#allocation2 + $0x10] sm:$0xff]  ;;  %v12246_v10 = vld [vmem:[#allocation2 + $0x28] sm:$0xff] }
 0x751   : > { %3941 = vmatpush1.bf16.msra.mxu0 %v2774_v15  ;;  %v3384_v55 = vsel %vm440_vm15, %v12028_v9, %v12082_v1  ;;  %v12250_v15 = vld [vmem:[#allocation2 + $0x48] sm:$0xff] }
 0x752   : > { %3580 = vrot.lane.b32.xlu0 %v11531_v57, %s16045_s18  ;;  %v3269_v57 = vsel %vm16227_vm3, %v11545_v60, %v3245_v4  ;;  %vm16231_vm3 = vmmov %vm16228_vm2  ;;  %v16235_v4 = vld [vmem:[#allocation32_spill] sm:$0xff] }
 0x753   : > { %3426 = vrot.lane.b32.xlu1 %v3400_v17, %s16220_s13  ;;  %v12221_v33 = vpop.permute.xlu1 %3114  ;;  %v3407_v12 = vsel %vm16231_vm3, %v11543_v45, %v12028_v9  ;;  %vm16232_vm2 = vmmov %vm16230_vm10  ;;  %v16233_v17 = vld [vmem:[#allocation31_spill] sm:$0xff] }
 0x754   : > { %v3409_v56 = vsel %vm16232_vm2, %v11843_v3, %v3385_v51  ;;  %v16240_v51 = vld [vmem:[#allocation19_spill] sm:$0xff] }
 0x756   : > { %3300 = vrot.lane.b32.xlu0 %v3267_v14, %s16209_s9 }
 0x757   : > { %3588 = vrot.lane.b32.xlu1 %v11843_v3, %s16045_s18 }
 0x75a   : > { %3424 = vrot.lane.b32.xlu0 %v3399_v50, %s16220_s13 }
 0x75b   : > { %3584 = vrot.lane.b32.xlu1 %v11543_v45, %s16045_s18  ;;  %v12242_v45 = vld [vmem:[#allocation2 + $0x50] sm:$0xff] }
 0x75e   : > { %v2757_v6 = vpop.permute.xlu0 %2756  ;;  %3586 = vrot.lane.b32.xlu0 %v11545_v60, %s16045_s18 }
 0x75f   : > { %3432 = vrot.lane.b32.xlu1 %v3403_v38, %s16220_s13 }
 0x762   : > { %v2759_v34 = vpop.permute.xlu0 %2758  ;;  %3422 = vrot.lane.b32.xlu0 %v3398_v29, %s16220_s13  ;;  %v12267_v29 = vld [vmem:[#allocation2 + $0x68] sm:$0xff] }
 0x763   : > { %3436 = vrot.lane.b32.xlu1 %v3405_v47, %s16220_s13  ;;  %v2777_v21 = vsel %vm461_vm8, %v2759_v34, %v11911_v48  ;;  %v2776_v7 = vsel %vm461_vm8, %v2757_v6, %v2759_v34  ;;  %v3404_v48 = vsel %vm16229_vm14, %v11529_v42, %v11980_v63  ;;  %v3408_v42 = vsel %vm16226_vm12, %v11545_v60, %v3384_v55  ;;  %v12214_v63 = vld [vmem:[#allocation2 + $0x8] sm:$0xff]  ;;  %v12232_v0 = vpop.permute.xlu1 %2968  ;;  %v16234_v47 = vld [vmem:[#allocation18_spill] sm:$0xff]  ;;  %v16239_v55 = vld [vmem:[#allocation29_spill] sm:$0xff] }
 0x764   : > { %3942 = vmatprep.subr.bf16.mxu0 %v2777_v21  ;;  %v2847_v21 = vsel %vm486_vm7, %v16235_v4, %v16234_v47  ;;  %v16244_v47 = vld [vmem:[#allocation21_spill] sm:$0xff]  ;;  %vm16251_vm14 = vcmask 1039360  }
 0x765   : > { %3943 = vmatpush1.bf16.msra.mxu0 %v2776_v7  ;;  %vm16254_vm12 = vmmov %vm16251_vm14 }
 0x766   : > { %3430 = vrot.lane.b32.xlu0 %v3402_v49, %s16220_s13  ;;  %v16236_v49 = vld [vmem:[#allocation25_spill] sm:$0xff]  ;;  %vm16255_vm3 = vmmov %vm16254_vm12 }
 0x767   : > { %3304 = vrot.lane.b32.xlu1 %v3269_v57, %s16209_s9  ;;  %v16237_v57 = vld [vmem:[#allocation28_spill] sm:$0xff]  ;;  %vm16256_vm2 = vmmov %vm16255_vm3 }
 0x76a   : > { %3428 = vrot.lane.b32.xlu0 %v3401_v58, %s16220_s13  ;;  %v16238_v58 = vld [vmem:[#allocation17_spill] sm:$0xff] }
 0x76b   : > { %3434 = vrot.lane.b32.xlu1 %v3404_v48, %s16220_s13  ;;  %v2849_v27 = vsel %vm486_vm7, %v16238_v58, %v16237_v57  ;;  %v16246_v57 = vld [vmem:[#allocation26_spill] sm:$0xff] }
 0x76e   : > { %3438 = vrot.lane.b32.xlu0 %v3406_v54, %s16220_s13 }
 0x76f   : > { %3496 = vrot.lane.b32.xlu1 %v12204_v24, %s16125_s28 }
 0x772   : > { %3442 = vrot.lane.b32.xlu0 %v3408_v42, %s16220_s13  ;;  %v2848_v42 = vsel %vm486_vm7, %v16239_v55, %v16238_v58  ;;  %v16247_v58 = vld [vmem:[#allocation23_spill] sm:$0xff] }
 0x773   : > { %3494 = vrot.lane.b32.xlu1 %v12214_v63, %s16125_s28 }
 0x776   : > { %3440 = vrot.lane.b32.xlu0 %v3407_v12, %s16220_s13  ;;  %v16241_v12 = vld [vmem:[#allocation20_spill] sm:$0xff] }
 0x777   : > { %3444 = vrot.lane.b32.xlu1 %v3409_v56, %s16220_s13  ;;  %v2851_v56 = vsel %vm486_vm7, %v16241_v12, %v16240_v51 }
 0x77a   : > { %3498 = vrot.lane.b32.xlu0 %v11676_v20, %s16125_s28 }
 0x77b   : > { %3504 = vrot.lane.b32.xlu1 %v11738_v13, %s16125_s28 }
 0x77d   : > { %v2763_v1 = vpop.permute.xlu1 %2762 }
 0x77e   : > { %3502 = vrot.lane.b32.xlu0 %v12238_v2, %s16125_s28 }
 0x77f   : > { %3508 = vrot.lane.b32.xlu1 %v12242_v45, %s16125_s28 }
 0x781   : > { %v2765_v9 = vpop.permute.xlu1 %2764 }
 0x782   : > { %3500 = vrot.lane.b32.xlu0 %v12246_v10, %s16125_s28  ;;  %v2779_v14 = vsel %vm461_vm8, %v2765_v9, %v16233_v17  ;;  %v2778_v62 = vsel %vm461_vm8, %v2763_v1, %v2765_v9  ;;  %v2850_v17 = vsel %vm486_vm7, %v11996_v11, %v16241_v12 }
 0x783   : > { %3506 = vrot.lane.b32.xlu1 %v12250_v15, %s16125_s28  ;;  %3944 = vmatprep.subr.bf16.mxu0 %v2779_v14  ;;  %v16242_v14 = vld [vmem:[#allocation22_spill] sm:$0xff] }
 0x784   : > { %3945 = vmatpush1.bf16.msra.mxu0 %v2778_v62  ;;  %v16243_v62 = vld [vmem:[#allocation30_spill] sm:$0xff] }
 0x785   : > { %v2975_v50 = vpop.permute.xlu1 %2974 }
 0x786   : > { %3510 = vrot.lane.b32.xlu0 %v11778_v52, %s16125_s28 }
 0x787   : > { %3516 = vrot.lane.b32.xlu1 %v11843_v3, %s16125_s28 }
 0x788   : > { %v2769_v35 = vpop.permute.xlu0 %2768 }
 0x789   : > { %v12261_v6 = vpop.permute.xlu1 %3124 }
 0x78a   : > { %3514 = vrot.lane.b32.xlu0 %v11545_v60, %s16125_s28 }
 0x78c   : > { %v2771_v38 = vpop.permute.xlu0 %2770 }
 0x78d   : > { %v12265_v25 = vpop.permute.xlu1 %3128  ;;  %v2781_v8 = vsel %vm461_vm8, %v2771_v38, %v12012_v5  ;;  %v2780_v34 = vsel %vm461_vm8, %v2769_v35, %v2771_v38  ;;  %v2846_v5 = vsel %vm486_vm7, %v16236_v49, %v16235_v4  ;;  %v2853_v35 = vsel %vm486_vm7, %v16243_v62, %v16242_v14  ;;  %v16245_v4 = vld [vmem:[#allocation24_spill] sm:$0xff] }
 0x78e   : > { %3512 = vrot.lane.b32.xlu0 %v12267_v29, %s16125_s28  ;;  %3946 = vmatprep.subr.bf16.mxu0 %v2781_v8 }
 0x78f   : > { %3947 = vmatpush1.bf16.msra.mxu0 %v2780_v34  ;;  %v2852_v34 = vsel %vm486_vm7, %v12194_v31, %v16243_v62 }
 0x790   : > { %v12277_v60 = vpop.permute.xlu0 %3122  ;;  %3948 = vmatprep.subr.bf16.mxu0 %v2847_v21  ;;  %v2987_v21 = vsel %vm366_vm1, %v16245_v4, %v16244_v47 }
 0x791   : > { %v12279_v7 = vpop.permute.xlu1 %3126 }
 0x793   : > { %3949 = vmatpush1.bf16.msra.mxu0 %v2846_v5  ;;  %v2986_v5 = vsel %vm366_vm1, %v12206_v26, %v16245_v4  ;;  %v16249_v26 = vld [vmem:[#allocation27_spill] sm:$0xff] }
 0x794   : > { %v3121_v48 = vpop.permute.xlu0 %3120  ;;  %3950 = vmatprep.subr.bf16.mxu0 %v2849_v27  ;;  %v2989_v27 = vsel %vm366_vm1, %v16247_v58, %v16246_v57 }
 0x795   : > { %v12287_v54 = vpop.permute.xlu1 %3136 }
 0x797   : > { %3951 = vmatpush1.bf16.msra.mxu0 %v2848_v42  ;;  %v2988_v42 = vsel %vm366_vm1, %v12232_v0, %v16247_v58 }
 0x798   : > { %v3131_v1 = vpop.permute.xlu0 %3130  ;;  %3952 = vmatprep.subr.bf16.mxu0 %v2851_v56  ;;  %v2991_v56 = vsel %vm366_vm1, %v11925_v36, %v16249_v26 }
 0x799   : > { %v12295_v9 = vpop.permute.xlu1 %3284 }
 0x79b   : > { %3953 = vmatpush1.bf16.msra.mxu0 %v2850_v17 }
 0x79c   : > { %v12303_v38 = vpop.permute.xlu0 %3134  ;;  %3954 = vmatprep.subr.bf16.mxu0 %v2853_v35  ;;  %v2990_v35 = vsel %vm366_vm1, %v2975_v50, %v11925_v36  ;;  %v9937_v50 = vld [vmem:[#allocation2 + $0x8] sm:$0xff] }
 0x79d   : > { %v12305_v8 = vpop.permute.xlu1 %3282 }
 0x79f   : > { %3955 = vmatpush1.bf16.msra.mxu0 %v2852_v34 }
 0x7a0   : > { %v12313_v11 = vpop.permute.xlu0 %3286  ;;  %3956 = vmatprep.subr.bf16.mxu0 %v2987_v21 }
 0x7a1   : > { %v12315_v49 = vpop.permute.xlu1 %3292 }
 0x7a3   : > { %3957 = vmatpush1.bf16.msra.mxu0 %v2986_v5  ;;  %v16252_v5 = vld [vmem:[#allocation14_spill] sm:$0xff] }
 0x7a4   : > { %v12323_v31 = vpop.permute.xlu0 %3290  ;;  %3958 = vmatprep.subr.bf16.mxu0 %v2989_v27  ;;  %vm16253_vm10 = vcmp.ne.s16.totalorder %v16252_v5, 0 }
 0x7a5   : > { %v3571_v55 = vpop.permute.xlu1 %3570 }
 0x7a6   : > { %v3612_v12 = vsel %vm755_vm9, %v11676_v20, %v3571_v55  ;;  %v2993_v20 = vsel %vm366_vm1, %v11968_v32, %v12040_v23 }
 0x7a7   : > { %3959 = vmatpush1.bf16.msra.mxu0 %v2988_v42  ;;  %3638 = vrot.lane.b32.xlu0 %v3612_v12, %s16143_s30  ;;  %v3140_v42 = vsel %vm16256_vm2, %v3121_v48, %v12277_v60 }
 0x7a8   : > { %v3569_v17 = vpop.permute.xlu0 %3568  ;;  %3960 = vmatprep.subr.bf16.mxu0 %v2991_v56  ;;  %v9938_v56 = vld [vmem:[#allocation2 + $0x28] sm:$0xff] }
 0x7a9   : > { %v3591_v14 = vsel %vm528_vm13, %v3569_v17, %v3571_v55  ;;  %v2981_v62 = vpop.permute.xlu1 %2980 }
 0x7aa   : > { %v3611_v34 = vsel %vm16008_vm4, %v11503_v18, %v3591_v14  ;;  %v2992_v21 = vsel %vm366_vm1, %v2981_v62, %v11968_v32  ;;  %v3139_v18 = vsel %vm16251_vm14, %v12010_v30, %v12070_v59  ;;  %v3138_v32 = vsel %vm16254_vm12, %v12221_v33, %v12010_v30  ;;  %vm16257_vm14 = vmmov %vm16256_vm2 }
 0x7ab   : > { %3961 = vmatpush1.bf16.msra.mxu0 %v2990_v35  ;;  %3636 = vrot.lane.b32.xlu1 %v3611_v34, %s16143_s30  ;;  %v3141_v59 = vsel %vm16255_vm3, %v12277_v60, %v12261_v6  ;;  %v3143_v30 = vsel %vm16257_vm14, %v12265_v25, %v3131_v1  ;;  %vm16259_vm12 = vmmov %vm16256_vm2  ;;  %vm16260_vm3 = vcmp.ne.s16.totalorder %v16252_v5, 0  ;;  %v9824_v35 = vld [vmem:[%s15938_s4 + $0xa0] ss:$20 sps:$4 sm:$0xff]  }
 0x7ac   : > { %v12345_v47 = vpop.permute.xlu0 %3288  ;;  %3962 = vmatprep.subr.bf16.mxu0 %v2993_v20  ;;  %v3145_v1 = vsel %vm16259_vm12, %v12303_v38, %v12287_v54  ;;  %v9827_v34 = vld [vmem:[%s15938_s4 + $0xcc] ss:$20 sps:$4 sm:$0xff]   ;;  %vm16261_vm14 = vmmov %vm16260_vm3 }
 0x7ad   : > { %v3567_v4 = vpop.permute.xlu1 %3566 }
 0x7ae   : > { %v3590_v36 = vsel %vm528_vm13, %v3567_v4, %v3569_v17 }
 0x7af   : > { %3963 = vmatpush1.bf16.msra.mxu0 %v2992_v21  ;;  %v3610_v57 = vsel %vm16253_vm10, %v9937_v50, %v3590_v36  ;;  %vm16258_vm10 = vmmov %vm16256_vm2  ;;  %v9829_v50 = vld [vmem:[%s15938_s4 + $0xc8] ss:$20 sps:$4 sm:$0xff]  }
 0x7b0   : > { %v12355_v58 = vpop.permute.xlu0 %3296  ;;  %3964 = vmatprep.subr.bf16.mxu0 %v3139_v18  ;;  %3634 = vrot.lane.b32.xlu1 %v3610_v57, %s16143_s30 }
 0x7b1   : > { %v12358_v23 = vpop.permute.xlu1 %3298 }
 0x7b3   : > { %3965 = vmatpush1.bf16.msra.mxu0 %v3138_v32  ;;  %v9830_v32 = vld [vmem:[%s15938_s4 + $0xf4] ss:$20 sps:$4 sm:$0xff]  }
 0x7b4   : > { %v3575_v27 = vpop.permute.xlu0 %3574  ;;  %3966 = vmatprep.subr.bf16.mxu0 %v3141_v59 }
 0x7b5   : > { %v3577_v55 = vpop.permute.xlu1 %3576 }
 0x7b6   : > { %v3593_v12 = vsel %vm528_vm13, %v3575_v27, %v3577_v55  ;;  %v3615_v26 = vsel %vm755_vm9, %v11738_v13, %v3577_v55  ;;  %v3142_v13 = vsel %vm16258_vm10, %v12279_v7, %v12265_v25  ;;  %vm16262_vm10 = vcmask 7168  }
 0x7b7   : > { %3967 = vmatpush1.bf16.msra.mxu0 %v3140_v42  ;;  %3644 = vrot.lane.b32.xlu1 %v3615_v26, %s16143_s30  ;;  %v3614_v33 = vsel %vm16008_vm4, %v11517_v40, %v3593_v12  ;;  %v9941_v26 = vld [vmem:[#allocation2 + $0x70] sm:$0xff]  ;;  %vm16263_vm12 = vmmov %vm16262_vm10 }
 0x7b8   : > { %v12378_v6 = vpop.permute.xlu0 %3294  ;;  %3968 = vmatprep.subr.bf16.mxu0 %v3143_v30  ;;  %3642 = vrot.lane.b32.xlu0 %v3614_v33, %s16143_s30  ;;  %v9833_v33 = vld [vmem:[%s15938_s4 + $0x11c] ss:$20 sps:$4 sm:$0xff]  }
 0x7b9   : > { %v3573_v60 = vpop.permute.xlu1 %3572 }
 0x7ba   : > { %v3592_v48 = vsel %vm528_vm13, %v3573_v60, %v3575_v27  ;;  %v3169_v27 = vld [vmem:[#allocation2 + $0x70] sm:$0xff] }
 0x7bb   : > { %3969 = vmatpush1.bf16.msra.mxu0 %v3142_v13  ;;  %v3613_v40 = vsel %vm16260_vm3, %v9938_v56, %v3592_v48  ;;  %vm16264_vm3 = vmmov %vm16262_vm10  ;;  %v9942_v56 = vld [vmem:[#allocation2 + $0x68] sm:$0xff] }
 0x7bc   : > { %v12390_v17 = vpop.permute.xlu0 %3302  ;;  %3970 = vmatprep.subr.bf16.mxu0 %v3145_v1  ;;  %3640 = vrot.lane.b32.xlu0 %v3613_v40, %s16143_s30  ;;  %v3309_v1 = vsel %vm16264_vm3, %v12323_v31, %v12315_v49  ;;  %v9338_v49 = vld [vmem:[%s15940_s6 + $0x88] sm:$0xff] }
 0x7bd   : > { %v3583_v14 = vpop.permute.xlu1 %3582 }
 0x7be   : > { %v3618_v25 = vsel %vm755_vm9, %v11778_v52, %v3583_v14 }
 0x7c0   : > { %v3133_v7 = vpop.permute.xlu0 %3132  ;;  %3650 = vrot.lane.b32.xlu0 %v3618_v25, %s16143_s30 }
 0x7c1   : > { %v3144_v54 = vsel %vm16256_vm2, %v3133_v7, %v12303_v38  ;;  %v3579_v62 = vpop.permute.xlu1 %3578  ;;  %v9939_v38 = vld [vmem:[#allocation2 + $0x50] sm:$0xff]  ;;  %vm16265_vm2 = vmmov %vm16261_vm14  ;;  %v9835_v7 = vld [vmem:[%s15938_s4 + $0x118] ss:$20 sps:$4 sm:$0xff]  }
 0x7c2   : > { %3971 = vmatpush1.bf16.msra.mxu0 %v3144_v54 }
 0x7c3   : > { %4013 = vmatprep.subr.bf16.mxu0 %v12204_v24 }
 0x7c4   : > { %v3581_v20 = vpop.permute.xlu0 %3580 }
 0x7c5   : > { %v3595_v52 = vsel %vm528_vm13, %v3581_v20, %v3583_v14  ;;  %v12407_v4 = vpop.permute.xlu1 %3426  ;;  %3973 = vmatmul.mubr.bf16.vlgmr.msra.gmra.mrb[16].mxu0 %v9824_v35  ;;  %v3594_v36 = vsel %vm528_vm13, %v3579_v62, %v3581_v20  ;;  %v9838_v62 = vld [vmem:[%s15938_s4 + $0xac] ss:$20 sps:$4 sm:$0xff]  }
 0x7c6   : > { %4014 = vmatpush1.bf16.msra.mxu0 %v12214_v63  ;;  %v3617_v21 = vsel %vm16008_vm4, %v9939_v38, %v3595_v52  ;;  %3982 = vmatprep.mubr.bf16.mxu0 %v9827_v34  ;;  %v9940_v63 = vld [vmem:[#allocation2 + $0x48] sm:$0xff] }
 0x7c7   : > { %4015 = vmatprep.subr.bf16.mxu0 %v12238_v2  ;;  %3648 = vrot.lane.b32.xlu1 %v3617_v21, %s16143_s30  ;;  %v3616_v57 = vsel %vm16261_vm14, %v9940_v63, %v3594_v36  ;;  %vm16266_vm14 = vmmov %vm16264_vm3 }
 0x7c8   : > { %v12415_v24 = vpop.permute.xlu0 %3300 }
 0x7c9   : > { %v3589_v18 = vpop.permute.xlu1 %3588 }
 0x7ca   : > { %4016 = vmatpush1.bf16.msra.mxu0 %v12246_v10  ;;  %v3621_v10 = vsel %vm755_vm9, %v11843_v3, %v3589_v18  ;;  %v3307_v3 = vsel %vm16262_vm10, %v12295_v9, %v12313_v11  ;;  %v3306_v11 = vsel %vm16263_vm12, %v12305_v8, %v12295_v9  ;;  %v9341_v9 = vld [vmem:[%s15940_s6 + $0xa0] sm:$0xff]  ;;  %v3308_v8 = vsel %vm16266_vm14, %v12345_v47, %v12323_v31  ;;  %vm16267_vm10 = vmmov %vm16264_vm3  ;;  %v9343_v47 = vld [vmem:[%s15940_s6 + $0xb0] sm:$0xff] }
 0x7cb   : > { %4017 = vmatprep.subr.bf16.mxu0 %v12242_v45  ;;  %3646 = vrot.lane.b32.xlu1 %v3616_v57, %s16143_s30  ;;  %v9337_v45 = vld [vmem:[%s15940_s6 + $0x80] sm:$0xff]  ;;  %v3311_v54 = vsel %vm16267_vm10, %v12355_v58, %v12358_v23  ;;  %vm16268_vm12 = vmmov %vm16264_vm3  ;;  %v9340_v23 = vld [vmem:[%s15940_s6 + $0x98] sm:$0xff]  ;;  %vm16270_vm14 = vcmask 908288  }
 0x7cc   : > { %v12428_v2 = vpop.permute.xlu0 %3424  ;;  %v3310_v35 = vsel %vm16268_vm12, %v12378_v6, %v12355_v58  ;;  %v9342_v6 = vld [vmem:[%s15940_s6 + $0xa8] sm:$0xff]  ;;  %vm16271_vm10 = vmmov %vm16270_vm14 }
 0x7cd   : > { %v3585_v59 = vpop.permute.xlu1 %3584  ;;  %3983 = vmatmul.mubr.bf16.gmra.mrb[20].mxu0 %v9829_v50  ;;  %v3447_v21 = vsel %vm16270_vm14, %v12428_v2, %v12407_v4  ;;  %vm16272_vm12 = vmmov %vm16271_vm10 }
 0x7ce   : > { %4018 = vmatpush1.bf16.msra.mxu0 %v12250_v15  ;;  %3992 = vmatprep.mubr.bf16.mxu0 %v9830_v32  ;;  %v9832_v15 = vld [vmem:[%s15938_s4 + $0xf0] ss:$20 sps:$4 sm:$0xff]  }
 0x7cf   : > { %4019 = vmatprep.subr.bf16.mxu0 %v3169_v27  ;;  %3656 = vrot.lane.b32.xlu1 %v3621_v10, %s16143_s30 }
 0x7d0   : > { %v3587_v55 = vpop.permute.xlu0 %3586 }
 0x7d1   : > { %v3597_v42 = vsel %vm528_vm13, %v3587_v55, %v3589_v18  ;;  %v3433_v12 = vpop.permute.xlu1 %3432  ;;  %v3596_v60 = vsel %vm528_vm13, %v3585_v59, %v3587_v55 }
 0x7d2   : > { %4020 = vmatpush1.bf16.msra.mxu0 %v12267_v29  ;;  %v3620_v30 = vsel %vm16008_vm4, %v9941_v26, %v3597_v42  ;;  %v9339_v29 = vld [vmem:[%s15940_s6 + $0x90] sm:$0xff]  ;;  %v3619_v40 = vsel %vm16265_vm2, %v9942_v56, %v3596_v60  ;;  %vm16269_vm2 = vmmov %vm16264_vm3  ;;  %vm16278_vm4 = vcmask 916480  }
 0x7d3   : > { %4021 = vmatprep.subr.bf16.mxu0 %v3307_v3  ;;  %3790 = vperm.xlu1 %9795, %v9337_v45   ;;  %v3312_v38 = vsel %vm16269_vm2, %v12415_v24, %v12390_v17 }
 0x7d4   : > { %3654 = vrot.lane.b32.xlu0 %v3620_v30, %s16143_s30  ;;  %v3423_v13 = vpop.permute.xlu0 %3422 }
 0x7d5   : > { %v3437_v48 = vpop.permute.xlu1 %3436  ;;  %3993 = vmatmul.mubr.bf16.gmra.mrb[24].mxu0 %v9832_v15  ;;  %v3446_v18 = vsel %vm16271_vm10, %v3423_v13, %v12428_v2 }
 0x7d6   : > { %4022 = vmatpush1.bf16.msra.mxu0 %v3306_v11  ;;  %4002 = vmatprep.mubr.bf16.mxu0 %v9833_v33 }
 0x7d7   : > { %4023 = vmatprep.subr.bf16.mxu0 %v3309_v1  ;;  %3800 = vperm.xlu1 %9795, %v9339_v29  }
 0x7d8   : > { %3652 = vrot.lane.b32.xlu0 %v3619_v40, %s16143_s30  ;;  %v3431_v14 = vpop.permute.xlu0 %3430 }
 0x7d9   : > { %v3305_v25 = vpop.permute.xlu1 %3304  ;;  %v3449_v24 = vsel %vm16272_vm12, %v3431_v14, %v3433_v12 }
 0x7da   : > { %4024 = vmatpush1.bf16.msra.mxu0 %v3308_v8  ;;  %v3313_v20 = vsel %vm16264_vm3, %v12390_v17, %v3305_v25  ;;  %v9344_v17 = vld [vmem:[%s15940_s6 + $0xb8] sm:$0xff]  ;;  %vm16273_vm3 = vmmov %vm16271_vm10  ;;  %v9841_v8 = vld [vmem:[%s15938_s4 + $0xd0] ss:$20 sps:$4 sm:$0xff]  }
 0x7db   : > { %4025 = vmatprep.subr.bf16.mxu0 %v3311_v54  ;;  %3810 = vperm.xlu1 %9795, %v9341_v9   ;;  %vm16274_vm2 = vmmov %vm16273_vm3  ;;  %v9839_v9 = vld [vmem:[%s15938_s4 + $0xd4] ss:$20 sps:$4 sm:$0xff]   ;;  %v9842_v25 = vld [vmem:[%s15938_s4 + $0xfc] ss:$20 sps:$4 sm:$0xff]  }
 0x7dc   : > { %3795 = vperm.xlu0 %9794, %v9338_v49   ;;  %v3429_v31 = vpop.permute.xlu0 %3428  ;;  %vm16275_vm14 = vmmov %vm16274_vm2  ;;  %v9844_v49 = vld [vmem:[%s15938_s4 + $0xf8] ss:$20 sps:$4 sm:$0xff]   ;;  %v9847_v54 = vld [vmem:[%s15938_s4 + $0x120] ss:$20 sps:$4 sm:$0xff]  }
 0x7dd   : > { %v3435_v34 = vpop.permute.xlu1 %3434  ;;  %4003 = vmatmul.mubr.bf16.gmra.mrb[28].mxu0 %v9835_v7  ;;  %v3448_v57 = vsel %vm16273_vm3, %v3429_v31, %v3431_v14  ;;  %vm16276_vm10 = vmmov %vm16274_vm2  ;;  %v9836_v14 = vld [vmem:[%s15938_s4 + $0xa8] ss:$20 sps:$4 sm:$0xff]   ;;  %v9845_v7 = vld [vmem:[%s15938_s4 + $0x124] ss:$20 sps:$4 sm:$0xff]  }
 0x7de   : > { %4026 = vmatpush1.bf16.msra.mxu0 %v3310_v35  ;;  %4045 = vmatprep.mubr.bf16.mxu0 %v9838_v62  ;;  %v3450_v2 = vsel %vm16275_vm14, %v3435_v34, %v3437_v48  ;;  %vm16277_vm12 = vmmov %vm16274_vm2  ;;  %v16287_v35 = vmov 0  }
 0x7df   : > { %3820 = vperm.xlu1 %9795, %v9343_v47   ;;  %4027 = vmatprep.subr.bf16.mxu0 %v3313_v20  ;;  %vm16279_vm3 = vmmov %vm16278_vm4 }
 0x7e0   : > { %3805 = vperm.xlu0 %9794, %v9340_v23   ;;  %v3439_v52 = vpop.permute.xlu0 %3438 }
 0x7e1   : > { %v3497_v58 = vpop.permute.xlu1 %3496  ;;  %v3451_v32 = vsel %vm16274_vm2, %v3437_v48, %v3439_v52  ;;  %vm16280_vm2 = vmmov %vm16279_vm3 }
 0x7e2   : > { %4028 = vmatpush1.bf16.msra.mxu0 %v3312_v38  ;;  %vm16281_vm14 = vmmov %vm16280_vm2 }
 0x7e3   : > { %4029 = vmatprep.subr.bf16.mxu0 %v3447_v21 }
 0x7e4   : > { %3815 = vperm.xlu0 %9794, %v9342_v6   ;;  %v3443_v36 = vpop.permute.xlu0 %3442 }
 0x7e5   : > { %v3495_v50 = vpop.permute.xlu1 %3494 }
 0x7e6   : > { %4030 = vmatpush1.bf16.msra.mxu0 %v3446_v18  ;;  %v3518_v3 = vsel %vm16279_vm3, %v3495_v50, %v3497_v58  ;;  %vm16285_vm3 = vmmov %vm16280_vm2 }
 0x7e7   : > { %4031 = vmatprep.subr.bf16.mxu0 %v3449_v24 }
 0x7e8   : > { %3825 = vperm.xlu0 %9794, %v9344_v17   ;;  %v3441_v63 = vpop.permute.xlu0 %3440 }
 0x7e9   : > { %v3445_v4 = vpop.permute.xlu1 %3444  ;;  %v3452_v45 = vsel %vm16277_vm12, %v3441_v63, %v3443_v36  ;;  %vm16283_vm12 = vmmov %vm16280_vm2 }
 0x7ea   : > { %4032 = vmatpush1.bf16.msra.mxu0 %v3448_v57  ;;  %v3453_v10 = vsel %vm16276_vm10, %v3443_v36, %v3445_v4  ;;  %vm16282_vm10 = vmmov %vm16280_vm2 }
 0x7eb   : > { %4033 = vmatprep.subr.bf16.mxu0 %v3451_v32 }
 0x7ec   : > { %v3499_v59 = vpop.permute.xlu0 %3498 }
 0x7ed   : > { %v3505_v27 = vpop.permute.xlu1 %3504  ;;  %v3519_v12 = vsel %vm16278_vm4, %v3497_v58, %v3499_v59  ;;  %vm16284_vm4 = vmmov %vm16280_vm2  ;;  %v9848_v59 = vld [vmem:[%s15938_s4 + $0xb0] ss:$20 sps:$4 sm:$0xff]  }
 0x7ee   : > { %4034 = vmatpush1.bf16.msra.mxu0 %v3450_v2  ;;  %v9849_v2 = vld [vmem:[%s15938_s4 + $0xd8] ss:$20 sps:$4 sm:$0xff]  }
 0x7ef   : > { %4035 = vmatprep.subr.bf16.mxu0 %v3453_v10  ;;  %v9851_v10 = vld [vmem:[%s15938_s4 + $0x128] ss:$20 sps:$4 sm:$0xff]  }
 0x7f0   : > { %v3503_v55 = vpop.permute.xlu0 %3502 }
 0x7f1   : > { %v3509_v42 = vpop.permute.xlu1 %3508  ;;  %v3521_v30 = vsel %vm16280_vm2, %v3503_v55, %v3505_v27  ;;  %vm16286_vm2 = vcmask 924672   ;;  %v9850_v27 = vld [vmem:[%s15938_s4 + $0x100] ss:$20 sps:$4 sm:$0xff]  }
 0x7f2   : > { %4036 = vmatpush1.bf16.msra.mxu0 %v3452_v45 }
 0x7f3   : > { %4037 = vmatprep.subr.bf16.mxu0 %v3519_v12 }
 0x7f4   : > { %v3501_v15 = vpop.permute.xlu0 %3500 }
 0x7f5   : > { %v3507_v26 = vpop.permute.xlu1 %3506  ;;  %v3520_v60 = vsel %vm16281_vm14, %v3501_v15, %v3503_v55  ;;  %vm16288_vm14 = vmmov %vm16286_vm2 }
 0x7f6   : > { %4038 = vmatpush1.bf16.msra.mxu0 %v3518_v3  ;;  %v3522_v48 = vsel %vm16283_vm12, %v3507_v26, %v3509_v42  ;;  %vm16290_vm12 = vmmov %vm16286_vm2 }
 0x7f7   : > { %4039 = vmatprep.subr.bf16.mxu0 %v3521_v30 }
 0x7f8   : > { %v3511_v33 = vpop.permute.xlu0 %3510 }
 0x7f9   : > { %v3523_v13 = vsel %vm16282_vm10, %v3509_v42, %v3511_v33  ;;  %v3517_v29 = vpop.permute.xlu1 %3516  ;;  %vm16289_vm10 = vmmov %vm16286_vm2 }
 0x7fa   : > { %4040 = vmatpush1.bf16.msra.mxu0 %v3520_v60 }
 0x7fb   : > { %4041 = vmatprep.subr.bf16.mxu0 %v3523_v13 }
 0x7fc   : > { %v3515_v11 = vpop.permute.xlu0 %3514 }
 0x7fd   : > { %v3525_v1 = vsel %vm16284_vm4, %v3515_v11, %v3517_v29  ;;  %vm16291_vm4 = vmmov %vm16286_vm2 }
 0x7fe   : > { %4042 = vmatpush1.bf16.msra.mxu0 %v3522_v48 }
 0x7ff   : > { %4043 = vmatprep.subr.bf16.mxu0 %v3525_v1 }
 0x800   : > { %v3513_v56 = vpop.permute.xlu0 %3512 }
 0x801   : > { %v3524_v40 = vsel %vm16285_vm3, %v3513_v56, %v3515_v11  ;;  %vm16292_vm3 = vmmov %vm16286_vm2 }
 0x802   : > { %4044 = vmatpush1.bf16.msra.mxu0 %v3524_v40 }
 0x805   : > { %4046 = vmatmul.mubr.bf16.vlgmr.msra.gmra.mrb[16].mxu0 %v9836_v14 }
 0x806   : > { %4055 = vmatprep.mubr.bf16.mxu0 %v9839_v9 }
 0x80d   : > { %4056 = vmatmul.mubr.bf16.gmra.mrb[20].mxu0 %v9841_v8 }
 0x80e   : > { %4065 = vmatprep.mubr.bf16.mxu0 %v9842_v25 }
 0x815   : > { %4066 = vmatmul.mubr.bf16.gmra.mrb[24].mxu0 %v9844_v49 }
 0x816   : > { %4075 = vmatprep.mubr.bf16.mxu0 %v9845_v7 }
 0x819   : > { %v3639_v62 = vpop.permute.xlu0 %3638 }
 0x81d   : > { %v3637_v31 = vpop.permute.xlu1 %3636  ;;  %4076 = vmatmul.mubr.bf16.gmra.mrb[28].mxu0 %v9847_v54 }
 0x81e   : > { %v3659_v47 = vsel %vm16286_vm2, %v3637_v31, %v3639_v62  ;;  %4118 = vmatprep.mubr.bf16.mxu0 %v16287_v35 }
 0x81f   : > { %4086 = vmatprep.subr.bf16.mxu0 %v3659_v47 }
 0x822   : > { %v3635_v34 = vpop.permute.xlu1 %3634 }
 0x823   : > { %v3658_v23 = vsel %vm16288_vm14, %v3635_v34, %v3637_v31  ;;  %vm16293_vm14 = vmmov %vm16286_vm2 }
 0x824   : > { %4087 = vmatpush1.bf16.msra.mxu0 %v3658_v23 }
 0x829   : > { %v3645_v20 = vpop.permute.xlu1 %3644 }
 0x82a   : > { %v3643_v52 = vpop.permute.xlu0 %3642 }
 0x82b   : > { %v3661_v38 = vsel %vm16289_vm10, %v3643_v52, %v3645_v20 }
 0x82c   : > { %4088 = vmatprep.subr.bf16.mxu0 %v3661_v38 }
 0x82e   : > { %v3641_v58 = vpop.permute.xlu0 %3640 }
 0x82f   : > { %v3660_v6 = vsel %vm16290_vm12, %v3641_v58, %v3643_v52 }
 0x830   : > { %4089 = vmatpush1.bf16.msra.mxu0 %v3660_v6 }
 0x832   : > { %v3651_v21 = vpop.permute.xlu0 %3650 }
 0x839   : > { %v3649_v36 = vpop.permute.xlu1 %3648 }
 0x83a   : > { %v3663_v18 = vsel %vm16291_vm4, %v3649_v36, %v3651_v21 }
 0x83b   : > { %4090 = vmatprep.subr.bf16.mxu0 %v3663_v18 }
 0x83d   : > { %v3647_v50 = vpop.permute.xlu1 %3646 }
 0x83e   : > { %v3662_v17 = vsel %vm16292_vm3, %v3647_v50, %v3649_v36 }
 0x83f   : > { %4091 = vmatpush1.bf16.msra.mxu0 %v3662_v17 }
 0x841   : > { %v3657_v24 = vpop.permute.xlu1 %3656 }
 0x846   : > { %v3655_v63 = vpop.permute.xlu0 %3654 }
 0x847   : > { %v3665_v57 = vsel %vm16286_vm2, %v3655_v63, %v3657_v24 }
 0x848   : > { %4092 = vmatprep.subr.bf16.mxu0 %v3665_v57 }
 0x84a   : > { %v3653_v4 = vpop.permute.xlu0 %3652 }
 0x84b   : > { %v3664_v32 = vsel %vm16293_vm14, %v3653_v4, %v3655_v63 }
 0x84c   : > { %4093 = vmatpush1.bf16.msra.mxu0 %v3664_v32 }
 0x84f   : > { %9365 = vmatmul.mubr.msk.bf16.vlgmr.msra.gmra.mrb[16].mxu0 %vm2346_vm5, %v9848_v59 }
 0x850   : > { %4128 = vmatprep.mubr.bf16.mxu0 %v16287_v35 }
 0x852   : > { %v3791_v55 = vpop.permute.xlu1 %3790 }
 0x856   : > { %v3801_v56 = vpop.permute.xlu1 %3800 }
 0x857   : > { %9366 = vmatmul.mubr.msk.bf16.gmra.mrb[20].mxu0 %vm2346_vm5, %v9849_v2 }
 0x858   : > { %4138 = vmatprep.mubr.bf16.mxu0 %v16287_v35 }
 0x85a   : > { %v3811_v38 = vpop.permute.xlu1 %3810 }
 0x85b   : > { %v3796_v15 = vpop.permute.xlu0 %3795 }
 0x85f   : > { %9367 = vmatmul.mubr.msk.bf16.gmra.mrb[24].mxu0 %vm2346_vm5, %v9850_v27  ;;  %v3806_v25 = vpop.permute.xlu0 %3805 }
 0x860   : > { %4148 = vmatprep.mubr.bf16.mxu0 %v16287_v35 }
 0x863   : > { %v3816_v18 = vpop.permute.xlu0 %3815 }
 0x867   : > { %9368 = vmatmul.mubr.msk.bf16.gmra.mrb[28].mxu0 %vm2346_vm5, %v9851_v10  ;;  %v3821_v10 = vpop.permute.xlu1 %3820 }
 0x922   : > { %v4120_v45 = vpop.f32.mrb[16].mxu0 }
 0x923   : > { %v9517_v42 = vadd.f32 %v4120_v45, %v3791_v55  ;;  %v4122_v12 = vpop.f32.mrb[17].mxu0 }
 0x924   : > { %v9518_v3 = vadd.f32 %v4122_v12, %v3791_v55  ;;  %v4124_v26 = vpop.f32.mrb[18].mxu0 }
 0x925   : > { %v9519_v30 = vadd.f32 %v4124_v26, %v3796_v15  ;;  %v4126_v33 = vpop.f32.mrb[19].mxu0  ;;  %v4159_v13 = vmax.f32 %v9517_v42, 0.0 }
 0x926   : > { %v9520_v60 = vadd.f32 %v4126_v33, %v3796_v15  ;;  %v4160_v11 = vmax.f32 %v9518_v3, 0.0  ;;  %v3826_v15 = vpop.permute.xlu0 %3825 }
 0x927   : > { %v4161_v29 = vmax.f32 %v9519_v30, 0.0 }
 0x928   : > { %v4162_v48 = vmax.f32 %v9520_v60, 0.0 }
 0x929   : > { %v12571_v1 = vpack.c.bf16 %v4161_v29, %v4159_v13 }
 0x92a   : > { %v12573_v40 = vpack.c.bf16 %v4162_v48, %v4160_v11  ;;  %v4130_v14 = vpop.f32.mrb[20].mxu0 }
 0x92b   : > { %4183 = vst [vmem:[#allocation2 + $0x8] sm:$0xff] %v12571_v1  ;;  %v9521_v9 = vadd.f32 %v4130_v14, %v3801_v56  ;;  %v4132_v8 = vpop.f32.mrb[21].mxu0  ;;  %4265 = vrot.lane.b32.xlu0 %v12571_v1, %s9974_s19  ;;  %4199 = vrot.lane.b32.xlu1 %v12571_v1, %s9971_s16 }
 0x92c   : > { %4184 = vst [vmem:[#allocation2 + $0x10] sm:$0xff] %v12573_v40  ;;  %v9522_v49 = vadd.f32 %v4132_v8, %v3801_v56  ;;  %v4134_v7 = vpop.f32.mrb[22].mxu0 }
 0x92d   : > { %v9523_v54 = vadd.f32 %v4134_v7, %v3806_v25  ;;  %v4136_v62 = vpop.f32.mrb[23].mxu0  ;;  %v4163_v47 = vmax.f32 %v9521_v9, 0.0 }
 0x92e   : > { %v9524_v31 = vadd.f32 %v4136_v62, %v3806_v25  ;;  %v4164_v23 = vmax.f32 %v9522_v49, 0.0 }
 0x92f   : > { %v4165_v34 = vmax.f32 %v9523_v54, 0.0  ;;  %4795 = vrot.lane.b32.xlu0 %v12571_v1, %s16045_s18  ;;  %4477 = vrot.lane.b32.xlu1 %v12571_v1, %s16045_s18 }
 0x930   : > { %v4166_v20 = vmax.f32 %v9524_v31, 0.0 }
 0x931   : > { %v12585_v52 = vpack.c.bf16 %v4165_v34, %v4163_v47 }
 0x932   : > { %v12587_v58 = vpack.c.bf16 %v4166_v20, %v4164_v23  ;;  %v4140_v6 = vpop.f32.mrb[24].mxu0  ;;  %v16296_v20 = vld [vmem:[#allocation12_spill] sm:$0xff] }
 0x933   : > { %4185 = vst [vmem:[#allocation2 + $0x28] sm:$0xff] %v12585_v52  ;;  %v9525_v21 = vadd.f32 %v4140_v6, %v3811_v38  ;;  %v4142_v36 = vpop.f32.mrb[25].mxu0  ;;  %4935 = vrot.lane.b32.xlu0 %v12571_v1, %s9974_s19  ;;  %4629 = vrot.lane.b32.xlu1 %v12571_v1, %s9974_s19  ;;  %vm16297_vm10 = vcmp.ne.s16.totalorder %v16296_v20, 0 }
 0x934   : > { %4186 = vst [vmem:[#allocation2 + $0x30] sm:$0xff] %v12587_v58  ;;  %v9526_v50 = vadd.f32 %v4142_v36, %v3811_v38  ;;  %v4144_v17 = vpop.f32.mrb[26].mxu0  ;;  %vm16303_vm4 = vmmov %vm16297_vm10 }
 0x935   : > { %v9527_v24 = vadd.f32 %v4144_v17, %v3816_v18  ;;  %v4146_v63 = vpop.f32.mrb[27].mxu0  ;;  %v4167_v4 = vmax.f32 %v9525_v21, 0.0  ;;  %vm16308_vm14 = vmmov %vm16303_vm4 }
 0x936   : > { %v9528_v57 = vadd.f32 %v4146_v63, %v3816_v18  ;;  %v4168_v59 = vmax.f32 %v9526_v50, 0.0  ;;  %v16298_v18 = vld [vmem:[#allocation13_spill] sm:$0xff] }
 0x937   : > { %v4169_v32 = vmax.f32 %v9527_v24, 0.0  ;;  %4479 = vrot.lane.b32.xlu0 %v12573_v40, %s16045_s18  ;;  %4405 = vrot.lane.b32.xlu1 %v12571_v1, %s16043_s22  ;;  %vm16299_vm12 = vcmp.ne.s16.totalorder %v16298_v18, 0 }
 0x938   : > { %v4170_v2 = vmax.f32 %v9528_v57, 0.0  ;;  %vm16305_vm3 = vmmov %vm16299_vm12 }
 0x939   : > { %v12599_v27 = vpack.c.bf16 %v4169_v32, %v4167_v4  ;;  %vm16307_vm2 = vmmov %vm16305_vm3 }
 0x93a   : > { %v12601_v55 = vpack.c.bf16 %v4170_v2, %v4168_v59  ;;  %v4150_v45 = vpop.f32.mrb[28].mxu0 }
 0x93b   : > { %4187 = vst [vmem:[#allocation2 + $0x48] sm:$0xff] %v12599_v27  ;;  %v9529_v42 = vadd.f32 %v4150_v45, %v3821_v10  ;;  %v4152_v12 = vpop.f32.mrb[29].mxu0  ;;  %4631 = vrot.lane.b32.xlu0 %v12573_v40, %s9974_s19  ;;  %4267 = vrot.lane.b32.xlu1 %v12573_v40, %s9974_s19 }
 0x93c   : > { %4188 = vst [vmem:[#allocation2 + $0x50] sm:$0xff] %v12601_v55  ;;  %v9530_v3 = vadd.f32 %v4152_v12, %v3821_v10  ;;  %v4154_v26 = vpop.f32.mrb[30].mxu0 }
 0x93d   : > { %v9531_v30 = vadd.f32 %v4154_v26, %v3826_v15  ;;  %v4156_v33 = vpop.f32.mrb[31].mxu0  ;;  %v4171_v13 = vmax.f32 %v9529_v42, 0.0 }
 0x93e   : > { %v9532_v60 = vadd.f32 %v4156_v33, %v3826_v15  ;;  %v4172_v11 = vmax.f32 %v9530_v3, 0.0 }
 0x93f   : > { %v4173_v29 = vmax.f32 %v9531_v30, 0.0  ;;  %4407 = vrot.lane.b32.xlu0 %v12573_v40, %s16043_s22  ;;  %4223 = vrot.lane.b32.xlu1 %v12573_v40, %s16028_s14 }
 0x940   : > { %v4174_v48 = vmax.f32 %v9532_v60, 0.0 }
 0x941   : > { %v12613_v56 = vpack.c.bf16 %v4173_v29, %v4171_v13 }
 0x942   : > { %v12615_v14 = vpack.c.bf16 %v4174_v48, %v4172_v11 }
 0x943   : > { %4189 = vst [vmem:[#allocation2 + $0x68] sm:$0xff] %v12613_v56  ;;  %4797 = vrot.lane.b32.xlu1 %v12573_v40, %s16045_s18  ;;  %4201 = vrot.lane.b32.xlu0 %v12585_v52, %s9971_s16 }
 0x944   : > { %4190 = vst [vmem:[#allocation2 + $0x70] sm:$0xff] %v12615_v14 }
 0x947   : > { %4937 = vrot.lane.b32.xlu1 %v12573_v40, %s9974_s19  ;;  %4483 = vrot.lane.b32.xlu0 %v12585_v52, %s16045_s18 }
 0x94b   : > { %4271 = vrot.lane.b32.xlu1 %v12585_v52, %s9974_s19  ;;  %4635 = vrot.lane.b32.xlu0 %v12585_v52, %s9974_s19 }
 0x94f   : > { %4485 = vrot.lane.b32.xlu1 %v12587_v58, %s16045_s18  ;;  %4411 = vrot.lane.b32.xlu0 %v12585_v52, %s16043_s22 }
 0x953   : > { %4637 = vrot.lane.b32.xlu1 %v12587_v58, %s9974_s19  ;;  %4801 = vrot.lane.b32.xlu0 %v12585_v52, %s16045_s18 }
 0x957   : > { %4413 = vrot.lane.b32.xlu1 %v12587_v58, %s16043_s22  ;;  %4941 = vrot.lane.b32.xlu0 %v12585_v52, %s9974_s19 }
 0x95b   : > { %4803 = vrot.lane.b32.xlu1 %v12587_v58, %s16045_s18  ;;  %4273 = vrot.lane.b32.xlu0 %v12587_v58, %s9974_s19 }
 0x95f   : > { %4943 = vrot.lane.b32.xlu1 %v12587_v58, %s9974_s19  ;;  %4225 = vrot.lane.b32.xlu0 %v12587_v58, %s16028_s14 }
 0x963   : > { %4277 = vrot.lane.b32.xlu0 %v12599_v27, %s9974_s19  ;;  %4203 = vrot.lane.b32.xlu1 %v12599_v27, %s9971_s16 }
 0x967   : > { %4417 = vrot.lane.b32.xlu0 %v12599_v27, %s16043_s22  ;;  %4489 = vrot.lane.b32.xlu1 %v12599_v27, %s16045_s18 }
 0x96b   : > { %4807 = vrot.lane.b32.xlu0 %v12599_v27, %s16045_s18  ;;  %4641 = vrot.lane.b32.xlu1 %v12599_v27, %s9974_s19 }
 0x96f   : > { %4491 = vrot.lane.b32.xlu0 %v12601_v55, %s16045_s18  ;;  %4279 = vrot.lane.b32.xlu1 %v12601_v55, %s9974_s19 }
 0x973   : > { %4643 = vrot.lane.b32.xlu0 %v12601_v55, %s9974_s19  ;;  %4227 = vrot.lane.b32.xlu1 %v12601_v55, %s16028_s14 }
 0x977   : > { %4419 = vrot.lane.b32.xlu1 %v12601_v55, %s16043_s22  ;;  %4205 = vrot.lane.b32.xlu0 %v12613_v56, %s9971_s16 }
 0x97b   : > { %4809 = vrot.lane.b32.xlu1 %v12601_v55, %s16045_s18  ;;  %4495 = vrot.lane.b32.xlu0 %v12613_v56, %s16045_s18 }
 0x97f   : > { %4283 = vrot.lane.b32.xlu1 %v12613_v56, %s9974_s19  ;;  %4647 = vrot.lane.b32.xlu0 %v12613_v56, %s9974_s19 }
 0x983   : > { %4497 = vrot.lane.b32.xlu1 %v12615_v14, %s16045_s18  ;;  %4423 = vrot.lane.b32.xlu0 %v12613_v56, %s16043_s22 }
 0x987   : > { %4649 = vrot.lane.b32.xlu1 %v12615_v14, %s9974_s19  ;;  %4813 = vrot.lane.b32.xlu0 %v12613_v56, %s16045_s18 }
 0x98b   : > { %4425 = vrot.lane.b32.xlu1 %v12615_v14, %s16043_s22  ;;  %4285 = vrot.lane.b32.xlu0 %v12615_v14, %s9974_s19 }
 0x98f   : > { %4815 = vrot.lane.b32.xlu1 %v12615_v14, %s16045_s18  ;;  %4229 = vrot.lane.b32.xlu0 %v12615_v14, %s16028_s14 }
 0x99d   : > { %v12699_v9 = vpop.permute.xlu0 %4265  ;;  %v4200_v8 = vpop.permute.xlu1 %4199 }
 0x99e   : > { %4211 = vst.msk [vmem:[#allocation2] sm:$0xff] %vm1046_vm6, %v4200_v8 }
 0x9a1   : > { %v12702_v25 = vpop.permute.xlu0 %4795  ;;  %v12704_v49 = vpop.permute.xlu1 %4477 }
 0x9a5   : > { %v12706_v7 = vpop.permute.xlu0 %4935  ;;  %v12708_v54 = vpop.permute.xlu1 %4629  ;;  %v12733_v63 = vld [vmem:[#allocation2] sm:$0xff] }
 0x9a9   : > { %v4480_v62 = vpop.permute.xlu0 %4479  ;;  %v12710_v31 = vpop.permute.xlu1 %4405 }
 0x9aa   : > { %16294 = vst [vmem:[#allocation31_spill] sm:$0xff] %v12710_v31  ;;  %v4500_v47 = vsel %vm528_vm13, %v12704_v49, %v4480_v62  ;;  %v4521_v23 = vsel %vm518_vm11, %v12573_v40, %v4480_v62 }
 0x9ab   : > { %4547 = vrot.lane.b32.xlu1 %v4521_v23, %s16026_s17  ;;  %v4520_v38 = vsel %vm16297_vm10, %v12571_v1, %v4500_v47  ;;  %vm16311_vm10 = vmmov %vm16303_vm4 }
 0x9ac   : > { %4545 = vrot.lane.b32.xlu0 %v4520_v38, %s16026_s17 }
 0x9ad   : > { %v12722_v6 = vpop.permute.xlu0 %4631  ;;  %v4268_v21 = vpop.permute.xlu1 %4267 }
 0x9ae   : > { %v4288_v36 = vsel %vm440_vm15, %v12699_v9, %v4268_v21 }
 0x9af   : > { %v4309_v50 = vsel %vm16299_vm12, %v12573_v40, %v4288_v36  ;;  %vm16312_vm12 = vmmov %vm16307_vm2 }
 0x9b0   : > { %4335 = vrot.lane.b32.xlu1 %v4309_v50, %s16300_s26 }
 0x9b1   : > { %v12730_v17 = vpop.permute.xlu0 %4407  ;;  %v4224_v24 = vpop.permute.xlu1 %4223 }
 0x9b2   : > { %16301 = vst [vmem:[#allocation18_spill] sm:$0xff] %v12730_v17  ;;  %4235 = vst.msk [vmem:[#allocation2 + $0x18] sm:$0xff] %vm486_vm7, %v4224_v24 }
 0x9b4   : > { %4263 = vrot.lane.b32.xlu1 %v12733_v63, %s9974_s19 }
 0x9b5   : > { %v4202_v57 = vpop.permute.xlu0 %4201  ;;  %v12737_v4 = vpop.permute.xlu1 %4797 }
 0x9b6   : > { %4212 = vst.msk [vmem:[#allocation2 + $0x20] sm:$0xff] %vm1046_vm6, %v4202_v57 }
 0x9b8   : > { %4475 = vrot.lane.b32.xlu1 %v12733_v63, %s16045_s18 }
 0x9b9   : > { %v12742_v32 = vpop.permute.xlu0 %4483  ;;  %v12744_v59 = vpop.permute.xlu1 %4937  ;;  %v12746_v2 = vld [vmem:[#allocation2 + $0x18] sm:$0xff] }
 0x9ba   : > { %4799 = vrot.lane.b32.xlu0 %v12746_v2, %s16045_s18 }
 0x9bc   : > { %4627 = vrot.lane.b32.xlu1 %v12733_v63, %s9974_s19 }
 0x9bd   : > { %v12752_v10 = vpop.permute.xlu0 %4635  ;;  %v12754_v45 = vpop.permute.xlu1 %4271  ;;  %v12776_v60 = vld [vmem:[#allocation2 + $0x20] sm:$0xff] }
 0x9be   : > { %4939 = vrot.lane.b32.xlu0 %v12746_v2, %s9974_s19 }
 0x9c0   : > { %4403 = vrot.lane.b32.xlu1 %v12733_v63, %s16043_s22 }
 0x9c1   : > { %v12760_v42 = vpop.permute.xlu0 %4411  ;;  %v4486_v12 = vpop.permute.xlu1 %4485 }
 0x9c2   : > { %16302 = vst [vmem:[#allocation32_spill] sm:$0xff] %v12760_v42  ;;  %v4502_v15 = vsel %vm528_vm13, %v12742_v32, %v4486_v12  ;;  %v4524_v3 = vsel %vm518_vm11, %v12587_v58, %v4486_v12 }
 0x9c3   : > { %v4523_v26 = vsel %vm16303_vm4, %v12585_v52, %v4502_v15  ;;  %vm16313_vm4 = vcmp.ne.s16.totalorder %v10197_v61, 0 }
 0x9c4   : > { %4553 = vrot.lane.b32.xlu1 %v4524_v3, %s16026_s17  ;;  %4551 = vrot.lane.b32.xlu0 %v4523_v26, %s16026_s17 }
 0x9c5   : > { %v12772_v30 = vpop.permute.xlu0 %4801  ;;  %v12774_v33 = vpop.permute.xlu1 %4637 }
 0x9c8   : > { %4269 = vrot.lane.b32.xlu0 %v12776_v60, %s9974_s19 }
 0x9c9   : > { %v12780_v13 = vpop.permute.xlu0 %4941  ;;  %v12782_v29 = vpop.permute.xlu1 %4413 }
 0x9ca   : > { %16304 = vst [vmem:[#allocation25_spill] sm:$0xff] %v12782_v29 }
 0x9cc   : > { %4481 = vrot.lane.b32.xlu0 %v12776_v60, %s16045_s18 }
 0x9cd   : > { %v4274_v11 = vpop.permute.xlu0 %4273  ;;  %v12786_v48 = vpop.permute.xlu1 %4803 }
 0x9ce   : > { %v4290_v8 = vsel %vm440_vm15, %v12754_v45, %v4274_v11 }
 0x9cf   : > { %v4312_v62 = vsel %vm16305_vm3, %v12587_v58, %v4290_v8  ;;  %vm16315_vm3 = vcmp.ne.s16.totalorder %v10155_v39, 0 }
 0x9d0   : > { %4341 = vrot.lane.b32.xlu1 %v4312_v62, %s16300_s26  ;;  %4633 = vrot.lane.b32.xlu0 %v12776_v60, %s9974_s19 }
 0x9d1   : > { %v4226_v47 = vpop.permute.xlu0 %4225  ;;  %v12796_v23 = vpop.permute.xlu1 %4943 }
 0x9d2   : > { %4236 = vst.msk [vmem:[#allocation2 + $0x38] sm:$0xff] %vm486_vm7, %v4226_v47 }
 0x9d4   : > { %4409 = vrot.lane.b32.xlu1 %v12776_v60, %s16043_s22 }
 0x9d5   : > { %v12801_v38 = vpop.permute.xlu0 %4277  ;;  %v4204_v21 = vpop.permute.xlu1 %4203 }
 0x9d6   : > { %4213 = vst.msk [vmem:[#allocation2 + $0x40] sm:$0xff] %vm1046_vm6, %v4204_v21 }
 0x9d9   : > { %v12804_v36 = vpop.permute.xlu0 %4417  ;;  %v12806_v50 = vpop.permute.xlu1 %4489  ;;  %v12808_v24 = vld [vmem:[#allocation2 + $0x38] sm:$0xff] }
 0x9da   : > { %16306 = vst [vmem:[#allocation28_spill] sm:$0xff] %v12804_v36  ;;  %4805 = vrot.lane.b32.xlu0 %v12808_v24, %s16045_s18 }
 0x9dd   : > { %v12812_v57 = vpop.permute.xlu0 %4807  ;;  %v12814_v12 = vpop.permute.xlu1 %4641 }
 0x9e1   : > { %v4492_v15 = vpop.permute.xlu0 %4491  ;;  %v4280_v3 = vpop.permute.xlu1 %4279 }
 0x9e2   : > { %v4292_v26 = vsel %vm440_vm15, %v12801_v38, %v4280_v3  ;;  %v4527_v11 = vsel %vm518_vm11, %v12601_v55, %v4492_v15  ;;  %v4504_v62 = vsel %vm528_vm13, %v12806_v50, %v4492_v15  ;;  %v12831_v3 = vld [vmem:[#allocation2 + $0x40] sm:$0xff] }
 0x9e3   : > { %4559 = vrot.lane.b32.xlu1 %v4527_v11, %s16026_s17  ;;  %v4315_v8 = vsel %vm16307_vm2, %v12601_v55, %v4292_v26  ;;  %v4526_v11 = vsel %vm16308_vm14, %v12599_v27, %v4504_v62  ;;  %vm16319_vm2 = vcmp.ne.s16.totalorder %v10274_v28, 0  ;;  %vm16320_vm14 = vcmp.ne.s16.totalorder %v10151_v37, 0 }
 0x9e4   : > { %4347 = vrot.lane.b32.xlu0 %v4315_v8, %s16300_s26 }
 0x9e5   : > { %v12828_v47 = vpop.permute.xlu0 %4643  ;;  %v4228_v21 = vpop.permute.xlu1 %4227 }
 0x9e6   : > { %4237 = vst.msk [vmem:[#allocation2 + $0x58] sm:$0xff] %vm486_vm7, %v4228_v21 }
 0x9e7   : > { %4275 = vrot.lane.b32.xlu1 %v12831_v3, %s9974_s19 }
 0x9e8   : > { %4557 = vrot.lane.b32.xlu0 %v4526_v11, %s16026_s17 }
 0x9e9   : > { %v4206_v26 = vpop.permute.xlu0 %4205  ;;  %v12839_v15 = vpop.permute.xlu1 %4419 }
 0x9ea   : > { %16309 = vst [vmem:[#allocation17_spill] sm:$0xff] %v12839_v15  ;;  %4214 = vst.msk [vmem:[#allocation2 + $0x60] sm:$0xff] %vm1046_vm6, %v4206_v26 }
 0x9eb   : > { %4487 = vrot.lane.b32.xlu1 %v12831_v3, %s16045_s18 }
 0x9ed   : > { %v12844_v8 = vpop.permute.xlu0 %4495  ;;  %v12846_v21 = vpop.permute.xlu1 %4809  ;;  %v12848_v35 = vld [vmem:[#allocation2 + $0x58] sm:$0xff] }
 0x9ee   : > { %4811 = vrot.lane.b32.xlu0 %v12848_v35, %s16045_s18 }
 0x9ef   : > { %4639 = vrot.lane.b32.xlu1 %v12831_v3, %s9974_s19 }
 0x9f1   : > { %v12854_v62 = vpop.permute.xlu0 %4647  ;;  %v12856_v11 = vpop.permute.xlu1 %4283  ;;  %v12858_v26 = vld [vmem:[#allocation2 + $0x60] sm:$0xff] }
 0x9f2   : > { %4281 = vrot.lane.b32.xlu0 %v12858_v26, %s9974_s19 }
 0x9f3   : > { %4415 = vrot.lane.b32.xlu1 %v12831_v3, %s16043_s22 }
 0x9f5   : > { %v12864_v5 = vpop.permute.xlu0 %4423  ;;  %v4498_v0 = vpop.permute.xlu1 %4497 }
 0x9f6   : > { %16310 = vst [vmem:[#allocation29_spill] sm:$0xff] %v12864_v5  ;;  %v4506_v51 = vsel %vm528_vm13, %v12844_v8, %v4498_v0  ;;  %4945 = vrot.lane.b32.xlu0 %v12808_v24, %s9974_s19 }
 0x9f7   : > { %v4529_v15 = vsel %vm16311_vm10, %v12613_v56, %v4506_v51  ;;  %v4652_v51 = vsel %vm440_vm15, %v12708_v54, %v12722_v6  ;;  %vm16321_vm10 = vcmp.ne.s16.totalorder %v10161_v44, 0 }
 0x9f9   : > { %v12870_v36 = vpop.permute.xlu0 %4813 }
 0x9fa   : > { %4563 = vrot.lane.b32.xlu0 %v4529_v15, %s16026_s17 }
 0x9fd   : > { %v4286_v42 = vpop.permute.xlu0 %4285 }
 0x9fe   : > { %v4294_v29 = vsel %vm440_vm15, %v12856_v11, %v4286_v42  ;;  %4947 = vrot.lane.b32.xlu0 %v12599_v27, %s9974_s19  ;;  %v4530_v42 = vsel %vm518_vm11, %v12615_v14, %v4498_v0  ;;  %v12907_v0 = vpop.permute.xlu1 %4649 }
 0x9ff   : > { %v4318_v5 = vsel %vm16312_vm12, %v12615_v14, %v4294_v29  ;;  %vm16323_vm12 = vmmov %vm16319_vm2 }
 0xa00   : > { %4353 = vrot.lane.b32.xlu1 %v4318_v5, %s16300_s26  ;;  %v4672_v5 = vsel %vm16313_vm4, %v12573_v40, %v4652_v51  ;;  %vm16324_vm4 = vmmov %vm16320_vm14 }
 0xa01   : > { %v4230_v31 = vpop.permute.xlu0 %4229 }
 0xa02   : > { %4238 = vst.msk [vmem:[#allocation2 + $0x78] sm:$0xff] %vm486_vm7, %v4230_v31  ;;  %4951 = vrot.lane.b32.xlu0 %v12848_v35, %s9974_s19  ;;  %v4673_v31 = vsel %vm16315_vm3, %v12746_v2, %v12722_v6  ;;  %v12917_v15 = vpop.permute.xlu1 %4425  ;;  %vm16330_vm3 = vmmov %vm16319_vm2 }
 0xa03   : > { %16316 = vst [vmem:[#allocation19_spill] sm:$0xff] %v12917_v15 }
 0xa04   : > { %4565 = vrot.lane.b32.xlu1 %v4530_v42, %s16026_s17 }
 0xa06   : > { %4697 = vrot.lane.b32.xlu0 %v4672_v5, %s16314_s27  ;;  %v12925_v6 = vpop.permute.xlu1 %4815 }
 0xa08   : > { %4949 = vrot.lane.b32.xlu1 %v12601_v55, %s9974_s19 }
 0xa09   : > { %v12913_v29 = vld [vmem:[#allocation2 + $0x78] sm:$0xff] }
 0xa0a   : > { %4953 = vrot.lane.b32.xlu0 %v12613_v56, %s9974_s19 }
 0xa0c   : > { %4699 = vrot.lane.b32.xlu1 %v4673_v31, %s16314_s27 }
 0xa0e   : > { %4493 = vrot.lane.b32.xlu0 %v12858_v26, %s16045_s18 }
 0xa10   : > { %4955 = vrot.lane.b32.xlu1 %v12615_v14, %s9974_s19 }
 0xa12   : > { %4817 = vrot.lane.b32.xlu0 %v12913_v29, %s16045_s18 }
 0xa14   : > { %4645 = vrot.lane.b32.xlu1 %v12858_v26, %s9974_s19 }
 0xa16   : > { %4957 = vrot.lane.b32.xlu0 %v12913_v29, %s9974_s19 }
 0xa18   : > { %4421 = vrot.lane.b32.xlu1 %v12858_v26, %s16043_s22 }
 0xa1d   : > { %v12927_v51 = vpop.permute.xlu1 %4547 }
 0xa1e   : > { %16317 = vst [vmem:[#allocation20_spill] sm:$0xff] %v12927_v51  ;;  %v12934_v18 = vpop.permute.xlu0 %4545 }
 0xa1f   : > { %16318 = vst [vmem:[#allocation22_spill] sm:$0xff] %v12934_v18 }
 0xa22   : > { %v12929_v42 = vpop.permute.xlu1 %4335 }
 0xa26   : > { %v4264_v5 = vpop.permute.xlu1 %4263 }
 0xa27   : > { %v4307_v31 = vsel %vm428_vm0, %v12733_v63, %v4264_v5  ;;  %v4287_v20 = vsel %vm440_vm15, %v4264_v5, %v12699_v9 }
 0xa28   : > { %4331 = vrot.lane.b32.xlu0 %v4307_v31, %s16300_s26  ;;  %v4308_v51 = vsel %vm16319_vm2, %v12571_v1, %v4287_v20  ;;  %vm16331_vm2 = vmmov %vm16324_vm4 }
 0xa2a   : > { %v4476_v34 = vpop.permute.xlu1 %4475 }
 0xa2b   : > { %v4499_v15 = vsel %vm528_vm13, %v4476_v34, %v12704_v49 }
 0xa2c   : > { %v12944_v17 = vpop.permute.xlu0 %4799  ;;  %4333 = vrot.lane.b32.xlu0 %v4308_v51, %s16300_s26  ;;  %v4519_v18 = vsel %vm16320_vm14, %v12733_v63, %v4499_v15  ;;  %vm16332_vm14 = vcmp.ne.s16.totalorder %v10155_v39, 0 }
 0xa2d   : > { %4543 = vrot.lane.b32.xlu1 %v4519_v18, %s16026_s17 }
 0xa2e   : > { %v4628_v9 = vpop.permute.xlu1 %4627 }
 0xa2f   : > { %v4651_v5 = vsel %vm440_vm15, %v4628_v9, %v12708_v54 }
 0xa30   : > { %v4671_v49 = vsel %vm16321_vm10, %v12571_v1, %v4651_v5  ;;  %v12957_v34 = vpop.permute.xlu0 %4939  ;;  %vm16333_vm10 = vmmov %vm16330_vm3 }
 0xa31   : > { %4695 = vrot.lane.b32.xlu1 %v4671_v49, %s16314_s27 }
 0xa32   : > { %v12976_v49 = vpop.permute.xlu1 %4403 }
 0xa33   : > { %16325 = vst [vmem:[#allocation21_spill] sm:$0xff] %v12976_v49 }
 0xa36   : > { %v12959_v20 = vpop.permute.xlu0 %4551 }
 0xa37   : > { %16322 = vst [vmem:[#allocation30_spill] sm:$0xff] %v12959_v20 }
 0xa3a   : > { %v4270_v51 = vpop.permute.xlu0 %4269 }
 0xa3b   : > { %v4310_v15 = vsel %vm428_vm0, %v12776_v60, %v4270_v51  ;;  %v4289_v18 = vsel %vm440_vm15, %v4270_v51, %v12754_v45  ;;  %v12979_v45 = vpop.permute.xlu1 %4553 }
 0xa3c   : > { %4337 = vrot.lane.b32.xlu0 %v4310_v15, %s16300_s26  ;;  %v4311_v9 = vsel %vm16323_vm12, %v12585_v52, %v4289_v18  ;;  %16326 = vst [vmem:[#allocation24_spill] sm:$0xff] %v12979_v45  ;;  %vm16334_vm12 = vcmp.ne.s16.totalorder %v10197_v61, 0 }
 0xa3e   : > { %v4482_v54 = vpop.permute.xlu0 %4481 }
 0xa3f   : > { %v4501_v31 = vsel %vm528_vm13, %v4482_v54, %v12742_v32 }
 0xa40   : > { %4339 = vrot.lane.b32.xlu0 %v4311_v9, %s16300_s26  ;;  %v4522_v5 = vsel %vm16324_vm4, %v12776_v60, %v4501_v31  ;;  %vm16335_vm4 = vmmov %vm16334_vm12 }
 0xa41   : > { %4549 = vrot.lane.b32.xlu1 %v4522_v5, %s16026_s17 }
 0xa42   : > { %v12981_v51 = vpop.permute.xlu1 %4341  ;;  %v4634_v15 = vpop.permute.xlu0 %4633 }
 0xa46   : > { %v12983_v32 = vpop.permute.xlu1 %4409 }
 0xa47   : > { %16327 = vst [vmem:[#allocation26_spill] sm:$0xff] %v12983_v32 }
 0xa4c   : > { %v4806_v54 = vpop.permute.xlu0 %4805 }
 0xa55   : > { %v12985_v20 = vpop.permute.xlu1 %4559 }
 0xa56   : > { %16328 = vst [vmem:[#allocation23_spill] sm:$0xff] %v12985_v20  ;;  %v12987_v18 = vpop.permute.xlu0 %4347 }
 0xa57   : > { %16329 = vst [vmem:[#allocation27_spill] sm:$0xff] %v12987_v18 }
 0xa59   : > { %v4276_v9 = vpop.permute.xlu1 %4275 }
 0xa5a   : > { %v4313_v31 = vsel %vm428_vm0, %v12831_v3, %v4276_v9  ;;  %v4291_v5 = vsel %vm440_vm15, %v4276_v9, %v12801_v38  ;;  %v12995_v45 = vpop.permute.xlu0 %4557 }
 0xa5b   : > { %4343 = vrot.lane.b32.xlu1 %v4313_v31, %s16300_s26  ;;  %v4314_v32 = vsel %vm16330_vm3, %v12599_v27, %v4291_v5  ;;  %vm16336_vm3 = vcmp.ne.s16.totalorder %v10161_v44, 0 }
 0xa5d   : > { %v4488_v49 = vpop.permute.xlu1 %4487 }
 0xa5e   : > { %v4503_v20 = vsel %vm528_vm13, %v4488_v49, %v12806_v50  ;;  %v4676_v50 = vsel %vm16332_vm14, %v12808_v24, %v12774_v33 }
 0xa5f   : > { %4345 = vrot.lane.b32.xlu1 %v4314_v32, %s16300_s26  ;;  %v4525_v38 = vsel %vm16331_vm2, %v12831_v3, %v4503_v20  ;;  %v4656_v20 = vsel %vm440_vm15, %v12814_v12, %v12828_v47  ;;  %vm16337_vm2 = vmmov %vm16336_vm3 }
 0xa60   : > { %v13003_v18 = vpop.permute.xlu0 %4811 }
 0xa61   : > { %v4640_v49 = vpop.permute.xlu1 %4639 }
 0xa63   : > { %4555 = vrot.lane.b32.xlu1 %v4525_v38, %s16026_s17  ;;  %v4654_v38 = vsel %vm440_vm15, %v12752_v10, %v12774_v33  ;;  %v4653_v33 = vsel %vm440_vm15, %v4634_v15, %v12752_v10  ;;  %v4682_v10 = vsel %vm16332_vm14, %v12913_v29, %v12907_v0  ;;  %v4819_v15 = vsel %vm528_vm13, %v12702_v25, %v12737_v4 }
 0xa64   : > { %v4282_v9 = vpop.permute.xlu0 %4281 }
 0xa65   : > { %v4316_v31 = vsel %vm428_vm0, %v12858_v26, %v4282_v9  ;;  %v4293_v5 = vsel %vm440_vm15, %v4282_v9, %v12856_v11  ;;  %v4678_v9 = vsel %vm16334_vm12, %v12601_v55, %v4656_v20  ;;  %vm16339_vm12 = vcmp.ne.s16.totalorder %v10256_v19, 0 }
 0xa66   : > { %4349 = vrot.lane.b32.xlu0 %v4316_v31, %s16300_s26  ;;  %v4317_v11 = vsel %vm16333_vm10, %v12613_v56, %v4293_v5  ;;  %v4655_v31 = vsel %vm440_vm15, %v4640_v49, %v12814_v12  ;;  %v4675_v5 = vsel %vm16335_vm4, %v12587_v58, %v4654_v38  ;;  %v4674_v49 = vsel %vm16337_vm2, %v12585_v52, %v4653_v33  ;;  %v13066_v38 = vpop.permute.xlu1 %4415  ;;  %vm16338_vm10 = vmmov %vm16332_vm14 }
 0xa67   : > { %4705 = vrot.lane.b32.xlu1 %v4676_v50, %s16314_s27  ;;  %v4677_v20 = vsel %vm16336_vm3, %v12599_v27, %v4655_v31  ;;  %v4658_v31 = vsel %vm440_vm15, %v12854_v62, %v12907_v0  ;;  %v4820_v0 = vsel %vm528_vm13, %v12737_v4, %v12944_v17  ;;  %vm16340_vm3 = vcmp.ne.s16.totalorder %v10163_v46, 0 }
 0xa68   : > { %v13023_v32 = vpop.permute.xlu0 %4945  ;;  %vm16341_vm2 = vcmp.ne.s16.totalorder %v10157_v41, 0  ;;  %v4821_v17 = vsel %vm528_vm13, %v12772_v30, %v12786_v48 }
 0xa69   : > { %vm16342_vm14 = vmmov %vm16341_vm2 }
 0xa6a   : > { %4351 = vrot.lane.b32.xlu0 %v4317_v11, %s16300_s26 }
 0xa6b   : > { %4709 = vrot.lane.b32.xlu1 %v4678_v9, %s16314_s27  ;;  %v4679_v9 = vsel %vm16338_vm10, %v12848_v35, %v12828_v47  ;;  %v4681_v47 = vsel %vm16335_vm4, %v12615_v14, %v4658_v31  ;;  %vm16343_vm10 = vmmov %vm16339_vm12 }
 0xa6c   : > { %v13038_v50 = vpop.permute.xlu0 %4563  ;;  %vm16345_vm4 = vmmov %vm16340_vm3 }
 0xa6e   : > { %4703 = vrot.lane.b32.xlu0 %v4675_v5, %s16314_s27  ;;  %v4840_v5 = vsel %vm16339_vm12, %v12571_v1, %v4819_v15  ;;  %vm16344_vm12 = vcmp.ne.s16.totalorder %v10151_v37, 0 }
 0xa6f   : > { %4707 = vrot.lane.b32.xlu1 %v4677_v20, %s16314_s27 }
 0xa70   : > { %v13050_v12 = vpop.permute.xlu0 %4947 }
 0xa72   : > { %4701 = vrot.lane.b32.xlu0 %v4674_v49, %s16314_s27  ;;  %v13082_v20 = vpop.permute.xlu1 %4353  ;;  %v4839_v49 = vsel %vm16340_vm3, %v12733_v63, %v12702_v25  ;;  %vm16346_vm3 = vmmov %vm16343_vm10 }
 0xa73   : > { %4717 = vrot.lane.b32.xlu1 %v4682_v10, %s16314_s27  ;;  %v4822_v10 = vsel %vm528_vm13, %v12786_v48, %v4806_v54  ;;  %v4843_v54 = vsel %vm16343_vm10, %v12585_v52, %v4821_v17  ;;  %v4825_v17 = vsel %vm528_vm13, %v12870_v36, %v12925_v6  ;;  %vm16348_vm10 = vmmov %vm16346_vm3 }
 0xa74   : > { %v13064_v11 = vpop.permute.xlu0 %4951  ;;  %v4844_v25 = vsel %vm16342_vm14, %v12587_v58, %v4822_v10  ;;  %vm16347_vm14 = vmmov %vm16345_vm4 }
 0xa76   : > { %4711 = vrot.lane.b32.xlu0 %v4679_v9, %s16314_s27  ;;  %v4841_v9 = vsel %vm16341_vm2, %v12573_v40, %v4820_v0  ;;  %v13110_v63 = vpop.permute.xlu1 %4565  ;;  %v4824_v0 = vsel %vm528_vm13, %v12846_v21, %v13003_v18  ;;  %v4845_v18 = vsel %vm16347_vm14, %v12831_v3, %v12812_v57 }
 0xa77   : > { %4865 = vrot.lane.b32.xlu1 %v4840_v5, %s16209_s9 }
 0xa78   : > { %v13080_v33 = vpop.permute.xlu0 %4697 }
 0xa7a   : > { %4715 = vrot.lane.b32.xlu0 %v4681_v47, %s16314_s27  ;;  %v13121_v31 = vpop.permute.xlu1 %4949  ;;  %v4842_v47 = vsel %vm16345_vm4, %v12776_v60, %v12772_v30  ;;  %v4847_v30 = vsel %vm16341_vm2, %v12601_v55, %v4824_v0  ;;  %vm16350_vm4 = vcmp.ne.s16.totalorder %v10159_v43, 0  ;;  %vm16352_vm2 = vcmp.ne.s16.totalorder %v10261_v22, 0 }
 0xa7b   : > { %4863 = vrot.lane.b32.xlu1 %v4839_v49, %s16209_s9 }
 0xa7c   : > { %v13098_v15 = vpop.permute.xlu0 %4953 }
 0xa7e   : > { %4867 = vrot.lane.b32.xlu0 %v4841_v9, %s16209_s9  ;;  %v13140_v49 = vpop.permute.xlu1 %4699 }
 0xa7f   : > { %4873 = vrot.lane.b32.xlu1 %v4844_v25, %s16209_s9 }
 0xa80   : > { %v4494_v4 = vpop.permute.xlu0 %4493 }
 0xa81   : > { %v4505_v48 = vsel %vm528_vm13, %v4494_v4, %v12844_v8  ;;  %v4823_v8 = vsel %vm528_vm13, %v12812_v57, %v12846_v21  ;;  %v9854_v21 = vld [vmem:[%s15938_s4 + $0x144] ss:$20 sps:$4 sm:$0xff]  }
 0xa82   : > { %4871 = vrot.lane.b32.xlu0 %v4843_v54, %s16209_s9  ;;  %v4528_v5 = vsel %vm16344_vm12, %v12858_v26, %v4505_v48  ;;  %v4846_v10 = vsel %vm16346_vm3, %v12599_v27, %v4823_v8  ;;  %v13152_v9 = vpop.permute.xlu1 %4955  ;;  %5553 = vmatprep.mubr.bf16.mxu1 %v9854_v21  ;;  %v4849_v54 = vsel %vm16348_vm10, %v12613_v56, %v4825_v17  ;;  %vm16349_vm12 = vcmp.ne.s16.totalorder %v10161_v44, 0  ;;  %vm16351_vm3 = vmmov %vm16347_vm14 }
 0xa83   : > { %5151 = vrot.lane.b32.xlu1 %v12746_v2, %s16045_s18  ;;  %vm16353_vm14 = vmmov %vm16350_vm4  ;;  %vm16354_vm10 = vcmp.ne.s16.totalorder %v10176_v53, 0  ;;  %v4961_v21 = vsel %vm440_vm15, %v12780_v13, %v12796_v23 }
 0xa84   : > { %v4818_v60 = vpop.permute.xlu0 %4817 }
 0xa86   : > { %5149 = vrot.lane.b32.xlu0 %v12573_v40, %s16045_s18  ;;  %v4646_v4 = vpop.permute.xlu1 %4645 }
 0xa87   : > { %4561 = vrot.lane.b32.xlu1 %v4528_v5, %s16026_s17  ;;  %v4657_v57 = vsel %vm440_vm15, %v4646_v4, %v12854_v62  ;;  %v4826_v4 = vsel %vm528_vm13, %v12925_v6, %v4818_v60  ;;  %v4964_v6 = vsel %vm440_vm15, %v13121_v31, %v13064_v11 }
 0xa88   : > { %v13168_v25 = vpop.permute.xlu0 %4957  ;;  %v4680_v48 = vsel %vm16349_vm12, %v12613_v56, %v4657_v57  ;;  %vm16355_vm12 = vmmov %vm16352_vm2 }
 0xa8a   : > { %4869 = vrot.lane.b32.xlu0 %v4842_v47, %s16209_s9  ;;  %v4960_v47 = vsel %vm440_vm15, %v12744_v59, %v12957_v34  ;;  %v4848_v34 = vsel %vm16351_vm3, %v12858_v26, %v12870_v36  ;;  %v4963_v26 = vsel %vm440_vm15, %v13050_v12, %v13121_v31  ;;  %vm16357_vm3 = vcmp.ne.s16.totalorder %v10157_v41, 0  ;;  %v13264_v60 = vpop.permute.xlu1 %4421 }
 0xa8b   : > { %5147 = vrot.lane.b32.xlu1 %v12571_v1, %s16045_s18  ;;  %v4981_v0 = vsel %vm16350_vm4, %v12746_v2, %v4960_v47  ;;  %v4986_v17 = vsel %vm16355_vm12, %v12601_v55, %v4963_v26  ;;  %vm16356_vm4 = vmmov %vm16352_vm2  ;;  %v4966_v31 = vsel %vm440_vm15, %v13152_v9, %v13168_v25  ;;  %v13308_v25 = vld [vmem:[#allocation2 + $0x30] sm:$0xff] }
 0xa8c   : > { %vm16361_vm12 = vmmov %vm16356_vm4 }
 0xa8e   : > { %4877 = vrot.lane.b32.xlu0 %v4846_v10, %s16209_s9 }
 0xa8f   : > { %4879 = vrot.lane.b32.xlu1 %v4847_v30, %s16209_s9  ;;  %v4962_v30 = vsel %vm440_vm15, %v12796_v23, %v13023_v32  ;;  %v4979_v32 = vsel %vm16354_vm10, %v12571_v1, %v12706_v7 }
 0xa92   : > { %5155 = vrot.lane.b32.xlu0 %v12587_v58, %s16045_s18 }
 0xa93   : > { %5157 = vrot.lane.b32.xlu1 %v12808_v24, %s16045_s18 }
 0xa96   : > { %4875 = vrot.lane.b32.xlu0 %v4845_v18, %s16209_s9 }
 0xa97   : > { %5153 = vrot.lane.b32.xlu1 %v12585_v52, %s16045_s18 }
 0xa9a   : > { %v4332_v3 = vpop.permute.xlu0 %4331  ;;  %4883 = vrot.lane.b32.xlu0 %v4849_v54, %s16209_s9 }
 0xa9b   : > { %5163 = vrot.lane.b32.xlu1 %v12848_v35, %s16045_s18 }
 0xa9e   : > { %v4334_v5 = vpop.permute.xlu0 %4333  ;;  %4713 = vrot.lane.b32.xlu0 %v4680_v48, %s16314_s27 }
 0xa9f   : > { %5159 = vrot.lane.b32.xlu1 %v12599_v27, %s16045_s18  ;;  %v4356_v62 = vsel %vm461_vm8, %v4334_v5, %v12929_v42  ;;  %v4355_v8 = vsel %vm461_vm8, %v4332_v3, %v4334_v5  ;;  %v4959_v42 = vsel %vm440_vm15, %v12706_v7, %v12744_v59  ;;  %v4984_v59 = vsel %vm16353_vm14, %v12808_v24, %v4962_v30  ;;  %v13276_v11 = vpop.permute.xlu1 %4543 }
 0xaa0   : > { %5521 = vmatprep.subr.bf16.mxu1 %v4356_v62  ;;  %v4980_v10 = vsel %vm16352_vm2, %v12573_v40, %v4959_v42  ;;  %v4983_v7 = vsel %vm16356_vm4, %v12587_v58, %v4961_v21  ;;  %vm16358_vm2 = vmmov %vm16354_vm10  ;;  %vm16360_vm10 = vcmp.ne.s16.totalorder %v10159_v43, 0  ;;  %v13316_v62 = vld [vmem:[#allocation2 + $0x28] sm:$0xff] }
 0xaa1   : > { %5522 = vmatpush1.bf16.msra.mxu1 %v4355_v8  ;;  %v4982_v23 = vsel %vm16358_vm2, %v12585_v52, %v12780_v13  ;;  %vm16359_vm14 = vmmov %vm16358_vm2  ;;  %v4987_v57 = vsel %vm16360_vm10, %v12848_v35, %v4964_v6  ;;  %v4965_v52 = vsel %vm440_vm15, %v13098_v15, %v13152_v9  ;;  %v13274_v13 = vld [vmem:[#allocation2 + $0x10] sm:$0xff]  ;;  %v13320_v8 = vld [vmem:[#allocation2 + $0x48] sm:$0xff] }
 0xaa2   : > { %5161 = vrot.lane.b32.xlu0 %v12601_v55, %s16045_s18  ;;  %v4850_v55 = vsel %vm16357_vm3, %v12615_v14, %v4826_v4  ;;  %vm16362_vm4 = vmmov %vm16358_vm2  ;;  %v16366_v4 = vld [vmem:[#allocation31_spill] sm:$0xff] }
 0xaa3   : > { %5007 = vrot.lane.b32.xlu1 %v4981_v0, %s16220_s13  ;;  %v13291_v3 = vpop.permute.xlu1 %4695  ;;  %v4988_v48 = vsel %vm16362_vm4, %v12613_v56, %v13098_v15  ;;  %vm16363_vm3 = vmmov %vm16360_vm10  ;;  %v16364_v0 = vld [vmem:[#allocation27_spill] sm:$0xff] }
 0xaa4   : > { %v4990_v5 = vsel %vm16363_vm3, %v12913_v29, %v4966_v31  ;;  %v16371_v31 = vld [vmem:[#allocation17_spill] sm:$0xff] }
 0xaa6   : > { %4881 = vrot.lane.b32.xlu0 %v4848_v34, %s16209_s9 }
 0xaa7   : > { %5169 = vrot.lane.b32.xlu1 %v12913_v29, %s16045_s18 }
 0xaaa   : > { %5005 = vrot.lane.b32.xlu0 %v4980_v10, %s16220_s13 }
 0xaab   : > { %5165 = vrot.lane.b32.xlu1 %v12613_v56, %s16045_s18  ;;  %v13312_v56 = vld [vmem:[#allocation2 + $0x50] sm:$0xff] }
 0xaae   : > { %v4338_v36 = vpop.permute.xlu0 %4337  ;;  %5167 = vrot.lane.b32.xlu0 %v12615_v14, %s16045_s18 }
 0xaaf   : > { %5013 = vrot.lane.b32.xlu1 %v4984_v59, %s16220_s13 }
 0xab2   : > { %v4340_v18 = vpop.permute.xlu0 %4339  ;;  %5003 = vrot.lane.b32.xlu0 %v4979_v32, %s16220_s13  ;;  %v13337_v32 = vld [vmem:[#allocation2 + $0x68] sm:$0xff] }
 0xab3   : > { %5017 = vrot.lane.b32.xlu1 %v4986_v17, %s16220_s13  ;;  %v4358_v54 = vsel %vm461_vm8, %v4340_v18, %v12981_v51  ;;  %v4357_v1 = vsel %vm461_vm8, %v4338_v36, %v4340_v18  ;;  %v4985_v51 = vsel %vm16359_vm14, %v12599_v27, %v13050_v12  ;;  %v4989_v27 = vsel %vm16361_vm12, %v12615_v14, %v4965_v52  ;;  %v13284_v12 = vld [vmem:[#allocation2 + $0x8] sm:$0xff]  ;;  %v13302_v47 = vpop.permute.xlu1 %4549  ;;  %v16365_v17 = vld [vmem:[#allocation18_spill] sm:$0xff] }
 0xab4   : > { %5523 = vmatprep.subr.bf16.mxu1 %v4358_v54  ;;  %v4428_v54 = vsel %vm486_vm7, %v16366_v4, %v16365_v17  ;;  %v16370_v52 = vld [vmem:[#allocation26_spill] sm:$0xff]  ;;  %v16375_v17 = vld [vmem:[#allocation20_spill] sm:$0xff]  ;;  %vm16383_vm14 = vcmask 1039360  }
 0xab5   : > { %5524 = vmatpush1.bf16.msra.mxu1 %v4357_v1  ;;  %vm16386_vm12 = vmmov %vm16383_vm14 }
 0xab6   : > { %5011 = vrot.lane.b32.xlu0 %v4983_v7, %s16220_s13  ;;  %v16367_v7 = vld [vmem:[#allocation21_spill] sm:$0xff]  ;;  %vm16387_vm4 = vmmov %vm16386_vm12 }
 0xab7   : > { %4885 = vrot.lane.b32.xlu1 %v4850_v55, %s16209_s9  ;;  %v16368_v55 = vld [vmem:[#allocation25_spill] sm:$0xff]  ;;  %vm16388_vm3 = vmmov %vm16387_vm4 }
 0xaba   : > { %5009 = vrot.lane.b32.xlu0 %v4982_v23, %s16220_s13  ;;  %v16369_v23 = vld [vmem:[#allocation32_spill] sm:$0xff] }
 0xabb   : > { %5015 = vrot.lane.b32.xlu1 %v4985_v51, %s16220_s13  ;;  %v4430_v6 = vsel %vm486_vm7, %v16369_v23, %v16368_v55  ;;  %v16377_v55 = vld [vmem:[#allocation24_spill] sm:$0xff] }
 0xabe   : > { %5019 = vrot.lane.b32.xlu0 %v4987_v57, %s16220_s13 }
 0xabf   : > { %5077 = vrot.lane.b32.xlu1 %v13274_v13, %s16125_s28 }
 0xac2   : > { %5023 = vrot.lane.b32.xlu0 %v4989_v27, %s16220_s13  ;;  %v4429_v27 = vsel %vm486_vm7, %v16370_v52, %v16369_v23  ;;  %v16378_v23 = vld [vmem:[#allocation30_spill] sm:$0xff] }
 0xac3   : > { %5075 = vrot.lane.b32.xlu1 %v13284_v12, %s16125_s28 }
 0xac6   : > { %5021 = vrot.lane.b32.xlu0 %v4988_v48, %s16220_s13  ;;  %v16372_v48 = vld [vmem:[#allocation28_spill] sm:$0xff] }
 0xac7   : > { %5025 = vrot.lane.b32.xlu1 %v4990_v5, %s16220_s13  ;;  %v4432_v5 = vsel %vm486_vm7, %v16372_v48, %v16371_v31 }
 0xaca   : > { %5079 = vrot.lane.b32.xlu0 %v12746_v2, %s16125_s28 }
 0xacb   : > { %5085 = vrot.lane.b32.xlu1 %v12808_v24, %s16125_s28 }
 0xacd   : > { %v4344_v9 = vpop.permute.xlu1 %4343 }
 0xace   : > { %5083 = vrot.lane.b32.xlu0 %v13308_v25, %s16125_s28 }
 0xacf   : > { %5089 = vrot.lane.b32.xlu1 %v13312_v56, %s16125_s28 }
 0xad1   : > { %v4346_v15 = vpop.permute.xlu1 %4345 }
 0xad2   : > { %5081 = vrot.lane.b32.xlu0 %v13316_v62, %s16125_s28  ;;  %v4360_v34 = vsel %vm461_vm8, %v4346_v15, %v16364_v0  ;;  %v4359_v42 = vsel %vm461_vm8, %v4344_v9, %v4346_v15  ;;  %v4431_v0 = vsel %vm486_vm7, %v13066_v38, %v16372_v48 }
 0xad3   : > { %5087 = vrot.lane.b32.xlu1 %v13320_v8, %s16125_s28  ;;  %5525 = vmatprep.subr.bf16.mxu1 %v4360_v34  ;;  %v16373_v34 = vld [vmem:[#allocation19_spill] sm:$0xff] }
 0xad4   : > { %5526 = vmatpush1.bf16.msra.mxu1 %v4359_v42  ;;  %v16374_v42 = vld [vmem:[#allocation29_spill] sm:$0xff] }
 0xad5   : > { %v4556_v10 = vpop.permute.xlu1 %4555 }
 0xad6   : > { %5091 = vrot.lane.b32.xlu0 %v12848_v35, %s16125_s28 }
 0xad7   : > { %5097 = vrot.lane.b32.xlu1 %v12913_v29, %s16125_s28 }
 0xad8   : > { %v4350_v30 = vpop.permute.xlu0 %4349 }
 0xad9   : > { %v13331_v36 = vpop.permute.xlu1 %4705 }
 0xada   : > { %5095 = vrot.lane.b32.xlu0 %v12615_v14, %s16125_s28 }
 0xadc   : > { %v4352_v59 = vpop.permute.xlu0 %4351 }
 0xadd   : > { %v13335_v26 = vpop.permute.xlu1 %4709  ;;  %v4362_v21 = vsel %vm461_vm8, %v4352_v59, %v13082_v20  ;;  %v4361_v18 = vsel %vm461_vm8, %v4350_v30, %v4352_v59  ;;  %v4427_v20 = vsel %vm486_vm7, %v16367_v7, %v16366_v4  ;;  %v4434_v30 = vsel %vm486_vm7, %v16374_v42, %v16373_v34  ;;  %v16376_v4 = vld [vmem:[#allocation22_spill] sm:$0xff] }
 0xade   : > { %5093 = vrot.lane.b32.xlu0 %v13337_v32, %s16125_s28  ;;  %5527 = vmatprep.subr.bf16.mxu1 %v4362_v21 }
 0xadf   : > { %5528 = vmatpush1.bf16.msra.mxu1 %v4361_v18  ;;  %v4433_v18 = vsel %vm486_vm7, %v13264_v60, %v16374_v42 }
 0xae0   : > { %v13347_v14 = vpop.permute.xlu0 %4703  ;;  %5529 = vmatprep.subr.bf16.mxu1 %v4428_v54  ;;  %v4568_v54 = vsel %vm366_vm1, %v16376_v4, %v16375_v17 }
 0xae1   : > { %v13349_v1 = vpop.permute.xlu1 %4707 }
 0xae3   : > { %5530 = vmatpush1.bf16.msra.mxu1 %v4427_v20  ;;  %v4567_v20 = vsel %vm366_vm1, %v13276_v11, %v16376_v4  ;;  %v16380_v11 = vld [vmem:[#allocation23_spill] sm:$0xff] }
 0xae4   : > { %v4702_v51 = vpop.permute.xlu0 %4701  ;;  %5531 = vmatprep.subr.bf16.mxu1 %v4430_v6  ;;  %v4570_v6 = vsel %vm366_vm1, %v16378_v23, %v16377_v55 }
 0xae5   : > { %v13357_v57 = vpop.permute.xlu1 %4717 }
 0xae7   : > { %5532 = vmatpush1.bf16.msra.mxu1 %v4429_v27  ;;  %v4569_v27 = vsel %vm366_vm1, %v13302_v47, %v16378_v23  ;;  %v16381_v47 = vld [vmem:[#allocation16_spill] sm:$0xff] }
 0xae8   : > { %v4712_v9 = vpop.permute.xlu0 %4711  ;;  %5533 = vmatprep.subr.bf16.mxu1 %v4432_v5  ;;  %v4572_v5 = vsel %vm366_vm1, %v12995_v45, %v16380_v11  ;;  %vm16382_vm2 = vcmp.ne.s16.totalorder %v16381_v47, 0 }
 0xae9   : > { %v13365_v15 = vpop.permute.xlu1 %4865 }
 0xaeb   : > { %5534 = vmatpush1.bf16.msra.mxu1 %v4431_v0 }
 0xaec   : > { %v13373_v59 = vpop.permute.xlu0 %4715  ;;  %5535 = vmatprep.subr.bf16.mxu1 %v4434_v30  ;;  %v4571_v30 = vsel %vm366_vm1, %v4556_v10, %v12995_v45  ;;  %v9943_v10 = vld [vmem:[#allocation2 + $0x8] sm:$0xff] }
 0xaed   : > { %v13375_v21 = vpop.permute.xlu1 %4863 }
 0xaef   : > { %5536 = vmatpush1.bf16.msra.mxu1 %v4433_v18 }
 0xaf0   : > { %v13383_v38 = vpop.permute.xlu0 %4867  ;;  %5537 = vmatprep.subr.bf16.mxu1 %v4568_v54 }
 0xaf1   : > { %v13385_v7 = vpop.permute.xlu1 %4873 }
 0xaf3   : > { %5538 = vmatpush1.bf16.msra.mxu1 %v4567_v20  ;;  %v16384_v20 = vld [vmem:[#allocation14_spill] sm:$0xff] }
 0xaf4   : > { %v13393_v60 = vpop.permute.xlu0 %4871  ;;  %5539 = vmatprep.subr.bf16.mxu1 %v4570_v6  ;;  %vm16385_vm10 = vcmp.ne.s16.totalorder %v16384_v20, 0 }
 0xaf5   : > { %v5152_v52 = vpop.permute.xlu1 %5151 }
 0xaf6   : > { %v5193_v48 = vsel %vm755_vm9, %v12746_v2, %v5152_v52  ;;  %v4574_v2 = vsel %vm366_vm1, %v13038_v50, %v13110_v63 }
 0xaf7   : > { %5540 = vmatpush1.bf16.msra.mxu1 %v4569_v27  ;;  %5219 = vrot.lane.b32.xlu0 %v5193_v48, %s16143_s30  ;;  %v4721_v27 = vsel %vm16388_vm3, %v4702_v51, %v13347_v14 }
 0xaf8   : > { %v5150_v0 = vpop.permute.xlu0 %5149  ;;  %5541 = vmatprep.subr.bf16.mxu1 %v4572_v5  ;;  %v9944_v5 = vld [vmem:[#allocation2 + $0x28] sm:$0xff] }
 0xaf9   : > { %v5172_v34 = vsel %vm528_vm13, %v5150_v0, %v5152_v52  ;;  %v4562_v42 = vpop.permute.xlu1 %4561 }
 0xafa   : > { %v5192_v18 = vsel %vm16382_vm2, %v12573_v40, %v5172_v34  ;;  %v4573_v54 = vsel %vm366_vm1, %v4562_v42, %v13038_v50  ;;  %v4720_v40 = vsel %vm16383_vm14, %v13080_v33, %v13140_v49  ;;  %v4719_v50 = vsel %vm16386_vm12, %v13291_v3, %v13080_v33  ;;  %vm16389_vm2 = vmmov %vm16388_vm3 }
 0xafb   : > { %5542 = vmatpush1.bf16.msra.mxu1 %v4571_v30  ;;  %5217 = vrot.lane.b32.xlu1 %v5192_v18, %s16143_s30  ;;  %v4722_v49 = vsel %vm16387_vm4, %v13347_v14, %v13331_v36  ;;  %v4724_v33 = vsel %vm16389_vm2, %v13335_v26, %v4712_v9  ;;  %vm16390_vm14 = vcmp.ne.s16.totalorder %v16381_v47, 0  ;;  %vm16392_vm12 = vmmov %vm16389_vm2  ;;  %vm16393_vm4 = vcmp.ne.s16.totalorder %v16384_v20, 0  ;;  %v9852_v30 = vld [vmem:[%s15938_s4 + $0x140] ss:$20 sps:$4 sm:$0xff]  }
 0xafc   : > { %v13415_v17 = vpop.permute.xlu0 %4869  ;;  %5543 = vmatprep.subr.bf16.mxu1 %v4574_v2  ;;  %v4726_v9 = vsel %vm16392_vm12, %v13373_v59, %v13357_v57  ;;  %vm16394_vm3 = vmmov %vm16389_vm2  ;;  %v9855_v18 = vld [vmem:[%s15938_s4 + $0x16c] ss:$20 sps:$4 sm:$0xff]  }
 0xafd   : > { %v5148_v4 = vpop.permute.xlu1 %5147 }
 0xafe   : > { %v5171_v45 = vsel %vm528_vm13, %v5148_v4, %v5150_v0 }
 0xaff   : > { %5544 = vmatpush1.bf16.msra.mxu1 %v4573_v54  ;;  %v5191_v55 = vsel %vm16385_vm10, %v9943_v10, %v5171_v45  ;;  %vm16391_vm10 = vmmov %vm16389_vm2  ;;  %v9857_v10 = vld [vmem:[%s15938_s4 + $0x168] ss:$20 sps:$4 sm:$0xff]  }
 0xb00   : > { %v13425_v23 = vpop.permute.xlu0 %4877  ;;  %5545 = vmatprep.subr.bf16.mxu1 %v4720_v40  ;;  %5215 = vrot.lane.b32.xlu1 %v5191_v55, %s16143_s30  ;;  %vm16395_vm2 = vmmov %vm16390_vm14 }
 0xb01   : > { %v13428_v63 = vpop.permute.xlu1 %4879  ;;  %vm16398_vm12 = vmmov %vm16395_vm2 }
 0xb03   : > { %5546 = vmatpush1.bf16.msra.mxu1 %v4719_v50  ;;  %v9858_v50 = vld [vmem:[%s15938_s4 + $0x194] ss:$20 sps:$4 sm:$0xff]  }
 0xb04   : > { %v5156_v6 = vpop.permute.xlu0 %5155  ;;  %5547 = vmatprep.subr.bf16.mxu1 %v4722_v49 }
 0xb05   : > { %v5158_v52 = vpop.permute.xlu1 %5157 }
 0xb06   : > { %v5174_v48 = vsel %vm528_vm13, %v5156_v6, %v5158_v52  ;;  %v5196_v11 = vsel %vm755_vm9, %v12808_v24, %v5158_v52  ;;  %v4723_v24 = vsel %vm16391_vm10, %v13349_v1, %v13335_v26  ;;  %vm16397_vm10 = vcmask 7168  }
 0xb07   : > { %5548 = vmatpush1.bf16.msra.mxu1 %v4721_v27  ;;  %5225 = vrot.lane.b32.xlu1 %v5196_v11, %s16143_s30  ;;  %v5195_v3 = vsel %vm16390_vm14, %v12587_v58, %v5174_v48  ;;  %vm16396_vm14 = vmmov %vm16393_vm4  ;;  %v9947_v11 = vld [vmem:[#allocation2 + $0x70] sm:$0xff] }
 0xb08   : > { %v13448_v36 = vpop.permute.xlu0 %4875  ;;  %5549 = vmatprep.subr.bf16.mxu1 %v4724_v33  ;;  %5223 = vrot.lane.b32.xlu0 %v5195_v3, %s16143_s30  ;;  %v9861_v3 = vld [vmem:[%s15938_s4 + $0x1bc] ss:$20 sps:$4 sm:$0xff]  }
 0xb09   : > { %v5154_v14 = vpop.permute.xlu1 %5153 }
 0xb0a   : > { %v5173_v51 = vsel %vm528_vm13, %v5154_v14, %v5156_v6  ;;  %v4750_v6 = vld [vmem:[#allocation2 + $0x70] sm:$0xff] }
 0xb0b   : > { %5550 = vmatpush1.bf16.msra.mxu1 %v4723_v24  ;;  %v5194_v58 = vsel %vm16393_vm4, %v9944_v5, %v5173_v51  ;;  %vm16399_vm4 = vmmov %vm16397_vm10  ;;  %v9948_v5 = vld [vmem:[#allocation2 + $0x68] sm:$0xff] }
 0xb0c   : > { %v13460_v0 = vpop.permute.xlu0 %4883  ;;  %5551 = vmatprep.subr.bf16.mxu1 %v4726_v9  ;;  %5221 = vrot.lane.b32.xlu0 %v5194_v58, %s16143_s30 }
 0xb0d   : > { %v5164_v34 = vpop.permute.xlu1 %5163 }
 0xb0e   : > { %v5199_v26 = vsel %vm755_vm9, %v12848_v35, %v5164_v34 }
 0xb10   : > { %v4714_v1 = vpop.permute.xlu0 %4713  ;;  %5231 = vrot.lane.b32.xlu0 %v5199_v26, %s16143_s30 }
 0xb11   : > { %v4725_v57 = vsel %vm16394_vm3, %v4714_v1, %v13373_v59  ;;  %v5160_v42 = vpop.permute.xlu1 %5159  ;;  %v9945_v59 = vld [vmem:[#allocation2 + $0x50] sm:$0xff]  ;;  %vm16400_vm3 = vmmov %vm16399_vm4  ;;  %v9863_v1 = vld [vmem:[%s15938_s4 + $0x1b8] ss:$20 sps:$4 sm:$0xff]  }
 0xb12   : > { %5552 = vmatpush1.bf16.msra.mxu1 %v4725_v57  ;;  %v4890_v9 = vsel %vm16400_vm3, %v13393_v60, %v13385_v7  ;;  %v9394_v7 = vld [vmem:[%s15940_s6 + $0xc8] sm:$0xff] }
 0xb13   : > { %5594 = vmatprep.subr.bf16.mxu1 %v13274_v13 }
 0xb14   : > { %v5162_v2 = vpop.permute.xlu0 %5161 }
 0xb15   : > { %v5176_v35 = vsel %vm528_vm13, %v5162_v2, %v5164_v34  ;;  %v13477_v4 = vpop.permute.xlu1 %5007  ;;  %5554 = vmatmul.mubr.bf16.vlgmr.msra.gmra.mrb[16].mxu1 %v9852_v30  ;;  %v5175_v45 = vsel %vm528_vm13, %v5160_v42, %v5162_v2  ;;  %v9866_v42 = vld [vmem:[%s15938_s4 + $0x14c] ss:$20 sps:$4 sm:$0xff]  }
 0xb16   : > { %5595 = vmatpush1.bf16.msra.mxu1 %v13284_v12  ;;  %v5198_v54 = vsel %vm16395_vm2, %v9945_v59, %v5176_v35  ;;  %5563 = vmatprep.mubr.bf16.mxu1 %v9855_v18  ;;  %v9946_v12 = vld [vmem:[#allocation2 + $0x48] sm:$0xff]  ;;  %vm16401_vm2 = vmmov %vm16396_vm14 }
 0xb17   : > { %5596 = vmatprep.subr.bf16.mxu1 %v13308_v25  ;;  %5229 = vrot.lane.b32.xlu1 %v5198_v54, %s16143_s30  ;;  %v5197_v55 = vsel %vm16396_vm14, %v9946_v12, %v5175_v45  ;;  %vm16402_vm14 = vmmov %vm16400_vm3 }
 0xb18   : > { %v13485_v13 = vpop.permute.xlu0 %4881 }
 0xb19   : > { %v5170_v40 = vpop.permute.xlu1 %5169  ;;  %v4893_v59 = vsel %vm16400_vm3, %v13485_v13, %v13460_v0 }
 0xb1a   : > { %5597 = vmatpush1.bf16.msra.mxu1 %v13316_v62  ;;  %v5202_v62 = vsel %vm755_vm9, %v12913_v29, %v5170_v40  ;;  %v4888_v29 = vsel %vm16397_vm10, %v13365_v15, %v13383_v38  ;;  %v4887_v38 = vsel %vm16399_vm4, %v13375_v21, %v13365_v15  ;;  %v9397_v15 = vld [vmem:[%s15940_s6 + $0xe0] sm:$0xff]  ;;  %v4889_v21 = vsel %vm16402_vm14, %v13415_v17, %v13393_v60  ;;  %vm16403_vm10 = vmmov %vm16400_vm3  ;;  %v9399_v17 = vld [vmem:[%s15940_s6 + $0xf0] sm:$0xff] }
 0xb1b   : > { %5598 = vmatprep.subr.bf16.mxu1 %v13312_v56  ;;  %5227 = vrot.lane.b32.xlu1 %v5197_v55, %s16143_s30  ;;  %v9393_v56 = vld [vmem:[%s15940_s6 + $0xc0] sm:$0xff]  ;;  %v4892_v57 = vsel %vm16403_vm10, %v13425_v23, %v13428_v63  ;;  %v9396_v63 = vld [vmem:[%s15940_s6 + $0xd8] sm:$0xff]  ;;  %vm16405_vm4 = vmmov %vm16400_vm3 }
 0xb1c   : > { %v13498_v25 = vpop.permute.xlu0 %5005 }
 0xb1d   : > { %v5166_v49 = vpop.permute.xlu1 %5165  ;;  %5564 = vmatmul.mubr.bf16.gmra.mrb[20].mxu1 %v9857_v10 }
 0xb1e   : > { %5599 = vmatpush1.bf16.msra.mxu1 %v13320_v8  ;;  %5573 = vmatprep.mubr.bf16.mxu1 %v9858_v50  ;;  %v9860_v8 = vld [vmem:[%s15938_s4 + $0x190] ss:$20 sps:$4 sm:$0xff]  }
 0xb1f   : > { %5600 = vmatprep.subr.bf16.mxu1 %v4750_v6  ;;  %5237 = vrot.lane.b32.xlu1 %v5202_v62, %s16143_s30 }
 0xb20   : > { %v5168_v52 = vpop.permute.xlu0 %5167 }
 0xb21   : > { %v5178_v27 = vsel %vm528_vm13, %v5168_v52, %v5170_v40  ;;  %v5014_v48 = vpop.permute.xlu1 %5013  ;;  %v5177_v14 = vsel %vm528_vm13, %v5166_v49, %v5168_v52 }
 0xb22   : > { %5601 = vmatpush1.bf16.msra.mxu1 %v13337_v32  ;;  %v5201_v33 = vsel %vm16398_vm12, %v9947_v11, %v5178_v27  ;;  %v9395_v32 = vld [vmem:[%s15940_s6 + $0xd0] sm:$0xff]  ;;  %v5200_v58 = vsel %vm16401_vm2, %v9948_v5, %v5177_v14  ;;  %vm16404_vm12 = vmmov %vm16400_vm3  ;;  %vm16406_vm2 = vcmask 908288  }
 0xb23   : > { %5602 = vmatprep.subr.bf16.mxu1 %v4888_v29  ;;  %5371 = vperm.xlu1 %9795, %v9393_v56   ;;  %v4891_v30 = vsel %vm16404_vm12, %v13448_v36, %v13425_v23  ;;  %v9398_v36 = vld [vmem:[%s15940_s6 + $0xe8] sm:$0xff]  ;;  %v5028_v54 = vsel %vm16406_vm2, %v13498_v25, %v13477_v4  ;;  %vm16407_vm14 = vmmov %vm16406_vm2 }
 0xb24   : > { %5235 = vrot.lane.b32.xlu0 %v5201_v33, %s16143_s30  ;;  %v5004_v24 = vpop.permute.xlu0 %5003  ;;  %vm16408_vm10 = vmmov %vm16406_vm2 }
 0xb25   : > { %v5018_v51 = vpop.permute.xlu1 %5017  ;;  %5574 = vmatmul.mubr.bf16.gmra.mrb[24].mxu1 %v9860_v8  ;;  %v5027_v40 = vsel %vm16407_vm14, %v5004_v24, %v13498_v25  ;;  %vm16409_vm12 = vmmov %vm16406_vm2 }
 0xb26   : > { %5603 = vmatpush1.bf16.msra.mxu1 %v4887_v38  ;;  %5583 = vmatprep.mubr.bf16.mxu1 %v9861_v3  ;;  %vm16411_vm3 = vmmov %vm16406_vm2 }
 0xb27   : > { %5604 = vmatprep.subr.bf16.mxu1 %v4890_v9  ;;  %5381 = vperm.xlu1 %9795, %v9395_v32   ;;  %vm16412_vm14 = vmmov %vm16406_vm2 }
 0xb28   : > { %5233 = vrot.lane.b32.xlu0 %v5200_v58, %s16143_s30  ;;  %v5012_v34 = vpop.permute.xlu0 %5011 }
 0xb29   : > { %v4886_v26 = vpop.permute.xlu1 %4885  ;;  %v5030_v13 = vsel %vm16408_vm10, %v5012_v34, %v5014_v48  ;;  %vm16413_vm10 = vcmask 916480  }
 0xb2a   : > { %5605 = vmatpush1.bf16.msra.mxu1 %v4889_v21  ;;  %v4894_v2 = vsel %vm16405_vm4, %v13460_v0, %v4886_v26  ;;  %v9400_v0 = vld [vmem:[%s15940_s6 + $0xf8] sm:$0xff]  ;;  %vm16410_vm4 = vmmov %vm16406_vm2  ;;  %v9869_v21 = vld [vmem:[%s15938_s4 + $0x170] ss:$20 sps:$4 sm:$0xff]  }
 0xb2b   : > { %5606 = vmatprep.subr.bf16.mxu1 %v4892_v57  ;;  %5391 = vperm.xlu1 %9795, %v9397_v15   ;;  %v9867_v15 = vld [vmem:[%s15938_s4 + $0x174] ss:$20 sps:$4 sm:$0xff]   ;;  %v9870_v26 = vld [vmem:[%s15938_s4 + $0x19c] ss:$20 sps:$4 sm:$0xff]  }
 0xb2c   : > { %5376 = vperm.xlu0 %9794, %v9394_v7   ;;  %v5010_v60 = vpop.permute.xlu0 %5009  ;;  %v9872_v7 = vld [vmem:[%s15938_s4 + $0x198] ss:$20 sps:$4 sm:$0xff]   ;;  %v9875_v57 = vld [vmem:[%s15938_s4 + $0x1c0] ss:$20 sps:$4 sm:$0xff]  }
 0xb2d   : > { %v5016_v18 = vpop.permute.xlu1 %5015  ;;  %5584 = vmatmul.mubr.bf16.gmra.mrb[28].mxu1 %v9863_v1  ;;  %v5029_v55 = vsel %vm16409_vm12, %v5010_v60, %v5012_v34  ;;  %vm16414_vm12 = vmmov %vm16413_vm10  ;;  %v9864_v34 = vld [vmem:[%s15938_s4 + $0x148] ss:$20 sps:$4 sm:$0xff]   ;;  %v9873_v1 = vld [vmem:[%s15938_s4 + $0x1c4] ss:$20 sps:$4 sm:$0xff]  }
 0xb2e   : > { %5607 = vmatpush1.bf16.msra.mxu1 %v4891_v30  ;;  %5626 = vmatprep.mubr.bf16.mxu1 %v9866_v42  ;;  %v5031_v25 = vsel %vm16411_vm3, %v5016_v18, %v5018_v51  ;;  %v16422_v30 = vmov 0  }
 0xb2f   : > { %5401 = vperm.xlu1 %9795, %v9399_v17   ;;  %5608 = vmatprep.subr.bf16.mxu1 %v4894_v2 }
 0xb30   : > { %5386 = vperm.xlu0 %9794, %v9396_v63   ;;  %v5020_v35 = vpop.permute.xlu0 %5019 }
 0xb31   : > { %v5078_v23 = vpop.permute.xlu1 %5077  ;;  %v5032_v50 = vsel %vm16410_vm4, %v5018_v51, %v5020_v35  ;;  %vm16415_vm4 = vmmov %vm16413_vm10 }
 0xb32   : > { %5609 = vmatpush1.bf16.msra.mxu1 %v4893_v59  ;;  %vm16416_vm3 = vmmov %vm16415_vm4 }
 0xb33   : > { %5610 = vmatprep.subr.bf16.mxu1 %v5028_v54 }
 0xb34   : > { %5396 = vperm.xlu0 %9794, %v9398_v36   ;;  %v5024_v45 = vpop.permute.xlu0 %5023 }
 0xb35   : > { %v5076_v10 = vpop.permute.xlu1 %5075 }
 0xb36   : > { %5611 = vmatpush1.bf16.msra.mxu1 %v5027_v40  ;;  %v5099_v29 = vsel %vm16414_vm12, %v5076_v10, %v5078_v23 }
 0xb37   : > { %5612 = vmatprep.subr.bf16.mxu1 %v5030_v13 }
 0xb38   : > { %5406 = vperm.xlu0 %9794, %v9400_v0   ;;  %v5022_v12 = vpop.permute.xlu0 %5021 }
 0xb39   : > { %v5026_v4 = vpop.permute.xlu1 %5025  ;;  %v5033_v56 = vsel %vm16412_vm14, %v5022_v12, %v5024_v45 }
 0xb3a   : > { %5613 = vmatpush1.bf16.msra.mxu1 %v5029_v55  ;;  %v5034_v62 = vsel %vm16406_vm2, %v5024_v45, %v5026_v4  ;;  %vm16417_vm2 = vmmov %vm16416_vm3 }
 0xb3b   : > { %5614 = vmatprep.subr.bf16.mxu1 %v5032_v50  ;;  %vm16418_vm14 = vmmov %vm16417_vm2 }
 0xb3c   : > { %v5080_v49 = vpop.permute.xlu0 %5079  ;;  %vm16420_vm12 = vmmov %vm16417_vm2 }
 0xb3d   : > { %v5086_v6 = vpop.permute.xlu1 %5085  ;;  %v5100_v48 = vsel %vm16413_vm10, %v5078_v23, %v5080_v49  ;;  %vm16419_vm10 = vmmov %vm16417_vm2  ;;  %v9876_v49 = vld [vmem:[%s15938_s4 + $0x150] ss:$20 sps:$4 sm:$0xff]  }
 0xb3e   : > { %5615 = vmatpush1.bf16.msra.mxu1 %v5031_v25  ;;  %v9877_v25 = vld [vmem:[%s15938_s4 + $0x178] ss:$20 sps:$4 sm:$0xff]  }
 0xb3f   : > { %5616 = vmatprep.subr.bf16.mxu1 %v5034_v62  ;;  %v9879_v62 = vld [vmem:[%s15938_s4 + $0x1c8] ss:$20 sps:$4 sm:$0xff]  }
 0xb40   : > { %v5084_v52 = vpop.permute.xlu0 %5083 }
 0xb41   : > { %v5090_v27 = vpop.permute.xlu1 %5089  ;;  %v5102_v33 = vsel %vm16415_vm4, %v5084_v52, %v5086_v6  ;;  %vm16421_vm4 = vcmask 924672   ;;  %v9878_v6 = vld [vmem:[%s15938_s4 + $0x1a0] ss:$20 sps:$4 sm:$0xff]  }
 0xb42   : > { %5617 = vmatpush1.bf16.msra.mxu1 %v5033_v56 }
 0xb43   : > { %5618 = vmatprep.subr.bf16.mxu1 %v5100_v48 }
 0xb44   : > { %v5082_v8 = vpop.permute.xlu0 %5081 }
 0xb45   : > { %v5088_v11 = vpop.permute.xlu1 %5087  ;;  %v5101_v14 = vsel %vm16416_vm3, %v5082_v8, %v5084_v52  ;;  %vm16423_vm3 = vmmov %vm16421_vm4 }
 0xb46   : > { %5619 = vmatpush1.bf16.msra.mxu1 %v5099_v29  ;;  %v5103_v51 = vsel %vm16418_vm14, %v5088_v11, %v5090_v27 }
 0xb47   : > { %5620 = vmatprep.subr.bf16.mxu1 %v5102_v33 }
 0xb48   : > { %v5092_v3 = vpop.permute.xlu0 %5091 }
 0xb49   : > { %v5104_v24 = vsel %vm16417_vm2, %v5090_v27, %v5092_v3  ;;  %v5098_v32 = vpop.permute.xlu1 %5097  ;;  %vm16424_vm2 = vmmov %vm16423_vm3 }
 0xb4a   : > { %5621 = vmatpush1.bf16.msra.mxu1 %v5101_v14  ;;  %vm16425_vm14 = vmmov %vm16424_vm2 }
 0xb4b   : > { %5622 = vmatprep.subr.bf16.mxu1 %v5104_v24 }
 0xb4c   : > { %v5096_v38 = vpop.permute.xlu0 %5095 }
 0xb4d   : > { %v5106_v9 = vsel %vm16419_vm10, %v5096_v38, %v5098_v32  ;;  %vm16426_vm10 = vmmov %vm16424_vm2 }
 0xb4e   : > { %5623 = vmatpush1.bf16.msra.mxu1 %v5103_v51 }
 0xb4f   : > { %5624 = vmatprep.subr.bf16.mxu1 %v5106_v9 }
 0xb50   : > { %v5094_v5 = vpop.permute.xlu0 %5093 }
 0xb51   : > { %v5105_v58 = vsel %vm16420_vm12, %v5094_v5, %v5096_v38  ;;  %vm16427_vm12 = vmmov %vm16424_vm2 }
 0xb52   : > { %5625 = vmatpush1.bf16.msra.mxu1 %v5105_v58 }
 0xb55   : > { %5627 = vmatmul.mubr.bf16.vlgmr.msra.gmra.mrb[16].mxu1 %v9864_v34 }
 0xb56   : > { %5636 = vmatprep.mubr.bf16.mxu1 %v9867_v15 }
 0xb5d   : > { %5637 = vmatmul.mubr.bf16.gmra.mrb[20].mxu1 %v9869_v21 }
 0xb5e   : > { %5646 = vmatprep.mubr.bf16.mxu1 %v9870_v26 }
 0xb65   : > { %5647 = vmatmul.mubr.bf16.gmra.mrb[24].mxu1 %v9872_v7 }
 0xb66   : > { %5656 = vmatprep.mubr.bf16.mxu1 %v9873_v1 }
 0xb69   : > { %v5220_v42 = vpop.permute.xlu0 %5219 }
 0xb6d   : > { %v5218_v60 = vpop.permute.xlu1 %5217  ;;  %5657 = vmatmul.mubr.bf16.gmra.mrb[28].mxu1 %v9875_v57 }
 0xb6e   : > { %v5240_v17 = vsel %vm16421_vm4, %v5218_v60, %v5220_v42  ;;  %5699 = vmatprep.mubr.bf16.mxu1 %v16422_v30  ;;  %vm16428_vm4 = vmmov %vm16424_vm2 }
 0xb6f   : > { %5667 = vmatprep.subr.bf16.mxu1 %v5240_v17 }
 0xb72   : > { %v5216_v18 = vpop.permute.xlu1 %5215 }
 0xb73   : > { %v5239_v63 = vsel %vm16423_vm3, %v5216_v18, %v5218_v60  ;;  %vm16429_vm3 = vmmov %vm16424_vm2 }
 0xb74   : > { %5668 = vmatpush1.bf16.msra.mxu1 %v5239_v63 }
 0xb79   : > { %v5226_v2 = vpop.permute.xlu1 %5225 }
 0xb7a   : > { %v5224_v35 = vpop.permute.xlu0 %5223 }
 0xb7b   : > { %v5242_v59 = vsel %vm16424_vm2, %v5224_v35, %v5226_v2 }
 0xb7c   : > { %5669 = vmatprep.subr.bf16.mxu1 %v5242_v59 }
 0xb7e   : > { %v5222_v23 = vpop.permute.xlu0 %5221 }
 0xb7f   : > { %v5241_v36 = vsel %vm16425_vm14, %v5222_v23, %v5224_v35 }
 0xb80   : > { %5670 = vmatpush1.bf16.msra.mxu1 %v5241_v36 }
 0xb82   : > { %v5232_v54 = vpop.permute.xlu0 %5231 }
 0xb89   : > { %v5230_v45 = vpop.permute.xlu1 %5229 }
 0xb8a   : > { %v5244_v40 = vsel %vm16426_vm10, %v5230_v45, %v5232_v54 }
 0xb8b   : > { %5671 = vmatprep.subr.bf16.mxu1 %v5244_v40 }
 0xb8d   : > { %v5228_v10 = vpop.permute.xlu1 %5227 }
 0xb8e   : > { %v5243_v0 = vsel %vm16427_vm12, %v5228_v10, %v5230_v45 }
 0xb8f   : > { %5672 = vmatpush1.bf16.msra.mxu1 %v5243_v0 }
 0xb91   : > { %v5238_v13 = vpop.permute.xlu1 %5237 }
 0xb96   : > { %v5236_v12 = vpop.permute.xlu0 %5235 }
 0xb97   : > { %v5246_v55 = vsel %vm16428_vm4, %v5236_v12, %v5238_v13 }
 0xb98   : > { %5673 = vmatprep.subr.bf16.mxu1 %v5246_v55 }
 0xb9a   : > { %v5234_v4 = vpop.permute.xlu0 %5233 }
 0xb9b   : > { %v5245_v50 = vsel %vm16429_vm3, %v5234_v4, %v5236_v12 }
 0xb9c   : > { %5674 = vmatpush1.bf16.msra.mxu1 %v5245_v50 }
 0xb9f   : > { %9421 = vmatmul.mubr.msk.bf16.vlgmr.msra.gmra.mrb[16].mxu1 %vm2346_vm5, %v9876_v49 }
 0xba0   : > { %5709 = vmatprep.mubr.bf16.mxu1 %v16422_v30 }
 0xba2   : > { %v5372_v52 = vpop.permute.xlu1 %5371 }
 0xba6   : > { %v5382_v5 = vpop.permute.xlu1 %5381 }
 0xba7   : > { %9422 = vmatmul.mubr.msk.bf16.gmra.mrb[20].mxu1 %vm2346_vm5, %v9877_v25 }
 0xba8   : > { %5719 = vmatprep.mubr.bf16.mxu1 %v16422_v30 }
 0xbaa   : > { %v5392_v59 = vpop.permute.xlu1 %5391 }
 0xbab   : > { %v5377_v8 = vpop.permute.xlu0 %5376 }
 0xbaf   : > { %9423 = vmatmul.mubr.msk.bf16.gmra.mrb[24].mxu1 %vm2346_vm5, %v9878_v6  ;;  %v5387_v26 = vpop.permute.xlu0 %5386 }
 0xbb0   : > { %5729 = vmatprep.mubr.bf16.mxu1 %v16422_v30 }
 0xbb3   : > { %v5397_v40 = vpop.permute.xlu0 %5396 }
 0xbb7   : > { %9424 = vmatmul.mubr.msk.bf16.gmra.mrb[28].mxu1 %vm2346_vm5, %v9879_v62  ;;  %v5402_v62 = vpop.permute.xlu1 %5401 }
 0xc72   : > { %v5701_v56 = vpop.f32.mrb[16].mxu1 }
 0xc73   : > { %v9533_v27 = vadd.f32 %v5701_v56, %v5372_v52  ;;  %v5703_v48 = vpop.f32.mrb[17].mxu1 }
 0xc74   : > { %v9534_v29 = vadd.f32 %v5703_v48, %v5372_v52  ;;  %v5705_v11 = vpop.f32.mrb[18].mxu1 }
 0xc75   : > { %v9535_v33 = vadd.f32 %v5705_v11, %v5377_v8  ;;  %v5707_v3 = vpop.f32.mrb[19].mxu1  ;;  %v5740_v24 = vmax.f32 %v9533_v27, 0.0 }
 0xc76   : > { %v9536_v14 = vadd.f32 %v5707_v3, %v5377_v8  ;;  %v5741_v38 = vmax.f32 %v9534_v29, 0.0  ;;  %v5407_v8 = vpop.permute.xlu0 %5406 }
 0xc77   : > { %v5742_v32 = vmax.f32 %v9535_v33, 0.0 }
 0xc78   : > { %v5743_v51 = vmax.f32 %v9536_v14, 0.0 }
 0xc79   : > { %v13641_v9 = vpack.c.bf16 %v5742_v32, %v5740_v24 }
 0xc7a   : > { %v13643_v58 = vpack.c.bf16 %v5743_v51, %v5741_v38  ;;  %v5711_v34 = vpop.f32.mrb[20].mxu1 }
 0xc7b   : > { %5764 = vst [vmem:[#allocation2 + $0x8] sm:$0xff] %v13641_v9  ;;  %v9537_v15 = vadd.f32 %v5711_v34, %v5382_v5  ;;  %v5713_v21 = vpop.f32.mrb[21].mxu1  ;;  %5846 = vrot.lane.b32.xlu0 %v13641_v9, %s9974_s19  ;;  %5780 = vrot.lane.b32.xlu1 %v13641_v9, %s9971_s16 }
 0xc7c   : > { %5765 = vst [vmem:[#allocation2 + $0x10] sm:$0xff] %v13643_v58  ;;  %v9538_v7 = vadd.f32 %v5713_v21, %v5382_v5  ;;  %v5715_v1 = vpop.f32.mrb[22].mxu1 }
 0xc7d   : > { %v9539_v57 = vadd.f32 %v5715_v1, %v5387_v26  ;;  %v5717_v42 = vpop.f32.mrb[23].mxu1  ;;  %v5744_v17 = vmax.f32 %v9537_v15, 0.0 }
 0xc7e   : > { %v9540_v60 = vadd.f32 %v5717_v42, %v5387_v26  ;;  %v5745_v63 = vmax.f32 %v9538_v7, 0.0 }
 0xc7f   : > { %v5746_v18 = vmax.f32 %v9539_v57, 0.0  ;;  %6376 = vrot.lane.b32.xlu0 %v13641_v9, %s16045_s18  ;;  %6058 = vrot.lane.b32.xlu1 %v13641_v9, %s16045_s18 }
 0xc80   : > { %v5747_v2 = vmax.f32 %v9540_v60, 0.0 }
 0xc81   : > { %v13655_v35 = vpack.c.bf16 %v5746_v18, %v5744_v17 }
 0xc82   : > { %v13657_v23 = vpack.c.bf16 %v5747_v2, %v5745_v63  ;;  %v5721_v36 = vpop.f32.mrb[24].mxu1  ;;  %v16434_v2 = vld [vmem:[#allocation12_spill] sm:$0xff] }
 0xc83   : > { %5766 = vst [vmem:[#allocation2 + $0x28] sm:$0xff] %v13655_v35  ;;  %v9541_v54 = vadd.f32 %v5721_v36, %v5392_v59  ;;  %v5723_v45 = vpop.f32.mrb[25].mxu1  ;;  %6516 = vrot.lane.b32.xlu0 %v13641_v9, %s9974_s19  ;;  %6210 = vrot.lane.b32.xlu1 %v13641_v9, %s9974_s19  ;;  %vm16435_vm2 = vcmp.ne.s16.totalorder %v16434_v2, 0 }
 0xc84   : > { %5767 = vst [vmem:[#allocation2 + $0x30] sm:$0xff] %v13657_v23  ;;  %v9542_v10 = vadd.f32 %v5723_v45, %v5392_v59  ;;  %v5725_v0 = vpop.f32.mrb[26].mxu1  ;;  %vm16440_vm10 = vmmov %vm16435_vm2 }
 0xc85   : > { %v9543_v13 = vadd.f32 %v5725_v0, %v5397_v40  ;;  %v5727_v12 = vpop.f32.mrb[27].mxu1  ;;  %v5748_v4 = vmax.f32 %v9541_v54, 0.0  ;;  %vm16445_vm3 = vmmov %vm16435_vm2 }
 0xc86   : > { %v9544_v55 = vadd.f32 %v5727_v12, %v5397_v40  ;;  %v5749_v49 = vmax.f32 %v9542_v10, 0.0  ;;  %v16436_v40 = vld [vmem:[#allocation13_spill] sm:$0xff] }
 0xc87   : > { %v5750_v50 = vmax.f32 %v9543_v13, 0.0  ;;  %6060 = vrot.lane.b32.xlu0 %v13643_v58, %s16045_s18  ;;  %5986 = vrot.lane.b32.xlu1 %v13641_v9, %s16043_s22  ;;  %vm16437_vm14 = vcmp.ne.s16.totalorder %v16436_v40, 0 }
 0xc88   : > { %v5751_v25 = vmax.f32 %v9544_v55, 0.0  ;;  %vm16442_vm12 = vmmov %vm16437_vm14 }
 0xc89   : > { %v13669_v6 = vpack.c.bf16 %v5750_v50, %v5748_v4  ;;  %vm16444_vm4 = vmmov %vm16442_vm12 }
 0xc8a   : > { %v13671_v52 = vpack.c.bf16 %v5751_v25, %v5749_v49  ;;  %v5731_v56 = vpop.f32.mrb[28].mxu1 }
 0xc8b   : > { %5768 = vst [vmem:[#allocation2 + $0x48] sm:$0xff] %v13669_v6  ;;  %v9545_v27 = vadd.f32 %v5731_v56, %v5402_v62  ;;  %v5733_v48 = vpop.f32.mrb[29].mxu1  ;;  %6212 = vrot.lane.b32.xlu0 %v13643_v58, %s9974_s19  ;;  %5848 = vrot.lane.b32.xlu1 %v13643_v58, %s9974_s19 }
 0xc8c   : > { %5769 = vst [vmem:[#allocation2 + $0x50] sm:$0xff] %v13671_v52  ;;  %v9546_v29 = vadd.f32 %v5733_v48, %v5402_v62  ;;  %v5735_v11 = vpop.f32.mrb[30].mxu1 }
 0xc8d   : > { %v9547_v33 = vadd.f32 %v5735_v11, %v5407_v8  ;;  %v5737_v3 = vpop.f32.mrb[31].mxu1  ;;  %v5752_v24 = vmax.f32 %v9545_v27, 0.0 }
 0xc8e   : > { %v9548_v14 = vadd.f32 %v5737_v3, %v5407_v8  ;;  %v5753_v38 = vmax.f32 %v9546_v29, 0.0 }
 0xc8f   : > { %v5754_v32 = vmax.f32 %v9547_v33, 0.0  ;;  %5988 = vrot.lane.b32.xlu0 %v13643_v58, %s16043_s22  ;;  %5804 = vrot.lane.b32.xlu1 %v13643_v58, %s16430_s10 }
 0xc90   : > { %v5755_v51 = vmax.f32 %v9548_v14, 0.0 }
 0xc91   : > { %v13683_v5 = vpack.c.bf16 %v5754_v32, %v5752_v24 }
 0xc92   : > { %v13685_v34 = vpack.c.bf16 %v5755_v51, %v5753_v38 }
 0xc93   : > { %5770 = vst [vmem:[#allocation2 + $0x68] sm:$0xff] %v13683_v5  ;;  %6378 = vrot.lane.b32.xlu1 %v13643_v58, %s16045_s18  ;;  %5782 = vrot.lane.b32.xlu0 %v13655_v35, %s9971_s16 }
 0xc94   : > { %5771 = vst [vmem:[#allocation2 + $0x70] sm:$0xff] %v13685_v34 }
 0xc97   : > { %6518 = vrot.lane.b32.xlu1 %v13643_v58, %s9974_s19  ;;  %6064 = vrot.lane.b32.xlu0 %v13655_v35, %s16045_s18 }
 0xc9b   : > { %5852 = vrot.lane.b32.xlu1 %v13655_v35, %s9974_s19  ;;  %6216 = vrot.lane.b32.xlu0 %v13655_v35, %s9974_s19 }
 0xc9f   : > { %6066 = vrot.lane.b32.xlu1 %v13657_v23, %s16045_s18  ;;  %5992 = vrot.lane.b32.xlu0 %v13655_v35, %s16043_s22 }
 0xca3   : > { %6218 = vrot.lane.b32.xlu1 %v13657_v23, %s9974_s19  ;;  %6382 = vrot.lane.b32.xlu0 %v13655_v35, %s16045_s18 }
 0xca7   : > { %5994 = vrot.lane.b32.xlu1 %v13657_v23, %s16043_s22  ;;  %6522 = vrot.lane.b32.xlu0 %v13655_v35, %s9974_s19 }
 0xcab   : > { %6384 = vrot.lane.b32.xlu1 %v13657_v23, %s16045_s18  ;;  %5854 = vrot.lane.b32.xlu0 %v13657_v23, %s9974_s19 }
 0xcaf   : > { %6524 = vrot.lane.b32.xlu1 %v13657_v23, %s9974_s19  ;;  %5806 = vrot.lane.b32.xlu0 %v13657_v23, %s16430_s10 }
 0xcb3   : > { %5858 = vrot.lane.b32.xlu0 %v13669_v6, %s9974_s19  ;;  %5784 = vrot.lane.b32.xlu1 %v13669_v6, %s9971_s16 }
 0xcb7   : > { %5998 = vrot.lane.b32.xlu0 %v13669_v6, %s16043_s22  ;;  %6070 = vrot.lane.b32.xlu1 %v13669_v6, %s16045_s18 }
 0xcbb   : > { %6388 = vrot.lane.b32.xlu0 %v13669_v6, %s16045_s18  ;;  %6222 = vrot.lane.b32.xlu1 %v13669_v6, %s9974_s19 }
 0xcbf   : > { %6072 = vrot.lane.b32.xlu0 %v13671_v52, %s16045_s18  ;;  %5860 = vrot.lane.b32.xlu1 %v13671_v52, %s9974_s19 }
 0xcc3   : > { %6224 = vrot.lane.b32.xlu0 %v13671_v52, %s9974_s19  ;;  %5808 = vrot.lane.b32.xlu1 %v13671_v52, %s16430_s10 }
 0xcc7   : > { %6000 = vrot.lane.b32.xlu1 %v13671_v52, %s16043_s22  ;;  %5786 = vrot.lane.b32.xlu0 %v13683_v5, %s9971_s16 }
 0xccb   : > { %6390 = vrot.lane.b32.xlu1 %v13671_v52, %s16045_s18  ;;  %6076 = vrot.lane.b32.xlu0 %v13683_v5, %s16045_s18 }
 0xccf   : > { %5864 = vrot.lane.b32.xlu1 %v13683_v5, %s9974_s19  ;;  %6228 = vrot.lane.b32.xlu0 %v13683_v5, %s9974_s19 }
 0xcd3   : > { %6078 = vrot.lane.b32.xlu1 %v13685_v34, %s16045_s18  ;;  %6004 = vrot.lane.b32.xlu0 %v13683_v5, %s16043_s22 }
 0xcd7   : > { %6230 = vrot.lane.b32.xlu1 %v13685_v34, %s9974_s19  ;;  %6394 = vrot.lane.b32.xlu0 %v13683_v5, %s16045_s18 }
 0xcdb   : > { %6006 = vrot.lane.b32.xlu1 %v13685_v34, %s16043_s22  ;;  %5866 = vrot.lane.b32.xlu0 %v13685_v34, %s9974_s19 }
 0xcdf   : > { %6396 = vrot.lane.b32.xlu1 %v13685_v34, %s16045_s18  ;;  %5810 = vrot.lane.b32.xlu0 %v13685_v34, %s16430_s10 }
 0xced   : > { %v13769_v15 = vpop.permute.xlu0 %5846  ;;  %v5781_v21 = vpop.permute.xlu1 %5780 }
 0xcee   : > { %5792 = vst.msk [vmem:[#allocation2] sm:$0xff] %vm1046_vm6, %v5781_v21 }
 0xcf1   : > { %v13772_v26 = vpop.permute.xlu0 %6376  ;;  %v13774_v7 = vpop.permute.xlu1 %6058 }
 0xcf5   : > { %v13776_v1 = vpop.permute.xlu0 %6516  ;;  %v13778_v57 = vpop.permute.xlu1 %6210  ;;  %v13803_v12 = vld [vmem:[#allocation2] sm:$0xff] }
 0xcf9   : > { %v6061_v42 = vpop.permute.xlu0 %6060  ;;  %v13780_v60 = vpop.permute.xlu1 %5986 }
 0xcfa   : > { %16431 = vst [vmem:[#allocation27_spill] sm:$0xff] %v13780_v60  ;;  %v6081_v17 = vsel %vm528_vm13, %v13774_v7, %v6061_v42  ;;  %v6102_v63 = vsel %vm518_vm11, %v13643_v58, %v6061_v42 }
 0xcfb   : > { %6128 = vrot.lane.b32.xlu1 %v6102_v63, %s16433_s12  ;;  %v6101_v59 = vsel %vm16435_vm2, %v13641_v9, %v6081_v17 }
 0xcfc   : > { %6126 = vrot.lane.b32.xlu0 %v6101_v59, %s16433_s12 }
 0xcfd   : > { %v13792_v36 = vpop.permute.xlu0 %6212  ;;  %v5849_v54 = vpop.permute.xlu1 %5848 }
 0xcfe   : > { %v5869_v45 = vsel %vm440_vm15, %v13769_v15, %v5849_v54 }
 0xcff   : > { %v5890_v10 = vsel %vm16437_vm14, %v13643_v58, %v5869_v45  ;;  %vm16448_vm14 = vmmov %vm16444_vm4 }
 0xd00   : > { %5916 = vrot.lane.b32.xlu1 %v5890_v10, %s16300_s26 }
 0xd01   : > { %v13800_v0 = vpop.permute.xlu0 %5988  ;;  %v5805_v13 = vpop.permute.xlu1 %5804 }
 0xd02   : > { %16438 = vst [vmem:[#allocation18_spill] sm:$0xff] %v13800_v0  ;;  %5816 = vst.msk [vmem:[#allocation2 + $0x18] sm:$0xff] %vm486_vm7, %v5805_v13 }
 0xd04   : > { %5844 = vrot.lane.b32.xlu1 %v13803_v12, %s9974_s19 }
 0xd05   : > { %v5783_v55 = vpop.permute.xlu0 %5782  ;;  %v13807_v4 = vpop.permute.xlu1 %6378 }
 0xd06   : > { %5793 = vst.msk [vmem:[#allocation2 + $0x20] sm:$0xff] %vm1046_vm6, %v5783_v55 }
 0xd08   : > { %6056 = vrot.lane.b32.xlu1 %v13803_v12, %s16045_s18 }
 0xd09   : > { %v13812_v50 = vpop.permute.xlu0 %6064  ;;  %v13814_v49 = vpop.permute.xlu1 %6518  ;;  %v13816_v25 = vld [vmem:[#allocation2 + $0x18] sm:$0xff] }
 0xd0a   : > { %6380 = vrot.lane.b32.xlu0 %v13816_v25, %s16045_s18 }
 0xd0c   : > { %6208 = vrot.lane.b32.xlu1 %v13803_v12, %s9974_s19 }
 0xd0d   : > { %v13822_v62 = vpop.permute.xlu0 %6216  ;;  %v13824_v56 = vpop.permute.xlu1 %5852  ;;  %v13846_v14 = vld [vmem:[#allocation2 + $0x20] sm:$0xff] }
 0xd0e   : > { %6520 = vrot.lane.b32.xlu0 %v13816_v25, %s9974_s19 }
 0xd10   : > { %5984 = vrot.lane.b32.xlu1 %v13803_v12, %s16043_s22 }
 0xd11   : > { %v13830_v27 = vpop.permute.xlu0 %5992  ;;  %v6067_v48 = vpop.permute.xlu1 %6066 }
 0xd12   : > { %16439 = vst [vmem:[#allocation31_spill] sm:$0xff] %v13830_v27  ;;  %v6083_v8 = vsel %vm528_vm13, %v13812_v50, %v6067_v48  ;;  %v6105_v29 = vsel %vm518_vm11, %v13657_v23, %v6067_v48 }
 0xd13   : > { %v6104_v11 = vsel %vm16440_vm10, %v13655_v35, %v6083_v8  ;;  %vm16449_vm10 = vcmp.ne.s16.totalorder %v10197_v61, 0 }
 0xd14   : > { %6134 = vrot.lane.b32.xlu1 %v6105_v29, %s16433_s12  ;;  %6132 = vrot.lane.b32.xlu0 %v6104_v11, %s16433_s12 }
 0xd15   : > { %v13842_v33 = vpop.permute.xlu0 %6382  ;;  %v13844_v3 = vpop.permute.xlu1 %6218 }
 0xd18   : > { %5850 = vrot.lane.b32.xlu0 %v13846_v14, %s9974_s19 }
 0xd19   : > { %v13850_v24 = vpop.permute.xlu0 %6522  ;;  %v13852_v32 = vpop.permute.xlu1 %5994 }
 0xd1a   : > { %16441 = vst [vmem:[#allocation21_spill] sm:$0xff] %v13852_v32 }
 0xd1c   : > { %6062 = vrot.lane.b32.xlu0 %v13846_v14, %s16045_s18 }
 0xd1d   : > { %v5855_v38 = vpop.permute.xlu0 %5854  ;;  %v13856_v51 = vpop.permute.xlu1 %6384 }
 0xd1e   : > { %v5871_v21 = vsel %vm440_vm15, %v13824_v56, %v5855_v38 }
 0xd1f   : > { %v5893_v42 = vsel %vm16442_vm12, %v13657_v23, %v5871_v21  ;;  %vm16450_vm12 = vcmp.ne.s16.totalorder %v10155_v39, 0 }
 0xd20   : > { %5922 = vrot.lane.b32.xlu1 %v5893_v42, %s16300_s26  ;;  %6214 = vrot.lane.b32.xlu0 %v13846_v14, %s9974_s19 }
 0xd21   : > { %v5807_v17 = vpop.permute.xlu0 %5806  ;;  %v13866_v63 = vpop.permute.xlu1 %6524 }
 0xd22   : > { %5817 = vst.msk [vmem:[#allocation2 + $0x38] sm:$0xff] %vm486_vm7, %v5807_v17 }
 0xd24   : > { %5990 = vrot.lane.b32.xlu1 %v13846_v14, %s16043_s22 }
 0xd25   : > { %v13871_v59 = vpop.permute.xlu0 %5858  ;;  %v5785_v54 = vpop.permute.xlu1 %5784 }
 0xd26   : > { %5794 = vst.msk [vmem:[#allocation2 + $0x40] sm:$0xff] %vm1046_vm6, %v5785_v54 }
 0xd29   : > { %v13874_v45 = vpop.permute.xlu0 %5998  ;;  %v13876_v10 = vpop.permute.xlu1 %6070  ;;  %v13878_v13 = vld [vmem:[#allocation2 + $0x38] sm:$0xff] }
 0xd2a   : > { %16443 = vst [vmem:[#allocation25_spill] sm:$0xff] %v13874_v45  ;;  %6386 = vrot.lane.b32.xlu0 %v13878_v13, %s16045_s18 }
 0xd2d   : > { %v13882_v55 = vpop.permute.xlu0 %6388  ;;  %v13884_v48 = vpop.permute.xlu1 %6222 }
 0xd31   : > { %v6073_v8 = vpop.permute.xlu0 %6072  ;;  %v5861_v29 = vpop.permute.xlu1 %5860 }
 0xd32   : > { %v5873_v11 = vsel %vm440_vm15, %v13871_v59, %v5861_v29  ;;  %v6108_v38 = vsel %vm518_vm11, %v13671_v52, %v6073_v8  ;;  %v6085_v42 = vsel %vm528_vm13, %v13876_v10, %v6073_v8  ;;  %v13901_v29 = vld [vmem:[#allocation2 + $0x40] sm:$0xff] }
 0xd33   : > { %6140 = vrot.lane.b32.xlu1 %v6108_v38, %s16433_s12  ;;  %v5896_v21 = vsel %vm16444_vm4, %v13671_v52, %v5873_v11  ;;  %v6107_v38 = vsel %vm16445_vm3, %v13669_v6, %v6085_v42  ;;  %vm16454_vm4 = vcmp.ne.s16.totalorder %v10274_v28, 0  ;;  %vm16455_vm3 = vcmp.ne.s16.totalorder %v10151_v37, 0 }
 0xd34   : > { %5928 = vrot.lane.b32.xlu0 %v5896_v21, %s16300_s26 }
 0xd35   : > { %v13898_v17 = vpop.permute.xlu0 %6224  ;;  %v5809_v54 = vpop.permute.xlu1 %5808 }
 0xd36   : > { %5818 = vst.msk [vmem:[#allocation2 + $0x58] sm:$0xff] %vm486_vm7, %v5809_v54 }
 0xd37   : > { %5856 = vrot.lane.b32.xlu1 %v13901_v29, %s9974_s19 }
 0xd38   : > { %6138 = vrot.lane.b32.xlu0 %v6107_v38, %s16433_s12 }
 0xd39   : > { %v5787_v11 = vpop.permute.xlu0 %5786  ;;  %v13909_v8 = vpop.permute.xlu1 %6000 }
 0xd3a   : > { %16446 = vst [vmem:[#allocation32_spill] sm:$0xff] %v13909_v8  ;;  %5795 = vst.msk [vmem:[#allocation2 + $0x60] sm:$0xff] %vm1046_vm6, %v5787_v11 }
 0xd3b   : > { %6068 = vrot.lane.b32.xlu1 %v13901_v29, %s16045_s18 }
 0xd3d   : > { %v13914_v21 = vpop.permute.xlu0 %6076  ;;  %v13916_v54 = vpop.permute.xlu1 %6390  ;;  %v13918_v30 = vld [vmem:[#allocation2 + $0x58] sm:$0xff] }
 0xd3e   : > { %6392 = vrot.lane.b32.xlu0 %v13918_v30, %s16045_s18 }
 0xd3f   : > { %6220 = vrot.lane.b32.xlu1 %v13901_v29, %s9974_s19 }
 0xd41   : > { %v13924_v42 = vpop.permute.xlu0 %6228  ;;  %v13926_v38 = vpop.permute.xlu1 %5864  ;;  %v13928_v11 = vld [vmem:[#allocation2 + $0x60] sm:$0xff] }
 0xd42   : > { %5862 = vrot.lane.b32.xlu0 %v13928_v11, %s9974_s19 }
 0xd43   : > { %5996 = vrot.lane.b32.xlu1 %v13901_v29, %s16043_s22 }
 0xd45   : > { %v13934_v20 = vpop.permute.xlu0 %6004  ;;  %v6079_v47 = vpop.permute.xlu1 %6078 }
 0xd46   : > { %16447 = vst [vmem:[#allocation26_spill] sm:$0xff] %v13934_v20  ;;  %v6087_v31 = vsel %vm528_vm13, %v13914_v21, %v6079_v47  ;;  %6526 = vrot.lane.b32.xlu0 %v13878_v13, %s9974_s19 }
 0xd47   : > { %v6110_v8 = vsel %vm16435_vm2, %v13683_v5, %v6087_v31  ;;  %v6233_v31 = vsel %vm440_vm15, %v13778_v57, %v13792_v36  ;;  %vm16456_vm2 = vcmp.ne.s16.totalorder %v10161_v44, 0 }
 0xd49   : > { %v13940_v45 = vpop.permute.xlu0 %6394 }
 0xd4a   : > { %6144 = vrot.lane.b32.xlu0 %v6110_v8, %s16433_s12 }
 0xd4d   : > { %v5867_v27 = vpop.permute.xlu0 %5866 }
 0xd4e   : > { %v5875_v32 = vsel %vm440_vm15, %v13926_v38, %v5867_v27  ;;  %6528 = vrot.lane.b32.xlu0 %v13669_v6, %s9974_s19  ;;  %v6111_v27 = vsel %vm518_vm11, %v13685_v34, %v6079_v47  ;;  %v13977_v47 = vpop.permute.xlu1 %6230 }
 0xd4f   : > { %v5899_v20 = vsel %vm16448_vm14, %v13685_v34, %v5875_v32  ;;  %vm16458_vm14 = vmmov %vm16454_vm4 }
 0xd50   : > { %5934 = vrot.lane.b32.xlu1 %v5899_v20, %s16300_s26  ;;  %v6253_v20 = vsel %vm16449_vm10, %v13643_v58, %v6233_v31  ;;  %vm16459_vm10 = vmmov %vm16455_vm3 }
 0xd51   : > { %v5811_v60 = vpop.permute.xlu0 %5810 }
 0xd52   : > { %5819 = vst.msk [vmem:[#allocation2 + $0x78] sm:$0xff] %vm486_vm7, %v5811_v60  ;;  %6532 = vrot.lane.b32.xlu0 %v13918_v30, %s9974_s19  ;;  %v6254_v60 = vsel %vm16450_vm12, %v13816_v25, %v13792_v36  ;;  %v13987_v8 = vpop.permute.xlu1 %6006  ;;  %vm16465_vm12 = vmmov %vm16454_vm4 }
 0xd53   : > { %16451 = vst [vmem:[#allocation17_spill] sm:$0xff] %v13987_v8 }
 0xd54   : > { %6146 = vrot.lane.b32.xlu1 %v6111_v27, %s16433_s12 }
 0xd56   : > { %6278 = vrot.lane.b32.xlu0 %v6253_v20, %s16314_s27  ;;  %v13995_v36 = vpop.permute.xlu1 %6396 }
 0xd58   : > { %6530 = vrot.lane.b32.xlu1 %v13671_v52, %s9974_s19 }
 0xd59   : > { %v13983_v32 = vld [vmem:[#allocation2 + $0x78] sm:$0xff] }
 0xd5a   : > { %6534 = vrot.lane.b32.xlu0 %v13683_v5, %s9974_s19 }
 0xd5c   : > { %6280 = vrot.lane.b32.xlu1 %v6254_v60, %s16314_s27 }
 0xd5e   : > { %6074 = vrot.lane.b32.xlu0 %v13928_v11, %s16045_s18 }
 0xd60   : > { %6536 = vrot.lane.b32.xlu1 %v13685_v34, %s9974_s19 }
 0xd62   : > { %6398 = vrot.lane.b32.xlu0 %v13983_v32, %s16045_s18 }
 0xd64   : > { %6226 = vrot.lane.b32.xlu1 %v13928_v11, %s9974_s19 }
 0xd66   : > { %6538 = vrot.lane.b32.xlu0 %v13983_v32, %s9974_s19 }
 0xd68   : > { %6002 = vrot.lane.b32.xlu1 %v13928_v11, %s16043_s22 }
 0xd6d   : > { %v13997_v31 = vpop.permute.xlu1 %6128 }
 0xd6e   : > { %16452 = vst [vmem:[#allocation28_spill] sm:$0xff] %v13997_v31  ;;  %v14004_v40 = vpop.permute.xlu0 %6126 }
 0xd6f   : > { %16453 = vst [vmem:[#allocation19_spill] sm:$0xff] %v14004_v40 }
 0xd72   : > { %v13999_v27 = vpop.permute.xlu1 %5916 }
 0xd76   : > { %v5845_v20 = vpop.permute.xlu1 %5844 }
 0xd77   : > { %v5888_v60 = vsel %vm428_vm0, %v13803_v12, %v5845_v20  ;;  %v5868_v2 = vsel %vm440_vm15, %v5845_v20, %v13769_v15 }
 0xd78   : > { %5912 = vrot.lane.b32.xlu0 %v5888_v60, %s16300_s26  ;;  %v5889_v31 = vsel %vm16454_vm4, %v13641_v9, %v5868_v2  ;;  %vm16466_vm4 = vmmov %vm16455_vm3 }
 0xd7a   : > { %v6057_v18 = vpop.permute.xlu1 %6056 }
 0xd7b   : > { %v6080_v8 = vsel %vm528_vm13, %v6057_v18, %v13774_v7 }
 0xd7c   : > { %v14014_v0 = vpop.permute.xlu0 %6380  ;;  %5914 = vrot.lane.b32.xlu0 %v5889_v31, %s16300_s26  ;;  %v6100_v40 = vsel %vm16455_vm3, %v13803_v12, %v6080_v8  ;;  %vm16467_vm3 = vcmp.ne.s16.totalorder %v10155_v39, 0 }
 0xd7d   : > { %6124 = vrot.lane.b32.xlu1 %v6100_v40, %s16433_s12 }
 0xd7e   : > { %v6209_v15 = vpop.permute.xlu1 %6208 }
 0xd7f   : > { %v6232_v20 = vsel %vm440_vm15, %v6209_v15, %v13778_v57 }
 0xd80   : > { %v6252_v7 = vsel %vm16456_vm2, %v13641_v9, %v6232_v20  ;;  %v14027_v18 = vpop.permute.xlu0 %6520  ;;  %vm16468_vm2 = vmmov %vm16465_vm12 }
 0xd81   : > { %6276 = vrot.lane.b32.xlu1 %v6252_v7, %s16314_s27 }
 0xd82   : > { %v14046_v7 = vpop.permute.xlu1 %5984 }
 0xd83   : > { %16460 = vst [vmem:[#allocation20_spill] sm:$0xff] %v14046_v7 }
 0xd86   : > { %v14029_v2 = vpop.permute.xlu0 %6132 }
 0xd87   : > { %16457 = vst [vmem:[#allocation29_spill] sm:$0xff] %v14029_v2 }
 0xd8a   : > { %v5851_v31 = vpop.permute.xlu0 %5850 }
 0xd8b   : > { %v5891_v8 = vsel %vm428_vm0, %v13846_v14, %v5851_v31  ;;  %v5870_v40 = vsel %vm440_vm15, %v5851_v31, %v13824_v56  ;;  %v14049_v56 = vpop.permute.xlu1 %6134 }
 0xd8c   : > { %5918 = vrot.lane.b32.xlu0 %v5891_v8, %s16300_s26  ;;  %v5892_v15 = vsel %vm16458_vm14, %v13655_v35, %v5870_v40  ;;  %16461 = vst [vmem:[#allocation22_spill] sm:$0xff] %v14049_v56  ;;  %vm16469_vm14 = vcmp.ne.s16.totalorder %v10197_v61, 0 }
 0xd8e   : > { %v6063_v57 = vpop.permute.xlu0 %6062 }
 0xd8f   : > { %v6082_v60 = vsel %vm528_vm13, %v6063_v57, %v13812_v50 }
 0xd90   : > { %5920 = vrot.lane.b32.xlu0 %v5892_v15, %s16300_s26  ;;  %v6103_v20 = vsel %vm16459_vm10, %v13846_v14, %v6082_v60  ;;  %vm16470_vm10 = vmmov %vm16469_vm14 }
 0xd91   : > { %6130 = vrot.lane.b32.xlu1 %v6103_v20, %s16433_s12 }
 0xd92   : > { %v14051_v31 = vpop.permute.xlu1 %5922  ;;  %v6215_v8 = vpop.permute.xlu0 %6214 }
 0xd96   : > { %v14053_v50 = vpop.permute.xlu1 %5990 }
 0xd97   : > { %16462 = vst [vmem:[#allocation24_spill] sm:$0xff] %v14053_v50 }
 0xd9c   : > { %v6387_v57 = vpop.permute.xlu0 %6386 }
 0xda5   : > { %v14055_v2 = vpop.permute.xlu1 %6140 }
 0xda6   : > { %16463 = vst [vmem:[#allocation30_spill] sm:$0xff] %v14055_v2  ;;  %v14057_v40 = vpop.permute.xlu0 %5928 }
 0xda7   : > { %16464 = vst [vmem:[#allocation23_spill] sm:$0xff] %v14057_v40 }
 0xda9   : > { %v5857_v15 = vpop.permute.xlu1 %5856 }
 0xdaa   : > { %v5894_v60 = vsel %vm428_vm0, %v13901_v29, %v5857_v15  ;;  %v5872_v20 = vsel %vm440_vm15, %v5857_v15, %v13871_v59  ;;  %v14065_v56 = vpop.permute.xlu0 %6138 }
 0xdab   : > { %5924 = vrot.lane.b32.xlu1 %v5894_v60, %s16300_s26  ;;  %v5895_v50 = vsel %vm16465_vm12, %v13669_v6, %v5872_v20  ;;  %vm16471_vm12 = vcmp.ne.s16.totalorder %v10161_v44, 0 }
 0xdad   : > { %v6069_v7 = vpop.permute.xlu1 %6068 }
 0xdae   : > { %v6084_v2 = vsel %vm528_vm13, %v6069_v7, %v13876_v10  ;;  %v6257_v10 = vsel %vm16467_vm3, %v13878_v13, %v13844_v3 }
 0xdaf   : > { %5926 = vrot.lane.b32.xlu1 %v5895_v50, %s16300_s26  ;;  %v6106_v59 = vsel %vm16466_vm4, %v13901_v29, %v6084_v2  ;;  %v6237_v2 = vsel %vm440_vm15, %v13884_v48, %v13898_v17  ;;  %vm16472_vm4 = vmmov %vm16471_vm12 }
 0xdb0   : > { %v14073_v40 = vpop.permute.xlu0 %6392 }
 0xdb1   : > { %v6221_v7 = vpop.permute.xlu1 %6220 }
 0xdb3   : > { %6136 = vrot.lane.b32.xlu1 %v6106_v59, %s16433_s12  ;;  %v6235_v59 = vsel %vm440_vm15, %v13822_v62, %v13844_v3  ;;  %v6234_v3 = vsel %vm440_vm15, %v6215_v8, %v13822_v62  ;;  %v6263_v62 = vsel %vm16467_vm3, %v13983_v32, %v13977_v47  ;;  %v6400_v8 = vsel %vm528_vm13, %v13772_v26, %v13807_v4 }
 0xdb4   : > { %v5863_v15 = vpop.permute.xlu0 %5862 }
 0xdb5   : > { %v5897_v60 = vsel %vm428_vm0, %v13928_v11, %v5863_v15  ;;  %v5874_v20 = vsel %vm440_vm15, %v5863_v15, %v13926_v38  ;;  %v6259_v15 = vsel %vm16469_vm14, %v13671_v52, %v6237_v2  ;;  %vm16474_vm14 = vcmp.ne.s16.totalorder %v10256_v19, 0 }
 0xdb6   : > { %5930 = vrot.lane.b32.xlu0 %v5897_v60, %s16300_s26  ;;  %v5898_v38 = vsel %vm16468_vm2, %v13683_v5, %v5874_v20  ;;  %v6236_v60 = vsel %vm440_vm15, %v6221_v7, %v13884_v48  ;;  %v6256_v20 = vsel %vm16470_vm10, %v13657_v23, %v6235_v59  ;;  %v6255_v7 = vsel %vm16472_vm4, %v13655_v35, %v6234_v3  ;;  %v14136_v59 = vpop.permute.xlu1 %5996  ;;  %vm16473_vm2 = vmmov %vm16467_vm3 }
 0xdb7   : > { %6286 = vrot.lane.b32.xlu1 %v6257_v10, %s16314_s27  ;;  %v6258_v2 = vsel %vm16471_vm12, %v13669_v6, %v6236_v60  ;;  %v6239_v60 = vsel %vm440_vm15, %v13924_v42, %v13977_v47  ;;  %v6401_v47 = vsel %vm528_vm13, %v13807_v4, %v14014_v0  ;;  %vm16475_vm12 = vcmp.ne.s16.totalorder %v10163_v46, 0 }
 0xdb8   : > { %v14093_v50 = vpop.permute.xlu0 %6526  ;;  %vm16476_vm4 = vcmp.ne.s16.totalorder %v10157_v41, 0  ;;  %v6402_v0 = vsel %vm528_vm13, %v13842_v33, %v13856_v51 }
 0xdb9   : > { %vm16477_vm3 = vmmov %vm16476_vm4 }
 0xdba   : > { %5932 = vrot.lane.b32.xlu0 %v5898_v38, %s16300_s26 }
 0xdbb   : > { %6290 = vrot.lane.b32.xlu1 %v6259_v15, %s16314_s27  ;;  %v6260_v15 = vsel %vm16473_vm2, %v13918_v30, %v13898_v17  ;;  %v6262_v17 = vsel %vm16470_vm10, %v13685_v34, %v6239_v60  ;;  %vm16478_vm2 = vmmov %vm16474_vm14 }
 0xdbc   : > { %v14108_v10 = vpop.permute.xlu0 %6144  ;;  %vm16480_vm10 = vmmov %vm16475_vm12 }
 0xdbe   : > { %6284 = vrot.lane.b32.xlu0 %v6256_v20, %s16314_s27  ;;  %v6421_v20 = vsel %vm16474_vm14, %v13641_v9, %v6400_v8  ;;  %vm16479_vm14 = vcmp.ne.s16.totalorder %v10151_v37, 0 }
 0xdbf   : > { %6288 = vrot.lane.b32.xlu1 %v6258_v2, %s16314_s27 }
 0xdc0   : > { %v14120_v48 = vpop.permute.xlu0 %6528 }
 0xdc2   : > { %6282 = vrot.lane.b32.xlu0 %v6255_v7, %s16314_s27  ;;  %v14152_v2 = vpop.permute.xlu1 %5934  ;;  %v6420_v7 = vsel %vm16475_vm12, %v13803_v12, %v13772_v26  ;;  %vm16481_vm12 = vmmov %vm16478_vm2 }
 0xdc3   : > { %6298 = vrot.lane.b32.xlu1 %v6263_v62, %s16314_s27  ;;  %v6403_v62 = vsel %vm528_vm13, %v13856_v51, %v6387_v57  ;;  %v6424_v57 = vsel %vm16478_vm2, %v13655_v35, %v6402_v0  ;;  %v6406_v0 = vsel %vm528_vm13, %v13940_v45, %v13995_v36 }
 0xdc4   : > { %v14134_v38 = vpop.permute.xlu0 %6532  ;;  %v6425_v26 = vsel %vm16477_vm3, %v13657_v23, %v6403_v62 }
 0xdc6   : > { %6292 = vrot.lane.b32.xlu0 %v6260_v15, %s16314_s27  ;;  %v6422_v15 = vsel %vm16476_vm4, %v13643_v58, %v6401_v47  ;;  %v14180_v12 = vpop.permute.xlu1 %6146  ;;  %v6405_v47 = vsel %vm528_vm13, %v13916_v54, %v14073_v40  ;;  %vm16482_vm4 = vmmov %vm16477_vm3 }
 0xdc7   : > { %6446 = vrot.lane.b32.xlu1 %v6421_v20, %s16209_s9  ;;  %vm16483_vm3 = vmmov %vm16480_vm10 }
 0xdc8   : > { %v14150_v3 = vpop.permute.xlu0 %6278  ;;  %v6426_v40 = vsel %vm16483_vm3, %v13901_v29, %v13882_v55 }
 0xdca   : > { %6296 = vrot.lane.b32.xlu0 %v6262_v17, %s16314_s27  ;;  %v14191_v60 = vpop.permute.xlu1 %6530  ;;  %v6423_v17 = vsel %vm16480_vm10, %v13846_v14, %v13842_v33  ;;  %v6428_v33 = vsel %vm16482_vm4, %v13671_v52, %v6405_v47  ;;  %vm16485_vm10 = vcmp.ne.s16.totalorder %v10159_v43, 0  ;;  %vm16487_vm4 = vcmp.ne.s16.totalorder %v10261_v22, 0 }
 0xdcb   : > { %6444 = vrot.lane.b32.xlu1 %v6420_v7, %s16209_s9 }
 0xdcc   : > { %v14168_v8 = vpop.permute.xlu0 %6534 }
 0xdce   : > { %6448 = vrot.lane.b32.xlu0 %v6422_v15, %s16209_s9  ;;  %v14210_v7 = vpop.permute.xlu1 %6280 }
 0xdcf   : > { %6454 = vrot.lane.b32.xlu1 %v6425_v26, %s16209_s9 }
 0xdd0   : > { %v6075_v4 = vpop.permute.xlu0 %6074 }
 0xdd1   : > { %v6086_v51 = vsel %vm528_vm13, %v6075_v4, %v13914_v21  ;;  %v6404_v21 = vsel %vm528_vm13, %v13882_v55, %v13916_v54  ;;  %v9882_v54 = vld [vmem:[%s15938_s4 + $0x1e4] ss:$20 sps:$4 sm:$0xff]  }
 0xdd2   : > { %6452 = vrot.lane.b32.xlu0 %v6424_v57, %s16209_s9  ;;  %v6109_v20 = vsel %vm16479_vm14, %v13928_v11, %v6086_v51  ;;  %v6427_v62 = vsel %vm16481_vm12, %v13669_v6, %v6404_v21  ;;  %v14222_v15 = vpop.permute.xlu1 %6536  ;;  %7134 = vmatprep.mubr.bf16.mxu0 %v9882_v54  ;;  %v6430_v57 = vsel %vm16478_vm2, %v13683_v5, %v6406_v0  ;;  %vm16484_vm14 = vcmp.ne.s16.totalorder %v10161_v44, 0  ;;  %vm16486_vm12 = vmmov %vm16483_vm3 }
 0xdd3   : > { %6732 = vrot.lane.b32.xlu1 %v13816_v25, %s16045_s18  ;;  %vm16488_vm3 = vmmov %vm16485_vm10  ;;  %vm16489_vm2 = vcmp.ne.s16.totalorder %v10176_v53, 0  ;;  %v6542_v54 = vsel %vm440_vm15, %v13850_v24, %v13866_v63 }
 0xdd4   : > { %v6399_v14 = vpop.permute.xlu0 %6398 }
 0xdd6   : > { %6730 = vrot.lane.b32.xlu0 %v13643_v58, %s16045_s18  ;;  %v6227_v4 = vpop.permute.xlu1 %6226 }
 0xdd7   : > { %6142 = vrot.lane.b32.xlu1 %v6109_v20, %s16433_s12  ;;  %v6238_v55 = vsel %vm440_vm15, %v6227_v4, %v13924_v42  ;;  %v6407_v4 = vsel %vm528_vm13, %v13995_v36, %v6399_v14  ;;  %v6545_v36 = vsel %vm440_vm15, %v14191_v60, %v14134_v38 }
 0xdd8   : > { %v14238_v26 = vpop.permute.xlu0 %6538  ;;  %v6261_v51 = vsel %vm16484_vm14, %v13683_v5, %v6238_v55  ;;  %vm16490_vm14 = vmmov %vm16487_vm4 }
 0xdda   : > { %6450 = vrot.lane.b32.xlu0 %v6423_v17, %s16209_s9  ;;  %v6541_v17 = vsel %vm440_vm15, %v13814_v49, %v14027_v18  ;;  %v6429_v18 = vsel %vm16486_vm12, %v13928_v11, %v13940_v45  ;;  %v6544_v11 = vsel %vm440_vm15, %v14120_v48, %v14191_v60  ;;  %vm16492_vm12 = vcmp.ne.s16.totalorder %v10157_v41, 0  ;;  %v14334_v14 = vpop.permute.xlu1 %6002 }
 0xddb   : > { %6728 = vrot.lane.b32.xlu1 %v13641_v9, %s16045_s18  ;;  %v6562_v47 = vsel %vm16485_vm10, %v13816_v25, %v6541_v17  ;;  %v6567_v0 = vsel %vm16490_vm14, %v13671_v52, %v6544_v11  ;;  %vm16491_vm10 = vmmov %vm16487_vm4  ;;  %v6547_v60 = vsel %vm440_vm15, %v14222_v15, %v14238_v26  ;;  %v14378_v26 = vld [vmem:[#allocation2 + $0x30] sm:$0xff] }
 0xddc   : > { %vm16496_vm14 = vmmov %vm16491_vm10 }
 0xdde   : > { %6458 = vrot.lane.b32.xlu0 %v6427_v62, %s16209_s9 }
 0xddf   : > { %6460 = vrot.lane.b32.xlu1 %v6428_v33, %s16209_s9  ;;  %v6543_v33 = vsel %vm440_vm15, %v13866_v63, %v14093_v50  ;;  %v6560_v50 = vsel %vm16489_vm2, %v13641_v9, %v13776_v1 }
 0xde2   : > { %6736 = vrot.lane.b32.xlu0 %v13657_v23, %s16045_s18 }
 0xde3   : > { %6738 = vrot.lane.b32.xlu1 %v13878_v13, %s16045_s18 }
 0xde6   : > { %6456 = vrot.lane.b32.xlu0 %v6426_v40, %s16209_s9 }
 0xde7   : > { %6734 = vrot.lane.b32.xlu1 %v13655_v35, %s16045_s18 }
 0xdea   : > { %v5913_v29 = vpop.permute.xlu0 %5912  ;;  %6464 = vrot.lane.b32.xlu0 %v6430_v57, %s16209_s9 }
 0xdeb   : > { %6744 = vrot.lane.b32.xlu1 %v13918_v30, %s16045_s18 }
 0xdee   : > { %v5915_v20 = vpop.permute.xlu0 %5914  ;;  %6294 = vrot.lane.b32.xlu0 %v6261_v51, %s16314_s27 }
 0xdef   : > { %6740 = vrot.lane.b32.xlu1 %v13669_v6, %s16045_s18  ;;  %v5937_v42 = vsel %vm461_vm8, %v5915_v20, %v13999_v27  ;;  %v5936_v21 = vsel %vm461_vm8, %v5913_v29, %v5915_v20  ;;  %v6540_v27 = vsel %vm440_vm15, %v13776_v1, %v13814_v49  ;;  %v6565_v49 = vsel %vm16488_vm3, %v13878_v13, %v6543_v33  ;;  %vm16494_vm3 = vmmov %vm16489_vm2  ;;  %v14346_v38 = vpop.permute.xlu1 %6124 }
 0xdf0   : > { %7102 = vmatprep.subr.bf16.mxu0 %v5937_v42  ;;  %v6561_v62 = vsel %vm16487_vm4, %v13643_v58, %v6540_v27  ;;  %v6564_v1 = vsel %vm16491_vm10, %v13657_v23, %v6542_v54  ;;  %vm16493_vm4 = vmmov %vm16489_vm2  ;;  %vm16495_vm2 = vcmp.ne.s16.totalorder %v10159_v43, 0  ;;  %v14386_v42 = vld [vmem:[#allocation2 + $0x28] sm:$0xff] }
 0xdf1   : > { %7103 = vmatpush1.bf16.msra.mxu0 %v5936_v21  ;;  %v6563_v63 = vsel %vm16493_vm4, %v13655_v35, %v13850_v24  ;;  %v6568_v55 = vsel %vm16495_vm2, %v13918_v30, %v6545_v36  ;;  %v6546_v35 = vsel %vm440_vm15, %v14168_v8, %v14222_v15  ;;  %v14344_v24 = vld [vmem:[#allocation2 + $0x10] sm:$0xff]  ;;  %vm16497_vm10 = vmmov %vm16494_vm3  ;;  %v14390_v21 = vld [vmem:[#allocation2 + $0x48] sm:$0xff] }
 0xdf2   : > { %6742 = vrot.lane.b32.xlu0 %v13671_v52, %s16045_s18  ;;  %v6431_v52 = vsel %vm16492_vm12, %v13685_v34, %v6407_v4  ;;  %v6569_v51 = vsel %vm16497_vm10, %v13683_v5, %v14168_v8  ;;  %vm16498_vm12 = vmmov %vm16495_vm2  ;;  %v16501_v4 = vld [vmem:[#allocation27_spill] sm:$0xff] }
 0xdf3   : > { %6588 = vrot.lane.b32.xlu1 %v6562_v47, %s16220_s13  ;;  %v14361_v29 = vpop.permute.xlu1 %6276  ;;  %v6571_v20 = vsel %vm16498_vm12, %v13983_v32, %v6547_v60  ;;  %v16499_v47 = vld [vmem:[#allocation23_spill] sm:$0xff]  ;;  %v16506_v60 = vld [vmem:[#allocation32_spill] sm:$0xff] }
 0xdf6   : > { %6462 = vrot.lane.b32.xlu0 %v6429_v18, %s16209_s9 }
 0xdf7   : > { %6750 = vrot.lane.b32.xlu1 %v13983_v32, %s16045_s18 }
 0xdfa   : > { %6586 = vrot.lane.b32.xlu0 %v6561_v62, %s16220_s13 }
 0xdfb   : > { %6746 = vrot.lane.b32.xlu1 %v13683_v5, %s16045_s18  ;;  %v14382_v5 = vld [vmem:[#allocation2 + $0x50] sm:$0xff] }
 0xdfe   : > { %v5919_v45 = vpop.permute.xlu0 %5918  ;;  %6748 = vrot.lane.b32.xlu0 %v13685_v34, %s16045_s18 }
 0xdff   : > { %6594 = vrot.lane.b32.xlu1 %v6565_v49, %s16220_s13 }
 0xe02   : > { %v5921_v40 = vpop.permute.xlu0 %5920  ;;  %6584 = vrot.lane.b32.xlu0 %v6560_v50, %s16220_s13  ;;  %v14407_v50 = vld [vmem:[#allocation2 + $0x68] sm:$0xff] }
 0xe03   : > { %6598 = vrot.lane.b32.xlu1 %v6567_v0, %s16220_s13  ;;  %v5939_v57 = vsel %vm461_vm8, %v5921_v40, %v14051_v31  ;;  %v5938_v9 = vsel %vm461_vm8, %v5919_v45, %v5921_v40  ;;  %v6566_v31 = vsel %vm16494_vm3, %v13669_v6, %v14120_v48  ;;  %v6570_v6 = vsel %vm16496_vm14, %v13685_v34, %v6546_v35  ;;  %v14354_v48 = vld [vmem:[#allocation2 + $0x8] sm:$0xff]  ;;  %v14372_v17 = vpop.permute.xlu1 %6130  ;;  %v16500_v0 = vld [vmem:[#allocation18_spill] sm:$0xff]  ;;  %v16505_v35 = vld [vmem:[#allocation24_spill] sm:$0xff] }
 0xe04   : > { %7104 = vmatprep.subr.bf16.mxu0 %v5939_v57  ;;  %v6009_v57 = vsel %vm486_vm7, %v16501_v4, %v16500_v0  ;;  %v16510_v0 = vld [vmem:[#allocation28_spill] sm:$0xff]  ;;  %vm16518_vm3 = vcmask 1039360  }
 0xe05   : > { %7105 = vmatpush1.bf16.msra.mxu0 %v5938_v9  ;;  %vm16521_vm14 = vmmov %vm16518_vm3 }
 0xe06   : > { %6592 = vrot.lane.b32.xlu0 %v6564_v1, %s16220_s13  ;;  %v16502_v1 = vld [vmem:[#allocation20_spill] sm:$0xff]  ;;  %vm16522_vm10 = vmmov %vm16518_vm3 }
 0xe07   : > { %6466 = vrot.lane.b32.xlu1 %v6431_v52, %s16209_s9  ;;  %v16503_v52 = vld [vmem:[#allocation21_spill] sm:$0xff]  ;;  %vm16523_vm12 = vmmov %vm16518_vm3 }
 0xe0a   : > { %6590 = vrot.lane.b32.xlu0 %v6563_v63, %s16220_s13  ;;  %v16504_v63 = vld [vmem:[#allocation31_spill] sm:$0xff] }
 0xe0b   : > { %6596 = vrot.lane.b32.xlu1 %v6566_v31, %s16220_s13  ;;  %v6011_v36 = vsel %vm486_vm7, %v16504_v63, %v16503_v52  ;;  %v16512_v52 = vld [vmem:[#allocation22_spill] sm:$0xff] }
 0xe0e   : > { %6600 = vrot.lane.b32.xlu0 %v6568_v55, %s16220_s13 }
 0xe0f   : > { %6658 = vrot.lane.b32.xlu1 %v14344_v24, %s16125_s28 }
 0xe12   : > { %6604 = vrot.lane.b32.xlu0 %v6570_v6, %s16220_s13  ;;  %v6010_v6 = vsel %vm486_vm7, %v16505_v35, %v16504_v63  ;;  %v16513_v63 = vld [vmem:[#allocation29_spill] sm:$0xff] }
 0xe13   : > { %6656 = vrot.lane.b32.xlu1 %v14354_v48, %s16125_s28 }
 0xe16   : > { %6602 = vrot.lane.b32.xlu0 %v6569_v51, %s16220_s13  ;;  %v16507_v51 = vld [vmem:[#allocation25_spill] sm:$0xff] }
 0xe17   : > { %6606 = vrot.lane.b32.xlu1 %v6571_v20, %s16220_s13  ;;  %v6013_v20 = vsel %vm486_vm7, %v16507_v51, %v16506_v60 }
 0xe1a   : > { %6660 = vrot.lane.b32.xlu0 %v13816_v25, %s16125_s28 }
 0xe1b   : > { %6666 = vrot.lane.b32.xlu1 %v13878_v13, %s16125_s28 }
 0xe1d   : > { %v5925_v15 = vpop.permute.xlu1 %5924 }
 0xe1e   : > { %6664 = vrot.lane.b32.xlu0 %v14378_v26, %s16125_s28 }
 0xe1f   : > { %6670 = vrot.lane.b32.xlu1 %v14382_v5, %s16125_s28 }
 0xe21   : > { %v5927_v8 = vpop.permute.xlu1 %5926 }
 0xe22   : > { %6662 = vrot.lane.b32.xlu0 %v14386_v42, %s16125_s28  ;;  %v5941_v18 = vsel %vm461_vm8, %v5927_v8, %v16499_v47  ;;  %v5940_v27 = vsel %vm461_vm8, %v5925_v15, %v5927_v8  ;;  %v6012_v47 = vsel %vm486_vm7, %v14136_v59, %v16507_v51 }
 0xe23   : > { %6668 = vrot.lane.b32.xlu1 %v14390_v21, %s16125_s28  ;;  %7106 = vmatprep.subr.bf16.mxu0 %v5941_v18  ;;  %v16508_v18 = vld [vmem:[#allocation17_spill] sm:$0xff] }
 0xe24   : > { %7107 = vmatpush1.bf16.msra.mxu0 %v5940_v27  ;;  %v16509_v27 = vld [vmem:[#allocation26_spill] sm:$0xff] }
 0xe25   : > { %v6137_v62 = vpop.permute.xlu1 %6136 }
 0xe26   : > { %6672 = vrot.lane.b32.xlu0 %v13918_v30, %s16125_s28 }
 0xe27   : > { %6678 = vrot.lane.b32.xlu1 %v13983_v32, %s16125_s28 }
 0xe28   : > { %v5931_v33 = vpop.permute.xlu0 %5930 }
 0xe29   : > { %v14401_v45 = vpop.permute.xlu1 %6286 }
 0xe2a   : > { %6676 = vrot.lane.b32.xlu0 %v13685_v34, %s16125_s28 }
 0xe2c   : > { %v5933_v49 = vpop.permute.xlu0 %5932 }
 0xe2d   : > { %v14405_v11 = vpop.permute.xlu1 %6290  ;;  %v5943_v54 = vsel %vm461_vm8, %v5933_v49, %v14152_v2  ;;  %v5942_v40 = vsel %vm461_vm8, %v5931_v33, %v5933_v49  ;;  %v6008_v2 = vsel %vm486_vm7, %v16502_v1, %v16501_v4  ;;  %v6015_v33 = vsel %vm486_vm7, %v16509_v27, %v16508_v18  ;;  %v16511_v4 = vld [vmem:[#allocation19_spill] sm:$0xff] }
 0xe2e   : > { %6674 = vrot.lane.b32.xlu0 %v14407_v50, %s16125_s28  ;;  %7108 = vmatprep.subr.bf16.mxu0 %v5943_v54 }
 0xe2f   : > { %7109 = vmatpush1.bf16.msra.mxu0 %v5942_v40  ;;  %v6014_v40 = vsel %vm486_vm7, %v14334_v14, %v16509_v27 }
 0xe30   : > { %v14417_v34 = vpop.permute.xlu0 %6284  ;;  %7110 = vmatprep.subr.bf16.mxu0 %v6009_v57  ;;  %v6149_v57 = vsel %vm366_vm1, %v16511_v4, %v16510_v0 }
 0xe31   : > { %v14419_v9 = vpop.permute.xlu1 %6288 }
 0xe33   : > { %7111 = vmatpush1.bf16.msra.mxu0 %v6008_v2  ;;  %v6148_v2 = vsel %vm366_vm1, %v14346_v38, %v16511_v4  ;;  %v16515_v38 = vld [vmem:[#allocation30_spill] sm:$0xff] }
 0xe34   : > { %v6283_v31 = vpop.permute.xlu0 %6282  ;;  %7112 = vmatprep.subr.bf16.mxu0 %v6011_v36  ;;  %v6151_v36 = vsel %vm366_vm1, %v16513_v63, %v16512_v52 }
 0xe35   : > { %v14427_v55 = vpop.permute.xlu1 %6298 }
 0xe37   : > { %7113 = vmatpush1.bf16.msra.mxu0 %v6010_v6  ;;  %v6150_v6 = vsel %vm366_vm1, %v14372_v17, %v16513_v63  ;;  %v16516_v17 = vld [vmem:[#allocation16_spill] sm:$0xff] }
 0xe38   : > { %v6293_v15 = vpop.permute.xlu0 %6292  ;;  %7114 = vmatprep.subr.bf16.mxu0 %v6013_v20  ;;  %v6153_v20 = vsel %vm366_vm1, %v14065_v56, %v16515_v38  ;;  %vm16517_vm4 = vcmp.ne.s16.totalorder %v16516_v17, 0 }
 0xe39   : > { %v14435_v8 = vpop.permute.xlu1 %6446 }
 0xe3b   : > { %7115 = vmatpush1.bf16.msra.mxu0 %v6012_v47 }
 0xe3c   : > { %v14443_v49 = vpop.permute.xlu0 %6296  ;;  %7116 = vmatprep.subr.bf16.mxu0 %v6015_v33  ;;  %v6152_v33 = vsel %vm366_vm1, %v6137_v62, %v14065_v56  ;;  %v9949_v62 = vld [vmem:[#allocation2 + $0x8] sm:$0xff] }
 0xe3d   : > { %v14445_v54 = vpop.permute.xlu1 %6444 }
 0xe3f   : > { %7117 = vmatpush1.bf16.msra.mxu0 %v6014_v40 }
 0xe40   : > { %v14453_v59 = vpop.permute.xlu0 %6448  ;;  %7118 = vmatprep.subr.bf16.mxu0 %v6149_v57 }
 0xe41   : > { %v14455_v1 = vpop.permute.xlu1 %6454 }
 0xe43   : > { %7119 = vmatpush1.bf16.msra.mxu0 %v6148_v2  ;;  %v16519_v2 = vld [vmem:[#allocation14_spill] sm:$0xff] }
 0xe44   : > { %v14463_v14 = vpop.permute.xlu0 %6452  ;;  %7120 = vmatprep.subr.bf16.mxu0 %v6151_v36  ;;  %vm16520_vm2 = vcmp.ne.s16.totalorder %v16519_v2, 0 }
 0xe45   : > { %v6733_v35 = vpop.permute.xlu1 %6732 }
 0xe46   : > { %v6774_v51 = vsel %vm755_vm9, %v13816_v25, %v6733_v35  ;;  %v6155_v25 = vsel %vm366_vm1, %v14108_v10, %v14180_v12 }
 0xe47   : > { %7121 = vmatpush1.bf16.msra.mxu0 %v6150_v6  ;;  %6800 = vrot.lane.b32.xlu0 %v6774_v51, %s16143_s30  ;;  %v6302_v6 = vsel %vm16523_vm12, %v6283_v31, %v14417_v34 }
 0xe48   : > { %v6731_v47 = vpop.permute.xlu0 %6730  ;;  %7122 = vmatprep.subr.bf16.mxu0 %v6153_v20  ;;  %v9950_v20 = vld [vmem:[#allocation2 + $0x28] sm:$0xff] }
 0xe49   : > { %v6753_v18 = vsel %vm528_vm13, %v6731_v47, %v6733_v35  ;;  %v6143_v27 = vpop.permute.xlu1 %6142 }
 0xe4a   : > { %v6773_v40 = vsel %vm16517_vm4, %v13643_v58, %v6753_v18  ;;  %v6154_v57 = vsel %vm366_vm1, %v6143_v27, %v14108_v10  ;;  %v6301_v58 = vsel %vm16518_vm3, %v14150_v3, %v14210_v7  ;;  %v6300_v10 = vsel %vm16521_vm14, %v14361_v29, %v14150_v3  ;;  %vm16524_vm4 = vmmov %vm16518_vm3 }
 0xe4b   : > { %7123 = vmatpush1.bf16.msra.mxu0 %v6152_v33  ;;  %6798 = vrot.lane.b32.xlu1 %v6773_v40, %s16143_s30  ;;  %v6303_v7 = vsel %vm16522_vm10, %v14417_v34, %v14401_v45  ;;  %v6305_v3 = vsel %vm16524_vm4, %v14405_v11, %v6293_v15  ;;  %vm16525_vm3 = vcmp.ne.s16.totalorder %v16516_v17, 0  ;;  %vm16528_vm10 = vcmp.ne.s16.totalorder %v16519_v2, 0  ;;  %v9880_v33 = vld [vmem:[%s15938_s4 + $0x1e0] ss:$20 sps:$4 sm:$0xff]  }
 0xe4c   : > { %v14485_v0 = vpop.permute.xlu0 %6450  ;;  %7124 = vmatprep.subr.bf16.mxu0 %v6155_v25  ;;  %v9883_v40 = vld [vmem:[%s15938_s4 + $0x20c] ss:$20 sps:$4 sm:$0xff]  }
 0xe4d   : > { %v6729_v4 = vpop.permute.xlu1 %6728 }
 0xe4e   : > { %v6752_v56 = vsel %vm528_vm13, %v6729_v4, %v6731_v47 }
 0xe4f   : > { %7125 = vmatpush1.bf16.msra.mxu0 %v6154_v57  ;;  %v6772_v52 = vsel %vm16520_vm2, %v9949_v62, %v6752_v56  ;;  %vm16526_vm2 = vmmov %vm16524_vm4  ;;  %v9885_v62 = vld [vmem:[%s15938_s4 + $0x208] ss:$20 sps:$4 sm:$0xff]  }
 0xe50   : > { %v14495_v63 = vpop.permute.xlu0 %6458  ;;  %7126 = vmatprep.subr.bf16.mxu0 %v6301_v58  ;;  %6796 = vrot.lane.b32.xlu1 %v6772_v52, %s16143_s30  ;;  %vm16527_vm14 = vmmov %vm16526_vm2 }
 0xe51   : > { %v14498_v12 = vpop.permute.xlu1 %6460  ;;  %v6307_v15 = vsel %vm16527_vm14, %v14443_v49, %v14427_v55  ;;  %vm16529_vm12 = vmmov %vm16526_vm2 }
 0xe52   : > { %vm16530_vm4 = vmmov %vm16525_vm3 }
 0xe53   : > { %7127 = vmatpush1.bf16.msra.mxu0 %v6300_v10  ;;  %v9886_v10 = vld [vmem:[%s15938_s4 + $0x234] ss:$20 sps:$4 sm:$0xff]   ;;  %vm16533_vm14 = vmmov %vm16530_vm4 }
 0xe54   : > { %v6737_v36 = vpop.permute.xlu0 %6736  ;;  %7128 = vmatprep.subr.bf16.mxu0 %v6303_v7 }
 0xe55   : > { %v6739_v35 = vpop.permute.xlu1 %6738 }
 0xe56   : > { %v6755_v51 = vsel %vm528_vm13, %v6737_v36, %v6739_v35  ;;  %v6777_v38 = vsel %vm755_vm9, %v13878_v13, %v6739_v35  ;;  %v6304_v13 = vsel %vm16526_vm2, %v14419_v9, %v14405_v11  ;;  %vm16532_vm2 = vcmask 7168  }
 0xe57   : > { %7129 = vmatpush1.bf16.msra.mxu0 %v6302_v6  ;;  %6806 = vrot.lane.b32.xlu1 %v6777_v38, %s16143_s30  ;;  %v6776_v29 = vsel %vm16525_vm3, %v13657_v23, %v6755_v51  ;;  %vm16531_vm3 = vmmov %vm16528_vm10  ;;  %v9953_v38 = vld [vmem:[#allocation2 + $0x70] sm:$0xff] }
 0xe58   : > { %v14518_v45 = vpop.permute.xlu0 %6456  ;;  %7130 = vmatprep.subr.bf16.mxu0 %v6305_v3  ;;  %6804 = vrot.lane.b32.xlu0 %v6776_v29, %s16143_s30  ;;  %v9889_v29 = vld [vmem:[%s15938_s4 + $0x25c] ss:$20 sps:$4 sm:$0xff]  }
 0xe59   : > { %v6735_v34 = vpop.permute.xlu1 %6734 }
 0xe5a   : > { %v6754_v31 = vsel %vm528_vm13, %v6735_v34, %v6737_v36  ;;  %v6331_v36 = vld [vmem:[#allocation2 + $0x70] sm:$0xff] }
 0xe5b   : > { %7131 = vmatpush1.bf16.msra.mxu0 %v6304_v13  ;;  %v6775_v23 = vsel %vm16528_vm10, %v9950_v20, %v6754_v31  ;;  %vm16534_vm10 = vmmov %vm16532_vm2  ;;  %v9954_v20 = vld [vmem:[#allocation2 + $0x68] sm:$0xff] }
 0xe5c   : > { %v14530_v47 = vpop.permute.xlu0 %6464  ;;  %7132 = vmatprep.subr.bf16.mxu0 %v6307_v15  ;;  %6802 = vrot.lane.b32.xlu0 %v6775_v23, %s16143_s30 }
 0xe5d   : > { %v6745_v18 = vpop.permute.xlu1 %6744 }
 0xe5e   : > { %v6780_v11 = vsel %vm755_vm9, %v13918_v30, %v6745_v18 }
 0xe60   : > { %v6295_v9 = vpop.permute.xlu0 %6294  ;;  %6812 = vrot.lane.b32.xlu0 %v6780_v11, %s16143_s30 }
 0xe61   : > { %v6306_v55 = vsel %vm16529_vm12, %v6295_v9, %v14443_v49  ;;  %v6741_v27 = vpop.permute.xlu1 %6740  ;;  %v9951_v49 = vld [vmem:[#allocation2 + $0x50] sm:$0xff]  ;;  %vm16535_vm12 = vmmov %vm16532_vm2  ;;  %v9891_v9 = vld [vmem:[%s15938_s4 + $0x258] ss:$20 sps:$4 sm:$0xff]  }
 0xe62   : > { %7133 = vmatpush1.bf16.msra.mxu0 %v6306_v55  ;;  %v6471_v15 = vsel %vm16535_vm12, %v14463_v14, %v14455_v1  ;;  %v9450_v1 = vld [vmem:[%s15940_s6 + $0x108] sm:$0xff]  ;;  %v6473_v55 = vsel %vm16532_vm2, %v14495_v63, %v14498_v12  ;;  %v9452_v12 = vld [vmem:[%s15940_s6 + $0x118] sm:$0xff]  ;;  %vm16540_vm12 = vmmov %vm16532_vm2 }
 0xe63   : > { %7175 = vmatprep.subr.bf16.mxu0 %v14344_v24 }
 0xe64   : > { %v6743_v25 = vpop.permute.xlu0 %6742 }
 0xe65   : > { %v6757_v30 = vsel %vm528_vm13, %v6743_v25, %v6745_v18  ;;  %v14547_v4 = vpop.permute.xlu1 %6588  ;;  %7135 = vmatmul.mubr.bf16.vlgmr.msra.gmra.mrb[32].mxu0 %v9880_v33  ;;  %v6756_v56 = vsel %vm528_vm13, %v6741_v27, %v6743_v25  ;;  %v9894_v27 = vld [vmem:[%s15938_s4 + $0x1ec] ss:$20 sps:$4 sm:$0xff]  }
 0xe66   : > { %7176 = vmatpush1.bf16.msra.mxu0 %v14354_v48  ;;  %v6779_v57 = vsel %vm16530_vm4, %v9951_v49, %v6757_v30  ;;  %7144 = vmatprep.mubr.bf16.mxu0 %v9883_v40  ;;  %v9952_v48 = vld [vmem:[#allocation2 + $0x48] sm:$0xff]  ;;  %vm16536_vm4 = vmmov %vm16531_vm3 }
 0xe67   : > { %7177 = vmatprep.subr.bf16.mxu0 %v14378_v26  ;;  %6810 = vrot.lane.b32.xlu1 %v6779_v57, %s16143_s30  ;;  %v6778_v52 = vsel %vm16531_vm3, %v9952_v48, %v6756_v56  ;;  %vm16537_vm3 = vmmov %vm16532_vm2 }
 0xe68   : > { %v14555_v24 = vpop.permute.xlu0 %6462 }
 0xe69   : > { %v6751_v58 = vpop.permute.xlu1 %6750  ;;  %v6474_v49 = vsel %vm16540_vm12, %v14555_v24, %v14530_v47 }
 0xe6a   : > { %7178 = vmatpush1.bf16.msra.mxu0 %v14386_v42  ;;  %v6783_v42 = vsel %vm755_vm9, %v13983_v32, %v6751_v58  ;;  %v6469_v32 = vsel %vm16532_vm2, %v14435_v8, %v14453_v59  ;;  %v6468_v59 = vsel %vm16534_vm10, %v14445_v54, %v14435_v8  ;;  %v9453_v8 = vld [vmem:[%s15940_s6 + $0x120] sm:$0xff]  ;;  %v6470_v54 = vsel %vm16537_vm3, %v14485_v0, %v14463_v14  ;;  %v9455_v0 = vld [vmem:[%s15940_s6 + $0x130] sm:$0xff]  ;;  %vm16539_vm10 = vmmov %vm16532_vm2 }
 0xe6b   : > { %7179 = vmatprep.subr.bf16.mxu0 %v14382_v5  ;;  %6808 = vrot.lane.b32.xlu1 %v6778_v52, %s16143_s30  ;;  %v9449_v5 = vld [vmem:[%s15940_s6 + $0x100] sm:$0xff] }
 0xe6c   : > { %v14568_v26 = vpop.permute.xlu0 %6586 }
 0xe6d   : > { %v6747_v7 = vpop.permute.xlu1 %6746  ;;  %7145 = vmatmul.mubr.bf16.gmra.mrb[36].mxu0 %v9885_v62 }
 0xe6e   : > { %7180 = vmatpush1.bf16.msra.mxu0 %v14390_v21  ;;  %7154 = vmatprep.mubr.bf16.mxu0 %v9886_v10  ;;  %v9888_v21 = vld [vmem:[%s15938_s4 + $0x230] ss:$20 sps:$4 sm:$0xff]  }
 0xe6f   : > { %7181 = vmatprep.subr.bf16.mxu0 %v6331_v36  ;;  %6818 = vrot.lane.b32.xlu1 %v6783_v42, %s16143_s30 }
 0xe70   : > { %v6749_v35 = vpop.permute.xlu0 %6748 }
 0xe71   : > { %v6759_v6 = vsel %vm528_vm13, %v6749_v35, %v6751_v58  ;;  %v6595_v51 = vpop.permute.xlu1 %6594  ;;  %v6758_v34 = vsel %vm528_vm13, %v6747_v7, %v6749_v35 }
 0xe72   : > { %7182 = vmatpush1.bf16.msra.mxu0 %v14407_v50  ;;  %v6782_v3 = vsel %vm16533_vm14, %v9953_v38, %v6759_v6  ;;  %v9451_v50 = vld [vmem:[%s15940_s6 + $0x110] sm:$0xff]  ;;  %v6781_v23 = vsel %vm16536_vm4, %v9954_v20, %v6758_v34  ;;  %vm16538_vm14 = vmmov %vm16532_vm2  ;;  %vm16541_vm4 = vcmask 908288  }
 0xe73   : > { %7183 = vmatprep.subr.bf16.mxu0 %v6469_v32  ;;  %6952 = vperm.xlu1 %9795, %v9449_v5   ;;  %v6472_v33 = vsel %vm16538_vm14, %v14518_v45, %v14495_v63  ;;  %v9454_v45 = vld [vmem:[%s15940_s6 + $0x128] sm:$0xff]  ;;  %v6609_v57 = vsel %vm16541_vm4, %v14568_v26, %v14547_v4  ;;  %vm16542_vm3 = vmmov %vm16541_vm4 }
 0xe74   : > { %6816 = vrot.lane.b32.xlu0 %v6782_v3, %s16143_s30  ;;  %v6585_v13 = vpop.permute.xlu0 %6584  ;;  %vm16543_vm2 = vmmov %vm16542_vm3 }
 0xe75   : > { %v6599_v31 = vpop.permute.xlu1 %6598  ;;  %7155 = vmatmul.mubr.bf16.gmra.mrb[40].mxu0 %v9888_v21  ;;  %v6608_v58 = vsel %vm16542_vm3, %v6585_v13, %v14568_v26  ;;  %vm16544_vm14 = vmmov %vm16543_vm2 }
 0xe76   : > { %7184 = vmatpush1.bf16.msra.mxu0 %v6468_v59  ;;  %7164 = vmatprep.mubr.bf16.mxu0 %v9889_v29  ;;  %vm16546_vm12 = vmmov %vm16543_vm2 }
 0xe77   : > { %7185 = vmatprep.subr.bf16.mxu0 %v6471_v15  ;;  %6962 = vperm.xlu1 %9795, %v9451_v50   ;;  %vm16547_vm4 = vmmov %vm16543_vm2 }
 0xe78   : > { %6814 = vrot.lane.b32.xlu0 %v6781_v23, %s16143_s30  ;;  %v6593_v18 = vpop.permute.xlu0 %6592  ;;  %vm16548_vm3 = vmmov %vm16543_vm2 }
 0xe79   : > { %v6467_v11 = vpop.permute.xlu1 %6466  ;;  %v6611_v24 = vsel %vm16543_vm2, %v6593_v18, %v6595_v51 }
 0xe7a   : > { %7186 = vmatpush1.bf16.msra.mxu0 %v6470_v54  ;;  %v6475_v25 = vsel %vm16539_vm10, %v14530_v47, %v6467_v11  ;;  %v9456_v47 = vld [vmem:[%s15940_s6 + $0x138] sm:$0xff]  ;;  %vm16545_vm10 = vmmov %vm16543_vm2  ;;  %vm16549_vm2 = vcmask 916480   ;;  %v9897_v54 = vld [vmem:[%s15938_s4 + $0x210] ss:$20 sps:$4 sm:$0xff]  }
 0xe7b   : > { %7187 = vmatprep.subr.bf16.mxu0 %v6473_v55  ;;  %6972 = vperm.xlu1 %9795, %v9453_v8   ;;  %v9895_v8 = vld [vmem:[%s15938_s4 + $0x214] ss:$20 sps:$4 sm:$0xff]   ;;  %v9898_v11 = vld [vmem:[%s15938_s4 + $0x23c] ss:$20 sps:$4 sm:$0xff]  }
 0xe7c   : > { %6957 = vperm.xlu0 %9794, %v9450_v1   ;;  %v6591_v14 = vpop.permute.xlu0 %6590  ;;  %v9900_v1 = vld [vmem:[%s15938_s4 + $0x238] ss:$20 sps:$4 sm:$0xff]   ;;  %v9903_v55 = vld [vmem:[%s15938_s4 + $0x260] ss:$20 sps:$4 sm:$0xff]  }
 0xe7d   : > { %v6597_v40 = vpop.permute.xlu1 %6596  ;;  %7165 = vmatmul.mubr.bf16.gmra.mrb[44].mxu0 %v9891_v9  ;;  %v6610_v52 = vsel %vm16544_vm14, %v6591_v14, %v6593_v18  ;;  %vm16550_vm14 = vmmov %vm16549_vm2  ;;  %v9892_v18 = vld [vmem:[%s15938_s4 + $0x1e8] ss:$20 sps:$4 sm:$0xff]   ;;  %v9901_v9 = vld [vmem:[%s15938_s4 + $0x264] ss:$20 sps:$4 sm:$0xff]  }
 0xe7e   : > { %7188 = vmatpush1.bf16.msra.mxu0 %v6472_v33  ;;  %7207 = vmatprep.mubr.bf16.mxu0 %v9894_v27  ;;  %v6612_v26 = vsel %vm16546_vm12, %v6597_v40, %v6599_v31  ;;  %vm16552_vm12 = vmmov %vm16549_vm2  ;;  %v16557_v33 = vmov 0  }
 0xe7f   : > { %6982 = vperm.xlu1 %9795, %v9455_v0   ;;  %7189 = vmatprep.subr.bf16.mxu0 %v6475_v25 }
 0xe80   : > { %6967 = vperm.xlu0 %9794, %v9452_v12   ;;  %v6601_v30 = vpop.permute.xlu0 %6600 }
 0xe81   : > { %v6659_v63 = vpop.permute.xlu1 %6658  ;;  %v6613_v10 = vsel %vm16545_vm10, %v6599_v31, %v6601_v30  ;;  %vm16551_vm10 = vmmov %vm16549_vm2 }
 0xe82   : > { %7190 = vmatpush1.bf16.msra.mxu0 %v6474_v49 }
 0xe83   : > { %7191 = vmatprep.subr.bf16.mxu0 %v6609_v57 }
 0xe84   : > { %6977 = vperm.xlu0 %9794, %v9454_v45   ;;  %v6605_v56 = vpop.permute.xlu0 %6604 }
 0xe85   : > { %v6657_v62 = vpop.permute.xlu1 %6656 }
 0xe86   : > { %7192 = vmatpush1.bf16.msra.mxu0 %v6608_v58  ;;  %v6680_v32 = vsel %vm16550_vm14, %v6657_v62, %v6659_v63  ;;  %vm16555_vm14 = vmmov %vm16549_vm2 }
 0xe87   : > { %7193 = vmatprep.subr.bf16.mxu0 %v6611_v24 }
 0xe88   : > { %6987 = vperm.xlu0 %9794, %v9456_v47   ;;  %v6603_v48 = vpop.permute.xlu0 %6602 }
 0xe89   : > { %v6607_v4 = vpop.permute.xlu1 %6606  ;;  %v6614_v5 = vsel %vm16548_vm3, %v6603_v48, %v6605_v56  ;;  %vm16554_vm3 = vmmov %vm16549_vm2 }
 0xe8a   : > { %7194 = vmatpush1.bf16.msra.mxu0 %v6610_v52  ;;  %v6615_v42 = vsel %vm16547_vm4, %v6605_v56, %v6607_v4  ;;  %vm16553_vm4 = vmmov %vm16549_vm2 }
 0xe8b   : > { %7195 = vmatprep.subr.bf16.mxu0 %v6613_v10 }
 0xe8c   : > { %v6661_v7 = vpop.permute.xlu0 %6660 }
 0xe8d   : > { %v6667_v36 = vpop.permute.xlu1 %6666  ;;  %v6681_v51 = vsel %vm16549_vm2, %v6659_v63, %v6661_v7  ;;  %v9904_v7 = vld [vmem:[%s15938_s4 + $0x1f0] ss:$20 sps:$4 sm:$0xff]  }
 0xe8e   : > { %7196 = vmatpush1.bf16.msra.mxu0 %v6612_v26  ;;  %v9905_v26 = vld [vmem:[%s15938_s4 + $0x218] ss:$20 sps:$4 sm:$0xff]  }
 0xe8f   : > { %7197 = vmatprep.subr.bf16.mxu0 %v6615_v42  ;;  %v9907_v42 = vld [vmem:[%s15938_s4 + $0x268] ss:$20 sps:$4 sm:$0xff]  }
 0xe90   : > { %v6665_v35 = vpop.permute.xlu0 %6664 }
 0xe91   : > { %v6671_v6 = vpop.permute.xlu1 %6670  ;;  %v6683_v3 = vsel %vm16551_vm10, %v6665_v35, %v6667_v36  ;;  %vm16556_vm10 = vcmask 924672   ;;  %v9906_v36 = vld [vmem:[%s15938_s4 + $0x240] ss:$20 sps:$4 sm:$0xff]  }
 0xe92   : > { %7198 = vmatpush1.bf16.msra.mxu0 %v6614_v5 }
 0xe93   : > { %7199 = vmatprep.subr.bf16.mxu0 %v6681_v51 }
 0xe94   : > { %v6663_v21 = vpop.permute.xlu0 %6662 }
 0xe95   : > { %v6669_v38 = vpop.permute.xlu1 %6668  ;;  %v6682_v34 = vsel %vm16552_vm12, %v6663_v21, %v6665_v35  ;;  %vm16558_vm12 = vmmov %vm16556_vm10 }
 0xe96   : > { %7200 = vmatpush1.bf16.msra.mxu0 %v6680_v32  ;;  %v6684_v31 = vsel %vm16554_vm3, %v6669_v38, %v6671_v6 }
 0xe97   : > { %7201 = vmatprep.subr.bf16.mxu0 %v6683_v3 }
 0xe98   : > { %v6673_v29 = vpop.permute.xlu0 %6672 }
 0xe99   : > { %v6685_v13 = vsel %vm16553_vm4, %v6671_v6, %v6673_v29  ;;  %v6679_v50 = vpop.permute.xlu1 %6678  ;;  %vm16559_vm4 = vmmov %vm16556_vm10 }
 0xe9a   : > { %7202 = vmatpush1.bf16.msra.mxu0 %v6682_v34  ;;  %vm16560_vm3 = vmmov %vm16559_vm4 }
 0xe9b   : > { %7203 = vmatprep.subr.bf16.mxu0 %v6685_v13 }
 0xe9c   : > { %v6677_v59 = vpop.permute.xlu0 %6676 }
 0xe9d   : > { %v6687_v15 = vsel %vm16549_vm2, %v6677_v59, %v6679_v50  ;;  %vm16561_vm2 = vmmov %vm16560_vm3 }
 0xe9e   : > { %7204 = vmatpush1.bf16.msra.mxu0 %v6684_v31 }
 0xe9f   : > { %7205 = vmatprep.subr.bf16.mxu0 %v6687_v15 }
 0xea0   : > { %v6675_v20 = vpop.permute.xlu0 %6674 }
 0xea1   : > { %v6686_v23 = vsel %vm16555_vm14, %v6675_v20, %v6677_v59  ;;  %vm16562_vm14 = vmmov %vm16561_vm2 }
 0xea2   : > { %7206 = vmatpush1.bf16.msra.mxu0 %v6686_v23 }
 0xea5   : > { %7208 = vmatmul.mubr.bf16.vlgmr.msra.gmra.mrb[32].mxu0 %v9892_v18 }
 0xea6   : > { %7217 = vmatprep.mubr.bf16.mxu0 %v9895_v8 }
 0xead   : > { %7218 = vmatmul.mubr.bf16.gmra.mrb[36].mxu0 %v9897_v54 }
 0xeae   : > { %7227 = vmatprep.mubr.bf16.mxu0 %v9898_v11 }
 0xeb5   : > { %7228 = vmatmul.mubr.bf16.gmra.mrb[40].mxu0 %v9900_v1 }
 0xeb6   : > { %7237 = vmatprep.mubr.bf16.mxu0 %v9901_v9 }
 0xeb9   : > { %v6801_v27 = vpop.permute.xlu0 %6800 }
 0xebd   : > { %v6799_v14 = vpop.permute.xlu1 %6798  ;;  %7238 = vmatmul.mubr.bf16.gmra.mrb[44].mxu0 %v9903_v55 }
 0xebe   : > { %v6821_v0 = vsel %vm16556_vm10, %v6799_v14, %v6801_v27  ;;  %7280 = vmatprep.mubr.bf16.mxu0 %v16557_v33  ;;  %vm16563_vm10 = vmmov %vm16561_vm2 }
 0xebf   : > { %7248 = vmatprep.subr.bf16.mxu0 %v6821_v0 }
 0xec2   : > { %v6797_v40 = vpop.permute.xlu1 %6796 }
 0xec3   : > { %v6820_v12 = vsel %vm16558_vm12, %v6797_v40, %v6799_v14  ;;  %vm16564_vm12 = vmmov %vm16561_vm2 }
 0xec4   : > { %7249 = vmatpush1.bf16.msra.mxu0 %v6820_v12 }
 0xec9   : > { %v6807_v25 = vpop.permute.xlu1 %6806 }
 0xeca   : > { %v6805_v30 = vpop.permute.xlu0 %6804 }
 0xecb   : > { %v6823_v49 = vsel %vm16559_vm4, %v6805_v30, %v6807_v25  ;;  %vm16569_vm4 = vcmp.ne.s16.totalorder %v10176_v53, 0 }
 0xecc   : > { %7250 = vmatprep.subr.bf16.mxu0 %v6823_v49 }
 0xece   : > { %v6803_v63 = vpop.permute.xlu0 %6802 }
 0xecf   : > { %v6822_v45 = vsel %vm16560_vm3, %v6803_v63, %v6805_v30 }
 0xed0   : > { %7251 = vmatpush1.bf16.msra.mxu0 %v6822_v45 }
 0xed2   : > { %v6813_v57 = vpop.permute.xlu0 %6812 }
 0xed9   : > { %v6811_v56 = vpop.permute.xlu1 %6810 }
 0xeda   : > { %v6825_v58 = vsel %vm16561_vm2, %v6811_v56, %v6813_v57 }
 0xedb   : > { %7252 = vmatprep.subr.bf16.mxu0 %v6825_v58 }
 0xedd   : > { %v6809_v62 = vpop.permute.xlu1 %6808 }
 0xede   : > { %v6824_v47 = vsel %vm16562_vm14, %v6809_v62, %v6811_v56  ;;  %vm16575_vm14 = vcmp.ne.s16.totalorder %v10197_v61, 0 }
 0xedf   : > { %7253 = vmatpush1.bf16.msra.mxu0 %v6824_v47 }
 0xee1   : > { %v6819_v24 = vpop.permute.xlu1 %6818 }
 0xee6   : > { %v6817_v48 = vpop.permute.xlu0 %6816 }
 0xee7   : > { %v6827_v52 = vsel %vm16563_vm10, %v6817_v48, %v6819_v24  ;;  %vm16577_vm10 = vcmp.ne.s16.totalorder %v10256_v19, 0 }
 0xee8   : > { %7254 = vmatprep.subr.bf16.mxu0 %v6827_v52 }
 0xeea   : > { %v6815_v4 = vpop.permute.xlu0 %6814 }
 0xeeb   : > { %v6826_v10 = vsel %vm16564_vm12, %v6815_v4, %v6817_v48  ;;  %vm16578_vm12 = vcmp.ne.s16.totalorder %v10261_v22, 0 }
 0xeec   : > { %7255 = vmatpush1.bf16.msra.mxu0 %v6826_v10 }
 0xeef   : > { %9477 = vmatmul.mubr.msk.bf16.vlgmr.msra.gmra.mrb[32].mxu0 %vm2346_vm5, %v9904_v7 }
 0xef0   : > { %7290 = vmatprep.mubr.bf16.mxu0 %v16557_v33 }
 0xef2   : > { %v6953_v35 = vpop.permute.xlu1 %6952 }
 0xef6   : > { %v6963_v20 = vpop.permute.xlu1 %6962 }
 0xef7   : > { %9478 = vmatmul.mubr.msk.bf16.gmra.mrb[36].mxu0 %vm2346_vm5, %v9905_v26 }
 0xef8   : > { %7300 = vmatprep.mubr.bf16.mxu0 %v16557_v33 }
 0xefa   : > { %v6973_v49 = vpop.permute.xlu1 %6972 }
 0xefb   : > { %v6958_v21 = vpop.permute.xlu0 %6957 }
 0xeff   : > { %9479 = vmatmul.mubr.msk.bf16.gmra.mrb[40].mxu0 %vm2346_vm5, %v9906_v36  ;;  %v6968_v11 = vpop.permute.xlu0 %6967 }
 0xf00   : > { %7310 = vmatprep.mubr.bf16.mxu0 %v16557_v33 }
 0xf03   : > { %v6978_v58 = vpop.permute.xlu0 %6977 }
 0xf07   : > { %9480 = vmatmul.mubr.msk.bf16.gmra.mrb[44].mxu0 %vm2346_vm5, %v9907_v42  ;;  %v6983_v42 = vpop.permute.xlu1 %6982 }
 0xfc2   : > { %v7282_v5 = vpop.f32.mrb[32].mxu0 }
 0xfc3   : > { %v9549_v6 = vadd.f32 %v7282_v5, %v6953_v35  ;;  %v7284_v51 = vpop.f32.mrb[33].mxu0 }
 0xfc4   : > { %v9550_v32 = vadd.f32 %v7284_v51, %v6953_v35  ;;  %v7286_v38 = vpop.f32.mrb[34].mxu0 }
 0xfc5   : > { %v9551_v3 = vadd.f32 %v7286_v38, %v6958_v21  ;;  %v7288_v29 = vpop.f32.mrb[35].mxu0  ;;  %v7321_v13 = vmax.f32 %v9549_v6, 0.0 }
 0xfc6   : > { %v9552_v34 = vadd.f32 %v7288_v29, %v6958_v21  ;;  %v7322_v59 = vmax.f32 %v9550_v32, 0.0  ;;  %v6988_v21 = vpop.permute.xlu0 %6987 }
 0xfc7   : > { %v7323_v50 = vmax.f32 %v9551_v3, 0.0 }
 0xfc8   : > { %v7324_v31 = vmax.f32 %v9552_v34, 0.0 }
 0xfc9   : > { %v14711_v15 = vpack.c.bf16 %v7323_v50, %v7321_v13 }
 0xfca   : > { %v14713_v23 = vpack.c.bf16 %v7324_v31, %v7322_v59  ;;  %v7292_v18 = vpop.f32.mrb[36].mxu0 }
 0xfcb   : > { %7345 = vst [vmem:[#allocation2 + $0x8] sm:$0xff] %v14711_v15  ;;  %v9553_v8 = vadd.f32 %v7292_v18, %v6963_v20  ;;  %v7294_v54 = vpop.f32.mrb[37].mxu0  ;;  %7427 = vrot.lane.b32.xlu0 %v14711_v15, %s9974_s19  ;;  %7361 = vrot.lane.b32.xlu1 %v14711_v15, %s9971_s16 }
 0xfcc   : > { %7346 = vst [vmem:[#allocation2 + $0x10] sm:$0xff] %v14713_v23  ;;  %v9554_v1 = vadd.f32 %v7294_v54, %v6963_v20  ;;  %v7296_v9 = vpop.f32.mrb[38].mxu0  ;;  %8561 = vmatprep.subr.bf16.mxu0 %v14713_v23 }
 0xfcd   : > { %v9555_v55 = vadd.f32 %v7296_v9, %v6968_v11  ;;  %v7298_v27 = vpop.f32.mrb[39].mxu0  ;;  %8562 = vmatpush1.bf16.msra.mxu0 %v14711_v15  ;;  %v7325_v0 = vmax.f32 %v9553_v8, 0.0 }
 0xfce   : > { %v9556_v14 = vadd.f32 %v7298_v27, %v6968_v11  ;;  %v7326_v12 = vmax.f32 %v9554_v1, 0.0 }
 0xfcf   : > { %v7327_v40 = vmax.f32 %v9555_v55, 0.0  ;;  %7639 = vrot.lane.b32.xlu0 %v14711_v15, %s16565_s15  ;;  %7957 = vrot.lane.b32.xlu1 %v14711_v15, %s16565_s15 }
 0xfd0   : > { %v7328_v25 = vmax.f32 %v9556_v14, 0.0 }
 0xfd1   : > { %v14727_v30 = vpack.c.bf16 %v7327_v40, %v7325_v0 }
 0xfd2   : > { %v14729_v63 = vpack.c.bf16 %v7328_v25, %v7326_v12  ;;  %v7302_v45 = vpop.f32.mrb[40].mxu0 }
 0xfd3   : > { %7347 = vst [vmem:[#allocation2 + $0x28] sm:$0xff] %v14727_v30  ;;  %v9557_v57 = vadd.f32 %v7302_v45, %v6973_v49  ;;  %v7304_v56 = vpop.f32.mrb[41].mxu0  ;;  %7791 = vrot.lane.b32.xlu0 %v14711_v15, %s9974_s19  ;;  %8097 = vrot.lane.b32.xlu1 %v14711_v15, %s9974_s19 }
 0xfd4   : > { %7348 = vst [vmem:[#allocation2 + $0x30] sm:$0xff] %v14729_v63  ;;  %v9558_v62 = vadd.f32 %v7304_v56, %v6973_v49  ;;  %v7306_v47 = vpop.f32.mrb[42].mxu0  ;;  %8563 = vmatprep.subr.bf16.mxu0 %v14729_v63 }
 0xfd5   : > { %v9559_v24 = vadd.f32 %v7306_v47, %v6978_v58  ;;  %v7308_v48 = vpop.f32.mrb[43].mxu0  ;;  %8564 = vmatpush1.bf16.msra.mxu0 %v14727_v30  ;;  %v7329_v4 = vmax.f32 %v9557_v57, 0.0 }
 0xfd6   : > { %v9560_v52 = vadd.f32 %v7308_v48, %v6978_v58  ;;  %v7330_v7 = vmax.f32 %v9558_v62, 0.0 }
 0xfd7   : > { %v7331_v10 = vmax.f32 %v9559_v24, 0.0  ;;  %7567 = vrot.lane.b32.xlu0 %v14711_v15, %s16566_s21  ;;  %8309 = vrot.lane.b32.xlu1 %v14711_v15, %s16565_s15  ;;  %v16571_v24 = vld [vmem:[#allocation12_spill] sm:$0xff] }
 0xfd8   : > { %v7332_v26 = vmax.f32 %v9560_v52, 0.0  ;;  %vm16572_vm3 = vcmp.ne.s16.totalorder %v16571_v24, 0 }
 0xfd9   : > { %v14743_v36 = vpack.c.bf16 %v7331_v10, %v7329_v4 }
 0xfda   : > { %v14745_v35 = vpack.c.bf16 %v7332_v26, %v7330_v7  ;;  %v7312_v5 = vpop.f32.mrb[44].mxu0  ;;  %v16573_v7 = vld [vmem:[#allocation13_spill] sm:$0xff] }
 0xfdb   : > { %7349 = vst [vmem:[#allocation2 + $0x48] sm:$0xff] %v14743_v36  ;;  %v9561_v6 = vadd.f32 %v7312_v5, %v6983_v42  ;;  %v7314_v51 = vpop.f32.mrb[45].mxu0  ;;  %7959 = vrot.lane.b32.xlu0 %v14713_v23, %s16565_s15  ;;  %7385 = vrot.lane.b32.xlu1 %v14713_v23, %s16430_s10  ;;  %vm16574_vm2 = vcmp.ne.s16.totalorder %v16573_v7, 0 }
 0xfdc   : > { %7350 = vst [vmem:[#allocation2 + $0x50] sm:$0xff] %v14745_v35  ;;  %v9562_v32 = vadd.f32 %v7314_v51, %v6983_v42  ;;  %v7316_v38 = vpop.f32.mrb[46].mxu0  ;;  %8565 = vmatprep.subr.bf16.mxu0 %v14745_v35 }
 0xfdd   : > { %v9563_v3 = vadd.f32 %v7316_v38, %v6988_v21  ;;  %v7318_v29 = vpop.f32.mrb[47].mxu0  ;;  %8566 = vmatpush1.bf16.msra.mxu0 %v14743_v36  ;;  %v7333_v13 = vmax.f32 %v9561_v6, 0.0 }
 0xfde   : > { %v9564_v34 = vadd.f32 %v7318_v29, %v6988_v21  ;;  %v7334_v59 = vmax.f32 %v9562_v32, 0.0 }
 0xfdf   : > { %v7335_v50 = vmax.f32 %v9563_v3, 0.0  ;;  %8099 = vrot.lane.b32.xlu0 %v14713_v23, %s9974_s19  ;;  %7429 = vrot.lane.b32.xlu1 %v14713_v23, %s9974_s19 }
 0xfe0   : > { %v7336_v31 = vmax.f32 %v9564_v34, 0.0 }
 0xfe1   : > { %v14759_v20 = vpack.c.bf16 %v7335_v50, %v7333_v13 }
 0xfe2   : > { %v14761_v18 = vpack.c.bf16 %v7336_v31, %v7334_v59 }
 0xfe3   : > { %7351 = vst [vmem:[#allocation2 + $0x68] sm:$0xff] %v14759_v20  ;;  %8311 = vrot.lane.b32.xlu0 %v14713_v23, %s16565_s15  ;;  %7641 = vrot.lane.b32.xlu1 %v14713_v23, %s16565_s15 }
 0xfe4   : > { %7352 = vst [vmem:[#allocation2 + $0x70] sm:$0xff] %v14761_v18  ;;  %8567 = vmatprep.subr.bf16.mxu0 %v14761_v18 }
 0xfe5   : > { %8568 = vmatpush1.bf16.msra.mxu0 %v14759_v20 }
 0xfe7   : > { %7793 = vrot.lane.b32.xlu1 %v14713_v23, %s9974_s19  ;;  %7363 = vrot.lane.b32.xlu0 %v14727_v30, %s9971_s16 }
 0xfeb   : > { %7569 = vrot.lane.b32.xlu1 %v14713_v23, %s16566_s21  ;;  %7645 = vrot.lane.b32.xlu0 %v14727_v30, %s16565_s15 }
 0xfef   : > { %7433 = vrot.lane.b32.xlu1 %v14727_v30, %s9974_s19  ;;  %7797 = vrot.lane.b32.xlu0 %v14727_v30, %s9974_s19 }
 0xff3   : > { %7963 = vrot.lane.b32.xlu1 %v14727_v30, %s16565_s15  ;;  %7573 = vrot.lane.b32.xlu0 %v14727_v30, %s16566_s21 }
 0xff7   : > { %8103 = vrot.lane.b32.xlu1 %v14727_v30, %s9974_s19  ;;  %7387 = vrot.lane.b32.xlu0 %v14729_v63, %s16430_s10 }
 0xffb   : > { %8315 = vrot.lane.b32.xlu1 %v14727_v30, %s16565_s15  ;;  %7435 = vrot.lane.b32.xlu0 %v14729_v63, %s9974_s19 }
 0xfff   : > { %7647 = vrot.lane.b32.xlu1 %v14729_v63, %s16565_s15  ;;  %7965 = vrot.lane.b32.xlu0 %v14729_v63, %s16565_s15 }
0x1003   : > { %7799 = vrot.lane.b32.xlu1 %v14729_v63, %s9974_s19  ;;  %8105 = vrot.lane.b32.xlu0 %v14729_v63, %s9974_s19 }
0x1007   : > { %7575 = vrot.lane.b32.xlu1 %v14729_v63, %s16566_s21  ;;  %8317 = vrot.lane.b32.xlu0 %v14729_v63, %s16565_s15 }
0x100b   : > { %7439 = vrot.lane.b32.xlu0 %v14743_v36, %s9974_s19  ;;  %7365 = vrot.lane.b32.xlu1 %v14743_v36, %s9971_s16 }
0x100f   : > { %7651 = vrot.lane.b32.xlu0 %v14743_v36, %s16565_s15  ;;  %7969 = vrot.lane.b32.xlu1 %v14743_v36, %s16565_s15 }
0x1013   : > { %7803 = vrot.lane.b32.xlu0 %v14743_v36, %s9974_s19  ;;  %8109 = vrot.lane.b32.xlu1 %v14743_v36, %s9974_s19 }
0x1017   : > { %7971 = vrot.lane.b32.xlu0 %v14745_v35, %s16565_s15  ;;  %8321 = vrot.lane.b32.xlu1 %v14743_v36, %s16565_s15 }
0x101b   : > { %8111 = vrot.lane.b32.xlu0 %v14745_v35, %s9974_s19  ;;  %7579 = vrot.lane.b32.xlu1 %v14743_v36, %s16566_s21 }
0x101f   : > { %8323 = vrot.lane.b32.xlu0 %v14745_v35, %s16565_s15  ;;  %7389 = vrot.lane.b32.xlu1 %v14745_v35, %s16430_s10 }
0x1023   : > { %7581 = vrot.lane.b32.xlu0 %v14745_v35, %s16566_s21  ;;  %7441 = vrot.lane.b32.xlu1 %v14745_v35, %s9974_s19 }
0x1027   : > { %7653 = vrot.lane.b32.xlu1 %v14745_v35, %s16565_s15  ;;  %7367 = vrot.lane.b32.xlu0 %v14759_v20, %s9971_s16 }
0x102b   : > { %7805 = vrot.lane.b32.xlu1 %v14745_v35, %s9974_s19  ;;  %7657 = vrot.lane.b32.xlu0 %v14759_v20, %s16565_s15 }
0x102f   : > { %7445 = vrot.lane.b32.xlu1 %v14759_v20, %s9974_s19  ;;  %7809 = vrot.lane.b32.xlu0 %v14759_v20, %s9974_s19 }
0x1033   : > { %7975 = vrot.lane.b32.xlu1 %v14759_v20, %s16565_s15  ;;  %7585 = vrot.lane.b32.xlu0 %v14759_v20, %s16566_s21 }
0x1037   : > { %8115 = vrot.lane.b32.xlu1 %v14759_v20, %s9974_s19  ;;  %7391 = vrot.lane.b32.xlu0 %v14761_v18, %s16430_s10  ;;  %s15770_s10 = sld [smem:[#allocation5]] }
0x103b   : > { %8327 = vrot.lane.b32.xlu1 %v14759_v20, %s16565_s15  ;;  %7447 = vrot.lane.b32.xlu0 %v14761_v18, %s9974_s19 }
0x103d   : > { %v14859_v8 = vpop.permute.xlu0 %7427  ;;  %v7362_v54 = vpop.permute.xlu1 %7361 }
0x103e   : > { %7373 = vst.msk [vmem:[#allocation2] sm:$0xff] %vm1046_vm6, %v7362_v54 }
0x103f   : > { %7659 = vrot.lane.b32.xlu1 %v14761_v18, %s16565_s15  ;;  %7977 = vrot.lane.b32.xlu0 %v14761_v18, %s16565_s15 }
0x1041   : > { %v14866_v11 = vpop.permute.xlu0 %7639  ;;  %v14868_v1 = vpop.permute.xlu1 %7957 }
0x1043   : > { %7811 = vrot.lane.b32.xlu1 %v14761_v18, %s9974_s19  ;;  %8117 = vrot.lane.b32.xlu0 %v14761_v18, %s9974_s19 }
0x1045   : > { %v14874_v9 = vpop.permute.xlu0 %7791  ;;  %v8098_v55 = vpop.permute.xlu1 %8097  ;;  %v14931_v38 = vld [vmem:[#allocation2] sm:$0xff] }
0x1046   : > { %v8141_v0 = vsel %vm16569_vm4, %v14711_v15, %v8098_v55  ;;  %vm16581_vm4 = vmmov %vm16572_vm3 }
0x1047   : > { %7587 = vrot.lane.b32.xlu1 %v14761_v18, %s16566_s21  ;;  %8329 = vrot.lane.b32.xlu0 %v14761_v18, %s16565_s15 }
0x1049   : > { %v14880_v27 = vpop.permute.xlu0 %7567  ;;  %v14882_v14 = vpop.permute.xlu1 %8309 }
0x104a   : > { %16567 = vst [vmem:[#allocation23_spill] sm:$0xff] %v14880_v27  ;;  %16568 = vst [vmem:[#allocation18_spill] sm:$0xff] %v14882_v14 }
0x104b   : > { %8165 = vrot.lane.b32.xlu1 %v8141_v0, %s16220_s13 }
0x104d   : > { %v14888_v40 = vpop.permute.xlu0 %7959  ;;  %v7386_v12 = vpop.permute.xlu1 %7385 }
0x104e   : > { %7397 = vst.msk [vmem:[#allocation2 + $0x18] sm:$0xff] %vm486_vm7, %v7386_v12  ;;  %v7981_v42 = vsel %vm528_vm13, %v14868_v1, %v14888_v40 }
0x104f   : > { %v8002_v21 = vsel %vm16577_vm10, %v14711_v15, %v7981_v42 }
0x1051   : > { %v14891_v25 = vpop.permute.xlu0 %8099  ;;  %v7430_v49 = vpop.permute.xlu1 %7429 }
0x1052   : > { %v7450_v47 = vsel %vm440_vm15, %v14859_v8, %v7430_v49  ;;  %v8121_v32 = vsel %vm440_vm15, %v8098_v55, %v14891_v25 }
0x1053   : > { %v7471_v26 = vsel %vm16574_vm2, %v14713_v23, %v7450_v47  ;;  %v8142_v34 = vsel %vm16578_vm12, %v14713_v23, %v8121_v32  ;;  %vm16585_vm2 = vcmp.ne.s16.totalorder %v10155_v39, 0 }
0x1055   : > { %v14893_v45 = vpop.permute.xlu0 %8311  ;;  %v7642_v57 = vpop.permute.xlu1 %7641  ;;  %v14954_v54 = vld [vmem:[#allocation2 + $0x18] sm:$0xff] }
0x1056   : > { %v7662_v56 = vsel %vm528_vm13, %v14866_v11, %v7642_v57  ;;  %v7683_v62 = vsel %vm518_vm11, %v14713_v23, %v7642_v57 }
0x1057   : > { %7709 = vrot.lane.b32.xlu1 %v7683_v62, %s16433_s12  ;;  %v7682_v48 = vsel %vm16572_vm3, %v14711_v15, %v7662_v56  ;;  %vm16582_vm3 = vcmp.ne.s16.totalorder %v10163_v46, 0 }
0x1058   : > { %7707 = vrot.lane.b32.xlu0 %v7682_v48, %s16433_s12  ;;  %v8001_v48 = vsel %vm16582_vm3, %v14931_v38, %v14868_v1  ;;  %vm16591_vm12 = vmmov %vm16582_vm3 }
0x1059   : > { %v7364_v52 = vpop.permute.xlu0 %7363  ;;  %v7794_v4 = vpop.permute.xlu1 %7793  ;;  %vm16594_vm3 = vmmov %vm16577_vm10 }
0x105a   : > { %7374 = vst.msk [vmem:[#allocation2 + $0x20] sm:$0xff] %vm1046_vm6, %v7364_v52  ;;  %v7814_v10 = vsel %vm440_vm15, %v14874_v9, %v7794_v4 }
0x105b   : > { %7497 = vrot.lane.b32.xlu1 %v7471_v26, %s16300_s26  ;;  %v7834_v5 = vsel %vm16575_vm14, %v14713_v23, %v7814_v10  ;;  %vm16586_vm14 = vcmp.ne.s16.totalorder %v16573_v7, 0 }
0x105c   : > { %7859 = vrot.lane.b32.xlu0 %v7834_v5, %s16314_s27 }
0x105d   : > { %v14921_v6 = vpop.permute.xlu0 %7645  ;;  %v14923_v51 = vpop.permute.xlu1 %7569 }
0x105e   : > { %16576 = vst [vmem:[#allocation27_spill] sm:$0xff] %v14923_v51 }
0x105f   : > { %8027 = vrot.lane.b32.xlu1 %v8002_v21, %s16209_s9  ;;  %v7835_v21 = vsel %vm16585_vm2, %v14954_v54, %v7794_v4  ;;  %vm16597_vm2 = vmmov %vm16581_vm4 }
0x1060   : > { %7637 = vrot.lane.b32.xlu0 %v14931_v38, %s16565_s15 }
0x1061   : > { %v14935_v3 = vpop.permute.xlu0 %7797  ;;  %v14937_v29 = vpop.permute.xlu1 %7433  ;;  %v14981_v52 = vld [vmem:[#allocation2 + $0x20] sm:$0xff] }
0x1063   : > { %8167 = vrot.lane.b32.xlu1 %v8142_v34, %s16220_s13 }
0x1064   : > { %7789 = vrot.lane.b32.xlu0 %v14931_v38, %s9974_s19 }
0x1065   : > { %v14945_v13 = vpop.permute.xlu0 %7573  ;;  %v7964_v50 = vpop.permute.xlu1 %7963 }
0x1066   : > { %16579 = vst [vmem:[#allocation20_spill] sm:$0xff] %v14945_v13  ;;  %v8004_v13 = vsel %vm16591_vm12, %v14981_v52, %v7964_v50 }
0x1067   : > { %7425 = vrot.lane.b32.xlu1 %v14931_v38, %s9974_s19 }
0x1068   : > { %7565 = vrot.lane.b32.xlu0 %v14931_v38, %s16566_s21 }
0x1069   : > { %v7388_v59 = vpop.permute.xlu0 %7387  ;;  %v14951_v31 = vpop.permute.xlu1 %8103 }
0x106a   : > { %7398 = vst.msk [vmem:[#allocation2 + $0x38] sm:$0xff] %vm486_vm7, %v7388_v59 }
0x106b   : > { %7961 = vrot.lane.b32.xlu1 %v14954_v54, %s16565_s15 }
0x106d   : > { %v7436_v55 = vpop.permute.xlu0 %7435  ;;  %v14958_v0 = vpop.permute.xlu1 %8315 }
0x106e   : > { %16580 = vst [vmem:[#allocation21_spill] sm:$0xff] %v14958_v0  ;;  %v7452_v32 = vsel %vm440_vm15, %v14937_v29, %v7436_v55 }
0x106f   : > { %8101 = vrot.lane.b32.xlu1 %v14954_v54, %s9974_s19 }
0x1071   : > { %v14962_v12 = vpop.permute.xlu0 %7965  ;;  %v7648_v49 = vpop.permute.xlu1 %7647 }
0x1072   : > { %v7664_v57 = vsel %vm528_vm13, %v14921_v6, %v7648_v49  ;;  %v7686_v42 = vsel %vm518_vm11, %v14729_v63, %v7648_v49  ;;  %v7474_v49 = vsel %vm16586_vm14, %v14729_v63, %v7452_v32 }
0x1073   : > { %8313 = vrot.lane.b32.xlu1 %v14954_v54, %s16565_s15  ;;  %v7685_v56 = vsel %vm16581_vm4, %v14727_v30, %v7664_v57  ;;  %v7983_v57 = vsel %vm528_vm13, %v7964_v50, %v14962_v12 }
0x1074   : > { %7713 = vrot.lane.b32.xlu0 %v7685_v56, %s16433_s12  ;;  %v8005_v56 = vsel %vm16577_vm10, %v14727_v30, %v7983_v57 }
0x1075   : > { %v14972_v62 = vpop.permute.xlu0 %8105  ;;  %v14974_v47 = vpop.permute.xlu1 %7799 }
0x1076   : > { %v8123_v19 = vsel %vm440_vm15, %v14951_v31, %v14972_v62 }
0x1077   : > { %8025 = vrot.lane.b32.xlu1 %v8001_v48, %s16209_s9 }
0x1078   : > { %7431 = vrot.lane.b32.xlu0 %v14981_v52, %s9974_s19 }
0x1079   : > { %v14985_v10 = vpop.permute.xlu0 %8317  ;;  %v14987_v26 = vpop.permute.xlu1 %7575 }
0x107a   : > { %16583 = vst [vmem:[#allocation31_spill] sm:$0xff] %v14985_v10  ;;  %16584 = vst [vmem:[#allocation24_spill] sm:$0xff] %v14987_v26 }
0x107b   : > { %7715 = vrot.lane.b32.xlu1 %v7686_v42, %s16433_s12 }
0x107c   : > { %7643 = vrot.lane.b32.xlu0 %v14981_v52, %s16565_s15 }
0x107d   : > { %v14995_v1 = vpop.permute.xlu0 %7439  ;;  %v7366_v5 = vpop.permute.xlu1 %7365 }
0x107e   : > { %7375 = vst.msk [vmem:[#allocation2 + $0x40] sm:$0xff] %vm1046_vm6, %v7366_v5  ;;  %v15030_v5 = vld [vmem:[#allocation2 + $0x38] sm:$0xff] }
0x107f   : > { %7861 = vrot.lane.b32.xlu1 %v7835_v21, %s16314_s27 }
0x1080   : > { %7795 = vrot.lane.b32.xlu0 %v14981_v52, %s9974_s19 }
0x1081   : > { %v15006_v34 = vpop.permute.xlu0 %7651  ;;  %v15008_v59 = vpop.permute.xlu1 %7969 }
0x1083   : > { %7503 = vrot.lane.b32.xlu1 %v7474_v49, %s16300_s26 }
0x1084   : > { %7571 = vrot.lane.b32.xlu0 %v14981_v52, %s16566_s21 }
0x1085   : > { %v15018_v4 = vpop.permute.xlu0 %7803  ;;  %v15020_v55 = vpop.permute.xlu1 %8109 }
0x1087   : > { %8033 = vrot.lane.b32.xlu1 %v8005_v56, %s16209_s9 }
0x1089   : > { %v15026_v48 = vpop.permute.xlu0 %7971  ;;  %v15028_v42 = vpop.permute.xlu1 %8321 }
0x108a   : > { %16587 = vst [vmem:[#allocation32_spill] sm:$0xff] %v15028_v42 }
0x108b   : > { %7967 = vrot.lane.b32.xlu1 %v15030_v5, %s16565_s15 }
0x108d   : > { %v15034_v21 = vpop.permute.xlu0 %8111  ;;  %v15036_v32 = vpop.permute.xlu1 %7579 }
0x108e   : > { %16588 = vst [vmem:[#allocation25_spill] sm:$0xff] %v15036_v32 }
0x108f   : > { %8107 = vrot.lane.b32.xlu1 %v15030_v5, %s9974_s19 }
0x1091   : > { %v15040_v49 = vpop.permute.xlu0 %8323  ;;  %v7390_v57 = vpop.permute.xlu1 %7389 }
0x1092   : > { %16589 = vst [vmem:[#allocation17_spill] sm:$0xff] %v15040_v49  ;;  %7399 = vst.msk [vmem:[#allocation2 + $0x58] sm:$0xff] %vm486_vm7, %v7390_v57 }
0x1093   : > { %8319 = vrot.lane.b32.xlu1 %v15030_v5, %s16565_s15 }
0x1095   : > { %v15045_v56 = vpop.permute.xlu0 %7581  ;;  %v7442_v33 = vpop.permute.xlu1 %7441 }
0x1096   : > { %16590 = vst [vmem:[#allocation26_spill] sm:$0xff] %v15045_v56  ;;  %v7454_v56 = vsel %vm440_vm15, %v14995_v1, %v7442_v33  ;;  %v7985_v33 = vsel %vm528_vm13, %v15008_v59, %v15026_v48 }
0x1097   : > { %8031 = vrot.lane.b32.xlu1 %v8004_v13, %s16209_s9 }
0x1099   : > { %v7368_v32 = vpop.permute.xlu0 %7367  ;;  %v7654_v26 = vpop.permute.xlu1 %7653 }
0x109a   : > { %7376 = vst.msk [vmem:[#allocation2 + $0x60] sm:$0xff] %vm1046_vm6, %v7368_v32  ;;  %v7666_v27 = vsel %vm528_vm13, %v15006_v34, %v7654_v26  ;;  %v7689_v57 = vsel %vm518_vm11, %v14745_v35, %v7654_v26  ;;  %vm16593_vm6 = vmmov %vm16586_vm14  ;;  %v15075_v26 = vld [vmem:[#allocation2 + $0x40] sm:$0xff] }
0x109b   : > { %7721 = vrot.lane.b32.xlu1 %v7689_v57, %s16433_s12  ;;  %v7688_v13 = vsel %vm16581_vm4, %v14743_v36, %v7666_v27  ;;  %v7477_v51 = vsel %vm16593_vm6, %v14745_v35, %v7454_v56  ;;  %vm16598_vm14 = vmmov %vm16591_vm12 }
0x109c   : > { %7719 = vrot.lane.b32.xlu0 %v7688_v13, %s16433_s12  ;;  %v8008_v13 = vsel %vm16594_vm3, %v14743_v36, %v7985_v33  ;;  %v8007_v24 = vsel %vm16598_vm14, %v15075_v26, %v15008_v59  ;;  %v7816_v59 = vsel %vm440_vm15, %v14935_v3, %v14974_v47  ;;  %vm16600_vm10 = vmmov %vm16593_vm6  ;;  %vm16610_vm6 = vcmp.ne.s16.totalorder %v10261_v22, 0 }
0x109d   : > { %v15064_v50 = vpop.permute.xlu0 %7657  ;;  %v15066_v32 = vpop.permute.xlu1 %7805  ;;  %vm16604_vm12 = vmmov %vm16594_vm3  ;;  %vm16612_vm3 = vcmp.ne.s16.totalorder %v10176_v53, 0  ;;  %vm16614_vm14 = vcmp.ne.s16.totalorder %v10274_v28, 0 }
0x109e   : > { %16592 = vst [vmem:[#allocation28_spill] sm:$0xff] %v15064_v50 }
0x109f   : > { %7509 = vrot.lane.b32.xlu1 %v7477_v51, %s16300_s26 }
0x10a0   : > { %7649 = vrot.lane.b32.xlu0 %v15075_v26, %s16565_s15 }
0x10a1   : > { %v15079_v27 = vpop.permute.xlu0 %7809  ;;  %v15081_v57 = vpop.permute.xlu1 %7445 }
0x10a3   : > { %8039 = vrot.lane.b32.xlu1 %v8008_v13, %s16209_s9  ;;  %v15102_v13 = vld [vmem:[#allocation2 + $0x58] sm:$0xff] }
0x10a4   : > { %7801 = vrot.lane.b32.xlu0 %v15075_v26, %s9974_s19 }
0x10a5   : > { %v15089_v56 = vpop.permute.xlu0 %7585  ;;  %v15091_v51 = vpop.permute.xlu1 %7975 }
0x10a6   : > { %16595 = vst [vmem:[#allocation19_spill] sm:$0xff] %v15089_v56 }
0x10a7   : > { %7437 = vrot.lane.b32.xlu1 %v15075_v26, %s9974_s19 }
0x10a9   : > { %v7392_v42 = vpop.permute.xlu0 %7391  ;;  %v15095_v49 = vpop.permute.xlu1 %8115 }
0x10aa   : > { %7400 = vst.msk [vmem:[#allocation2 + $0x78] sm:$0xff] %vm486_vm7, %v7392_v42 }
0x10ab   : > { %7577 = vrot.lane.b32.xlu1 %v15075_v26, %s16566_s21 }
0x10ad   : > { %v15100_v33 = vpop.permute.xlu1 %8327  ;;  %v7448_v10 = vpop.permute.xlu0 %7447 }
0x10ae   : > { %16596 = vst [vmem:[#allocation22_spill] sm:$0xff] %v15100_v33  ;;  %v15116_v33 = vld [vmem:[#allocation2 + $0x60] sm:$0xff] }
0x10af   : > { %7973 = vrot.lane.b32.xlu1 %v15102_v13, %s16565_s15 }
0x10b1   : > { %v7660_v56 = vpop.permute.xlu1 %7659 }
0x10b2   : > { %v7668_v0 = vsel %vm528_vm13, %v15064_v50, %v7660_v56  ;;  %v15122_v50 = vpop.permute.xlu0 %7977 }
0x10b3   : > { %8113 = vrot.lane.b32.xlu1 %v15102_v13, %s9974_s19  ;;  %v7691_v42 = vsel %vm16597_vm2, %v14759_v20, %v7668_v0  ;;  %v7692_v0 = vsel %vm518_vm11, %v14761_v18, %v7660_v56  ;;  %vm16601_vm11 = vcmp.ne.s16.totalorder %v10197_v61, 0  ;;  %vm16613_vm2 = vcmp.ne.s16.totalorder %v10155_v39, 0 }
0x10b4   : > { %7725 = vrot.lane.b32.xlu0 %v7691_v42, %s16433_s12  ;;  %v7456_v42 = vsel %vm440_vm15, %v15081_v57, %v7448_v10  ;;  %v7987_v10 = vsel %vm528_vm13, %v15091_v51, %v15122_v50  ;;  %v7837_v56 = vsel %vm16601_vm11, %v14729_v63, %v7816_v59  ;;  %vm16605_vm4 = vmmov %vm16601_vm11  ;;  %vm16616_vm11 = vcmp.ne.s16.totalorder %v10151_v37, 0 }
0x10b5   : > { %v15120_v2 = vpop.permute.xlu1 %7811  ;;  %v7480_v58 = vsel %vm16600_vm10, %v14761_v18, %v7456_v42  ;;  %v8011_v42 = vsel %vm16604_vm12, %v14759_v20, %v7987_v10  ;;  %vm16615_vm10 = vmmov %vm16610_vm6 }
0x10b6   : > { %v15142_v17 = vpop.permute.xlu0 %8117  ;;  %vm16617_vm12 = vmmov %vm16612_vm3 }
0x10b7   : > { %8325 = vrot.lane.b32.xlu1 %v15102_v13, %s16565_s15 }
0x10b8   : > { %7443 = vrot.lane.b32.xlu0 %v15116_v33, %s9974_s19 }
0x10b9   : > { %v15136_v14 = vpop.permute.xlu1 %7587 }
0x10ba   : > { %16599 = vst [vmem:[#allocation29_spill] sm:$0xff] %v15136_v14  ;;  %v15162_v7 = vpop.permute.xlu0 %8329 }
0x10bb   : > { %8037 = vrot.lane.b32.xlu1 %v8007_v24, %s16209_s9  ;;  %v7818_v24 = vsel %vm440_vm15, %v15018_v4, %v15066_v32  ;;  %16603 = vst [vmem:[#allocation30_spill] sm:$0xff] %v15162_v7 }
0x10bc   : > { %7655 = vrot.lane.b32.xlu0 %v15116_v33, %s16565_s15  ;;  %v7840_v59 = vsel %vm16605_vm4, %v14745_v35, %v7818_v24  ;;  %vm16618_vm4 = vcmp.ne.s16.totalorder %v10161_v44, 0 }
0x10bf   : > { %7727 = vrot.lane.b32.xlu1 %v7692_v0, %s16433_s12  ;;  %v15160_v0 = vpop.permute.xlu1 %8165 }
0x10c0   : > { %7583 = vrot.lane.b32.xlu0 %v15116_v33, %s16566_s21  ;;  %16602 = vst [vmem:[#allocation15_spill] sm:$0xff] %v15160_v0  ;;  %v15180_v0 = vld [vmem:[#allocation2 + $0x78] sm:$0xff] }
0x10c3   : > { %7515 = vrot.lane.b32.xlu1 %v7480_v58, %s16300_s26 }
0x10c4   : > { %7865 = vrot.lane.b32.xlu0 %v7837_v56, %s16314_s27 }
0x10c7   : > { %8045 = vrot.lane.b32.xlu1 %v8011_v42, %s16209_s9  ;;  %v8145_v42 = vsel %vm16610_vm6, %v14729_v63, %v8123_v19  ;;  %vm16619_vm6 = vmmov %vm16613_vm2 }
0x10c8   : > { %7871 = vrot.lane.b32.xlu0 %v7840_v59, %s16314_s27 }
0x10c9   : > { %v15172_v58 = vpop.permute.xlu1 %7709 }
0x10ca   : > { %16606 = vst [vmem:[#allocation11_spill] sm:$0xff] %v15172_v58  ;;  %v15174_v14 = vpop.permute.xlu0 %7707  ;;  %v8144_v58 = vsel %vm16612_vm3, %v14727_v30, %v14951_v31  ;;  %vm16620_vm3 = vcmp.ne.s16.totalorder %v10157_v41, 0 }
0x10cb   : > { %16607 = vst [vmem:[#allocation12_spill] sm:$0xff] %v15174_v14  ;;  %7807 = vrot.lane.b32.xlu1 %v15116_v33, %s9974_s19 }
0x10cd   : > { %v15178_v56 = vpop.permute.xlu1 %7497 }
0x10ce   : > { %v15187_v10 = vpop.permute.xlu0 %7859 }
0x10cf   : > { %7979 = vrot.lane.b32.xlu1 %v15180_v0, %s16565_s15  ;;  %16608 = vst [vmem:[#allocation13_spill] sm:$0xff] %v15187_v10  ;;  %v7838_v10 = vsel %vm16613_vm2, %v15030_v5, %v14974_v47  ;;  %v8125_v47 = vsel %vm440_vm15, %v15020_v55, %v15034_v21  ;;  %vm16621_vm2 = vmmov %vm16615_vm10 }
0x10d1   : > { %v15189_v24 = vpop.permute.xlu1 %8027 }
0x10d2   : > { %16609 = vst [vmem:[#allocation33_spill] sm:$0xff] %v15189_v24  ;;  %v7638_v14 = vpop.permute.xlu0 %7637 }
0x10d3   : > { %8173 = vrot.lane.b32.xlu1 %v8145_v42, %s16220_s13  ;;  %v7661_v24 = vsel %vm528_vm13, %v7638_v14, %v14866_v11 }
0x10d5   : > { %v15195_v59 = vpop.permute.xlu1 %8167 }
0x10d6   : > { %16611 = vst [vmem:[#allocation34_spill] sm:$0xff] %v15195_v59  ;;  %v7790_v31 = vpop.permute.xlu0 %7789 }
0x10d7   : > { %8171 = vrot.lane.b32.xlu1 %v8144_v58, %s16220_s13 }
0x10d9   : > { %v7426_v7 = vpop.permute.xlu1 %7425 }
0x10da   : > { %v7469_v19 = vsel %vm428_vm0, %v14931_v38, %v7426_v7  ;;  %v7449_v42 = vsel %vm440_vm15, %v7426_v7, %v14859_v8  ;;  %v15224_v7 = vpop.permute.xlu0 %7565 }
0x10db   : > { %7867 = vrot.lane.b32.xlu1 %v7838_v10, %s16314_s27  ;;  %7493 = vrot.lane.b32.xlu0 %v7469_v19, %s16300_s26  ;;  %v7470_v58 = vsel %vm16614_vm14, %v14711_v15, %v7449_v42  ;;  %v8148_v10 = vsel %vm16615_vm10, %v14745_v35, %v8125_v47  ;;  %v7681_v19 = vsel %vm16616_vm11, %v14931_v38, %v7661_v24  ;;  %vm16622_vm14 = vcmp.ne.s16.totalorder %v10159_v43, 0  ;;  %vm16623_vm10 = vmmov %vm16617_vm12 }
0x10dc   : > { %v7813_v42 = vsel %vm440_vm15, %v7790_v31, %v14874_v9  ;;  %v7841_v31 = vsel %vm16619_vm6, %v15102_v13, %v15066_v32  ;;  %v8127_v47 = vsel %vm440_vm15, %v15095_v49, %v15142_v17  ;;  %vm16624_vm11 = vcmp.ne.s16.totalorder %v10274_v28, 0 }
0x10dd   : > { %v7962_v59 = vpop.permute.xlu1 %7961  ;;  %v7833_v38 = vsel %vm16618_vm4, %v14711_v15, %v7813_v42  ;;  %v8151_v32 = vsel %vm16621_vm2, %v14761_v18, %v8127_v47  ;;  %vm16626_vm4 = vcmp.ne.s16.totalorder %v10151_v37, 0  ;;  %vm16628_vm2 = vcmp.ne.s16.totalorder %v10157_v41, 0 }
0x10de   : > { %v7982_v9 = vsel %vm528_vm13, %v14888_v40, %v7962_v59 }
0x10df   : > { %8119 = vrot.lane.b32.xlu1 %v15180_v0, %s9974_s19  ;;  %7495 = vrot.lane.b32.xlu0 %v7470_v58, %s16300_s26  ;;  %v8147_v58 = vsel %vm16617_vm12, %v14743_v36, %v15020_v55  ;;  %v8003_v55 = vsel %vm16620_vm3, %v14713_v23, %v7982_v9  ;;  %vm16625_vm12 = vcmp.ne.s16.totalorder %v10163_v46, 0  ;;  %vm16627_vm3 = vcmp.ne.s16.totalorder %v10161_v44, 0 }
0x10e0   : > { %v8010_v53 = vsel %vm16625_vm12, %v15116_v33, %v15091_v51  ;;  %vm16631_vm12 = vmmov %vm16627_vm3 }
0x10e1   : > { %v8102_v8 = vpop.permute.xlu1 %8101 }
0x10e2   : > { %v8122_v40 = vsel %vm440_vm15, %v14891_v25, %v8102_v8 }
0x10e3   : > { %8179 = vrot.lane.b32.xlu1 %v8148_v10, %s16220_s13  ;;  %7705 = vrot.lane.b32.xlu0 %v7681_v19, %s16433_s12  ;;  %v8143_v19 = vsel %vm16622_vm14, %v14954_v54, %v8122_v40  ;;  %v7844_v40 = vsel %vm16619_vm6, %v15180_v0, %v15120_v2  ;;  %vm16633_vm6 = vmmov %vm16622_vm14 }
0x10e5   : > { %v15236_v11 = vpop.permute.xlu1 %8313 }
0x10e6   : > { %v15238_v14 = vpop.permute.xlu0 %7713  ;;  %v8334_v28 = vsel %vm528_vm13, %v14893_v45, %v15236_v11 }
0x10e7   : > { %8177 = vrot.lane.b32.xlu1 %v8147_v58, %s16220_s13  ;;  %7857 = vrot.lane.b32.xlu0 %v7833_v38, %s16314_s27  ;;  %v8150_v38 = vsel %vm16623_vm10, %v14759_v20, %v15095_v49  ;;  %vm16629_vm10 = vmmov %vm16624_vm11 }
0x10e9   : > { %v15251_v24 = vpop.permute.xlu1 %8025 }
0x10ea   : > { %v7432_v59 = vpop.permute.xlu0 %7431 }
0x10eb   : > { %7873 = vrot.lane.b32.xlu1 %v7841_v31, %s16314_s27  ;;  %8029 = vrot.lane.b32.xlu0 %v8003_v55, %s16209_s9  ;;  %v7472_v42 = vsel %vm428_vm0, %v14981_v52, %v7432_v59  ;;  %v7451_v58 = vsel %vm440_vm15, %v7432_v59, %v14937_v29 }
0x10ec   : > { %v7473_v9 = vsel %vm16624_vm11, %v14727_v30, %v7451_v58  ;;  %vm16630_vm11 = vmmov %vm16626_vm4 }
0x10ed   : > { %v15267_v10 = vpop.permute.xlu1 %7715 }
0x10ee   : > { %v7644_v8 = vpop.permute.xlu0 %7643 }
0x10ef   : > { %8185 = vrot.lane.b32.xlu1 %v8151_v32, %s16220_s13  ;;  %8169 = vrot.lane.b32.xlu0 %v8143_v19, %s16220_s13  ;;  %v7663_v31 = vsel %vm528_vm13, %v7644_v8, %v14921_v6 }
0x10f0   : > { %v7684_v49 = vsel %vm16626_vm4, %v14981_v52, %v7663_v31  ;;  %vm16632_vm4 = vmmov %vm16628_vm2 }
0x10f1   : > { %v15277_v25 = vpop.permute.xlu1 %7861 }
0x10f2   : > { %v7796_v29 = vpop.permute.xlu0 %7795 }
0x10f3   : > { %8331 = vrot.lane.b32.xlu1 %v15180_v0, %s16565_s15  ;;  %7499 = vrot.lane.b32.xlu0 %v7472_v42, %s16300_s26  ;;  %v7815_v47 = vsel %vm440_vm15, %v7796_v29, %v14935_v3 }
0x10f4   : > { %v7836_v46 = vsel %vm16627_vm3, %v14727_v30, %v7815_v47  ;;  %vm16634_vm3 = vmmov %vm16629_vm10 }
0x10f5   : > { %v15287_v22 = vpop.permute.xlu1 %7503 }
0x10f6   : > { %v15351_v8 = vpop.permute.xlu0 %7571 }
0x10f7   : > { %8183 = vrot.lane.b32.xlu1 %v8150_v38, %s16220_s13  ;;  %7501 = vrot.lane.b32.xlu0 %v7473_v9, %s16300_s26 }
0x10f9   : > { %v15300_v55 = vpop.permute.xlu1 %8033 }
0x10fb   : > { %8043 = vrot.lane.b32.xlu1 %v8010_v53, %s16209_s9  ;;  %7711 = vrot.lane.b32.xlu0 %v7684_v49, %s16433_s12 }
0x10fd   : > { %v7968_v6 = vpop.permute.xlu1 %7967 }
0x10fe   : > { %v7984_v52 = vsel %vm528_vm13, %v14962_v12, %v7968_v6 }
0x10ff   : > { %7879 = vrot.lane.b32.xlu1 %v7844_v40, %s16314_s27  ;;  %7863 = vrot.lane.b32.xlu0 %v7836_v46, %s16314_s27  ;;  %v8006_v51 = vsel %vm16628_vm2, %v14729_v63, %v7984_v52 }
0x1101   : > { %v8108_v3 = vpop.permute.xlu1 %8107 }
0x1102   : > { %v8124_v39 = vsel %vm440_vm15, %v14972_v62, %v8108_v3  ;;  %v8355_v62 = vsel %vm755_vm9, %v14954_v54, %v15236_v11  ;;  %v16639_v11 = vld [vmem:[#allocation14_spill] sm:$0xff] }
0x1103   : > { %8239 = vrot.lane.b32.xlu1 %v14713_v23, %s16125_s28  ;;  %8035 = vrot.lane.b32.xlu0 %v8006_v51, %s16209_s9  ;;  %v8146_v12 = vsel %vm16622_vm14, %v15030_v5, %v8124_v39  ;;  %vm16640_vm14 = vcmp.ne.s16.totalorder %v16639_v11, 0 }
0x1105   : > { %v15332_v59 = vpop.permute.xlu1 %8319 }
0x1106   : > { %v8358_v9 = vsel %vm755_vm9, %v15030_v5, %v15332_v59 }
0x1107   : > { %8237 = vrot.lane.b32.xlu1 %v14711_v15, %s16125_s28  ;;  %8175 = vrot.lane.b32.xlu0 %v8146_v12, %s16220_s13 }
0x1109   : > { %v15340_v32 = vpop.permute.xlu1 %8031 }
0x110b   : > { %8381 = vrot.lane.b32.xlu1 %v8355_v62, %s16143_s30 }
0x110d   : > { %v15347_v19 = vpop.permute.xlu1 %7721 }
0x110e   : > { %v15357_v58 = vpop.permute.xlu0 %7719 }
0x110f   : > { %8245 = vrot.lane.b32.xlu1 %v14729_v63, %s16125_s28 }
0x1111   : > { %v15353_v42 = vpop.permute.xlu1 %7509 }
0x1112   : > { %v7650_v29 = vpop.permute.xlu0 %7649 }
0x1113   : > { %8243 = vrot.lane.b32.xlu1 %v14727_v30, %s16125_s28  ;;  %v7665_v40 = vsel %vm528_vm13, %v7650_v29, %v15006_v34 }
0x1114   : > { %v7687_v52 = vsel %vm16630_vm11, %v15075_v26, %v7665_v40 }
0x1115   : > { %v15359_v38 = vpop.permute.xlu1 %8039 }
0x1117   : > { %8387 = vrot.lane.b32.xlu1 %v8358_v9, %s16143_s30 }
0x1119   : > { %v7438_v31 = vpop.permute.xlu1 %7437 }
0x111a   : > { %v7475_v53 = vsel %vm428_vm0, %v15075_v26, %v7438_v31  ;;  %v7453_v49 = vsel %vm440_vm15, %v7438_v31, %v14995_v1  ;;  %v7802_v1 = vpop.permute.xlu0 %7801 }
0x111b   : > { %8251 = vrot.lane.b32.xlu1 %v14745_v35, %s16125_s28  ;;  %7505 = vrot.lane.b32.xlu0 %v7475_v53, %s16300_s26  ;;  %v7476_v6 = vsel %vm16629_vm10, %v14743_v36, %v7453_v49  ;;  %v7817_v3 = vsel %vm440_vm15, %v7802_v1, %v15018_v4  ;;  %v7820_v1 = vsel %vm440_vm15, %v15079_v27, %v15120_v2  ;;  %vm16641_vm10 = vcmask 908288  }
0x111c   : > { %v7839_v34 = vsel %vm16631_vm12, %v14743_v36, %v7817_v3  ;;  %vm16643_vm12 = vcmask 1039360  }
0x111d   : > { %v15374_v47 = vpop.permute.xlu1 %7577 }
0x111f   : > { %8249 = vrot.lane.b32.xlu1 %v14743_v36, %s16125_s28  ;;  %7507 = vrot.lane.b32.xlu0 %v7476_v6, %s16300_s26 }
0x1121   : > { %v7974_v46 = vpop.permute.xlu1 %7973 }
0x1122   : > { %v7986_v39 = vsel %vm528_vm13, %v15026_v48, %v7974_v46 }
0x1123   : > { %7717 = vrot.lane.b32.xlu0 %v7687_v52, %s16433_s12  ;;  %v8009_v26 = vsel %vm16632_vm4, %v14745_v35, %v7986_v39  ;;  %vm16644_vm4 = vcmp.ne.s16.totalorder %v10161_v44, 0 }
0x1125   : > { %v8114_v51 = vpop.permute.xlu1 %8113 }
0x1126   : > { %v15396_v12 = vpop.permute.xlu0 %7725  ;;  %v8126_v9 = vsel %vm440_vm15, %v15034_v21, %v8114_v51  ;;  %v16636_v51 = vld [vmem:[#allocation16_spill] sm:$0xff] }
0x1127   : > { %7869 = vrot.lane.b32.xlu0 %v7839_v34, %s16314_s27  ;;  %v8149_v31 = vsel %vm16633_vm6, %v15102_v13, %v8126_v9  ;;  %vm16637_vm2 = vcmp.ne.s16.totalorder %v16636_v51, 0  ;;  %vm16645_vm6 = vcmp.ne.s16.totalorder %v10157_v41, 0 }
0x1128   : > { %v8354_v34 = vsel %vm16637_vm2, %v14713_v23, %v8334_v28  ;;  %v7774_v28 = vld [vmem:[#allocation2 + $0x68] sm:$0xff] }
0x1129   : > { %v15398_v62 = vpop.permute.xlu1 %8325 }
0x112a   : > { %v8361_v4 = vsel %vm755_vm9, %v15102_v13, %v15398_v62  ;;  %v7444_v29 = vpop.permute.xlu0 %7443 }
0x112b   : > { %8041 = vrot.lane.b32.xlu0 %v8009_v26, %s16209_s9  ;;  %8393 = vrot.lane.b32.xlu1 %v8361_v4, %s16143_s30  ;;  %v7478_v21 = vsel %vm428_vm0, %v15116_v33, %v7444_v29  ;;  %v7455_v49 = vsel %vm440_vm15, %v7444_v29, %v15081_v57  ;;  %vm16635_vm0 = vcmp.ne.s16.totalorder %v10197_v61, 0  ;;  %v16638_v61 = vld [vmem:[#allocation18_spill] sm:$0xff] }
0x112c   : > { %v7479_v40 = vsel %vm16634_vm3, %v14759_v20, %v7455_v49  ;;  %v7843_v57 = vsel %vm16635_vm0, %v14761_v18, %v7820_v1  ;;  %v8333_v39 = vsel %vm528_vm13, %v16638_v61, %v14893_v45  ;;  %v16642_v45 = vld [vmem:[#allocation28_spill] sm:$0xff]  ;;  %vm16647_vm3 = vmmov %vm16637_vm2  ;;  %vm16650_vm0 = vcmask 7168  }
0x112d   : > { %v15411_v48 = vpop.permute.xlu1 %8037  ;;  %v8353_v9 = vsel %vm16640_vm14, %v14711_v15, %v8333_v39  ;;  %v7944_v61 = vld [vmem:[#allocation2 + $0x70] sm:$0xff]  ;;  %vm16651_vm2 = vmmov %vm16640_vm14 }
0x112e   : > { %v7656_v16 = vpop.permute.xlu0 %7655  ;;  %vm16652_vm14 = vmmov %vm16650_vm0 }
0x112f   : > { %8181 = vrot.lane.b32.xlu0 %v8149_v31, %s16220_s13  ;;  %8257 = vrot.lane.b32.xlu1 %v14761_v18, %s16125_s28  ;;  %v7667_v29 = vsel %vm528_vm13, %v7656_v16, %v16642_v45 }
0x1130   : > { %v7690_v15 = vsel %vm16630_vm11, %v15116_v33, %v7667_v29  ;;  %vm16658_vm11 = vmmov %vm16643_vm12 }
0x1131   : > { %v15419_v53 = vpop.permute.xlu1 %7727 }
0x1132   : > { %v15444_v52 = vpop.permute.xlu0 %7583 }
0x1133   : > { %7511 = vrot.lane.b32.xlu0 %v7478_v21, %s16300_s26  ;;  %8255 = vrot.lane.b32.xlu1 %v14759_v20, %s16125_s28 }
0x1135   : > { %v15429_v6 = vpop.permute.xlu1 %7515 }
0x1136   : > { %v15457_v4 = vpop.permute.xlu0 %7865 }
0x1137   : > { %7513 = vrot.lane.b32.xlu0 %v7479_v40, %s16300_s26 }
0x1139   : > { %v15438_v46 = vpop.permute.xlu1 %8045 }
0x113b   : > { %7877 = vrot.lane.b32.xlu0 %v7843_v57, %s16314_s27 }
0x113d   : > { %v7808_v3 = vpop.permute.xlu1 %7807 }
0x113e   : > { %v7819_v1 = vsel %vm440_vm15, %v7808_v3, %v15079_v27 }
0x113f   : > { %8241 = vrot.lane.b32.xlu0 %v14954_v54, %s16125_s28  ;;  %v15466_v54 = vpop.permute.xlu0 %7871  ;;  %v7842_v37 = vsel %vm16644_vm4, %v7774_v28, %v7819_v1  ;;  %vm16661_vm4 = vmmov %vm16647_vm3 }
0x1141   : > { %v7980_v2 = vpop.permute.xlu1 %7979 }
0x1142   : > { %v7988_v33 = vsel %vm528_vm13, %v15122_v50, %v7980_v2 }
0x1143   : > { %8379 = vrot.lane.b32.xlu0 %v8354_v34, %s16143_s30  ;;  %v8012_v39 = vsel %vm16645_vm6, %v7944_v61, %v7988_v33  ;;  %v16654_v33 = vld [vmem:[#allocation17_spill] sm:$0xff]  ;;  %vm16663_vm6 = vmmov %vm16650_vm0 }
0x1144   : > { %v8338_v61 = vsel %vm528_vm13, %v16654_v33, %v15398_v62  ;;  %v16656_v62 = vld [vmem:[#allocation32_spill] sm:$0xff] }
0x1145   : > { %v15460_v26 = vpop.permute.xlu1 %8173 }
0x1147   : > { %8377 = vrot.lane.b32.xlu0 %v8353_v9, %s16143_s30 }
0x1149   : > { %v8172_v31 = vpop.permute.xlu1 %8171 }
0x114a   : > { %v15470_v23 = vsel %vm16641_vm10, %v8172_v31, %v15460_v26  ;;  %v16648_v31 = vld [vmem:[#allocation21_spill] sm:$0xff]  ;;  %vm16653_vm10 = vcmp.ne.s16.totalorder %v10159_v43, 0 }
0x114b   : > { %8247 = vrot.lane.b32.xlu0 %v15030_v5, %s16125_s28 }
0x114d   : > { %v7494_v21 = vpop.permute.xlu0 %7493  ;;  %v7868_v49 = vpop.permute.xlu1 %7867 }
0x114e   : > { %v15481_v40 = vsel %vm16643_vm12, %v15457_v4, %v7868_v49  ;;  %vm16660_vm12 = vmmov %vm16650_vm0 }
0x114f   : > { %7723 = vrot.lane.b32.xlu0 %v7690_v15, %s16433_s12 }
0x1151   : > { %v7496_v57 = vpop.permute.xlu0 %7495  ;;  %v8120_v16 = vpop.permute.xlu1 %8119 }
0x1152   : > { %v7517_v5 = vsel %vm461_vm8, %v7494_v21, %v7496_v57  ;;  %v7518_v34 = vsel %vm461_vm8, %v7496_v57, %v15178_v56  ;;  %v16646_v56 = vld [vmem:[#allocation31_spill] sm:$0xff]  ;;  %v16649_v21 = vld [vmem:[#allocation33_spill] sm:$0xff] }
0x1153   : > { %8520 = vmatprep.subr.bf16.mxu1 %v7518_v34  ;;  %7875 = vrot.lane.b32.xlu0 %v7842_v37, %s16314_s27  ;;  %v8336_v44 = vsel %vm528_vm13, %v16646_v56, %v15332_v59  ;;  %v8335_v45 = vsel %vm528_vm13, %v16648_v31, %v16646_v56  ;;  %v15520_v59 = vld [vmem:[%s15939_s5] sm:$0xff]  ;;  %v8049_v1 = vsel %vm16652_vm14, %v15251_v24, %v16649_v21  ;;  %v15568_v56 = vld [vmem:[%s15939_s5 + $0x8] sm:$0xff]  ;;  %vm16681_vm14 = vmmov %vm16658_vm11 }
0x1154   : > { %8521 = vmatpush1.bf16.msra.mxu1 %v7517_v5  ;;  %v8357_v2 = vsel %vm16647_vm3, %v14729_v63, %v8336_v44  ;;  %v8356_v63 = vsel %vm16651_vm2, %v14727_v30, %v8335_v45  ;;  %v9482_v15 = vcombine.high %v15520_v59, %v15520_v59  ;;  %v8128_v5 = vsel %vm440_vm15, %v15142_v17, %v8120_v16  ;;  %vm16655_vm15 = vmmov %vm16647_vm3  ;;  %v16659_v45 = vld [vmem:[#allocation30_spill] sm:$0xff] }
0x1155   : > { %v15494_v27 = vpop.permute.xlu0 %7705  ;;  %v15496_v3 = vpop.permute.xlu1 %8179  ;;  %v8152_v37 = vsel %vm16653_vm10, %v15180_v0, %v8128_v5  ;;  %v8360_v43 = vsel %vm16655_vm15, %v14745_v35, %v8338_v61  ;;  %vm16664_vm3 = vmmov %vm16651_vm2 }
0x1156   : > { %8552 = vmatprep.mubr.bf16.mxu1 %v9482_v15  ;;  %vm16684_vm15 = vmmov %vm16658_vm11 }
0x1157   : > { %8047 = vrot.lane.b32.xlu0 %v8012_v39, %s16209_s9  ;;  %v8337_v39 = vsel %vm528_vm13, %v16656_v62, %v16654_v33 }
0x1159   : > { %v15504_v9 = vpop.permute.xlu0 %7857  ;;  %v15506_v50 = vpop.permute.xlu1 %8177 }
0x115b   : > { %8385 = vrot.lane.b32.xlu0 %v8357_v2, %s16143_s30 }
0x115d   : > { %v8030_v41 = vpop.permute.xlu0 %8029  ;;  %v15515_v29 = vpop.permute.xlu1 %7873 }
0x115e   : > { %v8050_v49 = vsel %vm16650_vm0, %v16649_v21, %v8030_v41  ;;  %vm16665_vm0 = vcmask 908288  }
0x115f   : > { %8569 = vmatprep.subr.bf16.mxu0 %v8050_v49  ;;  %8383 = vrot.lane.b32.xlu0 %v8356_v63, %s16143_s30  ;;  %v16662_v63 = vld [vmem:[#allocation22_spill] sm:$0xff]  ;;  %vm16683_vm10 = vmmov %vm16665_vm0 }
0x1160   : > { %8570 = vmatpush1.bf16.msra.mxu0 %v8049_v1  ;;  %v8339_v15 = vsel %vm528_vm13, %v16662_v63, %v16659_v45 }
0x1161   : > { %v15533_v57 = vpop.permute.xlu0 %8169  ;;  %v15535_v28 = vpop.permute.xlu1 %8185  ;;  %v8362_v1 = vsel %vm16664_vm3, %v14759_v20, %v8339_v15  ;;  %vm16692_vm3 = vmmov %vm16665_vm0 }
0x1163   : > { %8253 = vrot.lane.b32.xlu0 %v15102_v13, %s16125_s28  ;;  %v9487_v13 = vld [vmem:[%s15940_s6 + $0x140] sm:$0x3] }
0x1165   : > { %v7500_v30 = vpop.permute.xlu0 %7499  ;;  %v8332_v34 = vpop.permute.xlu1 %8331 }
0x1166   : > { %v8364_v24 = vsel %vm755_vm9, %v15180_v0, %v8332_v34  ;;  %vm16657_vm9 = vmmov %vm16651_vm2  ;;  %v8340_v41 = vsel %vm528_vm13, %v16659_v45, %v8332_v34 }
0x1167   : > { %8187 = vrot.lane.b32.xlu0 %v8152_v37, %s16220_s13  ;;  %8399 = vrot.lane.b32.xlu1 %v8364_v24, %s16143_s30  ;;  %v8359_v35 = vsel %vm16657_vm9, %v14743_v36, %v8337_v39  ;;  %v8363_v36 = vsel %vm16661_vm4, %v14761_v18, %v8340_v41  ;;  %vm16666_vm13 = vmmov %vm16663_vm6 }
0x1168   : > { %vm16667_vm2 = vmmov %vm16663_vm6 }
0x1169   : > { %v7502_v17 = vpop.permute.xlu0 %7501  ;;  %v15609_v34 = vpop.permute.xlu1 %8183  ;;  %v8053_v24 = vsel %vm16667_vm2, %v15411_v48, %v15359_v38  ;;  %vm16687_vm9 = vmmov %vm16658_vm11 }
0x116a   : > { %v7519_v60 = vsel %vm461_vm8, %v7500_v30, %v7502_v17  ;;  %v7520_v16 = vsel %vm461_vm8, %v7502_v17, %v15287_v22  ;;  %v9484_v22 = vcombine.high %v15568_v56, %v15568_v56  ;;  %vm16690_vm4 = vmmov %vm16687_vm9 }
0x116b   : > { %8522 = vmatprep.subr.bf16.mxu1 %v7520_v16  ;;  %8391 = vrot.lane.b32.xlu0 %v8360_v43, %s16143_s30  ;;  %v16668_v43 = vld [vmem:[#allocation27_spill] sm:$0xff] }
0x116c   : > { %8647 = vperm.xlu1 %9795, %v9487_v13   ;;  %8523 = vmatpush1.bf16.msra.mxu1 %v7519_v60 }
0x116d   : > { %v15570_v44 = vpop.permute.xlu0 %7711  ;;  %8593 = vmatprep.mubr.bf16.mxu0 %v9484_v22  ;;  %v8044_v37 = vpop.permute.xlu1 %8043  ;;  %v16670_v22 = vld [vmem:[#allocation24_spill] sm:$0xff] }
0x116f   : > { %8389 = vrot.lane.b32.xlu0 %v8359_v35, %s16143_s30  ;;  %v16671_v35 = vld [vmem:[#allocation20_spill] sm:$0xff] }
0x1170   : > { %v7591_v41 = vsel %vm486_vm7, %v15351_v8, %v16671_v35 }
0x1171   : > { %v7864_v2 = vpop.permute.xlu0 %7863 }
0x1172   : > { %v15580_v31 = vsel %vm16658_vm11, %v7864_v2, %v15457_v4  ;;  %v8051_v4 = vsel %vm16663_vm6, %v15340_v32, %v15300_v55  ;;  %vm16688_vm11 = vmmov %vm16665_vm0 }
0x1173   : > { %8259 = vrot.lane.b32.xlu0 %v15180_v0, %s16125_s28  ;;  %vm16691_vm6 = vmmov %vm16690_vm4 }
0x1175   : > { %v8036_v21 = vpop.permute.xlu0 %8035 }
0x1176   : > { %v8052_v49 = vsel %vm16660_vm12, %v15300_v55, %v8036_v21  ;;  %v16672_v21 = vld [vmem:[#allocation26_spill] sm:$0xff]  ;;  %vm16689_vm12 = vmmov %vm16665_vm0 }
0x1177   : > { %8571 = vmatprep.subr.bf16.mxu0 %v8052_v49  ;;  %8397 = vrot.lane.b32.xlu0 %v8363_v36, %s16143_s30  ;;  %v16673_v49 = vld [vmem:[#allocation25_spill] sm:$0xff] }
0x1178   : > { %8572 = vmatpush1.bf16.msra.mxu0 %v8051_v4  ;;  %v7594_v36 = vsel %vm486_vm7, %v16673_v49, %v16672_v21  ;;  %v7593_v63 = vsel %vm486_vm7, %v15374_v47, %v16673_v49  ;;  %v16674_v4 = vld [vmem:[#allocation29_spill] sm:$0xff]  ;;  %v16700_v49 = vmov 0  }
0x1179   : > { %v8176_v0 = vpop.permute.xlu0 %8175 }
0x117a   : > { %v15603_v18 = vsel %vm16665_vm0, %v15460_v26, %v8176_v0  ;;  %v16675_v0 = vld [vmem:[#allocation19_spill] sm:$0xff] }
0x117b   : > { %8395 = vrot.lane.b32.xlu0 %v8362_v1, %s16143_s30  ;;  %v7596_v1 = vsel %vm486_vm7, %v16675_v0, %v16674_v4 }
0x118d   : > { %v7506_v51 = vpop.permute.xlu0 %7505 }
0x1191   : > { %v7508_v5 = vpop.permute.xlu0 %7507 }
0x1192   : > { %v7521_v30 = vsel %vm461_vm8, %v7506_v51, %v7508_v5  ;;  %v7522_v55 = vsel %vm461_vm8, %v7508_v5, %v15353_v42  ;;  %v15620_v42 = vpop.permute.xlu1 %7879  ;;  %v7595_v51 = vsel %vm486_vm7, %v15444_v52, %v16675_v0  ;;  %v16676_v5 = vld [vmem:[#allocation11_spill] sm:$0xff] }
0x1193   : > { %8524 = vmatprep.subr.bf16.mxu1 %v7522_v55 }
0x1194   : > { %8525 = vmatpush1.bf16.msra.mxu1 %v7521_v30  ;;  %v16677_v30 = vld [vmem:[#allocation12_spill] sm:$0xff] }
0x1195   : > { %v7718_v32 = vpop.permute.xlu0 %7717  ;;  %v7730_v55 = vsel %vm366_vm1, %v16677_v30, %v16676_v5 }
0x1196   : > { %v15625_v16 = vpop.permute.xlu1 %8239 }
0x1199   : > { %v15611_v11 = vpop.permute.xlu0 %7869 }
0x119a   : > { %v15638_v2 = vpop.permute.xlu1 %8237 }
0x119d   : > { %v8042_v20 = vpop.permute.xlu0 %8041 }
0x119e   : > { %v8054_v26 = vsel %vm16666_vm13, %v15359_v38, %v8042_v20  ;;  %v16669_v38 = vld [vmem:[#allocation23_spill] sm:$0xff]  ;;  %v15653_v15 = vpop.permute.xlu1 %8381  ;;  %vm16693_vm13 = vmmov %vm16690_vm4 }
0x119f   : > { %8573 = vmatprep.subr.bf16.mxu0 %v8054_v26  ;;  %v7590_v48 = vsel %vm486_vm7, %v16669_v38, %v16668_v43  ;;  %v7589_v39 = vsel %vm486_vm7, %v15224_v7, %v16669_v38  ;;  %v7729_v26 = vsel %vm366_vm1, %v15494_v27, %v16677_v30 }
0x11a0   : > { %8574 = vmatpush1.bf16.msra.mxu0 %v8053_v24  ;;  %v7732_v24 = vsel %vm366_vm1, %v15238_v14, %v15267_v10  ;;  %v7736_v10 = vsel %vm366_vm1, %v15396_v12, %v15419_v53  ;;  %v16682_v53 = vld [vmem:[#allocation34_spill] sm:$0xff] }
0x11a1   : > { %v15618_v33 = vpop.permute.xlu0 %8181 }
0x11a2   : > { %v15666_v47 = vpop.permute.xlu1 %8245 }
0x11a5   : > { %v7512_v61 = vpop.permute.xlu0 %7511 }
0x11a9   : > { %v7514_v17 = vpop.permute.xlu0 %7513 }
0x11aa   : > { %v7523_v13 = vsel %vm461_vm8, %v7512_v61, %v7514_v17  ;;  %v7524_v60 = vsel %vm461_vm8, %v7514_v17, %v15429_v6  ;;  %v7592_v6 = vsel %vm486_vm7, %v16671_v35, %v16670_v22  ;;  %v7731_v61 = vsel %vm366_vm1, %v15570_v44, %v15238_v14  ;;  %v15679_v17 = vpop.permute.xlu1 %8243  ;;  %vm16678_vm7 = vmmov %vm16667_vm2 }
0x11ab   : > { %8526 = vmatprep.subr.bf16.mxu1 %v7524_v60  ;;  %v7733_v60 = vsel %vm366_vm1, %v7718_v32, %v15357_v58  ;;  %vm16679_vm8 = vmmov %vm16667_vm2  ;;  %vm16694_vm2 = vcmask 916480  }
0x11ac   : > { %8527 = vmatpush1.bf16.msra.mxu1 %v7523_v13  ;;  %v7734_v13 = vsel %vm366_vm1, %v15357_v58, %v15347_v19  ;;  %v8055_v38 = vsel %vm16679_vm8, %v8044_v37, %v15438_v46  ;;  %v16680_v58 = vld [vmem:[#allocation13_spill] sm:$0xff]  ;;  %vm16696_vm8 = vmmov %vm16694_vm2 }
0x11ad   : > { %v15630_v62 = vpop.permute.xlu0 %7877  ;;  %8528 = vmatprep.subr.bf16.mxu1 %v7590_v48  ;;  %v7882_v32 = vsel %vm16681_vm14, %v16680_v58, %v15277_v25  ;;  %v8190_v48 = vsel %vm16683_vm10, %v16682_v53, %v15533_v57  ;;  %v7886_v25 = vsel %vm16687_vm9, %v15466_v54, %v15515_v29  ;;  %vm16698_vm10 = vmmov %vm16694_vm2 }
0x11ae   : > { %v8388_v43 = vpop.permute.xlu1 %8387  ;;  %v7888_v29 = vsel %vm16691_vm6, %v15630_v62, %v15620_v42 }
0x11b0   : > { %8529 = vmatpush1.bf16.msra.mxu1 %v7589_v39 }
0x11b1   : > { %v15640_v45 = vpop.permute.xlu0 %8241  ;;  %8530 = vmatprep.subr.bf16.mxu1 %v7592_v6 }
0x11b2   : > { %v8252_v37 = vpop.permute.xlu1 %8251 }
0x11b4   : > { %8531 = vmatpush1.bf16.msra.mxu1 %v7591_v41 }
0x11b5   : > { %v15648_v7 = vpop.permute.xlu0 %8379  ;;  %8532 = vmatprep.subr.bf16.mxu1 %v7594_v36 }
0x11b6   : > { %v8250_v57 = vpop.permute.xlu1 %8249 }
0x11b8   : > { %8533 = vmatpush1.bf16.msra.mxu1 %v7593_v63 }
0x11b9   : > { %v15658_v8 = vpop.permute.xlu0 %8377  ;;  %8534 = vmatprep.subr.bf16.mxu1 %v7596_v1 }
0x11bc   : > { %8535 = vmatpush1.bf16.msra.mxu1 %v7595_v51 }
0x11bd   : > { %v15668_v20 = vpop.permute.xlu0 %8247  ;;  %8536 = vmatprep.subr.bf16.mxu1 %v7730_v55  ;;  %v9483_v55 = vcombine.low %v15568_v56, %v15568_v56  ;;  %v8666_v56 = vstv %s15770_s10 }
0x11c0   : > { %8537 = vmatpush1.bf16.msra.mxu1 %v7729_v26  ;;  %v9912_v26 = vld [vmem:[%s15939_s5 + $0x10] ss:$0 sps:$4 sm:$0xff]  }
0x11c1   : > { %v7724_v52 = vpop.permute.xlu0 %7723  ;;  %8538 = vmatprep.subr.bf16.mxu1 %v7732_v24 }
0x11c2   : > { %v7735_v19 = vsel %vm366_vm1, %v7724_v52, %v15396_v12  ;;  %v16685_v12 = vld [vmem:[#allocation15_spill] sm:$0xff]  ;;  %vm16686_vm1 = vmmov %vm16665_vm0 }
0x11c3   : > { %v8189_v22 = vsel %vm16686_vm1, %v16685_v12, %v16682_v53  ;;  %vm16701_vm1 = vmmov %vm16694_vm2 }
0x11c4   : > { %8539 = vmatpush1.bf16.msra.mxu1 %v7731_v61 }
0x11c5   : > { %8540 = vmatprep.subr.bf16.mxu1 %v7734_v13  ;;  %v7876_v27 = vpop.permute.xlu0 %7875  ;;  %v8669_v13 = vld [vmem:[%s15936_s2] sm:$0x3] }
0x11c8   : > { %8541 = vmatpush1.bf16.msra.mxu1 %v7733_v60  ;;  %v16711_v60 = vld [vmem:[#allocation6_spill] sm:$0xff] }
0x11c9   : > { %8542 = vmatprep.subr.bf16.mxu1 %v7736_v10  ;;  %v8048_v14 = vpop.permute.xlu0 %8047  ;;  %v8678_v10 = vsub.s32 1, %v16711_v60 }
0x11ca   : > { %v8056_v44 = vsel %vm16678_vm7, %v15438_v46, %v8048_v14  ;;  %v7881_v46 = vsel %vm16684_vm15, %v15504_v9, %v16680_v58  ;;  %v8194_v9 = vsel %vm16688_vm11, %v15496_v3, %v15618_v33  ;;  %vm16695_vm7 = vcmask 924672   ;;  %vm16703_vm11 = vmmov %vm16701_vm1 }
0x11cb   : > { %8575 = vmatprep.subr.bf16.mxu0 %v8056_v44  ;;  %v8402_v42 = vsel %vm16695_vm7, %v15648_v7, %v15653_v15  ;;  %vm16697_vm14 = vmmov %vm16695_vm7 }
0x11cc   : > { %8543 = vmatpush1.bf16.msra.mxu1 %v7735_v19  ;;  %8576 = vmatpush1.bf16.msra.mxu0 %v8055_v38  ;;  %vm16699_vm15 = vmmov %vm16695_vm7 }
0x11cd   : > { %8544 = vmatprep.subr.bf16.mxu1 %v7882_v32  ;;  %v8386_v39 = vpop.permute.xlu0 %8385  ;;  %8577 = vmatprep.subr.bf16.mxu0 %v8190_v48  ;;  %vm16702_vm9 = vmmov %vm16695_vm7  ;;  %v16712_v32 = vld [vmem:[#allocation8_spill] sm:$0xff] }
0x11ce   : > { %vm16706_vm6 = vmmov %vm16695_vm7 }
0x11d0   : > { %8545 = vmatpush1.bf16.msra.mxu1 %v7881_v46  ;;  %8578 = vmatpush1.bf16.msra.mxu0 %v8189_v22 }
0x11d1   : > { %v8384_v35 = vpop.permute.xlu0 %8383  ;;  %8546 = vmatprep.subr.bf16.mxu1 %v15481_v40  ;;  %8579 = vmatprep.subr.bf16.mxu0 %v15603_v18  ;;  %v8193_v40 = vsel %vm16689_vm12, %v15506_v50, %v15496_v3  ;;  %v8195_v3 = vsel %vm16665_vm0, %v15609_v34, %v15535_v28  ;;  %v7887_v50 = vsel %vm16693_vm13, %v7876_v27, %v15630_v62  ;;  %vm16704_vm12 = vmmov %vm16695_vm7 }
0x11d2   : > { %v8264_v62 = vsel %vm16698_vm10, %v15666_v47, %v15668_v20  ;;  %vm16708_vm0 = vmmov %vm16706_vm6  ;;  %v8670_v27 = vadd.f32 %v8669_v13, %v8666_v56 }
0x11d3   : > { %vm16709_vm13 = vmmov %vm16701_vm1 }
0x11d4   : > { %8547 = vmatpush1.bf16.msra.mxu1 %v15580_v31  ;;  %8580 = vmatpush1.bf16.msra.mxu0 %v15470_v23  ;;  %v7885_v23 = vsel %vm16690_vm4, %v15611_v11, %v15466_v54  ;;  %v8394_v31 = vpop.permute.xlu1 %8393  ;;  %v9481_v54 = vcombine.low %v15520_v59, %v15520_v59  ;;  %v8262_v11 = vsel %vm16694_vm2, %v15625_v16, %v15640_v45  ;;  %vm16705_vm4 = vmmov %vm16701_vm1 }
0x11d5   : > { %v8254_v6 = vpop.permute.xlu0 %8253  ;;  %8548 = vmatprep.subr.bf16.mxu1 %v7886_v25  ;;  %8581 = vmatprep.subr.bf16.mxu0 %v8194_v9  ;;  %v8401_v59 = vsel %vm16697_vm14, %v15658_v8, %v15648_v7  ;;  %v8404_v45 = vsel %vm16699_vm15, %v8386_v39, %v8388_v43  ;;  %v8265_v4 = vsel %vm16705_vm4, %v8250_v57, %v8252_v37  ;;  %vm16710_vm2 = vmmov %vm16708_vm0 }
0x11d6   : > { %v8266_v36 = vsel %vm16703_vm11, %v8252_v37, %v8254_v6  ;;  %v15778_v53 = vrot.slane %v8670_v27, %v16712_v32  ;;  %v15780_v48 = vrot.slane %v8670_v27, %v8678_v10  ;;  %v16713_v6 = vld [vmem:[#allocation9_spill] sm:$0xff] }
0x11d8   : > { %8549 = vmatpush1.bf16.msra.mxu1 %v7885_v23  ;;  %8582 = vmatpush1.bf16.msra.mxu0 %v8193_v40  ;;  %v8258_v34 = vpop.permute.xlu1 %8257  ;;  %v8682_v40 = vmul.f32 %v16713_v6, %v15778_v53  ;;  %v16714_v23 = vld [vmem:[#allocation10_spill] sm:$0xff] }
0x11d9   : > { %v8188_v18 = vpop.permute.xlu0 %8187  ;;  %8550 = vmatprep.subr.bf16.mxu1 %v7888_v29  ;;  %v8683_v29 = vmul.f32 %v15780_v48, %v16714_v23 }
0x11da   : > { %v8196_v33 = vsel %vm16692_vm3, %v15535_v28, %v8188_v18  ;;  %v8261_v28 = vsel %vm16696_vm8, %v15638_v2, %v15625_v16  ;;  %v8263_v16 = vsel %vm16701_vm1, %v15679_v17, %v15666_v47  ;;  %v8403_v2 = vsel %vm16702_vm9, %v8384_v35, %v8386_v39  ;;  %vm16707_vm3 = vmmov %vm16701_vm1  ;;  %v16715_v18 = vld [vmem:[#allocation7_spill] sm:$0xff] }
0x11db   : > { %8583 = vmatprep.subr.bf16.mxu0 %v8196_v33 }
0x11dc   : > { %8551 = vmatpush1.bf16.msra.mxu1 %v7887_v50  ;;  %8584 = vmatpush1.bf16.msra.mxu0 %v8195_v3  ;;  %v8256_v63 = vpop.permute.xlu1 %8255  ;;  %v8686_v3 = vcombine.low %v8682_v40, %v8683_v29  ;;  %v15792_v50 = vld [vmem:[%s10049_s11] sm:$0xf] }
0x11dd   : > { %v8392_v41 = vpop.permute.xlu0 %8391  ;;  %8585 = vmatprep.subr.bf16.mxu0 %v8262_v11  ;;  %8602 = vmatprep.subr.bf16.mxu1 %v8402_v42  ;;  %v8267_v30 = vsel %vm16709_vm13, %v8256_v63, %v8258_v34  ;;  %v8653_v11 = vld [vmem:[%s321_s23] sm:$0xf] }
0x11de   : > { %v8406_v7 = vsel %vm16704_vm12, %v8392_v41, %v8394_v31 }
0x11df   : > { %8553 = vmatmul.mubr.bf16.vlgmr.msra.gmra.mrb[32].mxu1 %v9481_v54 }
0x11e0   : > { %8586 = vmatpush1.bf16.msra.mxu0 %v8261_v28  ;;  %8603 = vmatpush1.bf16.msra.mxu1 %v8401_v59  ;;  %v8400_v8 = vpop.permute.xlu1 %8399 }
0x11e1   : > { %v8390_v21 = vpop.permute.xlu0 %8389  ;;  %8587 = vmatprep.subr.bf16.mxu0 %v8264_v62  ;;  %8604 = vmatprep.subr.bf16.mxu1 %v8404_v45 }
0x11e2   : > { %8634 = vmatprep.mubr.bf16.mxu1 %v16700_v49  ;;  %v8405_v0 = vsel %vm16706_vm6, %v8390_v21, %v8392_v41  ;;  %v8693_v41 = vrot.slane %v8686_v3, %v16715_v18 }
0x11e4   : > { %8588 = vmatpush1.bf16.msra.mxu0 %v8263_v16  ;;  %8605 = vmatpush1.bf16.msra.mxu1 %v8403_v2 }
0x11e5   : > { %v8260_v15 = vpop.permute.xlu0 %8259  ;;  %8589 = vmatprep.subr.bf16.mxu0 %v8266_v36  ;;  %8606 = vmatprep.subr.bf16.mxu1 %v8406_v7 }
0x11e6   : > { %v8268_v1 = vsel %vm16707_vm3, %v8258_v34, %v8260_v15 }
0x11e8   : > { %8590 = vmatpush1.bf16.msra.mxu0 %v8265_v4  ;;  %8607 = vmatpush1.bf16.msra.mxu1 %v8405_v0 }
0x11e9   : > { %v8398_v51 = vpop.permute.xlu0 %8397  ;;  %8591 = vmatprep.subr.bf16.mxu0 %v8268_v1 }
0x11ea   : > { %v8408_v5 = vsel %vm16708_vm0, %v8398_v51, %v8400_v8 }
0x11eb   : > { %8608 = vmatprep.subr.bf16.mxu1 %v8408_v5  ;;  %v8648_v12 = vpop.permute.xlu1 %8647 }
0x11ec   : > { %8592 = vmatpush1.bf16.msra.mxu0 %v8267_v30 }
0x11ed   : > { %v8396_v47 = vpop.permute.xlu0 %8395 }
0x11ee   : > { %v8407_v20 = vsel %vm16710_vm2, %v8396_v47, %v8398_v51 }
0x11ef   : > { %8594 = vmatmul.mubr.bf16.vlgmr.msra.gmra.mrb[48].mxu0 %v9483_v55  ;;  %8609 = vmatpush1.bf16.msra.mxu1 %v8407_v20 }
0x11f2   : > { %9486 = vmatmul.mubr.msk.bf16.vlgmr.msra.gmra.mrb[36].mxu1 %vm2346_vm5, %v9912_v26  ;;  %vm8708_vm5 = vcmask 1041408  }
0x12b2   : > { %v8554_v24 = vpop.f32.mrb[32].mxu1 }
0x12b3   : > { %v8556_v52 = vpop.f32.mrb[33].mxu1 }
0x12b4   : > { %v8558_v61 = vpop.f32.mrb[34].mxu1 }
0x12b5   : > { %v8559_v17 = vpop.f32.mrb[35].mxu1 }
0x12c2   : > { %v8595_v43 = vpop.f32.mrb[48].mxu0 }
0x12c3   : > { %v8596_v14 = vadd.f32 %v8595_v43, %v8554_v24  ;;  %v8597_v44 = vpop.f32.mrb[49].mxu0 }
0x12c4   : > { %v8598_v38 = vadd.f32 %v8597_v44, %v8556_v52  ;;  %v8599_v19 = vpop.f32.mrb[50].mxu0 }
0x12c5   : > { %v8636_v58 = vpop.f32.mrb[36].mxu1  ;;  %v8600_v39 = vpop.f32.mrb[51].mxu0 }
0x12c6   : > { %v8637_v46 = vadd.f32 %v8636_v58, %v8596_v14  ;;  %v8638_v37 = vpop.f32.mrb[37].mxu1 }
0x12c7   : > { %v8639_v22 = vadd.f32 %v8638_v37, %v8598_v38  ;;  %v8640_v35 = vpop.f32.mrb[38].mxu1 }
0x12c8   : > { %v8650_v25 = vadd.f32 %v8648_v12, %v8637_v46  ;;  %v8641_v9 = vpop.f32.mrb[39].mxu1 }
0x12c9   : > { %v8651_v57 = vadd.f32 %v8648_v12, %v8639_v22 }
0x12cb   : > { %v8656_v31 = vcombine.low %v8650_v25, %v8651_v57 }
0x12cd   : > { %v8663_v33 = vrot.slane %v8656_v31, %v16715_v18 }
0x12cf   : > { %v8665_v54 = vadd.f32 %v15792_v50, %v8663_v33 }
0x12d1   : > { %v8667_v42 = vmul.f32 %v8666_v56, %v8665_v54 }
0x12d3   : > { %v8668_v28 = vadd.f32 %v8667_v42, %v8653_v11 }
0x12d5   : > { %v15796_v34 = vsub.f32 %v8668_v28, %v8693_v41 }
0x12d7   : > { %v8696_v59 = vmul.f32 %v15796_v34, %v15796_v34  ;;  %v8728_v62 = vrot.slane %v15796_v34, %v16715_v18 }
0x12d9   : > { %v8704_v45 = vrot.slane %v8696_v59, %v16715_v18  ;;  %v8729_v21 = vcombine.high %v8728_v62, %v8728_v62  ;;  %v8732_v16 = vmul.f32 %v8728_v62, %v15778_v53 }
0x12db   : > { %v8705_v49 = vcombine.high %v8704_v45, %v8704_v45  ;;  %v8733_v2 = vmul.f32 %v8729_v21, %v15780_v48  ;;  %v8709_v36 = vsel %vm8708_vm5, %v8704_v45, 0.0 }
0x12dd   : > { %v8710_v7 = vsel %vm8708_vm5, %v8705_v49, 0.0  ;;  %v8736_v63 = vcombine.low %v8732_v16, %v8733_v2 }
0x12de   : > { %v8711_v15 = vadd.f32 %v8710_v7, %v8709_v36 }
0x12df   : > { %v8743_v4 = vrot.slane %v8736_v63, %v16715_v18 }
0x12e0   : > { %8712 = vadd.xlane.f32.xlu0 %v8711_v15 }
0x12e1   : > { %v8745_v0 = vmul.f32 %v8743_v4, %v15796_v34 }
0x12e3   : > { %v8753_v1 = vrot.slane %v8745_v0, %v16715_v18 }
0x12e5   : > { %v8754_v8 = vcombine.high %v8753_v1, %v8753_v1  ;;  %v8757_v51 = vsel %vm8708_vm5, %v8753_v1, 0.0 }
0x12e7   : > { %v8758_v5 = vsel %vm8708_vm5, %v8754_v8, 0.0 }
0x12e8   : > { %v8759_v30 = vadd.f32 %v8758_v5, %v8757_v51 }
0x12ea   : > { %8760 = vadd.xlane.f32.xlu1 %v8759_v30 }
0x136d   : > { %v8713_v55 = vpop.xlane.xlu0 %8712 }
0x136e   : > { %v8714_v47 = vrot.slane %v8713_v55, 4 }
0x1370   : > { %v8715_v20 = vadd.f32 %v8714_v47, %v8713_v55 }
0x1372   : > { %v8716_v26 = vrot.slane %v8715_v20, 2 }
0x1374   : > { %v8717_v24 = vadd.f32 %v8716_v26, %v8715_v20 }
0x1376   : > { %v8718_v52 = vrot.slane %v8717_v24, 1 }
0x1377   : > { %v8761_v61 = vpop.xlane.xlu1 %8760 }
0x1378   : > { %v8762_v17 = vrot.slane %v8761_v61, 4  ;;  %v8719_v56 = vadd.f32 %v8718_v52, %v8717_v24 }
0x137a   : > { %v8763_v13 = vadd.f32 %v8762_v17, %v8761_v61  ;;  %9693 = vpush %v8719_v56 }
0x137c   : > { %v8764_v27 = vrot.slane %v8763_v13, 2 }
0x137e   : > { %v8765_v60 = vadd.f32 %v8764_v27, %v8763_v13 }
0x1380   : > { %v8766_v10 = vrot.slane %v8765_v60, 1 }
0x1382   : > { %v8767_v43 = vadd.f32 %v8766_v10, %v8765_v60 }
0x1384   : > { %9695 = vpush %v8767_v43 }
0x13ab   : > { %s9694_s11 = spop %9693 }
0x13ac   : > { %p8816_p5 = scmp.ne.f32.partialorder %s9694_s11, 0.0 }
0x13b5   : > { %s9696_s14 = spop %9695 }
0x13b6   : > { %p8769_p4 = scmp.ne.f32.partialorder %s9696_s14, 0.0 }
0x13b8   : > { %s16719_s14 = smov (!%p8769_p4, %s9696_s14), 1.0 }
0x13b9   : > { %v8771_v14 = vstv %s16719_s14 }
0x13ba   : > { %9913 = vrcp.f32 %v8771_v14 }
0x13c4   : > { %v9914_v44 = vpop.eup %9913 }
0x13c5   : > { %9697 = vpush %v9914_v44 }
0x13f6   : > { %s9698_s17 = spop %9697 }
0x13f7   : > { %s8774_s24 = smul.f32 %s9698_s17, %s9694_s11  ;;  %s16721_s11 = smov (!%p8816_p5, %s9694_s11), 1.0 }
0x13f8   : > { %v8818_v57 = vstv %s16721_s11 }
0x13f9   : > { %v8775_v38 = vstv %s8774_s24  ;;  %9915 = vrcp.f32 %v8818_v57 }
0x13fa   : > { %v8778_v19 = vmul.f32 %v8775_v38, %v8732_v16  ;;  %v8779_v58 = vmul.f32 %v8775_v38, %v8733_v2  ;;  %v8776_v20 = vmul.f32 %v8775_v38, %v15796_v34 }
0x13fc   : > { %v8782_v32 = vcombine.low %v8778_v19, %v8779_v58  ;;  %v8777_v24 = vadd.f32 %v15792_v50, %v8776_v20 }
0x13fe   : > { %v8789_v39 = vrot.slane %v8782_v32, %v16715_v18 }
0x1400   : > { %v15814_v46 = vsub.f32 %v15796_v34, %v8789_v39 }
0x1402   : > { %v8792_v37 = vmul.f32 %v15814_v46, %v15814_v46 }
0x1403   : > { %v9916_v54 = vpop.eup %9915 }
0x1404   : > { %v8800_v12 = vrot.slane %v8792_v37, %v16715_v18 }
0x1406   : > { %v8801_v22 = vcombine.high %v8800_v12, %v8800_v12  ;;  %v8804_v35 = vsel %vm8708_vm5, %v8800_v12, 0.0 }
0x1408   : > { %v8805_v25 = vsel %vm8708_vm5, %v8801_v22, 0.0 }
0x1409   : > { %v8806_v9 = vadd.f32 %v8805_v25, %v8804_v35 }
0x140b   : > { %8807 = vadd.xlane.f32.xlu0 %v8806_v9 }
0x1498   : > { %v8808_v6 = vpop.xlane.xlu0 %8807 }
0x1499   : > { %v8809_v40 = vrot.slane %v8808_v6, 4 }
0x149b   : > { %v8810_v23 = vadd.f32 %v8809_v40, %v8808_v6 }
0x149d   : > { %v8811_v29 = vrot.slane %v8810_v23, 2 }
0x149f   : > { %v8812_v31 = vadd.f32 %v8811_v29, %v8810_v23 }
0x14a1   : > { %v8813_v33 = vrot.slane %v8812_v31, 1 }
0x14a3   : > { %v8814_v3 = vadd.f32 %v8813_v33, %v8812_v31 }
0x14a5   : > { %9699 = vpush %v8814_v3 }
0x14a6   : > { %9701 = vpush %v9916_v54 }
0x14d6   : > { %s15821_s25 = spop %9699 }
0x14d7   : > { %s9702_s15 = spop %9701  ;;  %p8920_p7 = scmp.ne.f32.partialorder %s15821_s25, 0.0 }
0x14d8   : > { %s8821_s21 = smul.f32 %s9702_s15, %s15821_s25 }
0x14da   : > { %v8822_v11 = vstv %s8821_s21 }
0x14db   : > { %v8823_v42 = vmul.f32 %v8822_v11, %v15796_v34 }
0x14dd   : > { %v15826_v41 = vadd.f32 %v8823_v42, %v15814_v46 }
0x14df   : > { %v8832_v28 = vrot.slane %v15826_v41, %v16715_v18 }
0x14e1   : > { %v8833_v59 = vcombine.high %v8832_v28, %v8832_v28  ;;  %v8836_v62 = vmul.f32 %v8832_v28, %v15778_v53 }
0x14e3   : > { %v8837_v45 = vmul.f32 %v8833_v59, %v15780_v48 }
0x14e5   : > { %v8840_v21 = vcombine.low %v8836_v62, %v8837_v45 }
0x14e7   : > { %v8847_v49 = vrot.slane %v8840_v21, %v16715_v18 }
0x14e9   : > { %v8849_v16 = vmul.f32 %v8847_v49, %v15826_v41 }
0x14eb   : > { %v8857_v2 = vrot.slane %v8849_v16, %v16715_v18 }
0x14ed   : > { %v8858_v36 = vcombine.high %v8857_v2, %v8857_v2  ;;  %v8861_v7 = vsel %vm8708_vm5, %v8857_v2, 0.0 }
0x14ef   : > { %v8862_v63 = vsel %vm8708_vm5, %v8858_v36, 0.0 }
0x14f0   : > { %v8863_v15 = vadd.f32 %v8862_v63, %v8861_v7 }
0x14f2   : > { %8864 = vadd.xlane.f32.xlu0 %v8863_v15 }
0x157f   : > { %v8865_v4 = vpop.xlane.xlu0 %8864 }
0x1580   : > { %v8866_v0 = vrot.slane %v8865_v4, 4 }
0x1582   : > { %v8867_v1 = vadd.f32 %v8866_v0, %v8865_v4 }
0x1584   : > { %v8868_v8 = vrot.slane %v8867_v1, 2 }
0x1586   : > { %v8869_v51 = vadd.f32 %v8868_v8, %v8867_v1 }
0x1588   : > { %v8870_v5 = vrot.slane %v8869_v51, 1 }
0x158a   : > { %v8871_v30 = vadd.f32 %v8870_v5, %v8869_v51 }
0x158c   : > { %9703 = vpush %v8871_v30 }
0x15bd   : > { %s9704_s16 = spop %9703 }
0x15be   : > { %p8873_p6 = scmp.ne.f32.partialorder %s9704_s16, 0.0 }
0x15c0   : > { %s16723_s16 = smov (!%p8873_p6, %s9704_s16), 1.0 }
0x15c1   : > { %v8875_v55 = vstv %s16723_s16 }
0x15c2   : > { %9917 = vrcp.f32 %v8875_v55 }
0x15cc   : > { %v9918_v47 = vpop.eup %9917 }
0x15cd   : > { %9705 = vpush %v9918_v47 }
0x15fe   : > { %s9706_s19 = spop %9705 }
0x15ff   : > { %s8878_s9 = smul.f32 %s9706_s19, %s15821_s25  ;;  %s16725_s25 = smov (!%p8920_p7, %s15821_s25), 1.0 }
0x1600   : > { %v8922_v38 = vstv %s16725_s25 }
0x1601   : > { %v8879_v26 = vstv %s8878_s9  ;;  %9919 = vrcp.f32 %v8922_v38  ;;  %s326_s9 = scalar_lea.vmem %s15942_s8, %s10043_s7 }
0x1602   : > { %v8880_v52 = vmul.f32 %v8879_v26, %v15826_v41  ;;  %v8882_v61 = vmul.f32 %v8879_v26, %v8836_v62  ;;  %v8883_v17 = vmul.f32 %v8879_v26, %v8837_v45 }
0x1604   : > { %v15841_v56 = vadd.f32 %v8880_v52, %v8777_v24  ;;  %v8886_v13 = vcombine.low %v8882_v61, %v8883_v17 }
0x1606   : > { %v8893_v27 = vrot.slane %v8886_v13, %v16715_v18 }
0x1608   : > { %v15845_v60 = vsub.f32 %v15814_v46, %v8893_v27 }
0x160a   : > { %v8896_v34 = vmul.f32 %v15845_v60, %v15845_v60 }
0x160b   : > { %v9920_v22 = vpop.eup %9919 }
0x160c   : > { %v8904_v10 = vrot.slane %v8896_v34, %v16715_v18 }
0x160e   : > { %v8905_v43 = vcombine.high %v8904_v10, %v8904_v10  ;;  %v8908_v50 = vsel %vm8708_vm5, %v8904_v10, 0.0 }
0x1610   : > { %v8909_v14 = vsel %vm8708_vm5, %v8905_v43, 0.0 }
0x1611   : > { %v8910_v44 = vadd.f32 %v8909_v14, %v8908_v50 }
0x1613   : > { %8911 = vadd.xlane.f32.xlu1 %v8910_v44 }
0x16a0   : > { %v8912_v19 = vpop.xlane.xlu1 %8911 }
0x16a1   : > { %v8913_v58 = vrot.slane %v8912_v19, 4 }
0x16a3   : > { %v8914_v32 = vadd.f32 %v8913_v58, %v8912_v19 }
0x16a5   : > { %v8915_v39 = vrot.slane %v8914_v32, 2 }
0x16a7   : > { %v8916_v46 = vadd.f32 %v8915_v39, %v8914_v32 }
0x16a9   : > { %v8917_v37 = vrot.slane %v8916_v46, 1 }
0x16ab   : > { %v8918_v12 = vadd.f32 %v8917_v37, %v8916_v46 }
0x16ad   : > { %9707 = vpush %v8918_v12 }
0x16ae   : > { %9709 = vpush %v9920_v22 }
0x16de   : > { %s15854_s26 = spop %9707 }
0x16df   : > { %s9710_s13 = spop %9709  ;;  %p9024_p9 = scmp.ne.f32.partialorder %s15854_s26, 0.0 }
0x16e0   : > { %s8925_s27 = smul.f32 %s9710_s13, %s15854_s26 }
0x16e2   : > { %v8926_v35 = vstv %s8925_s27 }
0x16e3   : > { %v8927_v25 = vmul.f32 %v8926_v35, %v15826_v41 }
0x16e5   : > { %v15859_v9 = vadd.f32 %v8927_v25, %v15845_v60 }
0x16e7   : > { %v8936_v57 = vrot.slane %v15859_v9, %v16715_v18 }
0x16e9   : > { %v8937_v6 = vcombine.high %v8936_v57, %v8936_v57  ;;  %v8940_v40 = vmul.f32 %v8936_v57, %v15778_v53 }
0x16eb   : > { %v8941_v23 = vmul.f32 %v8937_v6, %v15780_v48 }
0x16ed   : > { %v8944_v29 = vcombine.low %v8940_v40, %v8941_v23 }
0x16ef   : > { %v8951_v31 = vrot.slane %v8944_v29, %v16715_v18 }
0x16f1   : > { %v8953_v33 = vmul.f32 %v8951_v31, %v15859_v9 }
0x16f3   : > { %v8961_v3 = vrot.slane %v8953_v33, %v16715_v18 }
0x16f5   : > { %v8962_v54 = vcombine.high %v8961_v3, %v8961_v3  ;;  %v8965_v11 = vsel %vm8708_vm5, %v8961_v3, 0.0 }
0x16f7   : > { %v8966_v42 = vsel %vm8708_vm5, %v8962_v54, 0.0 }
0x16f8   : > { %v8967_v41 = vadd.f32 %v8966_v42, %v8965_v11 }
0x16fa   : > { %8968 = vadd.xlane.f32.xlu0 %v8967_v41 }
0x1787   : > { %v8969_v28 = vpop.xlane.xlu0 %8968 }
0x1788   : > { %v8970_v59 = vrot.slane %v8969_v28, 4 }
0x178a   : > { %v8971_v62 = vadd.f32 %v8970_v59, %v8969_v28 }
0x178c   : > { %v8972_v45 = vrot.slane %v8971_v62, 2 }
0x178e   : > { %v8973_v21 = vadd.f32 %v8972_v45, %v8971_v62 }
0x1790   : > { %v8974_v49 = vrot.slane %v8973_v21, 1 }
0x1792   : > { %v8975_v16 = vadd.f32 %v8974_v49, %v8973_v21 }
0x1794   : > { %9711 = vpush %v8975_v16 }
0x17c5   : > { %s9712_s28 = spop %9711 }
0x17c6   : > { %p8977_p8 = scmp.ne.f32.partialorder %s9712_s28, 0.0 }
0x17c8   : > { %s16727_s28 = smov (!%p8977_p8, %s9712_s28), 1.0 }
0x17c9   : > { %v8979_v2 = vstv %s16727_s28 }
0x17ca   : > { %9921 = vrcp.f32 %v8979_v2 }
0x17d4   : > { %v9922_v36 = vpop.eup %9921 }
0x17d5   : > { %9713 = vpush %v9922_v36 }
0x1806   : > { %s9714_s30 = spop %9713 }
0x1807   : > { %s8982_s10 = smul.f32 %s9714_s30, %s15854_s26  ;;  %s16729_s26 = smov (!%p9024_p9, %s15854_s26), 1.0 }
0x1808   : > { %v9026_v24 = vstv %s16729_s26 }
0x1809   : > { %v8983_v7 = vstv %s8982_s10  ;;  %9923 = vrcp.f32 %v9026_v24 }
0x180a   : > { %v8984_v63 = vmul.f32 %v8983_v7, %v15859_v9  ;;  %v8986_v15 = vmul.f32 %v8983_v7, %v8940_v40  ;;  %v8987_v4 = vmul.f32 %v8983_v7, %v8941_v23 }
0x180c   : > { %v15873_v0 = vadd.f32 %v8984_v63, %v15841_v56  ;;  %v8990_v1 = vcombine.low %v8986_v15, %v8987_v4 }
0x180e   : > { %v8997_v8 = vrot.slane %v8990_v1, %v16715_v18 }
0x1810   : > { %v15877_v51 = vsub.f32 %v15845_v60, %v8997_v8 }
0x1812   : > { %v9000_v5 = vmul.f32 %v15877_v51, %v15877_v51 }
0x1813   : > { %v9924_v34 = vpop.eup %9923 }
0x1814   : > { %v9008_v30 = vrot.slane %v9000_v5, %v16715_v18 }
0x1816   : > { %v9009_v55 = vcombine.high %v9008_v30, %v9008_v30  ;;  %v9012_v47 = vsel %vm8708_vm5, %v9008_v30, 0.0 }
0x1818   : > { %v9013_v20 = vsel %vm8708_vm5, %v9009_v55, 0.0 }
0x1819   : > { %v9014_v26 = vadd.f32 %v9013_v20, %v9012_v47 }
0x181b   : > { %9015 = vadd.xlane.f32.xlu1 %v9014_v26 }
0x18a8   : > { %v9016_v52 = vpop.xlane.xlu1 %9015 }
0x18a9   : > { %v9017_v61 = vrot.slane %v9016_v52, 4 }
0x18ab   : > { %v9018_v17 = vadd.f32 %v9017_v61, %v9016_v52 }
0x18ad   : > { %v9019_v56 = vrot.slane %v9018_v17, 2 }
0x18af   : > { %v9020_v13 = vadd.f32 %v9019_v56, %v9018_v17 }
0x18b1   : > { %v9021_v27 = vrot.slane %v9020_v13, 1 }
0x18b3   : > { %v9022_v60 = vadd.f32 %v9021_v27, %v9020_v13 }
0x18b5   : > { %9715 = vpush %v9022_v60 }
0x18b6   : > { %9717 = vpush %v9924_v34 }
0x18e6   : > { %s15886_s12 = spop %9715 }
0x18e7   : > { %s9718_s18 = spop %9717  ;;  %p9128_p11 = scmp.ne.f32.partialorder %s15886_s12, 0.0 }
0x18e8   : > { %s9029_s22 = smul.f32 %s9718_s18, %s15886_s12 }
0x18ea   : > { %v9030_v10 = vstv %s9029_s22 }
0x18eb   : > { %v9031_v43 = vmul.f32 %v9030_v10, %v15859_v9 }
0x18ed   : > { %v15891_v50 = vadd.f32 %v9031_v43, %v15877_v51 }
0x18ef   : > { %v9040_v14 = vrot.slane %v15891_v50, %v16715_v18 }
0x18f1   : > { %v9041_v44 = vcombine.high %v9040_v14, %v9040_v14  ;;  %v9044_v38 = vmul.f32 %v9040_v14, %v15778_v53 }
0x18f3   : > { %v9045_v19 = vmul.f32 %v9041_v44, %v15780_v48 }
0x18f5   : > { %v9048_v58 = vcombine.low %v9044_v38, %v9045_v19 }
0x18f7   : > { %v9055_v32 = vrot.slane %v9048_v58, %v16715_v18 }
0x18f9   : > { %v9057_v39 = vmul.f32 %v9055_v32, %v15891_v50 }
0x18fb   : > { %v9065_v46 = vrot.slane %v9057_v39, %v16715_v18 }
0x18fd   : > { %v9066_v37 = vcombine.high %v9065_v46, %v9065_v46  ;;  %v9069_v12 = vsel %vm8708_vm5, %v9065_v46, 0.0 }
0x18ff   : > { %v9070_v22 = vsel %vm8708_vm5, %v9066_v37, 0.0 }
0x1900   : > { %v9071_v35 = vadd.f32 %v9070_v22, %v9069_v12 }
0x1902   : > { %9072 = vadd.xlane.f32.xlu0 %v9071_v35 }
0x198f   : > { %v9073_v25 = vpop.xlane.xlu0 %9072 }
0x1990   : > { %v9074_v9 = vrot.slane %v9073_v25, 4 }
0x1992   : > { %v9075_v57 = vadd.f32 %v9074_v9, %v9073_v25 }
0x1994   : > { %v9076_v6 = vrot.slane %v9075_v57, 2 }
0x1996   : > { %v9077_v40 = vadd.f32 %v9076_v6, %v9075_v57 }
0x1998   : > { %v9078_v23 = vrot.slane %v9077_v40, 1 }
0x199a   : > { %v9079_v29 = vadd.f32 %v9078_v23, %v9077_v40 }
0x199c   : > { %9719 = vpush %v9079_v29 }
0x19cd   : > { %s9720_s20 = spop %9719 }
0x19ce   : > { %p9081_p10 = scmp.ne.f32.partialorder %s9720_s20, 0.0 }
0x19d0   : > { %s16731_s20 = smov (!%p9081_p10, %s9720_s20), 1.0 }
0x19d1   : > { %v9083_v31 = vstv %s16731_s20 }
0x19d2   : > { %9925 = vrcp.f32 %v9083_v31 }
0x19dc   : > { %v9926_v33 = vpop.eup %9925 }
0x19dd   : > { %9721 = vpush %v9926_v33 }
0x1a0e   : > { %s9722_s23 = spop %9721 }
0x1a0f   : > { %s9086_s11 = smul.f32 %s9722_s23, %s15886_s12  ;;  %s16733_s12 = smov (!%p9128_p11, %s15886_s12), 1.0 }
0x1a10   : > { %v9130_v7 = vstv %s16733_s12 }
0x1a11   : > { %v9087_v3 = vstv %s9086_s11  ;;  %9927 = vrcp.f32 %v9130_v7 }
0x1a12   : > { %v9088_v54 = vmul.f32 %v9087_v3, %v15891_v50  ;;  %v9090_v11 = vmul.f32 %v9087_v3, %v9044_v38  ;;  %v9091_v42 = vmul.f32 %v9087_v3, %v9045_v19 }
0x1a14   : > { %v15905_v41 = vadd.f32 %v9088_v54, %v15873_v0  ;;  %v9094_v28 = vcombine.low %v9090_v11, %v9091_v42 }
0x1a16   : > { %v9101_v59 = vrot.slane %v9094_v28, %v16715_v18 }
0x1a18   : > { %v9103_v62 = vsub.f32 %v15877_v51, %v9101_v59 }
0x1a1a   : > { %v9104_v45 = vmul.f32 %v9103_v62, %v9103_v62 }
0x1a1b   : > { %v9928_v5 = vpop.eup %9927 }
0x1a1c   : > { %v9112_v21 = vrot.slane %v9104_v45, %v16715_v18 }
0x1a1e   : > { %v9113_v49 = vcombine.high %v9112_v21, %v9112_v21  ;;  %v9116_v16 = vsel %vm8708_vm5, %v9112_v21, 0.0 }
0x1a20   : > { %v9117_v2 = vsel %vm8708_vm5, %v9113_v49, 0.0 }
0x1a21   : > { %v9118_v36 = vadd.f32 %v9117_v2, %v9116_v16 }
0x1a23   : > { %9119 = vadd.xlane.f32.xlu1 %v9118_v36 }
0x1ab0   : > { %v9120_v63 = vpop.xlane.xlu1 %9119 }
0x1ab1   : > { %v9121_v15 = vrot.slane %v9120_v63, 4 }
0x1ab3   : > { %v9122_v4 = vadd.f32 %v9121_v15, %v9120_v63 }
0x1ab5   : > { %v9123_v0 = vrot.slane %v9122_v4, 2 }
0x1ab7   : > { %v9124_v1 = vadd.f32 %v9123_v0, %v9122_v4 }
0x1ab9   : > { %v9125_v8 = vrot.slane %v9124_v1, 1 }
0x1abb   : > { %v9126_v51 = vadd.f32 %v9125_v8, %v9124_v1 }
0x1abd   : > { %9723 = vpush %v9126_v51 }
0x1abe   : > { %9725 = vpush %v9928_v5 }
0x1aee   : > { %s15914_s14 = spop %9723 }
0x1aef   : > { %s9726_s17 = spop %9725 }
0x1af0   : > { %s9133_s24 = smul.f32 %s9726_s17, %s15914_s14 }
0x1af2   : > { %v9134_v30 = vstv %s9133_s24 }
0x1af3   : > { %v9135_v55 = vmul.f32 %v9134_v30, %v15891_v50 }
0x1af5   : > { %v9136_v47 = vadd.f32 %v9135_v55, %v9103_v62 }
0x1af7   : > { %v9144_v20 = vrot.slane %v9136_v47, %v16715_v18 }
0x1af9   : > { %v9145_v26 = vcombine.high %v9144_v20, %v9144_v20  ;;  %v9148_v24 = vmul.f32 %v9144_v20, %v15778_v53 }
0x1afb   : > { %v9149_v52 = vmul.f32 %v9145_v26, %v15780_v48 }
0x1afd   : > { %v9152_v61 = vcombine.low %v9148_v24, %v9149_v52 }
0x1aff   : > { %v9159_v17 = vrot.slane %v9152_v61, %v16715_v18 }
0x1b01   : > { %v9161_v56 = vmul.f32 %v9159_v17, %v9136_v47 }
0x1b03   : > { %v9169_v13 = vrot.slane %v9161_v56, %v16715_v18 }
0x1b05   : > { %v9170_v27 = vcombine.high %v9169_v13, %v9169_v13  ;;  %v9173_v60 = vsel %vm8708_vm5, %v9169_v13, 0.0 }
0x1b07   : > { %v9174_v34 = vsel %vm8708_vm5, %v9170_v27, 0.0 }
0x1b08   : > { %v9175_v10 = vadd.f32 %v9174_v34, %v9173_v60 }
0x1b0a   : > { %9176 = vadd.xlane.f32.xlu0 %v9175_v10 }
0x1b97   : > { %v9177_v43 = vpop.xlane.xlu0 %9176 }
0x1b98   : > { %v9178_v50 = vrot.slane %v9177_v43, 4 }
0x1b9a   : > { %v9179_v14 = vadd.f32 %v9178_v50, %v9177_v43 }
0x1b9c   : > { %v9180_v53 = vrot.slane %v9179_v14, 2 }
0x1b9e   : > { %v9181_v48 = vadd.f32 %v9180_v53, %v9179_v14 }
0x1ba0   : > { %v9182_v44 = vrot.slane %v9181_v48, 1 }
0x1ba2   : > { %v9183_v38 = vadd.f32 %v9182_v44, %v9181_v48 }
0x1ba4   : > { %9727 = vpush %v9183_v38 }
0x1bd5   : > { %s9728_s25 = spop %9727 }
0x1bd6   : > { %p9185_p12 = scmp.ne.f32.partialorder %s9728_s25, 0.0 }
0x1bd8   : > { %s16735_s25 = smov (!%p9185_p12, %s9728_s25), 1.0 }
0x1bd9   : > { %v9187_v18 = vstv %s16735_s25 }
0x1bda   : > { %9929 = vrcp.f32 %v9187_v18 }
0x1be4   : > { %v9930_v19 = vpop.eup %9929 }
0x1be5   : > { %9729 = vpush %v9930_v19 }
0x1c16   : > { %s9730_s15 = spop %9729 }
0x1c17   : > { %s9190_s21 = smul.f32 %s9730_s15, %s15914_s14 }
0x1c19   : > { %v9191_v58 = vstv %s9190_s21 }
0x1c1a   : > { %v9192_v32 = vmul.f32 %v9191_v58, %v9136_v47 }
0x1c1c   : > { %v9193_v39 = vadd.f32 %v9192_v32, %v15905_v41 }
0x1c1e   : > { %9194 = vst [vmem:[%s326_s9] sm:$0xf] %v9193_v39 }
0x1c1f PF: > { %s19_s29 = sadd.s32 1, %s9963_s29  }
0x1c20   : > { %p16_p13 = scmp.ge.s32.totalorder %s19_s29, 4  }
0x1c22   :  { %18 = sbr.rel (!%p16_p13) target bundleno = 2 (0x2), region = 93 }

</bundles_post_ra>
